<compile_context>
chip_gen: v5e
topology: v5e:2x2
jax: 0.10.0
libtpu: 0.0.40
codegen_flags: <defaults>
</compile_context>

<pallas_src>
import numpy as np
import jax
import jax.numpy as jnp
from jax import lax
from jax.experimental import pallas as pl
from jax.experimental.pallas import tpu as pltpu

BLK = 512  # tokens (output rows) handled per grid step


def _partial_emb_kernel(idx_ref, w_ref, out_ref):
    """out[i] = W_cat[fused_idx[i]] via a single one-hot MXU matmul.

    idx_ref: (BLK, 1) int32 fused row ids into the concatenated table.
    w_ref:   (V, D) concatenated [learnable_pad; frozen_pad] table, V % 128 == 0.
    out_ref: (BLK, D) output tile.
    """
    idx = idx_ref[...]                                     # (BLK, 1)
    blk = idx.shape[0]
    V = w_ref.shape[0]
    one_hot = (idx == lax.broadcasted_iota(jnp.int32, (blk, V), 1)).astype(jnp.float32)
    # HIGHEST keeps the f32 gather exact: one-hot rows have a single 1.0, and the
    # 3-way f32 mantissa split recombines the selected row bit-exactly.
    out_ref[...] = jnp.dot(
        one_hot, w_ref[...],
        preferred_element_type=jnp.float32,
        precision=lax.Precision.HIGHEST,
    ).astype(out_ref.dtype)


def partial_trainable_embedding(indices, mask, learnable_lookup, frozen_lookup,
                                w_learn, w_frozen, *, blk=BLK):
    N = indices.shape[0]
    D = w_learn.shape[1]

    # Pad each table's row count to a multiple of 128 (lane-aligned one-hot K dim,
    # done once outside the hot path).  Padded rows are never selected.
    def _pad_rows(w, mult=128):
        p = (-w.shape[0]) % mult
        return jnp.pad(w, ((0, p), (0, 0))) if p else w

    wl = _pad_rows(w_learn)
    wf = _pad_rows(w_frozen)
    Lp = wl.shape[0]
    w_cat = jnp.concatenate([wl, wf], axis=0)              # (V, D), V % 128 == 0

    # Hoist the vocab-sized double indirection out of the kernel and fuse the
    # learnable/frozen select into a single row id in the concatenated table.
    m_tok = mask[indices].astype(jnp.int32)
    li_tok = jnp.clip(learnable_lookup[indices], 0, None).astype(jnp.int32)
    fi_tok = jnp.clip(frozen_lookup[indices], 0, None).astype(jnp.int32)
    fused = jnp.where(m_tok == 1, li_tok, fi_tok + Lp).reshape(N, 1)

    # Pad token count up to a multiple of blk; padded rows (fused id 0 -> row 0 of
    # the table) are sliced off at the end.  NOTE: do not buffer-donate a live
    # (Np, D) output into this call — padded rows are written before the slice.
    n_pad = (-N) % blk
    if n_pad:
        fused = jnp.pad(fused, ((0, n_pad), (0, 0)))
    Np = N + n_pad

    grid_spec = pltpu.PrefetchScalarGridSpec(
        num_scalar_prefetch=0,
        grid=(Np // blk,),
        in_specs=[
            pl.BlockSpec((blk, 1), lambda i: (i, 0)),      # fused per-token row id
            pl.BlockSpec(w_cat.shape, lambda i: (0, 0)),   # whole fused table resident
        ],
        out_specs=pl.BlockSpec((blk, D), lambda i: (i, 0)),
    )

    out = pl.pallas_call(
        _partial_emb_kernel,
        out_shape=jax.ShapeDtypeStruct((Np, D), w_learn.dtype),
        grid_spec=grid_spec,
        compiler_params=pltpu.CompilerParams(
            dimension_semantics=("parallel",),  # disjoint output tiles per step
        ),
    )(fused, w_cat)

    return out[:N]


if __name__ == "__main__":
    key = jax.random.PRNGKey(0)
    num_embeddings = 32     # vocab
    embedding_dim = 128
    N = 1000                # tokens (pads to 1024 -> 2 grid steps at BLK=512)

    k_wl, k_wf, k_idx = jax.random.split(key, 3)

    # mask_items_to_update (byte mask over the vocab); deterministic, both groups
    # non-empty: items with index % 3 != 0 are learnable.
    mask = (jnp.arange(num_embeddings) % 3 != 0).astype(jnp.int32)
    num_learnable = int(mask.sum())                        # 21
    num_frozen = num_embeddings - num_learnable            # 11

    # learnable_lookup / frozen_lookup: masked_scatter_ of arange, -1 elsewhere.
    learnable_lookup = jnp.where(mask == 1, jnp.cumsum(mask) - 1, -1).astype(jnp.int32)
    frozen_lookup = jnp.where(mask != 1, jnp.cumsum(1 - mask) - 1, -1).astype(jnp.int32)

    # EmbeddingSeq2seq.reset_parameters -> kaiming_uniform(mode='fan_in'):
    # bound = sqrt(6 / fan_in), fan_in = embedding_dim.
    bound = float(np.sqrt(6.0 / embedding_dim))
    w_learn = jax.random.uniform(k_wl, (num_learnable, embedding_dim),
                                 jnp.float32, -bound, bound)
    w_frozen = jax.random.uniform(k_wf, (num_frozen, embedding_dim),
                                  jnp.float32, -bound, bound)

    indices = jax.random.randint(k_idx, (N,), 0, num_embeddings, dtype=jnp.int32)

    out = partial_trainable_embedding(indices, mask, learnable_lookup, frozen_lookup,
                                      w_learn, w_frozen)
    out = jax.block_until_ready(out)

    # Pure-JAX reference of the PyTorch forward.
    full_table = jnp.where(mask[:, None] == 1,
                           w_learn[jnp.clip(learnable_lookup, 0, None)],
                           w_frozen[jnp.clip(frozen_lookup, 0, None)])
    expected = full_table[indices]

    assert out.shape == (N, embedding_dim)
    assert jnp.allclose(out, expected, atol=1e-6), "Pallas output mismatch vs reference"
    print("KERNEL_OK")
</pallas_src>

<mosaic_0001>
module attributes {stable_mosaic.version = 11 : i64} {
  func.func @_partial_emb_kernel(%arg0: i32, %arg1: memref<512x1xi32, #tpu.memory_space<vmem>>, %arg2: memref<256x128xf32, #tpu.memory_space<vmem>>, %arg3: memref<512x128xf32, #tpu.memory_space<vmem>>) attributes {dimension_semantics = [#tpu.dimension_semantics<parallel>], iteration_bounds = array<i64: 2>, scalar_prefetch = 0 : i64, scratch_operands = 0 : i64, tpu.core_type = #tpu.core_type<tc>, window_params = [{transform_indices = @transform_0, window_bounds = array<i64: 512, 1>}, {pipeline_mode = #tpu.pipeline_mode<synchronous>, transform_indices = @transform_1, window_bounds = array<i64: 256, 128>}, {transform_indices = @transform_2, window_bounds = array<i64: 512, 128>}]} {
    %c0 = arith.constant 0 : index
    %c0_0 = arith.constant 0 : index
    %0 = vector.load %arg1[%c0, %c0_0] : memref<512x1xi32, #tpu.memory_space<vmem>>, vector<512x1xi32>
    %1 = tpu.iota {dimensions = array<i32: 1>} : vector<512x256xi32>
    %2 = vector.broadcast %0 : vector<512x1xi32> to vector<512x256xi32>
    %3 = arith.cmpi eq, %2, %1 : vector<512x256xi32>
    %4 = arith.extui %3 : vector<512x256xi1> to vector<512x256xi32>
    %5 = arith.sitofp %4 : vector<512x256xi32> to vector<512x256xf32>
    %c0_1 = arith.constant 0 : index
    %c0_2 = arith.constant 0 : index
    %6 = vector.load %arg2[%c0_1, %c0_2] : memref<256x128xf32, #tpu.memory_space<vmem>>, vector<256x128xf32>
    %cst = arith.constant dense<0.000000e+00> : vector<512x128xf32>
    %7 = tpu.matmul %5, %6, %cst {dimension_numbers = #tpu.dot_dimension_numbers<[1], [0], [0], [1], [0, 0, 1, 1], [], []>, precision = #tpu.contract_precision<fp32>} : vector<512x256xf32>, vector<256x128xf32>, vector<512x128xf32> -> vector<512x128xf32>
    %c0_3 = arith.constant 0 : index
    %c0_4 = arith.constant 0 : index
    %8 = vector.load %arg3[%c0_3, %c0_4] : memref<512x128xf32, #tpu.memory_space<vmem>>, vector<512x128xf32>
    tpu.vector_store %arg3[%c0_3, %c0_4], %7 {strides = array<i32>} : memref<512x128xf32, #tpu.memory_space<vmem>>, vector<512x128xf32>,
    return
  }
  func.func @transform_0(%arg0: i32) -> (i32, i32) {
    %c0_i32 = arith.constant 0 : i32
    %c0_i32_0 = arith.constant 0 : i32
    return %arg0, %c0_i32 : i32, i32
  }
  func.func @transform_1(%arg0: i32) -> (i32, i32) {
    %c0_i32 = arith.constant 0 : i32
    %c0_i32_0 = arith.constant 0 : i32
    %c0_i32_1 = arith.constant 0 : i32
    return %c0_i32, %c0_i32_0 : i32, i32
  }
  func.func @transform_2(%arg0: i32) -> (i32, i32) {
    %c0_i32 = arith.constant 0 : i32
    %c0_i32_0 = arith.constant 0 : i32
    return %arg0, %c0_i32 : i32, i32
  }
}

</mosaic_0001>

<bundles_post_ra>
// kernel: tpu_custom_call.1
= control target key start
LH: loop header
LB: loop body
LE: loop exit
PB: predicated region body
PF: predicated region fallthrough
CT: control target
= control target key end

     0   :  { %7 = vsyncpa [#allocation3], 0  ;;  %s10400_s0 = inlined_call_operand.vmem [shape: s32[1024,1], index: 0, kind: input, shape index: {}]   ;;  %s10401_s1 = inlined_call_operand.vmem [shape: f32[256,128], index: 1, kind: input, shape index: {}]   ;;  %s10402_s2 = inlined_call_operand.hbm [shape: f32[1024,128], index: 2, kind: output, shape index: {}]  }
   0x1   :  { %9 = vsyncpa [#allocation3 + $0x1], 0  ;;  %s6206_s9 = smov 0   ;;  %s6208_s10 = smov 0  }
   0x2   :  { %s6210_s11 = smov 0   ;;  %s6212_s12 = smov 0  }
   0x3 LB: > { %s6227_s13 = sadd.s32 4294967295, %s6184_s12   ;;  %s5550_s14 = sadd.s32 4294967294, %s6184_s12   ;;  %s6184_s12 = sphi %s6212_s12, %s11549_s12   ;;  %s6180_s11 = sphi %s6210_s11, %s11548_s11   ;;  %s6176_s10 = sphi %s6208_s10, %s11547_s10   ;;  %s6172_s9 = sphi %s6206_s9, %s11546_s9  }
   0x4   : > { %s6231_s15 = sadd.s32 1, %s6184_s12   ;;  %s69_s16 = sadd.s32 1, %s6180_s11 }
   0x5   : > { %s66_s17 = ssub.s32 %s6184_s12, %s6231_s15  ;;  %p79_p0 = scmp.ne.s32.totalorder %s6180_s11, %s6176_s10 }
   0x6   : > { %p67_p1 = scmp.eq.s32.totalorder %s66_s17, 0  ;;  %p80_p2 = scmp.eq.s32.totalorder %s6227_s13, 1 }
   0x7   : > { %p85_p3 = scmp.ne.s32.totalorder %s6176_s10, %s6172_s9  ;;  %p86_p4 = scmp.eq.s32.totalorder %s5550_s14, 1 }
   0x8   : > { %s6242_s18 = scalar_select %p67_p1, %s6180_s11, %s69_s16  }
   0x9   : > { %p6244_p5 = por %p80_p2, %p79_p0  ;;  %p6248_p6 = por %p86_p4, %p85_p3 }
   0xa   : > { %p5553_p7 = scmp.ge.s32.totalorder %s6184_s12, 1  ;;  %p116_p8 = scmp.lt.s32.totalorder %s6184_s12, 3 }
   0xc   : > { %p117_p9 = pnand %p5553_p7, %p116_p8 }
   0xe   : > { %120 = sbr.rel (%p117_p9) target bundleno = 1818 (0x71a), region = 28 }
  0x13   : > { %s5555_s21 = sshll.u32 %s6227_s13, 6  ;;  %v6186_v0 = vmov 0   ;;  %v803_v19 = vld [vmem:[%s10401_s1 + $0x78] sm:$0xff]  ;;  %v802_v23 = vld [vmem:[%s10401_s1 + $0x70] sm:$0xff]  ;;  %v801_v27 = vld [vmem:[%s10401_s1 + $0x68] sm:$0xff]  ;;  %s135_s6 = sand.u32 1, %s6176_s10  }
  0x14   : > { %6121 = vset.pattern.permute.xlu2 %v6186_v0  ;;  %6120 = vset.pattern.permute.xlu1 %v6186_v0  ;;  %p139_p10 = scmp.lt.s32.totalorder %s5555_s21, 127  ;;  %v6281_v20 = vand.u32 4294901760, %v803_v19  ;;  %v6292_v26 = vand.u32 4294901760, %v802_v23  ;;  %v6303_v30 = vand.u32 4294901760, %v801_v27  ;;  %v800_v31 = vld [vmem:[%s10401_s1 + $0x60] sm:$0xff]  ;;  %v799_v36 = vld [vmem:[%s10401_s1 + $0x58] sm:$0xff] }
  0x15   : > { %6119 = vset.pattern.permute.xlu0 %v6186_v0  ;;  %v6316_v35 = vand.u32 4294901760, %v800_v31  ;;  %v6336_v43 = vand.u32 4294901760, %v799_v36  ;;  %v798_v44 = vld [vmem:[%s10401_s1 + $0x50] sm:$0xff]  ;;  %v797_v51 = vld [vmem:[%s10401_s1 + $0x48] sm:$0xff]  ;;  %v796_v57 = vld [vmem:[%s10401_s1 + $0x40] sm:$0xff]  ;;  %s5554_s7 = sshll.u32 %s135_s6, 9 }
  0x16   : > { %s11551_s21 = smov (!%p139_p10, %s5555_s21), 127  ;;  %v6290_v25 = vsub.f32 %v803_v19, %v6281_v20  ;;  %2088 = vmatpush.msra.mxu3 %v6281_v20  ;;  %821 = vmatpush.msra.mxu0 %v6281_v20  ;;  %v6301_v29 = vsub.f32 %v802_v23, %v6292_v26  ;;  %v6314_v34 = vsub.f32 %v801_v27, %v6303_v30  ;;  %v6346_v49 = vand.u32 4294901760, %v798_v44  ;;  %v795_v63 = vld [vmem:[%s10401_s1 + $0x38] sm:$0xff]  ;;  %s9732_s8 = scalar_lea.vmem [#allocation2], %s5554_s7 }
  0x17   : > { %s5556_s22 = sshll.u32 %s11551_s21, 3  ;;  %v6329_v40 = vsub.f32 %v800_v31, %v6316_v35  ;;  %v6350_v50 = vsub.f32 %v799_v36, %v6336_v43  ;;  %v6363_v55 = vand.u32 4294901760, %v797_v51  ;;  %v6375_v61 = vand.u32 4294901760, %v796_v57  ;;  %s6074_s14 = sshll.u32 %s6227_s13, 9 }
  0x18   : > { %s6258_s25 = scalar_lea.vmem %s10400_s0, %s5556_s22  ;;  %v1367_v28 = vand.u32 4294901760, %v6290_v25  ;;  %1720 = vmatpush.msra.mxu2 %v6290_v25  ;;  %v1373_v33 = vand.u32 4294901760, %v6301_v29  ;;  %2090 = vmatpush.msra.mxu3 %v6292_v26  ;;  %v1379_v39 = vand.u32 4294901760, %v6314_v34  ;;  %v6361_v54 = vsub.f32 %v798_v44, %v6346_v49  ;;  %s5484_s21 = scalar_lea.hbm %s10402_s2, %s6074_s14 }
  0x19   : > { %v149_v1 = vld [vmem:[%s6258_s25 + $0x20] sm:$0xff]  ;;  %v147_v2 = vld [vmem:[%s6258_s25 + $0x10] sm:$0xff]  ;;  %v150_v4 = vld [vmem:[%s6258_s25 + $0x28] sm:$0xff]  ;;  %823 = vmatpush.msra.mxu0 %v6292_v26  ;;  %v1385_v48 = vand.u32 4294901760, %v6329_v40  ;;  %v1391_v56 = vand.u32 4294901760, %v6350_v50  ;;  %v6372_v60 = vsub.f32 %v797_v51, %v6363_v55  ;;  %s5485_s22 = sshll.u32 %s9732_s8, 4  ;;  %s5486_s22 = int_to_ptr.vmem [resolvable:$true] %s5485_s22 }
  0x1a   : > { %v145_v3 = vld [vmem:[%s6258_s25] sm:$0xff]  ;;  %225 = vperm.xlu2 %6121, %v149_v1   ;;  %219 = vperm.xlu1 %6120, %v147_v2   ;;  %v148_v5 = vld [vmem:[%s6258_s25 + $0x18] sm:$0xff]  ;;  %v146_v6 = vld [vmem:[%s6258_s25 + $0x8] sm:$0xff]  ;;  %v1368_v32 = vsub.f32 %v6290_v25, %v1367_v28  ;;  %v1374_v38 = vsub.f32 %v6301_v29, %v1373_v33  ;;  %v1380_v47 = vsub.f32 %v6314_v34, %v1379_v39  ;;  %v1397_v59 = vand.u32 4294901760, %v6361_v54  ;;  %s5487_s23 = sshll.u32 %s5484_s21, 4  ;;  %s5473_s13 = scalar_lea.sflag [#allocation3], %s135_s6  ;;  %s5488_s23 = int_to_ptr.hbm [resolvable:$true] %s5487_s23 }
  0x1b   : > { %213 = vperm.xlu0 %6119, %v145_v3   ;;  %v153_v7 = vld [vmem:[%s6258_s25 + $0x40] sm:$0xff]  ;;  %v152_v8 = vld [vmem:[%s6258_s25 + $0x38] sm:$0xff]  ;;  %v151_v9 = vld [vmem:[%s6258_s25 + $0x30] sm:$0xff]  ;;  %1723 = vmatpush.msra.mxu2 %v6301_v29  ;;  %v1386_v53 = vsub.f32 %v6329_v40, %v1385_v48  ;;  %v1392_v62 = vsub.f32 %v6350_v50, %v1391_v56  ;;  %v1403_v1 = vand.u32 4294901760, %v6372_v60  ;;  %v6390_v2 = vsub.f32 %v796_v57, %v6375_v61  ;;  %s6136_s24 = sshra.s32 %s5488_s23, 4  ;;  %s6142_s28 = scalar_lea.hbm %s10402_s2, 1024  ;;  %s6137_s24 = int_to_ptr.hbm [resolvable:$true] %s6136_s24 }
  0x1c   : > { %v156_v10 = vld [vmem:[%s6258_s25 + $0x58] sm:$0xff]  ;;  %v155_v11 = vld [vmem:[%s6258_s25 + $0x50] sm:$0xff]  ;;  %v154_v12 = vld [vmem:[%s6258_s25 + $0x48] sm:$0xff]  ;;  %v1369_v37 = vand.u32 4294901760, %v1368_v32  ;;  %2092 = vmatpush.msra.mxu3 %v6303_v30  ;;  %825 = vmatpush.msra.mxu0 %v6303_v30  ;;  %v1375_v46 = vand.u32 4294901760, %v1374_v38  ;;  %v1381_v52 = vand.u32 4294901760, %v1380_v47  ;;  %v1398_v0 = vsub.f32 %v6361_v54, %v1397_v59  ;;  %p6143_p0 = scmp.lt.s32.totalorder %s6137_s24, %s10402_s2 }
  0x1d   : > { %v159_v13 = vld [vmem:[%s6258_s25 + $0x70] sm:$0xff]  ;;  %v158_v14 = vld [vmem:[%s6258_s25 + $0x68] sm:$0xff]  ;;  %v157_v15 = vld [vmem:[%s6258_s25 + $0x60] sm:$0xff]  ;;  %1726 = vmatpush.msra.mxu2 %v6314_v34  ;;  %v1387_v58 = vand.u32 4294901760, %v1386_v53  ;;  %v6393_v3 = vand.u32 4294901760, %v795_v63  ;;  %s6138_s26 = scalar_lea.hbm %s6137_s24, 512 }
  0x1e   : > { %v162_v16 = vld [vmem:[%s6258_s25 + $0x88] sm:$0xff]  ;;  %v161_v17 = vld [vmem:[%s6258_s25 + $0x80] sm:$0xff]  ;;  %v160_v18 = vld [vmem:[%s6258_s25 + $0x78] sm:$0xff]  ;;  %1370 = vmatpush.msra.mxu1 %v1369_v37  ;;  %2094 = vmatpush.msra.mxu3 %v6316_v35  ;;  %p6139_p11 = scmp.ne.s32.totalorder %s6137_s24, %s6138_s26  ;;  %p6144_p1 = scmp.lt.s32.totalorder %s6142_s28, %s6138_s26 }
  0x1f   : > { %v165_v21 = vld [vmem:[%s6258_s25 + $0xa0] sm:$0xff]  ;;  %v164_v22 = vld [vmem:[%s6258_s25 + $0x98] sm:$0xff]  ;;  %v163_v24 = vld [vmem:[%s6258_s25 + $0x90] sm:$0xff]  ;;  %1729 = vmatpush.msra.mxu2 %v6329_v40  ;;  %827 = vmatpush.msra.mxu0 %v6316_v35 }
  0x20   : > { %v168_v41 = vld [vmem:[%s6258_s25 + $0xb8] sm:$0xff]  ;;  %v167_v42 = vld [vmem:[%s6258_s25 + $0xb0] sm:$0xff]  ;;  %v166_v45 = vld [vmem:[%s6258_s25 + $0xa8] sm:$0xff]  ;;  %1376 = vmatpush.msra.mxu1 %v1375_v46  ;;  %2096 = vmatpush.msra.mxu3 %v6336_v43  ;;  %p6140_p12 = pnand %p6139_p11, %p6244_p5  ;;  %p6145_p2 = por %p6144_p1, %p6143_p0 }
  0x21   : > { %1732 = vmatpush.msra.mxu2 %v6350_v50  ;;  %829 = vmatpush.msra.mxu0 %v6336_v43  ;;  %v791_v32 = vld [vmem:[%s10401_s1 + $0x18] sm:$0xff]  ;;  %v173_v44 = vld [vmem:[%s6258_s25 + $0xe0] sm:$0xff]  ;;  %v790_v46 = vld [vmem:[%s10401_s1 + $0x10] sm:$0xff] }
  0x22   : > { %228 = vperm.xlu2 %6121, %v150_v4   ;;  %222 = vperm.xlu1 %6120, %v148_v5   ;;  %v171_v4 = vld [vmem:[%s6258_s25 + $0xd0] sm:$0xff]  ;;  %v170_v5 = vld [vmem:[%s6258_s25 + $0xc8] sm:$0xff]  ;;  %v172_v47 = vld [vmem:[%s6258_s25 + $0xd8] sm:$0xff]  ;;  %v6471_v57 = vand.u32 4294901760, %v790_v46  ;;  %p6141_p13 = pneg %p6140_p12 }
  0x23   : > { %216 = vperm.xlu0 %6119, %v146_v6   ;;  %1382 = vmatpush.msra.mxu1 %v1381_v52  ;;  %v1393_v6 = vand.u32 4294901760, %v1392_v62  ;;  %v789_v62 = vld [vmem:[%s10401_s1 + $0x8] sm:$0xff]  ;;  %v819_v25 = vld [vmem:[%s10401_s1 + $0xf8] sm:$0xff]  ;;  %v189_v40 = vld [vmem:[%s6258_s25 + $0x160] sm:$0xff] }
  0x24   : > { %1735 = vmatpush.msra.mxu2 %v6361_v54  ;;  %2098 = vmatpush.msra.mxu3 %v6346_v49  ;;  %p6146_p3 = pnand %p6145_p2, %p6141_p13 }
  0x25   : > { %1388 = vmatpush.msra.mxu1 %v1387_v58  ;;  %831 = vmatpush.msra.mxu0 %v6346_v49 }
  0x26   : > { %1738 = vmatpush.msra.mxu2 %v6372_v60  ;;  %2100 = vmatpush.msra.mxu3 %v6363_v55 }
  0x27   : > { %1394 = vmatpush.msra.mxu1 %v1393_v6  ;;  %833 = vmatpush.msra.mxu0 %v6363_v55  ;;  %v6484_v6 = vand.u32 4294901760, %v789_v62 }
  0x28   : > { %1741 = vmatpush.msra.mxu2 %v6390_v2  ;;  %2102 = vmatpush.msra.mxu3 %v6375_v61 }
  0x29   : > { %835 = vmatpush.msra.mxu0 %v6375_v61 }
  0x2a   : > { %237 = vperm.xlu2 %6121, %v153_v7   ;;  %234 = vperm.xlu1 %6120, %v152_v8   ;;  %v794_v7 = vld [vmem:[%s10401_s1 + $0x30] sm:$0xff]  ;;  %v169_v8 = vld [vmem:[%s6258_s25 + $0xc0] sm:$0xff] }
  0x2b   : > { %231 = vperm.xlu0 %6119, %v151_v9   ;;  %v1399_v9 = vand.u32 4294901760, %v1398_v0  ;;  %2104 = vmatpush.msra.mxu3 %v6393_v3 }
  0x2c   : > { %837 = vmatpush.msra.mxu0 %v6393_v3 }
  0x2d   : > { %1400 = vmatpush.msra.mxu1 %v1399_v9 }
  0x32   : > { %246 = vperm.xlu2 %6121, %v156_v10   ;;  %243 = vperm.xlu1 %6120, %v155_v11   ;;  %v1404_v10 = vsub.f32 %v6372_v60, %v1403_v1  ;;  %v1409_v11 = vand.u32 4294901760, %v6390_v2  ;;  %v192_v60 = vld [vmem:[%s6258_s25 + $0x178] sm:$0xff] }
  0x33   : > { %240 = vperm.xlu0 %6119, %v154_v12   ;;  %v6408_v12 = vsub.f32 %v795_v63, %v6393_v3 }
  0x35   : > { %1744 = vmatpush.msra.mxu2 %v6408_v12 }
  0x3a   : > { %255 = vperm.xlu2 %6121, %v159_v13   ;;  %252 = vperm.xlu1 %6120, %v158_v14   ;;  %v6411_v13 = vand.u32 4294901760, %v794_v7  ;;  %v793_v14 = vld [vmem:[%s10401_s1 + $0x28] sm:$0xff] }
  0x3b   : > { %249 = vperm.xlu0 %6119, %v157_v15   ;;  %v1405_v15 = vand.u32 4294901760, %v1404_v10 }
  0x3c   : > { %v6424_v19 = vsub.f32 %v794_v7, %v6411_v13  ;;  %2106 = vmatpush.msra.mxu3 %v6411_v13  ;;  %839 = vmatpush.msra.mxu0 %v6411_v13  ;;  %v788_v7 = vld [vmem:[%s10401_s1] sm:$0xff] }
  0x3d   : > { %1406 = vmatpush.msra.mxu1 %v1405_v15  ;;  %v6498_v15 = vsub.f32 %v789_v62, %v6484_v6  ;;  %v180_v62 = vld [vmem:[%s6258_s25 + $0x118] sm:$0xff] }
  0x3e   : > { %v1421_v31 = vand.u32 4294901760, %v6424_v19  ;;  %1747 = vmatpush.msra.mxu2 %v6424_v19 }
  0x42   : > { %264 = vperm.xlu2 %6121, %v162_v16   ;;  %261 = vperm.xlu1 %6120, %v161_v17   ;;  %v1410_v16 = vsub.f32 %v6390_v2, %v1409_v11  ;;  %v1415_v17 = vand.u32 4294901760, %v6408_v12  ;;  %v190_v2 = vld [vmem:[%s6258_s25 + $0x168] sm:$0xff] }
  0x43   : > { %258 = vperm.xlu0 %6119, %v160_v18   ;;  %v6421_v18 = vand.u32 4294901760, %v793_v14 }
  0x44   : > { %v1416_v23 = vsub.f32 %v6408_v12, %v1415_v17 }
  0x45   : > { %2108 = vmatpush.msra.mxu3 %v6421_v18  ;;  %841 = vmatpush.msra.mxu0 %v6421_v18 }
  0x46   : > { %v1417_v36 = vand.u32 4294901760, %v1416_v23  ;;  %v177_v23 = vld [vmem:[%s6258_s25 + $0x100] sm:$0xff] }
  0x4a   : > { %273 = vperm.xlu2 %6121, %v165_v21   ;;  %270 = vperm.xlu1 %6120, %v164_v22   ;;  %v792_v21 = vld [vmem:[%s10401_s1 + $0x20] sm:$0xff]  ;;  %v1411_v22 = vand.u32 4294901760, %v1410_v16 }
  0x4b   : > { %267 = vperm.xlu0 %6119, %v163_v24   ;;  %v6435_v24 = vsub.f32 %v793_v14, %v6421_v18  ;;  %v6437_v27 = vand.u32 4294901760, %v792_v21  ;;  %v6495_v14 = vand.u32 4294901760, %v788_v7 }
  0x4c   : > { %1412 = vmatpush.msra.mxu1 %v1411_v22 }
  0x4d   : > { %v1427_v37 = vand.u32 4294901760, %v6435_v24  ;;  %v6448_v38 = vsub.f32 %v792_v21, %v6437_v27  ;;  %1750 = vmatpush.msra.mxu2 %v6435_v24  ;;  %2110 = vmatpush.msra.mxu3 %v6437_v27  ;;  %v6507_v22 = vsub.f32 %v788_v7, %v6495_v14  ;;  %v183_v7 = vld [vmem:[%s6258_s25 + $0x130] sm:$0xff] }
  0x4e   : > { %1418 = vmatpush.msra.mxu1 %v1417_v36  ;;  %v1451_v36 = vand.u32 4294901760, %v6498_v15  ;;  %843 = vmatpush.msra.mxu0 %v6437_v27 }
  0x4f   : > { %v1428_v51 = vsub.f32 %v6435_v24, %v1427_v37  ;;  %v1433_v52 = vand.u32 4294901760, %v6448_v38  ;;  %1753 = vmatpush.msra.mxu2 %v6448_v38  ;;  %v194_v24 = vld [vmem:[%s6258_s25 + $0x188] sm:$0xff] }
  0x51   : > { %v1429_v63 = vand.u32 4294901760, %v1428_v51  ;;  %v1434_v0 = vsub.f32 %v6448_v38, %v1433_v52 }
  0x52   : > { %282 = vperm.xlu2 %6121, %v168_v41   ;;  %279 = vperm.xlu1 %6120, %v167_v42   ;;  %v6450_v41 = vand.u32 4294901760, %v791_v32  ;;  %v174_v42 = vld [vmem:[%s6258_s25 + $0xe8] sm:$0xff] }
  0x53   : > { %276 = vperm.xlu0 %6119, %v166_v45   ;;  %v1422_v45 = vsub.f32 %v6424_v19, %v1421_v31 }
  0x54   : > { %v6469_v53 = vsub.f32 %v791_v32, %v6450_v41  ;;  %v176_v32 = vld [vmem:[%s6258_s25 + $0xf8] sm:$0xff]  ;;  %2112 = vmatpush.msra.mxu3 %v6450_v41  ;;  %845 = vmatpush.msra.mxu0 %v6450_v41 }
  0x55   : > { %v1423_v58 = vand.u32 4294901760, %v1422_v45  ;;  %v1457_v45 = vand.u32 4294901760, %v6507_v22 }
  0x56   : > { %1756 = vmatpush.msra.mxu2 %v6469_v53  ;;  %2114 = vmatpush.msra.mxu3 %v6471_v57 }
  0x57   : > { %1424 = vmatpush.msra.mxu1 %v1423_v58  ;;  %847 = vmatpush.msra.mxu0 %v6471_v57 }
  0x58   : > { %2116 = vmatpush.msra.mxu3 %v6484_v6 }
  0x59   : > { %1430 = vmatpush.msra.mxu1 %v1429_v63  ;;  %v179_v63 = vld [vmem:[%s6258_s25 + $0x110] sm:$0xff]  ;;  %849 = vmatpush.msra.mxu0 %v6484_v6 }
  0x5a   : > { %291 = vperm.xlu2 %6121, %v171_v4   ;;  %288 = vperm.xlu1 %6120, %v170_v5   ;;  %v1439_v4 = vand.u32 4294901760, %v6469_v53  ;;  %v6482_v5 = vsub.f32 %v790_v46, %v6471_v57  ;;  %v1452_v46 = vsub.f32 %v6498_v15, %v1451_v36 }
  0x5b   : > { %285 = vperm.xlu0 %6119, %v169_v8   ;;  %v1435_v8 = vand.u32 4294901760, %v1434_v0  ;;  %v178_v0 = vld [vmem:[%s6258_s25 + $0x108] sm:$0xff]  ;;  %2118 = vmatpush.msra.mxu3 %v6495_v14 }
  0x5c   : > { %v1440_v9 = vsub.f32 %v6469_v53, %v1439_v4  ;;  %v1445_v10 = vand.u32 4294901760, %v6482_v5  ;;  %v1453_v51 = vand.u32 4294901760, %v1452_v46  ;;  %1759 = vmatpush.msra.mxu2 %v6482_v5  ;;  %851 = vmatpush.msra.mxu0 %v6495_v14  ;;  %v200_v46 = vld [vmem:[%s6258_s25 + $0x1b8] sm:$0xff] }
  0x5d   : > { %1436 = vmatpush.msra.mxu1 %v1435_v8  ;;  %v182_v8 = vld [vmem:[%s6258_s25 + $0x128] sm:$0xff] }
  0x5e   : > { %v1441_v16 = vand.u32 4294901760, %v1440_v9  ;;  %v1446_v21 = vsub.f32 %v6482_v5, %v1445_v10  ;;  %1762 = vmatpush.msra.mxu2 %v6498_v15  ;;  %2507 = vmatpush.msrb.mxu0 %v1367_v28  ;;  %v196_v15 = vld [vmem:[%s6258_s25 + $0x198] sm:$0xff] }
  0x60   : > { %1442 = vmatpush.msra.mxu1 %v1441_v16  ;;  %1765 = vmatpush.msra.mxu2 %v6507_v22 }
  0x61   : > { %2511 = vmatpush.msrb.mxu0 %v1373_v33  ;;  %v185_v33 = vld [vmem:[%s6258_s25 + $0x140] sm:$0xff] }
  0x62   : > { %300 = vperm.xlu2 %6121, %v174_v42   ;;  %297 = vperm.xlu1 %6120, %v173_v44   ;;  %v175_v42 = vld [vmem:[%s6258_s25 + $0xf0] sm:$0xff]  ;;  %v1447_v44 = vand.u32 4294901760, %v1446_v21 }
  0x63   : > { %294 = vperm.xlu0 %6119, %v172_v47   ;;  %v1458_v47 = vsub.f32 %v6507_v22, %v1457_v45  ;;  %2515 = vmatpush.msrb.mxu0 %v1379_v39 }
  0x64   : > { %1448 = vmatpush.msra.mxu1 %v1447_v44  ;;  %v201_v44 = vld [vmem:[%s6258_s25 + $0x1c0] sm:$0xff] }
  0x65   : > { %v1459_v58 = vand.u32 4294901760, %v1458_v47  ;;  %2519 = vmatpush.msrb.mxu0 %v1385_v48  ;;  %v209_v48 = vlaneseq  ;;  %v199_v47 = vld [vmem:[%s6258_s25 + $0x1b0] sm:$0xff] }
  0x66   : > { %1454 = vmatpush.msra.mxu1 %v1453_v51 }
  0x67   : > { %2523 = vmatpush.msrb.mxu0 %v1391_v56  ;;  %v6590_v50 = vand.u32 127, %v209_v48  ;;  %v10558_v56 = vmov 0.0  }
  0x68   : > { %1460 = vmatpush.msra.mxu1 %v1459_v58 }
  0x69   : > { %2527 = vmatpush.msrb.mxu0 %v1397_v59 }
  0x6a   : > { %309 = vperm.xlu2 %6121, %v177_v23   ;;  %306 = vperm.xlu1 %6120, %v176_v32  }
  0x6b   : > { %303 = vperm.xlu0 %6119, %v175_v42   ;;  %2826 = vmatpush.msrb.mxu1 %v6281_v20  ;;  %v181_v20 = vld [vmem:[%s6258_s25 + $0x120] sm:$0xff] }
  0x6c   : > { %2531 = vmatpush.msrb.mxu0 %v1403_v1  ;;  %v191_v1 = vld [vmem:[%s6258_s25 + $0x170] sm:$0xff] }
  0x6d   : > { %2828 = vmatpush.msrb.mxu1 %v6292_v26  ;;  %v6552_v26 = vand.u32 4294901760, %v819_v25 }
  0x6e   : > { %2535 = vmatpush.msrb.mxu0 %v1409_v11 }
  0x6f   : > { %2830 = vmatpush.msrb.mxu1 %v6303_v30  ;;  %3115 = vmatpush.msrb.mxu2 %v6552_v26  ;;  %v6558_v28 = vsub.f32 %v819_v25, %v6552_v26  ;;  %v186_v30 = vld [vmem:[%s6258_s25 + $0x148] sm:$0xff] }
  0x70   : > { %2539 = vmatpush.msrb.mxu0 %v1415_v17  ;;  %v202_v25 = vld [vmem:[%s6258_s25 + $0x1c8] sm:$0xff] }
  0x71   : > { %2832 = vmatpush.msrb.mxu1 %v6316_v35  ;;  %v10416_v29 = vand.u32 4294901760, %v6558_v28  ;;  %v184_v35 = vld [vmem:[%s6258_s25 + $0x138] sm:$0xff] }
  0x72   : > { %318 = vperm.xlu2 %6121, %v180_v62   ;;  %315 = vperm.xlu1 %6120, %v179_v63  }
  0x73   : > { %312 = vperm.xlu0 %6119, %v178_v0   ;;  %2834 = vmatpush.msrb.mxu1 %v6336_v43  ;;  %v3662_v34 = vsub.f32 %v6558_v28, %v10416_v29  ;;  %v188_v43 = vld [vmem:[%s6258_s25 + $0x158] sm:$0xff] }
  0x74   : > { %2543 = vmatpush.msrb.mxu0 %v1421_v31  ;;  %v6678_v23 = vpop.permute.xlu2 %225 }
  0x75   : > { %2836 = vmatpush.msrb.mxu1 %v6346_v49  ;;  %v3663_v39 = vand.u32 4294901760, %v3662_v34  ;;  %v187_v49 = vld [vmem:[%s6258_s25 + $0x150] sm:$0xff]  ;;  %vm412_vm4 = vcmp.eq.s32.totalorder %v6678_v23, %v6590_v50 }
  0x76   : > { %2547 = vmatpush.msrb.mxu0 %v1427_v37  ;;  %v193_v37 = vld [vmem:[%s6258_s25 + $0x180] sm:$0xff]  ;;  %v5565_v58 = vsel %vm412_vm4, 1.0, %v10558_v56 }
  0x77   : > { %2838 = vmatpush.msrb.mxu1 %v6363_v55  ;;  %3664 = vmatpush.msrb.mxu3 %v3663_v39  ;;  %v10419_v55 = vmov 1.0   ;;  %v885_v63 = vsub.f32 %v5565_v58, %v5565_v58 }
  0x78   : > { %2551 = vmatpush.msrb.mxu0 %v1433_v52 }
  0x79   : > { %2840 = vmatpush.msrb.mxu1 %v6375_v61 }
  0x7a   : > { %327 = vperm.xlu2 %6121, %v183_v7   ;;  %324 = vperm.xlu1 %6120, %v182_v8   ;;  %v204_v7 = vld [vmem:[%s6258_s25 + $0x1d8] sm:$0xff] }
  0x7b   : > { %321 = vperm.xlu0 %6119, %v181_v20   ;;  %2842 = vmatpush.msrb.mxu1 %v6393_v3  ;;  %v203_v20 = vld [vmem:[%s6258_s25 + $0x1d0] sm:$0xff] }
  0x7c   : > { %2555 = vmatpush.msrb.mxu0 %v1439_v4  ;;  %v6693_v0 = vpop.permute.xlu2 %228 }
  0x7d   : > { %2844 = vmatpush.msrb.mxu1 %v6411_v13  ;;  %vm414_vm5 = vcmp.eq.s32.totalorder %v6693_v0, %v6590_v50 }
  0x7e   : > { %2559 = vmatpush.msrb.mxu0 %v1445_v10 }
  0x7f   : > { %2846 = vmatpush.msrb.mxu1 %v6421_v18  ;;  %v195_v18 = vld [vmem:[%s6258_s25 + $0x190] sm:$0xff] }
  0x80   : > { %2563 = vmatpush.msrb.mxu0 %v1451_v36 }
  0x81   : > { %2848 = vmatpush.msrb.mxu1 %v6437_v27  ;;  %v818_v27 = vld [vmem:[%s10401_s1 + $0xf0] sm:$0xff] }
  0x82   : > { %336 = vperm.xlu2 %6121, %v186_v30   ;;  %333 = vperm.xlu1 %6120, %v185_v33   ;;  %v6645_v38 = vand.u32 4294901760, %v818_v27  ;;  %v886_v30 = vand.u32 4294901760, %v885_v63  ;;  %v5567_v33 = vsel %vm414_vm5, 1.0, %v10558_v56 }
  0x83   : > { %330 = vperm.xlu0 %6119, %v184_v35   ;;  %2850 = vmatpush.msrb.mxu1 %v6450_v41  ;;  %v893_v39 = vsub.f32 %v5567_v33, %v5567_v33 }
  0x84   : > { %2567 = vmatpush.msrb.mxu0 %v1457_v45  ;;  %3117 = vmatpush.msrb.mxu2 %v6645_v38  ;;  %v6655_v53 = vsub.f32 %v818_v27, %v6645_v38  ;;  %v887_v35 = vsub.f32 %v885_v63, %v886_v30 }
  0x85   : > { %2852 = vmatpush.msrb.mxu1 %v6471_v57 }
  0x86   : > { %v10415_v9 = vand.u32 4294901760, %v6655_v53  ;;  %v888_v48 = vand.u32 4294901760, %v887_v35 }
  0x87   : > { %2854 = vmatpush.msrb.mxu1 %v6484_v6  ;;  %v198_v6 = vld [vmem:[%s6258_s25 + $0x1a8] sm:$0xff] }
  0x88   : > { %v3668_v22 = vsub.f32 %v6655_v53, %v10415_v9 }
  0x89   : > { %2856 = vmatpush.msrb.mxu1 %v6495_v14  ;;  %v197_v14 = vld [vmem:[%s6258_s25 + $0x1a0] sm:$0xff] }
  0x8a   : > { %345 = vperm.xlu2 %6121, %v189_v40   ;;  %342 = vperm.xlu1 %6120, %v188_v43   ;;  %v3669_v32 = vand.u32 4294901760, %v3668_v22  ;;  %v207_v40 = vld [vmem:[%s6258_s25 + $0x1f0] sm:$0xff]  ;;  %v817_v43 = vld [vmem:[%s10401_s1 + $0xe8] sm:$0xff] }
  0x8b   : > { %339 = vperm.xlu0 %6119, %v187_v49   ;;  %v206_v49 = vld [vmem:[%s6258_s25 + $0x1e8] sm:$0xff] }
  0x8c   : > { %v6616_v11 = vpop.permute.xlu1 %219  ;;  %3670 = vmatpush.msrb.mxu3 %v3669_v32 }
  0x8d   : > { %v6593_v54 = vpop.permute.xlu0 %213  ;;  %vm408_vm2 = vcmp.eq.s32.totalorder %v6616_v11, %v6590_v50 }
  0x8e   : > { %vm404_vm0 = vcmp.eq.s32.totalorder %v6593_v54, %v6590_v50  ;;  %v5561_v41 = vsel %vm408_vm2, 1.0, %v10558_v56 }
  0x8f   : > { %5685 = vmatmul.msk.f32.vlgmr.msra.gmra.mxu1 %vm404_vm0, %v10419_v55  ;;  %v5557_v59 = vsel %vm404_vm0, 1.0, %v10558_v56  ;;  %v869_v57 = vsub.f32 %v5561_v41, %v5561_v41 }
  0x90   : > { %v853_v61 = vsub.f32 %v5557_v59, %v5557_v59  ;;  %4382 = vmatpush.msra.mxu1 %v6552_v26  ;;  %v205_v59 = vld [vmem:[%s6258_s25 + $0x1e0] sm:$0xff] }
  0x91   : > { %v870_v16 = vand.u32 4294901760, %v869_v57 }
  0x92   : > { %1768 = vmatmul.f32.vlgmr.msra.gmra.mxu2 %v853_v61  ;;  %354 = vperm.xlu2 %6121, %v192_v60   ;;  %v854_v3 = vand.u32 4294901760, %v853_v61  ;;  %v894_v60 = vand.u32 4294901760, %v893_v39 }
  0x93   : > { %351 = vperm.xlu1 %6120, %v191_v1   ;;  %348 = vperm.xlu0 %6119, %v190_v2   ;;  %v871_v36 = vsub.f32 %v869_v57, %v870_v16 }
  0x94   : > { %2122 = vmatmul.f32.vlgmr.msra.gmra.mxu3 %v854_v3  ;;  %v855_v12 = vsub.f32 %v853_v61, %v854_v3  ;;  %v6657_v4 = vpop.permute.xlu1 %222  ;;  %4384 = vmatpush.msra.mxu1 %v6645_v38  ;;  %v6722_v61 = vand.u32 4294901760, %v817_v43 }
  0x95   : > { %v6619_v13 = vpop.permute.xlu0 %216  ;;  %vm410_vm3 = vcmp.eq.s32.totalorder %v6657_v4, %v6590_v50  ;;  %v872_v45 = vand.u32 4294901760, %v871_v36 }
  0x96   : > { %vm406_vm1 = vcmp.eq.s32.totalorder %v6619_v13, %v6590_v50  ;;  %v856_v17 = vand.u32 4294901760, %v855_v12  ;;  %v5563_v21 = vsel %vm410_vm3, 1.0, %v10558_v56  ;;  %v6729_v2 = vsub.f32 %v817_v43, %v6722_v61  ;;  %3119 = vmatpush.msrb.mxu2 %v6722_v61  ;;  %4386 = vmatpush.msra.mxu1 %v6722_v61 }
  0x97   : > { %5686 = vmatmul.msk.f32.gmra.mxu1 %vm406_vm1, %v10419_v55  ;;  %v5559_v19 = vsel %vm406_vm1, 1.0, %v10558_v56  ;;  %v877_v42 = vsub.f32 %v5563_v21, %v5563_v21  ;;  %v895_v12 = vsub.f32 %v893_v39, %v894_v60 }
  0x98   : > { %857 = vmatmul.f32.vlgmr.msra.gmra.mxu0 %v856_v17  ;;  %v861_v31 = vsub.f32 %v5559_v19, %v5559_v19 }
  0x99   : > { %4014 = vmatpush.msra.mxu0 %v6558_v28  ;;  %v878_v51 = vand.u32 4294901760, %v877_v42  ;;  %v896_v19 = vand.u32 4294901760, %v895_v12 }
  0x9a   : > { %363 = vperm.xlu2 %6121, %v195_v18   ;;  %1773 = vmatmul.f32.gmra.mxu2 %v861_v31  ;;  %v862_v52 = vand.u32 4294901760, %v861_v31  ;;  %v10414_v18 = vand.u32 4294901760, %v6729_v2 }
  0x9b   : > { %360 = vperm.xlu1 %6120, %v194_v24   ;;  %357 = vperm.xlu0 %6119, %v193_v37   ;;  %v879_v62 = vsub.f32 %v877_v42, %v878_v51  ;;  %v208_v24 = vld [vmem:[%s6258_s25 + $0x1f8] sm:$0xff] }
  0x9c   : > { %2128 = vmatmul.f32.gmra.mxu3 %v862_v52  ;;  %4017 = vmatpush.msra.mxu0 %v6655_v53  ;;  %v863_v5 = vsub.f32 %v861_v31, %v862_v52  ;;  %v6731_v3 = vpop.permute.xlu1 %234  ;;  %v3674_v31 = vsub.f32 %v6729_v2, %v10414_v18 }
  0x9d   : > { %v880_v8 = vand.u32 4294901760, %v879_v62  ;;  %v6708_v34 = vpop.permute.xlu0 %231  ;;  %vm418_vm7 = vcmp.eq.s32.totalorder %v6731_v3, %v6590_v50 }
  0x9e   : > { %v864_v10 = vand.u32 4294901760, %v863_v5  ;;  %vm416_vm6 = vcmp.eq.s32.totalorder %v6708_v34, %v6590_v50  ;;  %4020 = vmatpush.msra.mxu0 %v6729_v2  ;;  %v5571_v37 = vsel %vm418_vm7, 1.0, %v10558_v56  ;;  %v3675_v41 = vand.u32 4294901760, %v3674_v31  ;;  %v6751_v5 = vpop.permute.xlu2 %237 }
  0x9f   : > { %5687 = vmatmul.msk.f32.gmra.mxu1 %vm408_vm2, %v10419_v55  ;;  %v5569_v1 = vsel %vm416_vm6, 1.0, %v10558_v56  ;;  %vm420_vm8 = vcmp.eq.s32.totalorder %v6751_v5, %v6590_v50 }
  0xa0   : > { %865 = vmatmul.f32.gmra.mxu0 %v864_v10  ;;  %v901_v17 = vsub.f32 %v5569_v1, %v5569_v1  ;;  %3676 = vmatpush.msrb.mxu3 %v3675_v41 }
  0xa2   : > { %372 = vperm.xlu2 %6121, %v198_v6   ;;  %1778 = vmatmul.f32.gmra.mxu2 %v869_v57  ;;  %v902_v27 = vand.u32 4294901760, %v901_v17  ;;  %v909_v57 = vsub.f32 %v5571_v37, %v5571_v37 }
  0xa3   : > { %369 = vperm.xlu1 %6120, %v197_v14   ;;  %366 = vperm.xlu0 %6119, %v196_v15   ;;  %v5573_v14 = vsel %vm420_vm8, 1.0, %v10558_v56 }
  0xa4   : > { %2134 = vmatmul.f32.gmra.mxu3 %v870_v16  ;;  %v903_v52 = vsub.f32 %v901_v17, %v902_v27  ;;  %v910_v10 = vand.u32 4294901760, %v909_v57  ;;  %v917_v21 = vsub.f32 %v5573_v14, %v5573_v14  ;;  %v815_v14 = vld [vmem:[%s10401_s1 + $0xd8] sm:$0xff] }
  0xa5   : > { %v6763_v15 = vpop.permute.xlu0 %240 }
  0xa6   : > { %v904_v6 = vand.u32 4294901760, %v903_v52  ;;  %10838 = vst [vmem:[#allocation5_spill] sm:$0xff] %v6763_v15  ;;  %v911_v16 = vsub.f32 %v909_v57, %v910_v10  ;;  %vm422_vm9 = vcmp.eq.s32.totalorder %v6763_v15, %v6590_v50  ;;  %v918_v32 = vand.u32 4294901760, %v917_v21 }
  0xa7   : > { %5688 = vmatmul.msk.f32.gmra.mxu1 %vm410_vm3, %v10419_v55  ;;  %v5575_v36 = vsel %vm422_vm9, 1.0, %v10558_v56 }
  0xa8   : > { %873 = vmatmul.f32.gmra.mxu0 %v872_v45  ;;  %v912_v22 = vand.u32 4294901760, %v911_v16  ;;  %v925_v45 = vsub.f32 %v5575_v36, %v5575_v36  ;;  %v6853_v16 = vand.u32 4294901760, %v815_v14 }
  0xaa   : > { %381 = vperm.xlu2 %6121, %v201_v44   ;;  %1783 = vmatmul.f32.gmra.mxu2 %v877_v42  ;;  %v6775_v42 = vpop.permute.xlu1 %243  ;;  %v919_v44 = vsub.f32 %v917_v21, %v918_v32  ;;  %v6866_v36 = vsub.f32 %v815_v14, %v6853_v16 }
  0xab   : > { %378 = vperm.xlu1 %6120, %v200_v46   ;;  %375 = vperm.xlu0 %6119, %v199_v47   ;;  %10839 = vst [vmem:[#allocation6_spill] sm:$0xff] %v6775_v42  ;;  %vm424_vm10 = vcmp.eq.s32.totalorder %v6775_v42, %v6590_v50  ;;  %v816_v46 = vld [vmem:[%s10401_s1 + $0xe0] sm:$0xff] }
  0xac   : > { %2140 = vmatmul.f32.gmra.mxu3 %v878_v51  ;;  %v920_v47 = vand.u32 4294901760, %v919_v44  ;;  %v926_v51 = vand.u32 4294901760, %v925_v45  ;;  %v6786_v58 = vand.u32 4294901760, %v816_v46  ;;  %v5577_v62 = vsel %vm424_vm10, 1.0, %v10558_v56 }
  0xad   : > { %v6814_v43 = vpop.permute.xlu0 %249 }
  0xae   : > { %3121 = vmatpush.msrb.mxu2 %v6786_v58  ;;  %4388 = vmatpush.msra.mxu1 %v6786_v58  ;;  %10841 = vst [vmem:[#allocation8_spill] sm:$0xff] %v6814_v43  ;;  %vm10569_vm12 = vcmp.eq.s32.totalorder %v6814_v43, %v6590_v50 }
  0xaf   : > { %5689 = vmatmul.msk.f32.gmra.mxu1 %vm412_vm4, %v10419_v55  ;;  %v5581_v1 = vsel %vm10569_vm12, 1.0, %v10558_v56 }
  0xb0   : > { %881 = vmatmul.f32.gmra.mxu0 %v880_v8  ;;  %v933_v8 = vsub.f32 %v5577_v62, %v5577_v62  ;;  %3123 = vmatpush.msrb.mxu2 %v6853_v16 }
  0xb1   : > { %4390 = vmatpush.msra.mxu1 %v6853_v16 }
  0xb2   : > { %390 = vperm.xlu2 %6121, %v204_v7   ;;  %1788 = vmatmul.f32.gmra.mxu2 %v885_v63  ;;  %v6793_v63 = vsub.f32 %v816_v46, %v6786_v58  ;;  %v927_v7 = vsub.f32 %v925_v45, %v926_v51  ;;  %v934_v33 = vand.u32 4294901760, %v933_v8  ;;  %v6826_v12 = vpop.permute.xlu1 %252  ;;  %v10412_v46 = vand.u32 4294901760, %v6866_v36 }
  0xb3   : > { %387 = vperm.xlu1 %6120, %v203_v20   ;;  %384 = vperm.xlu0 %6119, %v202_v25   ;;  %v6797_v20 = vpop.permute.xlu2 %246  ;;  %10842 = vst [vmem:[#allocation9_spill] sm:$0xff] %v6826_v12  ;;  %vm10404_vm13 = vcmp.eq.s32.totalorder %v6826_v12, %v6590_v50 }
  0xb4   : > { %2146 = vmatmul.f32.gmra.mxu3 %v886_v30  ;;  %10840 = vst [vmem:[#allocation7_spill] sm:$0xff] %v6797_v20  ;;  %4023 = vmatpush.msra.mxu0 %v6793_v63  ;;  %vm426_vm11 = vcmp.eq.s32.totalorder %v6797_v20, %v6590_v50  ;;  %v10413_v25 = vand.u32 4294901760, %v6793_v63  ;;  %v928_v30 = vand.u32 4294901760, %v927_v7  ;;  %v5583_v31 = vsel %vm10404_vm13, 1.0, %v10558_v56 }
  0xb5   : > { %v957_v41 = vsub.f32 %v5583_v31, %v5583_v31  ;;  %v10933_v20 = vand.u32 4294901760, %v6793_v63 }
  0xb6   : > { %v3680_v35 = vsub.f32 %v6793_v63, %v10413_v25  ;;  %4026 = vmatpush.msra.mxu0 %v6866_v36  ;;  %v10935_v63 = vmov 0.0  }
  0xb7   : > { %5690 = vmatmul.msk.f32.gmra.mxu1 %vm414_vm5, %v10419_v55 }
  0xb8   : > { %889 = vmatmul.f32.gmra.mxu0 %v888_v48  ;;  %v935_v48 = vsub.f32 %v933_v8, %v934_v33 }
  0xba   : > { %399 = vperm.xlu2 %6121, %v207_v40   ;;  %1793 = vmatmul.f32.gmra.mxu2 %v893_v39  ;;  %v5579_v39 = vsel %vm426_vm11, 1.0, %v10558_v56  ;;  %v3681_v40 = vand.u32 4294901760, %v3680_v35  ;;  %v6877_v62 = vpop.permute.xlu1 %261 }
  0xbb   : > { %396 = vperm.xlu1 %6120, %v206_v49   ;;  %393 = vperm.xlu0 %6119, %v205_v59   ;;  %v941_v49 = vsub.f32 %v5579_v39, %v5579_v39  ;;  %v936_v59 = vand.u32 4294901760, %v935_v48  ;;  %v6838_v52 = vpop.permute.xlu2 %255  ;;  %10845 = vst [vmem:[#allocation12_spill] sm:$0xff] %v6877_v62 }
  0xbc   : > { %2152 = vmatmul.f32.gmra.mxu3 %v894_v60  ;;  %10843 = vst [vmem:[#allocation10_spill] sm:$0xff] %v6838_v52  ;;  %vm10403_vm14 = vcmp.eq.s32.totalorder %v6838_v52, %v6590_v50 }
  0xbd   : > { %3682 = vmatpush.msrb.mxu3 %v3681_v40  ;;  %v942_v60 = vand.u32 4294901760, %v941_v49 }
  0xbf   : > { %5691 = vmatmul.msk.f32.gmra.mxu1 %vm416_vm6, %v10419_v55 }
  0xc0   : > { %897 = vmatmul.f32.gmra.mxu0 %v896_v19  ;;  %v949_v19 = vsub.f32 %v5581_v1, %v5581_v1 }
  0xc2   : > { %1798 = vmatmul.f32.gmra.mxu2 %v901_v17  ;;  %v943_v17 = vsub.f32 %v941_v49, %v942_v60 }
  0xc3   : > { %402 = vperm.xlu0 %6119, %v208_v24  }
  0xc4   : > { %2158 = vmatmul.f32.gmra.mxu3 %v902_v27  ;;  %v944_v24 = vand.u32 4294901760, %v943_v17  ;;  %v950_v27 = vand.u32 4294901760, %v949_v19 }
  0xc6   : > { %v951_v37 = vsub.f32 %v949_v19, %v950_v27 }
  0xc7   : > { %5692 = vmatmul.msk.f32.gmra.mxu1 %vm418_vm7, %v10419_v55 }
  0xc8   : > { %905 = vmatmul.f32.gmra.mxu0 %v904_v6  ;;  %v958_v6 = vand.u32 4294901760, %v957_v41 }
  0xca   : > { %1803 = vmatmul.f32.gmra.mxu2 %v909_v57  ;;  %v952_v57 = vand.u32 4294901760, %v951_v37 }
  0xcc   : > { %2164 = vmatmul.f32.gmra.mxu3 %v910_v10  ;;  %v5585_v10 = vsel %vm10403_vm14, 1.0, %v10558_v56 }
  0xcf   : > { %5693 = vmatmul.msk.f32.gmra.mxu1 %vm420_vm8, %v10419_v55 }
  0xd0   : > { %913 = vmatmul.f32.gmra.mxu0 %v912_v22  ;;  %v959_v22 = vsub.f32 %v957_v41, %v958_v6 }
  0xd2   : > { %1808 = vmatmul.f32.gmra.mxu2 %v917_v21  ;;  %v6855_v21 = vpop.permute.xlu0 %258  ;;  %v960_v44 = vand.u32 4294901760, %v959_v22 }
  0xd3   : > { %10844 = vst [vmem:[#allocation11_spill] sm:$0xff] %v6855_v21  ;;  %vm10566_vm15 = vcmp.eq.s32.totalorder %v6855_v21, %v6590_v50 }
  0xd4   : > { %2170 = vmatmul.f32.gmra.mxu3 %v918_v32  ;;  %v965_v32 = vsub.f32 %v5585_v10, %v5585_v10 }
  0xd7   : > { %5694 = vmatmul.msk.f32.gmra.mxu1 %vm422_vm9, %v10419_v55 }
  0xd8   : > { %921 = vmatmul.f32.gmra.mxu0 %v920_v47  ;;  %v5587_v47 = vsel %vm10566_vm15, 1.0, %v10558_v56 }
  0xda   : > { %1813 = vmatmul.f32.gmra.mxu2 %v925_v45  ;;  %v966_v45 = vand.u32 4294901760, %v965_v32 }
  0xdc   : > { %2176 = vmatmul.f32.gmra.mxu3 %v926_v51  ;;  %v3686_v51 = vsub.f32 %v6866_v36, %v10412_v46  ;;  %v967_v7 = vsub.f32 %v965_v32, %v966_v45 }
  0xdf   : > { %5695 = vmatmul.msk.f32.gmra.mxu1 %vm424_vm10, %v10419_v55 }
  0xe0   : > { %929 = vmatmul.f32.gmra.mxu0 %v928_v30  ;;  %v3687_v30 = vand.u32 4294901760, %v3686_v51 }
  0xe2   : > { %1818 = vmatmul.f32.gmra.mxu2 %v933_v8  ;;  %v973_v8 = vsub.f32 %v5587_v47, %v5587_v47  ;;  %3688 = vmatpush.msrb.mxu3 %v3687_v30  ;;  %v6918_v47 = vpop.permute.xlu1 %270 }
  0xe3   : > { %10849 = vst [vmem:[#allocation16_spill] sm:$0xff] %v6918_v47 }
  0xe4   : > { %2182 = vmatmul.f32.gmra.mxu3 %v934_v33  ;;  %v968_v33 = vand.u32 4294901760, %v967_v7  ;;  %v974_v35 = vand.u32 4294901760, %v973_v8 }
  0xe6   : > { %v975_v48 = vsub.f32 %v973_v8, %v974_v35 }
  0xe7   : > { %5696 = vmatmul.msk.f32.gmra.mxu1 %vm426_vm11, %v10419_v55 }
  0xe8   : > { %937 = vmatmul.f32.gmra.mxu0 %v936_v59  ;;  %v6889_v59 = vpop.permute.xlu2 %264 }
  0xe9   : > { %10846 = vst [vmem:[#allocation13_spill] sm:$0xff] %v6889_v59 }
  0xea   : > { %1823 = vmatmul.f32.gmra.mxu2 %v941_v49 }
  0xec   : > { %2188 = vmatmul.f32.gmra.mxu3 %v942_v60  ;;  %v976_v60 = vand.u32 4294901760, %v975_v48 }
  0xef   : > { %5697 = vmatmul.msk.f32.gmra.mxu1 %vm10569_vm12, %v10419_v55 }
  0xf0   : > { %945 = vmatmul.f32.gmra.mxu0 %v944_v24 }
  0xf2   : > { %1828 = vmatmul.f32.gmra.mxu2 %v949_v19  ;;  %v6901_v19 = vpop.permute.xlu0 %267 }
  0xf3   : > { %10847 = vst [vmem:[#allocation14_spill] sm:$0xff] %v6901_v19 }
  0xf4   : > { %2194 = vmatmul.f32.gmra.mxu3 %v950_v27 }
  0xf7   : > { %5698 = vmatmul.msk.f32.gmra.mxu1 %vm10404_vm13, %v10419_v55  ;;  %vm10406_vm13 = vcmp.eq.s32.totalorder %v6889_v59, %v6590_v50 }
  0xf8   : > { %953 = vmatmul.f32.gmra.mxu0 %v952_v57  ;;  %v5591_v17 = vsel %vm10406_vm13, 1.0, %v10558_v56 }
  0xf9   : > { %v989_v37 = vsub.f32 %v5591_v17, %v5591_v17 }
  0xfa   : > { %1833 = vmatmul.f32.gmra.mxu2 %v957_v41 }
  0xfb   : > { %v990_v22 = vand.u32 4294901760, %v989_v37 }
  0xfc   : > { %2200 = vmatmul.f32.gmra.mxu3 %v958_v6 }
  0xff   : > { %5699 = vmatmul.msk.f32.gmra.mxu1 %vm10403_vm14, %v10419_v55  ;;  %vm10405_vm14 = vcmp.eq.s32.totalorder %v6877_v62, %v6590_v50 }
 0x100   : > { %961 = vmatmul.f32.gmra.mxu0 %v960_v44  ;;  %v5589_v39 = vsel %vm10405_vm14, 1.0, %v10558_v56 }
 0x101   : > { %v981_v49 = vsub.f32 %v5589_v39, %v5589_v39 }
 0x102   : > { %1838 = vmatmul.f32.gmra.mxu2 %v965_v32 }
 0x103   : > { %v982_v1 = vand.u32 4294901760, %v981_v49 }
 0x104   : > { %2206 = vmatmul.f32.gmra.mxu3 %v966_v45  ;;  %v814_v45 = vld [vmem:[%s10401_s1 + $0xd0] sm:$0xff] }
 0x105   : > { %v983_v31 = vsub.f32 %v981_v49, %v982_v1  ;;  %v6920_v7 = vand.u32 4294901760, %v814_v45 }
 0x107   : > { %5700 = vmatmul.msk.f32.gmra.mxu1 %vm10566_vm15, %v10419_v55  ;;  %v984_v14 = vand.u32 4294901760, %v983_v31  ;;  %3125 = vmatpush.msrb.mxu2 %v6920_v7 }
 0x108   : > { %969 = vmatmul.f32.gmra.mxu0 %v968_v33  ;;  %4392 = vmatpush.msra.mxu1 %v6920_v7 }
 0x10a   : > { %1843 = vmatmul.f32.gmra.mxu2 %v973_v8  ;;  %v991_v8 = vsub.f32 %v989_v37, %v990_v22 }
 0x10c   : > { %v1463_v40 = vpop.f32.mrf.mxu1  ;;  %2212 = vmatmul.f32.gmra.mxu3 %v974_v35  ;;  %v6924_v35 = vsub.f32 %v814_v45, %v6920_v7 }
 0x10e   : > { %v10410_v48 = vand.u32 4294901760, %v6924_v35  ;;  %4029 = vmatpush.msra.mxu0 %v6924_v35 }
 0x10f   : > { %5701 = vmatmul.msk.f32.gmra.mxu1 %vm10405_vm14, %v10419_v55  ;;  %vm10407_vm14 = vcmp.eq.s32.totalorder %v6901_v19, %v6590_v50 }
 0x110   : > { %977 = vmatmul.f32.gmra.mxu0 %v976_v60  ;;  %v5593_v32 = vsel %vm10407_vm14, 1.0, %v10558_v56  ;;  %v992_v60 = vand.u32 4294901760, %v991_v8 }
 0x111   : > { %v997_v30 = vsub.f32 %v5593_v32, %v5593_v32 }
 0x112   : > { %1848 = vmatmul.f32.gmra.mxu2 %v981_v49 }
 0x114   : > { %v1467_v24 = vpop.f32.mrf.mxu1  ;;  %2218 = vmatmul.f32.gmra.mxu3 %v982_v1  ;;  %v998_v1 = vand.u32 4294901760, %v997_v30 }
 0x115   : > { %v1769_v27 = vpop.f32.mrf.mxu2  ;;  %v858_v41 = vpop.f32.mrf.mxu0 }
 0x116   : > { %v1464_v57 = vadd.f32 %v1463_v40, %v858_v41 }
 0x117   : > { %5702 = vmatmul.msk.f32.gmra.mxu1 %vm10406_vm13, %v10419_v55  ;;  %v2123_v6 = vpop.f32.mrf.mxu3  ;;  %vm10408_vm13 = vcmp.eq.s32.totalorder %v6918_v47, %v6590_v50 }
 0x118   : > { %v1770_v10 = vadd.f32 %v1769_v27, %v1464_v57  ;;  %985 = vmatmul.f32.gmra.mxu0 %v984_v14  ;;  %v5595_v17 = vsel %vm10408_vm13, 1.0, %v10558_v56  ;;  %v3692_v27 = vsub.f32 %v6924_v35, %v10410_v48 }
 0x11a   : > { %v6913_v44 = vadd.f32 %v2123_v6, %v1770_v10  ;;  %1853 = vmatmul.f32.gmra.mxu2 %v989_v37  ;;  %v3693_v41 = vand.u32 4294901760, %v3692_v27  ;;  %v1005_v6 = vsub.f32 %v5595_v17, %v5595_v17  ;;  %v6944_v10 = vpop.permute.xlu2 %273 }
 0x11b   : > { %10851 = vst [vmem:[#allocation18_spill] sm:$0xff] %v6944_v10 }
 0x11c   : > { %10848 = vst [vmem:[#allocation15_spill] sm:$0xff] %v6913_v44  ;;  %v1471_v51 = vpop.f32.mrf.mxu1  ;;  %2224 = vmatmul.f32.gmra.mxu3 %v990_v22 }
 0x11d   : > { %v1774_v33 = vpop.f32.mrf.mxu2  ;;  %v866_v39 = vpop.f32.mrf.mxu0  ;;  %3694 = vmatpush.msrb.mxu3 %v3693_v41 }
 0x11e   : > { %v1468_v49 = vadd.f32 %v1467_v24, %v866_v39  ;;  %v999_v24 = vsub.f32 %v997_v30, %v998_v1 }
 0x11f   : > { %5703 = vmatmul.msk.f32.gmra.mxu1 %vm10407_vm14, %v10419_v55  ;;  %v2129_v40 = vpop.f32.mrf.mxu3  ;;  %vm10409_vm14 = vcmp.eq.s32.totalorder %v6944_v10, %v6590_v50 }
 0x120   : > { %v1775_v31 = vadd.f32 %v1774_v33, %v1468_v49  ;;  %993 = vmatmul.f32.gmra.mxu0 %v992_v60  ;;  %v1000_v8 = vand.u32 4294901760, %v999_v24  ;;  %v1006_v33 = vand.u32 4294901760, %v1005_v6 }
 0x122   : > { %1858 = vmatmul.f32.gmra.mxu2 %v997_v30  ;;  %v6942_v57 = vadd.f32 %v2129_v40, %v1775_v31  ;;  %v5597_v30 = vsel %vm10409_vm14, 1.0, %v10558_v56  ;;  %v6956_v40 = vpop.permute.xlu0 %276 }
 0x123   : > { %10852 = vst [vmem:[#allocation19_spill] sm:$0xff] %v6956_v40  ;;  %v1013_v17 = vsub.f32 %v5597_v30, %v5597_v30 }
 0x124   : > { %v1475_v37 = vpop.f32.mrf.mxu1  ;;  %10850 = vst [vmem:[#allocation17_spill] sm:$0xff] %v6942_v57  ;;  %2230 = vmatmul.f32.gmra.mxu3 %v998_v1  ;;  %v1007_v1 = vsub.f32 %v1005_v6, %v1006_v33 }
 0x125   : > { %v1779_v14 = vpop.f32.mrf.mxu2  ;;  %v874_v22 = vpop.f32.mrf.mxu0 }
 0x126   : > { %v1472_v45 = vadd.f32 %v1471_v51, %v874_v22  ;;  %v1008_v24 = vand.u32 4294901760, %v1007_v1 }
 0x127   : > { %5704 = vmatmul.msk.f32.gmra.mxu1 %vm10408_vm13, %v10419_v55  ;;  %v2135_v32 = vpop.f32.mrf.mxu3  ;;  %vm10411_vm13 = vcmp.eq.s32.totalorder %v6956_v40, %v6590_v50 }
 0x128   : > { %v1780_v39 = vadd.f32 %v1779_v14, %v1472_v45  ;;  %1001 = vmatmul.f32.gmra.mxu0 %v1000_v8  ;;  %v1014_v14 = vand.u32 4294901760, %v1013_v17 }
 0x12a   : > { %1863 = vmatmul.f32.gmra.mxu2 %v1005_v6  ;;  %v6958_v60 = vadd.f32 %v2135_v32, %v1780_v39  ;;  %v5599_v6 = vsel %vm10411_vm13, 1.0, %v10558_v56  ;;  %v6970_v32 = vpop.permute.xlu1 %279  ;;  %v7013_v25 = vpop.permute.xlu0 %285 }
 0x12b   : > { %10854 = vst [vmem:[#allocation21_spill] sm:$0xff] %v6970_v32  ;;  %v1021_v30 = vsub.f32 %v5599_v6, %v5599_v6 }
 0x12c   : > { %v1479_v49 = vpop.f32.mrf.mxu1  ;;  %10853 = vst [vmem:[#allocation20_spill] sm:$0xff] %v6958_v60  ;;  %2236 = vmatmul.f32.gmra.mxu3 %v1006_v33  ;;  %v1015_v33 = vsub.f32 %v1013_v17, %v1014_v14 }
 0x12d   : > { %v1784_v27 = vpop.f32.mrf.mxu2  ;;  %v882_v51 = vpop.f32.mrf.mxu0  ;;  %10858 = vst [vmem:[#allocation25_spill] sm:$0xff] %v7013_v25 }
 0x12e   : > { %v1476_v41 = vadd.f32 %v1475_v37, %v882_v51  ;;  %v1016_v51 = vand.u32 4294901760, %v1015_v33 }
 0x12f   : > { %5705 = vmatmul.msk.f32.gmra.mxu1 %vm10409_vm14, %v10419_v55  ;;  %v2141_v31 = vpop.f32.mrf.mxu3  ;;  %vm10417_vm14 = vcmp.eq.s32.totalorder %v6970_v32, %v6590_v50 }
 0x130   : > { %v1785_v22 = vadd.f32 %v1784_v27, %v1476_v41  ;;  %1009 = vmatmul.f32.gmra.mxu0 %v1008_v24  ;;  %v1022_v41 = vand.u32 4294901760, %v1021_v30  ;;  %v813_v24 = vld [vmem:[%s10401_s1 + $0xc8] sm:$0xff] }
 0x132   : > { %1868 = vmatmul.f32.gmra.mxu2 %v1013_v17  ;;  %v6972_v8 = vadd.f32 %v2141_v31, %v1785_v22  ;;  %v5601_v17 = vsel %vm10417_vm14, 1.0, %v10558_v56  ;;  %v6989_v22 = vand.u32 4294901760, %v813_v24  ;;  %v1023_v33 = vsub.f32 %v1021_v30, %v1022_v41 }
 0x134   : > { %v1483_v45 = vpop.f32.mrf.mxu1  ;;  %10855 = vst [vmem:[#allocation22_spill] sm:$0xff] %v6972_v8  ;;  %2242 = vmatmul.f32.gmra.mxu3 %v1014_v14  ;;  %v6987_v14 = vpop.permute.xlu2 %282  ;;  %3127 = vmatpush.msrb.mxu2 %v6989_v22 }
 0x135   : > { %v1789_v39 = vpop.f32.mrf.mxu2  ;;  %v890_v37 = vpop.f32.mrf.mxu0  ;;  %10856 = vst [vmem:[#allocation23_spill] sm:$0xff] %v6987_v14  ;;  %4394 = vmatpush.msra.mxu1 %v6989_v22 }
 0x136   : > { %v1480_v27 = vadd.f32 %v1479_v49, %v890_v37  ;;  %v1029_v37 = vsub.f32 %v5601_v17, %v5601_v17 }
 0x137   : > { %5706 = vmatmul.msk.f32.gmra.mxu1 %vm10411_vm13, %v10419_v55  ;;  %v2147_v1 = vpop.f32.mrf.mxu3  ;;  %vm10421_vm13 = vcmp.eq.s32.totalorder %v6987_v14, %v6590_v50 }
 0x138   : > { %v1790_v31 = vadd.f32 %v1789_v39, %v1480_v27  ;;  %1017 = vmatmul.f32.gmra.mxu0 %v1016_v51  ;;  %v6995_v39 = vsub.f32 %v813_v24, %v6989_v22  ;;  %v1030_v17 = vand.u32 4294901760, %v1029_v37 }
 0x13a   : > { %1873 = vmatmul.f32.gmra.mxu2 %v1021_v30  ;;  %v6991_v49 = vadd.f32 %v2147_v1, %v1790_v31  ;;  %v10418_v30 = vand.u32 4294901760, %v6995_v39  ;;  %4032 = vmatpush.msra.mxu0 %v6995_v39  ;;  %v5603_v31 = vsel %vm10421_vm13, 1.0, %v10558_v56 }
 0x13c   : > { %v1487_v6 = vpop.f32.mrf.mxu1  ;;  %10857 = vst [vmem:[#allocation24_spill] sm:$0xff] %v6991_v49  ;;  %2248 = vmatmul.f32.gmra.mxu3 %v1022_v41  ;;  %v1024_v41 = vand.u32 4294901760, %v1023_v33  ;;  %v3698_v24 = vsub.f32 %v6995_v39, %v10418_v30  ;;  %v1037_v33 = vsub.f32 %v5603_v31, %v5603_v31 }
 0x13d   : > { %v1794_v48 = vpop.f32.mrf.mxu2  ;;  %v898_v1 = vpop.f32.mrf.mxu0 }
 0x13e   : > { %v1484_v51 = vadd.f32 %v1483_v45, %v898_v1  ;;  %v3699_v9 = vand.u32 4294901760, %v3698_v24  ;;  %v1031_v45 = vsub.f32 %v1029_v37, %v1030_v17  ;;  %v1038_v24 = vand.u32 4294901760, %v1037_v33 }
 0x13f   : > { %5707 = vmatmul.msk.f32.gmra.mxu1 %vm10417_vm14, %v10419_v55  ;;  %v2153_v27 = vpop.f32.mrf.mxu3  ;;  %vm10424_vm14 = vcmp.eq.s32.totalorder %v7013_v25, %v6590_v50 }
 0x140   : > { %v1795_v46 = vadd.f32 %v1794_v48, %v1484_v51  ;;  %1025 = vmatmul.f32.gmra.mxu0 %v1024_v41  ;;  %3700 = vmatpush.msrb.mxu3 %v3699_v9  ;;  %v1032_v30 = vand.u32 4294901760, %v1031_v45  ;;  %v7027_v9 = vpop.permute.xlu1 %288  ;;  %v1039_v31 = vsub.f32 %v1037_v33, %v1038_v24 }
 0x141   : > { %10860 = vst [vmem:[#allocation27_spill] sm:$0xff] %v7027_v9 }
 0x142   : > { %1878 = vmatmul.f32.gmra.mxu2 %v1029_v37  ;;  %v7015_v29 = vadd.f32 %v2153_v27, %v1795_v46  ;;  %v5605_v46 = vsel %vm10424_vm14, 1.0, %v10558_v56 }
 0x144   : > { %v1491_v18 = vpop.f32.mrf.mxu1  ;;  %10859 = vst [vmem:[#allocation26_spill] sm:$0xff] %v7015_v29  ;;  %2254 = vmatmul.f32.gmra.mxu3 %v1030_v17 }
 0x145   : > { %v1799_v1 = vpop.f32.mrf.mxu2  ;;  %v906_v48 = vpop.f32.mrf.mxu0 }
 0x146   : > { %v1488_v41 = vadd.f32 %v1487_v6, %v906_v48  ;;  %v10862_v6 = vmov 1.0   ;;  %v1040_v48 = vand.u32 4294901760, %v1039_v31 }
 0x147   : > { %5708 = vmatmul.msk.f32.gmra.mxu1 %vm10421_vm13, %v10419_v55  ;;  %v2159_v51 = vpop.f32.mrf.mxu3  ;;  %v1045_v55 = vsub.f32 %v5605_v46, %v5605_v46  ;;  %vm10425_vm13 = vcmp.eq.s32.totalorder %v7027_v9, %v6590_v50 }
 0x148   : > { %v1800_v37 = vadd.f32 %v1799_v1, %v1488_v41  ;;  %1033 = vmatmul.f32.gmra.mxu0 %v1032_v30 }
 0x149   : > { %v1046_v41 = vand.u32 4294901760, %v1045_v55 }
 0x14a   : > { %1883 = vmatmul.f32.gmra.mxu2 %v1037_v33  ;;  %v7029_v17 = vadd.f32 %v2159_v51, %v1800_v37  ;;  %v5607_v33 = vsel %vm10425_vm13, 1.0, %v10558_v56 }
 0x14b   : > { %v1053_v25 = vsub.f32 %v5607_v33, %v5607_v33 }
 0x14c   : > { %v1495_v27 = vpop.f32.mrf.mxu1  ;;  %10861 = vst [vmem:[#allocation28_spill] sm:$0xff] %v7029_v17  ;;  %2260 = vmatmul.f32.gmra.mxu3 %v1038_v24  ;;  %v7041_v24 = vpop.permute.xlu2 %291  ;;  %v1047_v17 = vsub.f32 %v1045_v55, %v1046_v41 }
 0x14d   : > { %v1804_v29 = vpop.f32.mrf.mxu2  ;;  %v914_v45 = vpop.f32.mrf.mxu0  ;;  %10863 = vst [vmem:[#allocation29_spill] sm:$0xff] %v7041_v24 }
 0x14e   : > { %v1492_v1 = vadd.f32 %v1491_v18, %v914_v45  ;;  %v1048_v45 = vand.u32 4294901760, %v1047_v17 }
 0x14f   : > { %5709 = vmatmul.msk.f32.gmra.mxu1 %vm10424_vm14, %v10862_v6  ;;  %v2165_v30 = vpop.f32.mrf.mxu3  ;;  %vm10432_vm14 = vcmp.eq.s32.totalorder %v7041_v24, %v6590_v50  ;;  %v7084_v24 = vpop.permute.xlu1 %297 }
 0x150   : > { %v1805_v51 = vadd.f32 %v1804_v29, %v1492_v1  ;;  %1041 = vmatmul.f32.gmra.mxu0 %v1040_v48  ;;  %v1054_v1 = vand.u32 4294901760, %v1053_v25  ;;  %v812_v48 = vld [vmem:[%s10401_s1 + $0xc0] sm:$0xff]  ;;  %10867 = vst [vmem:[#allocation33_spill] sm:$0xff] %v7084_v24 }
 0x152   : > { %1888 = vmatmul.f32.gmra.mxu2 %v1045_v55  ;;  %v7043_v37 = vadd.f32 %v2165_v30, %v1805_v51  ;;  %v5609_v55 = vsel %vm10432_vm14, 1.0, %v10558_v56  ;;  %v7060_v51 = vand.u32 4294901760, %v812_v48  ;;  %v1055_v17 = vsub.f32 %v1053_v25, %v1054_v1 }
 0x154   : > { %v1499_v46 = vpop.f32.mrf.mxu1  ;;  %10864 = vst [vmem:[#allocation30_spill] sm:$0xff] %v7043_v37  ;;  %2266 = vmatmul.f32.gmra.mxu3 %v1046_v41  ;;  %v7058_v41 = vpop.permute.xlu0 %294  ;;  %3129 = vmatpush.msrb.mxu2 %v7060_v51 }
 0x155   : > { %v1809_v49 = vpop.f32.mrf.mxu2  ;;  %v922_v29 = vpop.f32.mrf.mxu0  ;;  %10865 = vst [vmem:[#allocation31_spill] sm:$0xff] %v7058_v41  ;;  %4396 = vmatpush.msra.mxu1 %v7060_v51 }
 0x156   : > { %v1496_v31 = vadd.f32 %v1495_v27, %v922_v29  ;;  %v1061_v29 = vsub.f32 %v5609_v55, %v5609_v55 }
 0x157   : > { %5710 = vmatmul.msk.f32.gmra.mxu1 %vm10425_vm13, %v10862_v6  ;;  %v2171_v18 = vpop.f32.mrf.mxu3  ;;  %vm10436_vm13 = vcmp.eq.s32.totalorder %v7058_v41, %v6590_v50 }
 0x158   : > { %v1810_v30 = vadd.f32 %v1809_v49, %v1496_v31  ;;  %1049 = vmatmul.f32.gmra.mxu0 %v1048_v45  ;;  %v7066_v49 = vsub.f32 %v812_v48, %v7060_v51  ;;  %v1062_v55 = vand.u32 4294901760, %v1061_v29 }
 0x15a   : > { %1893 = vmatmul.f32.gmra.mxu2 %v1053_v25  ;;  %v7062_v27 = vadd.f32 %v2171_v18, %v1810_v30  ;;  %v10433_v25 = vand.u32 4294901760, %v7066_v49  ;;  %4035 = vmatpush.msra.mxu0 %v7066_v49  ;;  %v5611_v30 = vsel %vm10436_vm13, 1.0, %v10558_v56 }
 0x15c   : > { %v1503_v33 = vpop.f32.mrf.mxu1  ;;  %10866 = vst [vmem:[#allocation32_spill] sm:$0xff] %v7062_v27  ;;  %2272 = vmatmul.f32.gmra.mxu3 %v1054_v1  ;;  %v1056_v1 = vand.u32 4294901760, %v1055_v17  ;;  %v3704_v48 = vsub.f32 %v7066_v49, %v10433_v25  ;;  %v1069_v17 = vsub.f32 %v5611_v30, %v5611_v30 }
 0x15d   : > { %v1814_v37 = vpop.f32.mrf.mxu2  ;;  %v930_v18 = vpop.f32.mrf.mxu0 }
 0x15e   : > { %v1500_v45 = vadd.f32 %v1499_v46, %v930_v18  ;;  %v3705_v14 = vand.u32 4294901760, %v3704_v48  ;;  %v1063_v46 = vsub.f32 %v1061_v29, %v1062_v55  ;;  %v1070_v48 = vand.u32 4294901760, %v1069_v17 }
 0x15f   : > { %5711 = vmatmul.msk.f32.gmra.mxu1 %vm10432_vm14, %v10862_v6  ;;  %v2177_v31 = vpop.f32.mrf.mxu3  ;;  %vm10439_vm14 = vcmp.eq.s32.totalorder %v7084_v24, %v6590_v50 }
 0x160   : > { %v1815_v27 = vadd.f32 %v1814_v37, %v1500_v45  ;;  %1057 = vmatmul.f32.gmra.mxu0 %v1056_v1  ;;  %3706 = vmatpush.msrb.mxu3 %v3705_v14  ;;  %v1064_v25 = vand.u32 4294901760, %v1063_v46  ;;  %v7098_v14 = vpop.permute.xlu2 %300  ;;  %v1071_v30 = vsub.f32 %v1069_v17, %v1070_v48 }
 0x161   : > { %10869 = vst [vmem:[#allocation35_spill] sm:$0xff] %v7098_v14 }
 0x162   : > { %1898 = vmatmul.f32.gmra.mxu2 %v1061_v29  ;;  %v7086_v8 = vadd.f32 %v2177_v31, %v1815_v27  ;;  %v5613_v27 = vsel %vm10439_vm14, 1.0, %v10558_v56 }
 0x164   : > { %v1507_v9 = vpop.f32.mrf.mxu1  ;;  %10868 = vst [vmem:[#allocation34_spill] sm:$0xff] %v7086_v8  ;;  %2278 = vmatmul.f32.gmra.mxu3 %v1062_v55  ;;  %v1077_v8 = vsub.f32 %v5613_v27, %v5613_v27 }
 0x165   : > { %v1819_v18 = vpop.f32.mrf.mxu2  ;;  %v938_v37 = vpop.f32.mrf.mxu0 }
 0x166   : > { %v1504_v1 = vadd.f32 %v1503_v33, %v938_v37  ;;  %v1078_v37 = vand.u32 4294901760, %v1077_v8 }
 0x167   : > { %5712 = vmatmul.msk.f32.gmra.mxu1 %vm10436_vm13, %v10862_v6  ;;  %v2183_v45 = vpop.f32.mrf.mxu3  ;;  %vm10440_vm13 = vcmp.eq.s32.totalorder %v7098_v14, %v6590_v50 }
 0x168   : > { %v1820_v29 = vadd.f32 %v1819_v18, %v1504_v1  ;;  %1065 = vmatmul.f32.gmra.mxu0 %v1064_v25  ;;  %v1072_v18 = vand.u32 4294901760, %v1071_v30  ;;  %v7112_v1 = vpop.permute.xlu0 %303 }
 0x169   : > { %10871 = vst [vmem:[#allocation37_spill] sm:$0xff] %v7112_v1 }
 0x16a   : > { %1903 = vmatmul.f32.gmra.mxu2 %v1069_v17  ;;  %v7100_v55 = vadd.f32 %v2183_v45, %v1820_v29  ;;  %v5615_v17 = vsel %vm10440_vm13, 1.0, %v10558_v56  ;;  %v1079_v29 = vsub.f32 %v1077_v8, %v1078_v37 }
 0x16c   : > { %v1511_v31 = vpop.f32.mrf.mxu1  ;;  %10870 = vst [vmem:[#allocation36_spill] sm:$0xff] %v7100_v55  ;;  %2284 = vmatmul.f32.gmra.mxu3 %v1070_v48  ;;  %v1085_v55 = vsub.f32 %v5615_v17, %v5615_v17 }
 0x16d   : > { %v1824_v41 = vpop.f32.mrf.mxu2  ;;  %v946_v33 = vpop.f32.mrf.mxu0 }
 0x16e   : > { %v1508_v46 = vadd.f32 %v1507_v9, %v946_v33  ;;  %v1080_v33 = vand.u32 4294901760, %v1079_v29 }
 0x16f   : > { %5713 = vmatmul.msk.f32.gmra.mxu1 %vm10439_vm14, %v10862_v6  ;;  %v2189_v25 = vpop.f32.mrf.mxu3  ;;  %vm10447_vm14 = vcmp.eq.s32.totalorder %v7112_v1, %v6590_v50  ;;  %v7155_v1 = vpop.permute.xlu2 %309 }
 0x170   : > { %v1825_v45 = vadd.f32 %v1824_v41, %v1508_v46  ;;  %1073 = vmatmul.f32.gmra.mxu0 %v1072_v18  ;;  %v1086_v46 = vand.u32 4294901760, %v1085_v55  ;;  %v811_v18 = vld [vmem:[%s10401_s1 + $0xb8] sm:$0xff]  ;;  %10875 = vst [vmem:[#allocation41_spill] sm:$0xff] %v7155_v1 }
 0x172   : > { %1908 = vmatmul.f32.gmra.mxu2 %v1077_v8  ;;  %v7114_v27 = vadd.f32 %v2189_v25, %v1825_v45  ;;  %v5617_v8 = vsel %vm10447_vm14, 1.0, %v10558_v56  ;;  %v7131_v45 = vand.u32 4294901760, %v811_v18  ;;  %v1087_v29 = vsub.f32 %v1085_v55, %v1086_v46 }
 0x174   : > { %v1515_v48 = vpop.f32.mrf.mxu1  ;;  %10872 = vst [vmem:[#allocation38_spill] sm:$0xff] %v7114_v27  ;;  %2290 = vmatmul.f32.gmra.mxu3 %v1078_v37  ;;  %v7129_v37 = vpop.permute.xlu1 %306  ;;  %3131 = vmatpush.msrb.mxu2 %v7131_v45 }
 0x175   : > { %v1829_v24 = vpop.f32.mrf.mxu2  ;;  %v954_v9 = vpop.f32.mrf.mxu0  ;;  %10873 = vst [vmem:[#allocation39_spill] sm:$0xff] %v7129_v37  ;;  %4398 = vmatpush.msra.mxu1 %v7131_v45 }
 0x176   : > { %v1512_v30 = vadd.f32 %v1511_v31, %v954_v9  ;;  %v1093_v9 = vsub.f32 %v5617_v8, %v5617_v8 }
 0x177   : > { %5714 = vmatmul.msk.f32.gmra.mxu1 %vm10440_vm13, %v10862_v6  ;;  %v2195_v41 = vpop.f32.mrf.mxu3  ;;  %vm10451_vm13 = vcmp.eq.s32.totalorder %v7129_v37, %v6590_v50 }
 0x178   : > { %v1830_v25 = vadd.f32 %v1829_v24, %v1512_v30  ;;  %1081 = vmatmul.f32.gmra.mxu0 %v1080_v33  ;;  %v7137_v24 = vsub.f32 %v811_v18, %v7131_v45  ;;  %v1094_v8 = vand.u32 4294901760, %v1093_v9 }
 0x17a   : > { %1913 = vmatmul.f32.gmra.mxu2 %v1085_v55  ;;  %v7133_v31 = vadd.f32 %v2195_v41, %v1830_v25  ;;  %v10448_v55 = vand.u32 4294901760, %v7137_v24  ;;  %4038 = vmatpush.msra.mxu0 %v7137_v24  ;;  %v5619_v25 = vsel %vm10451_vm13, 1.0, %v10558_v56 }
 0x17c   : > { %v1519_v17 = vpop.f32.mrf.mxu1  ;;  %10874 = vst [vmem:[#allocation40_spill] sm:$0xff] %v7133_v31  ;;  %2296 = vmatmul.f32.gmra.mxu3 %v1086_v46  ;;  %v1088_v46 = vand.u32 4294901760, %v1087_v29  ;;  %v3710_v18 = vsub.f32 %v7137_v24, %v10448_v55  ;;  %v1101_v29 = vsub.f32 %v5619_v25, %v5619_v25 }
 0x17d   : > { %v1834_v27 = vpop.f32.mrf.mxu2  ;;  %v962_v41 = vpop.f32.mrf.mxu0 }
 0x17e   : > { %v1516_v33 = vadd.f32 %v1515_v48, %v962_v41  ;;  %v3711_v32 = vand.u32 4294901760, %v3710_v18  ;;  %v1095_v48 = vsub.f32 %v1093_v9, %v1094_v8  ;;  %v1102_v18 = vand.u32 4294901760, %v1101_v29 }
 0x17f   : > { %5715 = vmatmul.msk.f32.gmra.mxu1 %vm10447_vm14, %v10862_v6  ;;  %v2201_v30 = vpop.f32.mrf.mxu3  ;;  %vm10454_vm14 = vcmp.eq.s32.totalorder %v7155_v1, %v6590_v50 }
 0x180   : > { %v1835_v31 = vadd.f32 %v1834_v27, %v1516_v33  ;;  %1089 = vmatmul.f32.gmra.mxu0 %v1088_v46  ;;  %3712 = vmatpush.msrb.mxu3 %v3711_v32  ;;  %v1096_v55 = vand.u32 4294901760, %v1095_v48  ;;  %v7169_v32 = vpop.permute.xlu0 %312  ;;  %v1103_v25 = vsub.f32 %v1101_v29, %v1102_v18 }
 0x181   : > { %10877 = vst [vmem:[#allocation43_spill] sm:$0xff] %v7169_v32 }
 0x182   : > { %1918 = vmatmul.f32.gmra.mxu2 %v1093_v9  ;;  %v7157_v60 = vadd.f32 %v2201_v30, %v1835_v31  ;;  %v5621_v31 = vsel %vm10454_vm14, 1.0, %v10558_v56 }
 0x184   : > { %v1523_v14 = vpop.f32.mrf.mxu1  ;;  %10876 = vst [vmem:[#allocation42_spill] sm:$0xff] %v7157_v60  ;;  %2302 = vmatmul.f32.gmra.mxu3 %v1094_v8  ;;  %v1109_v60 = vsub.f32 %v5621_v31, %v5621_v31 }
 0x185   : > { %v1839_v41 = vpop.f32.mrf.mxu2  ;;  %v970_v27 = vpop.f32.mrf.mxu0 }
 0x186   : > { %v1520_v46 = vadd.f32 %v1519_v17, %v970_v27  ;;  %v1110_v27 = vand.u32 4294901760, %v1109_v60 }
 0x187   : > { %5716 = vmatmul.msk.f32.gmra.mxu1 %vm10451_vm13, %v10862_v6  ;;  %v2207_v33 = vpop.f32.mrf.mxu3  ;;  %vm10455_vm13 = vcmp.eq.s32.totalorder %v7169_v32, %v6590_v50 }
 0x188   : > { %v1840_v9 = vadd.f32 %v1839_v41, %v1520_v46  ;;  %1097 = vmatmul.f32.gmra.mxu0 %v1096_v55  ;;  %v1104_v41 = vand.u32 4294901760, %v1103_v25  ;;  %v7183_v46 = vpop.permute.xlu1 %315 }
 0x189   : > { %10879 = vst [vmem:[#allocation45_spill] sm:$0xff] %v7183_v46 }
 0x18a   : > { %1923 = vmatmul.f32.gmra.mxu2 %v1101_v29  ;;  %v7171_v8 = vadd.f32 %v2207_v33, %v1840_v9  ;;  %v5623_v29 = vsel %vm10455_vm13, 1.0, %v10558_v56  ;;  %v1111_v9 = vsub.f32 %v1109_v60, %v1110_v27 }
 0x18c   : > { %v1527_v30 = vpop.f32.mrf.mxu1  ;;  %10878 = vst [vmem:[#allocation44_spill] sm:$0xff] %v7171_v8  ;;  %2308 = vmatmul.f32.gmra.mxu3 %v1102_v18  ;;  %v1117_v8 = vsub.f32 %v5623_v29, %v5623_v29 }
 0x18d   : > { %v1844_v37 = vpop.f32.mrf.mxu2  ;;  %v978_v17 = vpop.f32.mrf.mxu0 }
 0x18e   : > { %v1524_v48 = vadd.f32 %v1523_v14, %v978_v17  ;;  %v1112_v17 = vand.u32 4294901760, %v1111_v9 }
 0x18f   : > { %5717 = vmatmul.msk.f32.gmra.mxu1 %vm10454_vm14, %v10862_v6  ;;  %v2213_v55 = vpop.f32.mrf.mxu3  ;;  %vm10462_vm14 = vcmp.eq.s32.totalorder %v7183_v46, %v6590_v50  ;;  %v7226_v46 = vpop.permute.xlu0 %321 }
 0x190   : > { %v1845_v33 = vadd.f32 %v1844_v37, %v1524_v48  ;;  %1105 = vmatmul.f32.gmra.mxu0 %v1104_v41  ;;  %v1118_v48 = vand.u32 4294901760, %v1117_v8  ;;  %v810_v41 = vld [vmem:[%s10401_s1 + $0xb0] sm:$0xff]  ;;  %10883 = vst [vmem:[#allocation49_spill] sm:$0xff] %v7226_v46 }
 0x192   : > { %1928 = vmatmul.f32.gmra.mxu2 %v1109_v60  ;;  %v7185_v31 = vadd.f32 %v2213_v55, %v1845_v33  ;;  %v5625_v60 = vsel %vm10462_vm14, 1.0, %v10558_v56  ;;  %v7202_v33 = vand.u32 4294901760, %v810_v41  ;;  %v1119_v9 = vsub.f32 %v1117_v8, %v1118_v48 }
 0x194   : > { %v1531_v18 = vpop.f32.mrf.mxu1  ;;  %10880 = vst [vmem:[#allocation46_spill] sm:$0xff] %v7185_v31  ;;  %2314 = vmatmul.f32.gmra.mxu3 %v1110_v27  ;;  %v7200_v27 = vpop.permute.xlu2 %318  ;;  %3133 = vmatpush.msrb.mxu2 %v7202_v33 }
 0x195   : > { %v1849_v1 = vpop.f32.mrf.mxu2  ;;  %v986_v14 = vpop.f32.mrf.mxu0  ;;  %10881 = vst [vmem:[#allocation47_spill] sm:$0xff] %v7200_v27  ;;  %4400 = vmatpush.msra.mxu1 %v7202_v33 }
 0x196   : > { %v1528_v25 = vadd.f32 %v1527_v30, %v986_v14  ;;  %v1125_v14 = vsub.f32 %v5625_v60, %v5625_v60 }
 0x197   : > { %5718 = vmatmul.msk.f32.gmra.mxu1 %vm10455_vm13, %v10862_v6  ;;  %v2219_v37 = vpop.f32.mrf.mxu3  ;;  %vm10466_vm13 = vcmp.eq.s32.totalorder %v7200_v27, %v6590_v50 }
 0x198   : > { %v1850_v55 = vadd.f32 %v1849_v1, %v1528_v25  ;;  %1113 = vmatmul.f32.gmra.mxu0 %v1112_v17  ;;  %v7208_v1 = vsub.f32 %v810_v41, %v7202_v33  ;;  %v1126_v60 = vand.u32 4294901760, %v1125_v14 }
 0x19a   : > { %1933 = vmatmul.f32.gmra.mxu2 %v1117_v8  ;;  %v7204_v30 = vadd.f32 %v2219_v37, %v1850_v55  ;;  %v10463_v8 = vand.u32 4294901760, %v7208_v1  ;;  %4041 = vmatpush.msra.mxu0 %v7208_v1  ;;  %v5627_v55 = vsel %vm10466_vm13, 1.0, %v10558_v56 }
 0x19c   : > { %v1535_v29 = vpop.f32.mrf.mxu1  ;;  %10882 = vst [vmem:[#allocation48_spill] sm:$0xff] %v7204_v30  ;;  %2320 = vmatmul.f32.gmra.mxu3 %v1118_v48  ;;  %v1120_v48 = vand.u32 4294901760, %v1119_v9  ;;  %v3716_v41 = vsub.f32 %v7208_v1, %v10463_v8  ;;  %v1133_v9 = vsub.f32 %v5627_v55, %v5627_v55 }
 0x19d   : > { %v1854_v31 = vpop.f32.mrf.mxu2  ;;  %v994_v37 = vpop.f32.mrf.mxu0 }
 0x19e   : > { %v1532_v17 = vadd.f32 %v1531_v18, %v994_v37  ;;  %v3717_v40 = vand.u32 4294901760, %v3716_v41  ;;  %v1127_v18 = vsub.f32 %v1125_v14, %v1126_v60  ;;  %v1134_v41 = vand.u32 4294901760, %v1133_v9 }
 0x19f   : > { %5719 = vmatmul.msk.f32.gmra.mxu1 %vm10462_vm14, %v10862_v6  ;;  %v2225_v25 = vpop.f32.mrf.mxu3  ;;  %vm10469_vm14 = vcmp.eq.s32.totalorder %v7226_v46, %v6590_v50 }
 0x1a0   : > { %v1855_v30 = vadd.f32 %v1854_v31, %v1532_v17  ;;  %1121 = vmatmul.f32.gmra.mxu0 %v1120_v48  ;;  %3718 = vmatpush.msrb.mxu3 %v3717_v40  ;;  %v1128_v8 = vand.u32 4294901760, %v1127_v18  ;;  %v7240_v40 = vpop.permute.xlu1 %324  ;;  %v1135_v55 = vsub.f32 %v1133_v9, %v1134_v41 }
 0x1a1   : > { %10885 = vst [vmem:[#allocation51_spill] sm:$0xff] %v7240_v40 }
 0x1a2   : > { %1938 = vmatmul.f32.gmra.mxu2 %v1125_v14  ;;  %v7228_v57 = vadd.f32 %v2225_v25, %v1855_v30  ;;  %v5629_v30 = vsel %vm10469_vm14, 1.0, %v10558_v56 }
 0x1a4   : > { %v1539_v32 = vpop.f32.mrf.mxu1  ;;  %10884 = vst [vmem:[#allocation50_spill] sm:$0xff] %v7228_v57  ;;  %2326 = vmatmul.f32.gmra.mxu3 %v1126_v60  ;;  %v1141_v57 = vsub.f32 %v5629_v30, %v5629_v30 }
 0x1a5   : > { %v1859_v37 = vpop.f32.mrf.mxu2  ;;  %v1002_v31 = vpop.f32.mrf.mxu0 }
 0x1a6   : > { %v1536_v48 = vadd.f32 %v1535_v29, %v1002_v31  ;;  %v1142_v31 = vand.u32 4294901760, %v1141_v57 }
 0x1a7   : > { %5720 = vmatmul.msk.f32.gmra.mxu1 %vm10466_vm13, %v10862_v6  ;;  %v2231_v17 = vpop.f32.mrf.mxu3  ;;  %vm10470_vm13 = vcmp.eq.s32.totalorder %v7240_v40, %v6590_v50 }
 0x1a8   : > { %v1860_v14 = vadd.f32 %v1859_v37, %v1536_v48  ;;  %1129 = vmatmul.f32.gmra.mxu0 %v1128_v8  ;;  %v1136_v37 = vand.u32 4294901760, %v1135_v55  ;;  %v7254_v48 = vpop.permute.xlu2 %327 }
 0x1a9   : > { %10887 = vst [vmem:[#allocation53_spill] sm:$0xff] %v7254_v48 }
 0x1aa   : > { %1943 = vmatmul.f32.gmra.mxu2 %v1133_v9  ;;  %v7242_v60 = vadd.f32 %v2231_v17, %v1860_v14  ;;  %v5631_v9 = vsel %vm10470_vm13, 1.0, %v10558_v56  ;;  %v1143_v14 = vsub.f32 %v1141_v57, %v1142_v31 }
 0x1ac   : > { %v1543_v25 = vpop.f32.mrf.mxu1  ;;  %10886 = vst [vmem:[#allocation52_spill] sm:$0xff] %v7242_v60  ;;  %2332 = vmatmul.f32.gmra.mxu3 %v1134_v41  ;;  %v1149_v60 = vsub.f32 %v5631_v9, %v5631_v9 }
 0x1ad   : > { %v1864_v27 = vpop.f32.mrf.mxu2  ;;  %v1010_v29 = vpop.f32.mrf.mxu0 }
 0x1ae   : > { %v1540_v18 = vadd.f32 %v1539_v32, %v1010_v29  ;;  %v1144_v29 = vand.u32 4294901760, %v1143_v14 }
 0x1af   : > { %5721 = vmatmul.msk.f32.gmra.mxu1 %vm10469_vm14, %v10862_v6  ;;  %v2237_v8 = vpop.f32.mrf.mxu3  ;;  %vm10477_vm14 = vcmp.eq.s32.totalorder %v7254_v48, %v6590_v50  ;;  %v7297_v48 = vpop.permute.xlu1 %333 }
 0x1b0   : > { %v1865_v17 = vadd.f32 %v1864_v27, %v1540_v18  ;;  %1137 = vmatmul.f32.gmra.mxu0 %v1136_v37  ;;  %v1150_v18 = vand.u32 4294901760, %v1149_v60  ;;  %v809_v37 = vld [vmem:[%s10401_s1 + $0xa8] sm:$0xff]  ;;  %10891 = vst [vmem:[#allocation57_spill] sm:$0xff] %v7297_v48 }
 0x1b2   : > { %1948 = vmatmul.f32.gmra.mxu2 %v1141_v57  ;;  %v7256_v30 = vadd.f32 %v2237_v8, %v1865_v17  ;;  %v5633_v57 = vsel %vm10477_vm14, 1.0, %v10558_v56  ;;  %v7273_v17 = vand.u32 4294901760, %v809_v37  ;;  %v1151_v14 = vsub.f32 %v1149_v60, %v1150_v18 }
 0x1b4   : > { %v1547_v41 = vpop.f32.mrf.mxu1  ;;  %10888 = vst [vmem:[#allocation54_spill] sm:$0xff] %v7256_v30  ;;  %2338 = vmatmul.f32.gmra.mxu3 %v1142_v31  ;;  %v7271_v31 = vpop.permute.xlu0 %330  ;;  %3135 = vmatpush.msrb.mxu2 %v7273_v17 }
 0x1b5   : > { %v1869_v46 = vpop.f32.mrf.mxu2  ;;  %v1018_v32 = vpop.f32.mrf.mxu0  ;;  %10889 = vst [vmem:[#allocation55_spill] sm:$0xff] %v7271_v31  ;;  %4402 = vmatpush.msra.mxu1 %v7273_v17 }
 0x1b6   : > { %v1544_v55 = vadd.f32 %v1543_v25, %v1018_v32  ;;  %v1157_v32 = vsub.f32 %v5633_v57, %v5633_v57 }
 0x1b7   : > { %5722 = vmatmul.msk.f32.gmra.mxu1 %vm10470_vm13, %v10862_v6  ;;  %v2243_v27 = vpop.f32.mrf.mxu3  ;;  %vm10481_vm13 = vcmp.eq.s32.totalorder %v7271_v31, %v6590_v50 }
 0x1b8   : > { %v1870_v8 = vadd.f32 %v1869_v46, %v1544_v55  ;;  %1145 = vmatmul.f32.gmra.mxu0 %v1144_v29  ;;  %v7279_v46 = vsub.f32 %v809_v37, %v7273_v17  ;;  %v1158_v57 = vand.u32 4294901760, %v1157_v32 }
 0x1ba   : > { %1953 = vmatmul.f32.gmra.mxu2 %v1149_v60  ;;  %v7275_v25 = vadd.f32 %v2243_v27, %v1870_v8  ;;  %v10478_v60 = vand.u32 4294901760, %v7279_v46  ;;  %4044 = vmatpush.msra.mxu0 %v7279_v46  ;;  %v5635_v8 = vsel %vm10481_vm13, 1.0, %v10558_v56 }
 0x1bc   : > { %v1551_v9 = vpop.f32.mrf.mxu1  ;;  %10890 = vst [vmem:[#allocation56_spill] sm:$0xff] %v7275_v25  ;;  %2344 = vmatmul.f32.gmra.mxu3 %v1150_v18  ;;  %v1152_v18 = vand.u32 4294901760, %v1151_v14  ;;  %v3722_v37 = vsub.f32 %v7279_v46, %v10478_v60  ;;  %v1165_v14 = vsub.f32 %v5635_v8, %v5635_v8 }
 0x1bd   : > { %v1874_v30 = vpop.f32.mrf.mxu2  ;;  %v1026_v27 = vpop.f32.mrf.mxu0 }
 0x1be   : > { %v1548_v29 = vadd.f32 %v1547_v41, %v1026_v27  ;;  %v3723_v10 = vand.u32 4294901760, %v3722_v37  ;;  %v1159_v41 = vsub.f32 %v1157_v32, %v1158_v57  ;;  %v1166_v37 = vand.u32 4294901760, %v1165_v14 }
 0x1bf   : > { %5723 = vmatmul.msk.f32.gmra.mxu1 %vm10477_vm14, %v10862_v6  ;;  %v2249_v55 = vpop.f32.mrf.mxu3  ;;  %vm10484_vm14 = vcmp.eq.s32.totalorder %v7297_v48, %v6590_v50 }
 0x1c0   : > { %v1875_v25 = vadd.f32 %v1874_v30, %v1548_v29  ;;  %1153 = vmatmul.f32.gmra.mxu0 %v1152_v18  ;;  %3724 = vmatpush.msrb.mxu3 %v3723_v10  ;;  %v1160_v60 = vand.u32 4294901760, %v1159_v41  ;;  %v7311_v10 = vpop.permute.xlu2 %336  ;;  %v1167_v8 = vsub.f32 %v1165_v14, %v1166_v37 }
 0x1c1   : > { %10893 = vst [vmem:[#allocation59_spill] sm:$0xff] %v7311_v10 }
 0x1c2   : > { %1958 = vmatmul.f32.gmra.mxu2 %v1157_v32  ;;  %v7299_v44 = vadd.f32 %v2249_v55, %v1875_v25  ;;  %v5637_v25 = vsel %vm10484_vm14, 1.0, %v10558_v56 }
 0x1c4   : > { %v1555_v40 = vpop.f32.mrf.mxu1  ;;  %10892 = vst [vmem:[#allocation58_spill] sm:$0xff] %v7299_v44  ;;  %2350 = vmatmul.f32.gmra.mxu3 %v1158_v57  ;;  %v1173_v44 = vsub.f32 %v5637_v25, %v5637_v25 }
 0x1c5   : > { %v1879_v27 = vpop.f32.mrf.mxu2  ;;  %v1034_v30 = vpop.f32.mrf.mxu0 }
 0x1c6   : > { %v1552_v18 = vadd.f32 %v1551_v9, %v1034_v30  ;;  %v1174_v30 = vand.u32 4294901760, %v1173_v44 }
 0x1c7   : > { %5724 = vmatmul.msk.f32.gmra.mxu1 %vm10481_vm13, %v10862_v6  ;;  %v2255_v29 = vpop.f32.mrf.mxu3  ;;  %vm10485_vm13 = vcmp.eq.s32.totalorder %v7311_v10, %v6590_v50 }
 0x1c8   : > { %v1880_v32 = vadd.f32 %v1879_v27, %v1552_v18  ;;  %1161 = vmatmul.f32.gmra.mxu0 %v1160_v60  ;;  %v1168_v27 = vand.u32 4294901760, %v1167_v8  ;;  %v7325_v18 = vpop.permute.xlu0 %339 }
 0x1c9   : > { %10895 = vst [vmem:[#allocation61_spill] sm:$0xff] %v7325_v18 }
 0x1ca   : > { %1963 = vmatmul.f32.gmra.mxu2 %v1165_v14  ;;  %v7313_v57 = vadd.f32 %v2255_v29, %v1880_v32  ;;  %v5639_v14 = vsel %vm10485_vm13, 1.0, %v10558_v56  ;;  %v1175_v32 = vsub.f32 %v1173_v44, %v1174_v30 }
 0x1cc   : > { %v1559_v55 = vpop.f32.mrf.mxu1  ;;  %10894 = vst [vmem:[#allocation60_spill] sm:$0xff] %v7313_v57  ;;  %2356 = vmatmul.f32.gmra.mxu3 %v1166_v37  ;;  %v1181_v57 = vsub.f32 %v5639_v14, %v5639_v14 }
 0x1cd   : > { %v1884_v31 = vpop.f32.mrf.mxu2  ;;  %v1042_v9 = vpop.f32.mrf.mxu0 }
 0x1ce   : > { %v1556_v41 = vadd.f32 %v1555_v40, %v1042_v9  ;;  %v1176_v9 = vand.u32 4294901760, %v1175_v32 }
 0x1cf   : > { %5725 = vmatmul.msk.f32.gmra.mxu1 %vm10484_vm14, %v10862_v6  ;;  %v2261_v60 = vpop.f32.mrf.mxu3  ;;  %vm10494_vm14 = vcmp.eq.s32.totalorder %v7325_v18, %v6590_v50  ;;  %v7368_v18 = vpop.permute.xlu2 %345 }
 0x1d0   : > { %v1885_v29 = vadd.f32 %v1884_v31, %v1556_v41  ;;  %1169 = vmatmul.f32.gmra.mxu0 %v1168_v27  ;;  %v1182_v41 = vand.u32 4294901760, %v1181_v57  ;;  %v808_v27 = vld [vmem:[%s10401_s1 + $0xa0] sm:$0xff]  ;;  %10899 = vst [vmem:[#allocation65_spill] sm:$0xff] %v7368_v18 }
 0x1d2   : > { %1968 = vmatmul.f32.gmra.mxu2 %v1173_v44  ;;  %v7327_v25 = vadd.f32 %v2261_v60, %v1885_v29  ;;  %v5641_v44 = vsel %vm10494_vm14, 1.0, %v10558_v56  ;;  %v7344_v29 = vand.u32 4294901760, %v808_v27  ;;  %v1183_v32 = vsub.f32 %v1181_v57, %v1182_v41 }
 0x1d4   : > { %v1563_v37 = vpop.f32.mrf.mxu1  ;;  %10896 = vst [vmem:[#allocation62_spill] sm:$0xff] %v7327_v25  ;;  %2362 = vmatmul.f32.gmra.mxu3 %v1174_v30  ;;  %v7342_v30 = vpop.permute.xlu1 %342  ;;  %3137 = vmatpush.msrb.mxu2 %v7344_v29 }
 0x1d5   : > { %v1889_v48 = vpop.f32.mrf.mxu2  ;;  %v1050_v40 = vpop.f32.mrf.mxu0  ;;  %10897 = vst [vmem:[#allocation63_spill] sm:$0xff] %v7342_v30  ;;  %4404 = vmatpush.msra.mxu1 %v7344_v29 }
 0x1d6   : > { %v1560_v8 = vadd.f32 %v1559_v55, %v1050_v40  ;;  %v1189_v40 = vsub.f32 %v5641_v44, %v5641_v44 }
 0x1d7   : > { %5726 = vmatmul.msk.f32.gmra.mxu1 %vm10485_vm13, %v10862_v6  ;;  %v2267_v31 = vpop.f32.mrf.mxu3  ;;  %vm10498_vm13 = vcmp.eq.s32.totalorder %v7342_v30, %v6590_v50 }
 0x1d8   : > { %v1890_v60 = vadd.f32 %v1889_v48, %v1560_v8  ;;  %1177 = vmatmul.f32.gmra.mxu0 %v1176_v9  ;;  %v7350_v48 = vsub.f32 %v808_v27, %v7344_v29  ;;  %v1190_v44 = vand.u32 4294901760, %v1189_v40 }
 0x1da   : > { %1973 = vmatmul.f32.gmra.mxu2 %v1181_v57  ;;  %v7346_v55 = vadd.f32 %v2267_v31, %v1890_v60  ;;  %v10495_v57 = vand.u32 4294901760, %v7350_v48  ;;  %4047 = vmatpush.msra.mxu0 %v7350_v48  ;;  %v5643_v60 = vsel %vm10498_vm13, 1.0, %v10558_v56 }
 0x1dc   : > { %v1567_v14 = vpop.f32.mrf.mxu1  ;;  %10898 = vst [vmem:[#allocation64_spill] sm:$0xff] %v7346_v55  ;;  %2368 = vmatmul.f32.gmra.mxu3 %v1182_v41  ;;  %v1184_v41 = vand.u32 4294901760, %v1183_v32  ;;  %v3728_v27 = vsub.f32 %v7350_v48, %v10495_v57  ;;  %v1197_v32 = vsub.f32 %v5643_v60, %v5643_v60 }
 0x1dd   : > { %v1894_v25 = vpop.f32.mrf.mxu2  ;;  %v1058_v31 = vpop.f32.mrf.mxu0 }
 0x1de   : > { %v1564_v9 = vadd.f32 %v1563_v37, %v1058_v31  ;;  %v3729_v47 = vand.u32 4294901760, %v3728_v27  ;;  %v1191_v37 = vsub.f32 %v1189_v40, %v1190_v44  ;;  %v1198_v27 = vand.u32 4294901760, %v1197_v32 }
 0x1df   : > { %5727 = vmatmul.msk.f32.gmra.mxu1 %vm10494_vm14, %v10862_v6  ;;  %v2273_v8 = vpop.f32.mrf.mxu3  ;;  %vm10501_vm14 = vcmp.eq.s32.totalorder %v7368_v18, %v6590_v50 }
 0x1e0   : > { %v1895_v55 = vadd.f32 %v1894_v25, %v1564_v9  ;;  %1185 = vmatmul.f32.gmra.mxu0 %v1184_v41  ;;  %3730 = vmatpush.msrb.mxu3 %v3729_v47  ;;  %v1192_v57 = vand.u32 4294901760, %v1191_v37  ;;  %v7382_v47 = vpop.permute.xlu0 %348  ;;  %v1199_v60 = vsub.f32 %v1197_v32, %v1198_v27 }
 0x1e1   : > { %10901 = vst [vmem:[#allocation67_spill] sm:$0xff] %v7382_v47 }
 0x1e2   : > { %1978 = vmatmul.f32.gmra.mxu2 %v1189_v40  ;;  %v7370_v19 = vadd.f32 %v2273_v8, %v1895_v55  ;;  %v5645_v55 = vsel %vm10501_vm14, 1.0, %v10558_v56 }
 0x1e4   : > { %v1571_v10 = vpop.f32.mrf.mxu1  ;;  %10900 = vst [vmem:[#allocation66_spill] sm:$0xff] %v7370_v19  ;;  %2374 = vmatmul.f32.gmra.mxu3 %v1190_v44  ;;  %v1205_v19 = vsub.f32 %v5645_v55, %v5645_v55 }
 0x1e5   : > { %v1899_v31 = vpop.f32.mrf.mxu2  ;;  %v1066_v25 = vpop.f32.mrf.mxu0 }
 0x1e6   : > { %v1568_v41 = vadd.f32 %v1567_v14, %v1066_v25  ;;  %v1206_v25 = vand.u32 4294901760, %v1205_v19 }
 0x1e7   : > { %5728 = vmatmul.msk.f32.gmra.mxu1 %vm10498_vm13, %v10862_v6  ;;  %v2279_v9 = vpop.f32.mrf.mxu3  ;;  %vm10502_vm13 = vcmp.eq.s32.totalorder %v7382_v47, %v6590_v50 }
 0x1e8   : > { %v1900_v40 = vadd.f32 %v1899_v31, %v1568_v41  ;;  %1193 = vmatmul.f32.gmra.mxu0 %v1192_v57  ;;  %v1200_v31 = vand.u32 4294901760, %v1199_v60  ;;  %v7396_v41 = vpop.permute.xlu1 %351 }
 0x1e9   : > { %10903 = vst [vmem:[#allocation69_spill] sm:$0xff] %v7396_v41 }
 0x1ea   : > { %1983 = vmatmul.f32.gmra.mxu2 %v1197_v32  ;;  %v7384_v44 = vadd.f32 %v2279_v9, %v1900_v40  ;;  %v5647_v32 = vsel %vm10502_vm13, 1.0, %v10558_v56  ;;  %v1207_v40 = vsub.f32 %v1205_v19, %v1206_v25 }
 0x1ec   : > { %v1575_v8 = vpop.f32.mrf.mxu1  ;;  %10902 = vst [vmem:[#allocation68_spill] sm:$0xff] %v7384_v44  ;;  %2380 = vmatmul.f32.gmra.mxu3 %v1198_v27  ;;  %v1213_v44 = vsub.f32 %v5647_v32, %v5647_v32 }
 0x1ed   : > { %v1904_v30 = vpop.f32.mrf.mxu2  ;;  %v1074_v14 = vpop.f32.mrf.mxu0 }
 0x1ee   : > { %v1572_v37 = vadd.f32 %v1571_v10, %v1074_v14  ;;  %v1208_v14 = vand.u32 4294901760, %v1207_v40 }
 0x1ef   : > { %5729 = vmatmul.msk.f32.gmra.mxu1 %vm10501_vm14, %v10862_v6  ;;  %v2285_v57 = vpop.f32.mrf.mxu3  ;;  %vm10511_vm14 = vcmp.eq.s32.totalorder %v7396_v41, %v6590_v50  ;;  %v7439_v41 = vpop.permute.xlu0 %357 }
 0x1f0   : > { %v1905_v9 = vadd.f32 %v1904_v30, %v1572_v37  ;;  %1201 = vmatmul.f32.gmra.mxu0 %v1200_v31  ;;  %v1214_v37 = vand.u32 4294901760, %v1213_v44  ;;  %v807_v31 = vld [vmem:[%s10401_s1 + $0x98] sm:$0xff]  ;;  %10907 = vst [vmem:[#allocation73_spill] sm:$0xff] %v7439_v41 }
 0x1f2   : > { %1988 = vmatmul.f32.gmra.mxu2 %v1205_v19  ;;  %v7398_v55 = vadd.f32 %v2285_v57, %v1905_v9  ;;  %v5649_v19 = vsel %vm10511_vm14, 1.0, %v10558_v56  ;;  %v7415_v9 = vand.u32 4294901760, %v807_v31  ;;  %v1215_v40 = vsub.f32 %v1213_v44, %v1214_v37 }
 0x1f4   : > { %v1579_v27 = vpop.f32.mrf.mxu1  ;;  %10904 = vst [vmem:[#allocation70_spill] sm:$0xff] %v7398_v55  ;;  %2386 = vmatmul.f32.gmra.mxu3 %v1206_v25  ;;  %v7413_v25 = vpop.permute.xlu2 %354  ;;  %3139 = vmatpush.msrb.mxu2 %v7415_v9 }
 0x1f5   : > { %v1909_v18 = vpop.f32.mrf.mxu2  ;;  %v1082_v10 = vpop.f32.mrf.mxu0  ;;  %10905 = vst [vmem:[#allocation71_spill] sm:$0xff] %v7413_v25  ;;  %4406 = vmatpush.msra.mxu1 %v7415_v9 }
 0x1f6   : > { %v1576_v60 = vadd.f32 %v1575_v8, %v1082_v10  ;;  %v1221_v10 = vsub.f32 %v5649_v19, %v5649_v19 }
 0x1f7   : > { %5730 = vmatmul.msk.f32.gmra.mxu1 %vm10502_vm13, %v10862_v6  ;;  %v2291_v30 = vpop.f32.mrf.mxu3  ;;  %vm10515_vm13 = vcmp.eq.s32.totalorder %v7413_v25, %v6590_v50 }
 0x1f8   : > { %v1910_v57 = vadd.f32 %v1909_v18, %v1576_v60  ;;  %1209 = vmatmul.f32.gmra.mxu0 %v1208_v14  ;;  %v7421_v18 = vsub.f32 %v807_v31, %v7415_v9  ;;  %v1222_v19 = vand.u32 4294901760, %v1221_v10 }
 0x1fa   : > { %1993 = vmatmul.f32.gmra.mxu2 %v1213_v44  ;;  %v7417_v8 = vadd.f32 %v2291_v30, %v1910_v57  ;;  %v10512_v44 = vand.u32 4294901760, %v7421_v18  ;;  %4050 = vmatpush.msra.mxu0 %v7421_v18  ;;  %v5651_v57 = vsel %vm10515_vm13, 1.0, %v10558_v56 }
 0x1fc   : > { %v1583_v32 = vpop.f32.mrf.mxu1  ;;  %10906 = vst [vmem:[#allocation72_spill] sm:$0xff] %v7417_v8  ;;  %2392 = vmatmul.f32.gmra.mxu3 %v1214_v37  ;;  %v1216_v37 = vand.u32 4294901760, %v1215_v40  ;;  %v3734_v31 = vsub.f32 %v7421_v18, %v10512_v44  ;;  %v1229_v40 = vsub.f32 %v5651_v57, %v5651_v57 }
 0x1fd   : > { %v1914_v55 = vpop.f32.mrf.mxu2  ;;  %v1090_v30 = vpop.f32.mrf.mxu0 }
 0x1fe   : > { %v1580_v14 = vadd.f32 %v1579_v27, %v1090_v30  ;;  %v3735_v59 = vand.u32 4294901760, %v3734_v31  ;;  %v1223_v27 = vsub.f32 %v1221_v10, %v1222_v19  ;;  %v1230_v31 = vand.u32 4294901760, %v1229_v40 }
 0x1ff   : > { %5731 = vmatmul.msk.f32.gmra.mxu1 %vm10511_vm14, %v10862_v6  ;;  %v2297_v60 = vpop.f32.mrf.mxu3  ;;  %vm10518_vm14 = vcmp.eq.s32.totalorder %v7439_v41, %v6590_v50 }
 0x200   : > { %v1915_v8 = vadd.f32 %v1914_v55, %v1580_v14  ;;  %1217 = vmatmul.f32.gmra.mxu0 %v1216_v37  ;;  %3736 = vmatpush.msrb.mxu3 %v3735_v59  ;;  %v1224_v44 = vand.u32 4294901760, %v1223_v27  ;;  %v7453_v59 = vpop.permute.xlu1 %360  ;;  %v1231_v57 = vsub.f32 %v1229_v40, %v1230_v31 }
 0x201   : > { %10909 = vst [vmem:[#allocation75_spill] sm:$0xff] %v7453_v59 }
 0x202   : > { %1998 = vmatmul.f32.gmra.mxu2 %v1221_v10  ;;  %v7441_v62 = vadd.f32 %v2297_v60, %v1915_v8  ;;  %v5653_v8 = vsel %vm10518_vm14, 1.0, %v10558_v56 }
 0x204   : > { %v1587_v47 = vpop.f32.mrf.mxu1  ;;  %10908 = vst [vmem:[#allocation74_spill] sm:$0xff] %v7441_v62  ;;  %2398 = vmatmul.f32.gmra.mxu3 %v1222_v19  ;;  %v1237_v62 = vsub.f32 %v5653_v8, %v5653_v8 }
 0x205   : > { %v1919_v30 = vpop.f32.mrf.mxu2  ;;  %v1098_v55 = vpop.f32.mrf.mxu0 }
 0x206   : > { %v1584_v37 = vadd.f32 %v1583_v32, %v1098_v55  ;;  %v1238_v55 = vand.u32 4294901760, %v1237_v62 }
 0x207   : > { %5732 = vmatmul.msk.f32.gmra.mxu1 %vm10515_vm13, %v10862_v6  ;;  %v2303_v14 = vpop.f32.mrf.mxu3  ;;  %vm10519_vm13 = vcmp.eq.s32.totalorder %v7453_v59, %v6590_v50 }
 0x208   : > { %v1920_v10 = vadd.f32 %v1919_v30, %v1584_v37  ;;  %1225 = vmatmul.f32.gmra.mxu0 %v1224_v44  ;;  %v1232_v30 = vand.u32 4294901760, %v1231_v57  ;;  %v7467_v37 = vpop.permute.xlu2 %363 }
 0x209   : > { %10911 = vst [vmem:[#allocation77_spill] sm:$0xff] %v7467_v37 }
 0x20a   : > { %2003 = vmatmul.f32.gmra.mxu2 %v1229_v40  ;;  %v7455_v19 = vadd.f32 %v2303_v14, %v1920_v10  ;;  %v5655_v40 = vsel %vm10519_vm13, 1.0, %v10558_v56  ;;  %v1239_v10 = vsub.f32 %v1237_v62, %v1238_v55 }
 0x20c   : > { %v1591_v60 = vpop.f32.mrf.mxu1  ;;  %10910 = vst [vmem:[#allocation76_spill] sm:$0xff] %v7455_v19  ;;  %2404 = vmatmul.f32.gmra.mxu3 %v1230_v31  ;;  %v1245_v19 = vsub.f32 %v5655_v40, %v5655_v40 }
 0x20d   : > { %v1924_v25 = vpop.f32.mrf.mxu2  ;;  %v1106_v32 = vpop.f32.mrf.mxu0 }
 0x20e   : > { %v1588_v27 = vadd.f32 %v1587_v47, %v1106_v32  ;;  %v1240_v32 = vand.u32 4294901760, %v1239_v10 }
 0x20f   : > { %5733 = vmatmul.msk.f32.gmra.mxu1 %vm10518_vm14, %v10862_v6  ;;  %v2309_v44 = vpop.f32.mrf.mxu3  ;;  %vm10528_vm14 = vcmp.eq.s32.totalorder %v7467_v37, %v6590_v50  ;;  %v7510_v37 = vpop.permute.xlu1 %369 }
 0x210   : > { %v1925_v14 = vadd.f32 %v1924_v25, %v1588_v27  ;;  %1233 = vmatmul.f32.gmra.mxu0 %v1232_v30  ;;  %v1246_v27 = vand.u32 4294901760, %v1245_v19  ;;  %v806_v30 = vld [vmem:[%s10401_s1 + $0x90] sm:$0xff]  ;;  %10915 = vst [vmem:[#allocation81_spill] sm:$0xff] %v7510_v37 }
 0x212   : > { %2008 = vmatmul.f32.gmra.mxu2 %v1237_v62  ;;  %v7469_v8 = vadd.f32 %v2309_v44, %v1925_v14  ;;  %v5657_v62 = vsel %vm10528_vm14, 1.0, %v10558_v56  ;;  %v7486_v14 = vand.u32 4294901760, %v806_v30  ;;  %v1247_v10 = vsub.f32 %v1245_v19, %v1246_v27 }
 0x214   : > { %v1595_v31 = vpop.f32.mrf.mxu1  ;;  %10912 = vst [vmem:[#allocation78_spill] sm:$0xff] %v7469_v8  ;;  %2410 = vmatmul.f32.gmra.mxu3 %v1238_v55  ;;  %v7484_v55 = vpop.permute.xlu0 %366  ;;  %3141 = vmatpush.msrb.mxu2 %v7486_v14 }
 0x215   : > { %v1929_v41 = vpop.f32.mrf.mxu2  ;;  %v1114_v47 = vpop.f32.mrf.mxu0  ;;  %10913 = vst [vmem:[#allocation79_spill] sm:$0xff] %v7484_v55  ;;  %4408 = vmatpush.msra.mxu1 %v7486_v14 }
 0x216   : > { %v1592_v57 = vadd.f32 %v1591_v60, %v1114_v47  ;;  %v1253_v47 = vsub.f32 %v5657_v62, %v5657_v62 }
 0x217   : > { %5734 = vmatmul.msk.f32.gmra.mxu1 %vm10519_vm13, %v10862_v6  ;;  %v2315_v25 = vpop.f32.mrf.mxu3  ;;  %vm10532_vm13 = vcmp.eq.s32.totalorder %v7484_v55, %v6590_v50 }
 0x218   : > { %v1930_v44 = vadd.f32 %v1929_v41, %v1592_v57  ;;  %1241 = vmatmul.f32.gmra.mxu0 %v1240_v32  ;;  %v7492_v41 = vsub.f32 %v806_v30, %v7486_v14  ;;  %v1254_v62 = vand.u32 4294901760, %v1253_v47 }
 0x21a   : > { %2013 = vmatmul.f32.gmra.mxu2 %v1245_v19  ;;  %v7488_v60 = vadd.f32 %v2315_v25, %v1930_v44  ;;  %v10529_v19 = vand.u32 4294901760, %v7492_v41  ;;  %4053 = vmatpush.msra.mxu0 %v7492_v41  ;;  %v5659_v44 = vsel %vm10532_vm13, 1.0, %v10558_v56 }
 0x21c   : > { %v1599_v40 = vpop.f32.mrf.mxu1  ;;  %10914 = vst [vmem:[#allocation80_spill] sm:$0xff] %v7488_v60  ;;  %2416 = vmatmul.f32.gmra.mxu3 %v1246_v27  ;;  %v1248_v27 = vand.u32 4294901760, %v1247_v10  ;;  %v3740_v30 = vsub.f32 %v7492_v41, %v10529_v19  ;;  %v1261_v10 = vsub.f32 %v5659_v44, %v5659_v44 }
 0x21d   : > { %v1934_v8 = vpop.f32.mrf.mxu2  ;;  %v1122_v25 = vpop.f32.mrf.mxu0 }
 0x21e   : > { %v1596_v32 = vadd.f32 %v1595_v31, %v1122_v25  ;;  %v3741_v21 = vand.u32 4294901760, %v3740_v30  ;;  %v1255_v31 = vsub.f32 %v1253_v47, %v1254_v62  ;;  %v1262_v30 = vand.u32 4294901760, %v1261_v10 }
 0x21f   : > { %5735 = vmatmul.msk.f32.gmra.mxu1 %vm10528_vm14, %v10862_v6  ;;  %v2321_v57 = vpop.f32.mrf.mxu3  ;;  %vm10535_vm14 = vcmp.eq.s32.totalorder %v7510_v37, %v6590_v50 }
 0x220   : > { %v1935_v60 = vadd.f32 %v1934_v8, %v1596_v32  ;;  %1249 = vmatmul.f32.gmra.mxu0 %v1248_v27  ;;  %3742 = vmatpush.msrb.mxu3 %v3741_v21  ;;  %v1256_v19 = vand.u32 4294901760, %v1255_v31  ;;  %v7524_v21 = vpop.permute.xlu2 %372  ;;  %v1263_v44 = vsub.f32 %v1261_v10, %v1262_v30 }
 0x221   : > { %10917 = vst [vmem:[#allocation83_spill] sm:$0xff] %v7524_v21 }
 0x222   : > { %2018 = vmatmul.f32.gmra.mxu2 %v1253_v47  ;;  %v7512_v52 = vadd.f32 %v2321_v57, %v1935_v60  ;;  %v5661_v60 = vsel %vm10535_vm14, 1.0, %v10558_v56 }
 0x224   : > { %v1603_v59 = vpop.f32.mrf.mxu1  ;;  %10916 = vst [vmem:[#allocation82_spill] sm:$0xff] %v7512_v52  ;;  %2422 = vmatmul.f32.gmra.mxu3 %v1254_v62  ;;  %v1269_v52 = vsub.f32 %v5661_v60, %v5661_v60 }
 0x225   : > { %v1939_v25 = vpop.f32.mrf.mxu2  ;;  %v1130_v8 = vpop.f32.mrf.mxu0 }
 0x226   : > { %v1600_v27 = vadd.f32 %v1599_v40, %v1130_v8  ;;  %v1270_v8 = vand.u32 4294901760, %v1269_v52 }
 0x227   : > { %5736 = vmatmul.msk.f32.gmra.mxu1 %vm10532_vm13, %v10862_v6  ;;  %v2327_v32 = vpop.f32.mrf.mxu3  ;;  %vm10536_vm13 = vcmp.eq.s32.totalorder %v7524_v21, %v6590_v50 }
 0x228   : > { %v1940_v47 = vadd.f32 %v1939_v25, %v1600_v27  ;;  %1257 = vmatmul.f32.gmra.mxu0 %v1256_v19  ;;  %v1264_v25 = vand.u32 4294901760, %v1263_v44  ;;  %v7538_v27 = vpop.permute.xlu0 %375 }
 0x229   : > { %10919 = vst [vmem:[#allocation85_spill] sm:$0xff] %v7538_v27 }
 0x22a   : > { %2023 = vmatmul.f32.gmra.mxu2 %v1261_v10  ;;  %v7526_v62 = vadd.f32 %v2327_v32, %v1940_v47  ;;  %v5663_v10 = vsel %vm10536_vm13, 1.0, %v10558_v56  ;;  %v1271_v47 = vsub.f32 %v1269_v52, %v1270_v8 }
 0x22c   : > { %v1607_v57 = vpop.f32.mrf.mxu1  ;;  %10918 = vst [vmem:[#allocation84_spill] sm:$0xff] %v7526_v62  ;;  %2428 = vmatmul.f32.gmra.mxu3 %v1262_v30  ;;  %v1277_v62 = vsub.f32 %v5663_v10, %v5663_v10 }
 0x22d   : > { %v1944_v55 = vpop.f32.mrf.mxu2  ;;  %v1138_v40 = vpop.f32.mrf.mxu0 }
 0x22e   : > { %v1604_v31 = vadd.f32 %v1603_v59, %v1138_v40  ;;  %v1272_v40 = vand.u32 4294901760, %v1271_v47 }
 0x22f   : > { %5737 = vmatmul.msk.f32.gmra.mxu1 %vm10535_vm14, %v10862_v6  ;;  %v2333_v19 = vpop.f32.mrf.mxu3  ;;  %vm10545_vm14 = vcmp.eq.s32.totalorder %v7538_v27, %v6590_v50  ;;  %v7581_v27 = vpop.permute.xlu2 %381 }
 0x230   : > { %v1945_v32 = vadd.f32 %v1944_v55, %v1604_v31  ;;  %1265 = vmatmul.f32.gmra.mxu0 %v1264_v25  ;;  %v1278_v31 = vand.u32 4294901760, %v1277_v62  ;;  %v805_v25 = vld [vmem:[%s10401_s1 + $0x88] sm:$0xff]  ;;  %10923 = vst [vmem:[#allocation89_spill] sm:$0xff] %v7581_v27 }
 0x232   : > { %2028 = vmatmul.f32.gmra.mxu2 %v1269_v52  ;;  %v7540_v60 = vadd.f32 %v2333_v19, %v1945_v32  ;;  %v5665_v52 = vsel %vm10545_vm14, 1.0, %v10558_v56  ;;  %v7557_v32 = vand.u32 4294901760, %v805_v25  ;;  %v1279_v47 = vsub.f32 %v1277_v62, %v1278_v31 }
 0x234   : > { %v1611_v30 = vpop.f32.mrf.mxu1  ;;  %10920 = vst [vmem:[#allocation86_spill] sm:$0xff] %v7540_v60  ;;  %2434 = vmatmul.f32.gmra.mxu3 %v1270_v8  ;;  %v7555_v8 = vpop.permute.xlu1 %378  ;;  %3143 = vmatpush.msrb.mxu2 %v7557_v32 }
 0x235   : > { %v1949_v37 = vpop.f32.mrf.mxu2  ;;  %v1146_v59 = vpop.f32.mrf.mxu0  ;;  %10921 = vst [vmem:[#allocation87_spill] sm:$0xff] %v7555_v8  ;;  %4410 = vmatpush.msra.mxu1 %v7557_v32 }
 0x236   : > { %v1608_v44 = vadd.f32 %v1607_v57, %v1146_v59  ;;  %v1285_v59 = vsub.f32 %v5665_v52, %v5665_v52 }
 0x237   : > { %5738 = vmatmul.msk.f32.gmra.mxu1 %vm10536_vm13, %v10862_v6  ;;  %v2339_v55 = vpop.f32.mrf.mxu3  ;;  %vm10549_vm13 = vcmp.eq.s32.totalorder %v7555_v8, %v6590_v50 }
 0x238   : > { %v1950_v19 = vadd.f32 %v1949_v37, %v1608_v44  ;;  %1273 = vmatmul.f32.gmra.mxu0 %v1272_v40  ;;  %v7563_v37 = vsub.f32 %v805_v25, %v7557_v32  ;;  %v1286_v52 = vand.u32 4294901760, %v1285_v59 }
 0x23a   : > { %2033 = vmatmul.f32.gmra.mxu2 %v1277_v62  ;;  %v7559_v57 = vadd.f32 %v2339_v55, %v1950_v19  ;;  %v10546_v62 = vand.u32 4294901760, %v7563_v37  ;;  %4056 = vmatpush.msra.mxu0 %v7563_v37  ;;  %v5667_v19 = vsel %vm10549_vm13, 1.0, %v10558_v56 }
 0x23c   : > { %v1615_v10 = vpop.f32.mrf.mxu1  ;;  %10922 = vst [vmem:[#allocation88_spill] sm:$0xff] %v7559_v57  ;;  %2440 = vmatmul.f32.gmra.mxu3 %v1278_v31  ;;  %v1280_v31 = vand.u32 4294901760, %v1279_v47  ;;  %v3746_v25 = vsub.f32 %v7563_v37, %v10546_v62  ;;  %v1293_v47 = vsub.f32 %v5667_v19, %v5667_v19 }
 0x23d   : > { %v1954_v60 = vpop.f32.mrf.mxu2  ;;  %v1154_v55 = vpop.f32.mrf.mxu0 }
 0x23e   : > { %v1612_v40 = vadd.f32 %v1611_v30, %v1154_v55  ;;  %v3747_v12 = vand.u32 4294901760, %v3746_v25  ;;  %v1287_v30 = vsub.f32 %v1285_v59, %v1286_v52  ;;  %v1294_v25 = vand.u32 4294901760, %v1293_v47 }
 0x23f   : > { %5739 = vmatmul.msk.f32.gmra.mxu1 %vm10545_vm14, %v10862_v6  ;;  %v2345_v44 = vpop.f32.mrf.mxu3  ;;  %vm10552_vm14 = vcmp.eq.s32.totalorder %v7581_v27, %v6590_v50 }
 0x240   : > { %v1955_v57 = vadd.f32 %v1954_v60, %v1612_v40  ;;  %1281 = vmatmul.f32.gmra.mxu0 %v1280_v31  ;;  %3748 = vmatpush.msrb.mxu3 %v3747_v12  ;;  %v1288_v62 = vand.u32 4294901760, %v1287_v30  ;;  %v7595_v12 = vpop.permute.xlu0 %384  ;;  %v1295_v19 = vsub.f32 %v1293_v47, %v1294_v25 }
 0x241   : > { %10925 = vst [vmem:[#allocation91_spill] sm:$0xff] %v7595_v12 }
 0x242   : > { %2038 = vmatmul.f32.gmra.mxu2 %v1285_v59  ;;  %v7583_v43 = vadd.f32 %v2345_v44, %v1955_v57  ;;  %v5669_v57 = vsel %vm10552_vm14, 1.0, %v10558_v56 }
 0x244   : > { %v1619_v21 = vpop.f32.mrf.mxu1  ;;  %10924 = vst [vmem:[#allocation90_spill] sm:$0xff] %v7583_v43  ;;  %2446 = vmatmul.f32.gmra.mxu3 %v1286_v52  ;;  %v1301_v43 = vsub.f32 %v5669_v57, %v5669_v57 }
 0x245   : > { %v1959_v55 = vpop.f32.mrf.mxu2  ;;  %v1162_v60 = vpop.f32.mrf.mxu0 }
 0x246   : > { %v1616_v31 = vadd.f32 %v1615_v10, %v1162_v60  ;;  %v1302_v60 = vand.u32 4294901760, %v1301_v43 }
 0x247   : > { %5740 = vmatmul.msk.f32.gmra.mxu1 %vm10549_vm13, %v10862_v6  ;;  %v2351_v40 = vpop.f32.mrf.mxu3  ;;  %vm10553_vm13 = vcmp.eq.s32.totalorder %v7595_v12, %v6590_v50 }
 0x248   : > { %v1960_v59 = vadd.f32 %v1959_v55, %v1616_v31  ;;  %1289 = vmatmul.f32.gmra.mxu0 %v1288_v62  ;;  %v1296_v55 = vand.u32 4294901760, %v1295_v19  ;;  %v7609_v31 = vpop.permute.xlu1 %387 }
 0x249   : > { %10927 = vst [vmem:[#allocation93_spill] sm:$0xff] %v7609_v31 }
 0x24a   : > { %2043 = vmatmul.f32.gmra.mxu2 %v1293_v47  ;;  %v7597_v52 = vadd.f32 %v2351_v40, %v1960_v59  ;;  %v5671_v47 = vsel %vm10553_vm13, 1.0, %v10558_v56  ;;  %v1303_v59 = vsub.f32 %v1301_v43, %v1302_v60 }
 0x24c   : > { %v1623_v44 = vpop.f32.mrf.mxu1  ;;  %10926 = vst [vmem:[#allocation92_spill] sm:$0xff] %v7597_v52  ;;  %2452 = vmatmul.f32.gmra.mxu3 %v1294_v25  ;;  %v1309_v52 = vsub.f32 %v5671_v47, %v5671_v47 }
 0x24d   : > { %v1964_v8 = vpop.f32.mrf.mxu2  ;;  %v1170_v10 = vpop.f32.mrf.mxu0 }
 0x24e   : > { %v1620_v30 = vadd.f32 %v1619_v21, %v1170_v10  ;;  %v1304_v10 = vand.u32 4294901760, %v1303_v59 }
 0x24f   : > { %5741 = vmatmul.msk.f32.gmra.mxu1 %vm10552_vm14, %v10862_v6  ;;  %v2357_v62 = vpop.f32.mrf.mxu3  ;;  %vm10562_vm14 = vcmp.eq.s32.totalorder %v7609_v31, %v6590_v50  ;;  %v7656_v31 = vpop.permute.xlu0 %393 }
 0x250   : > { %v1965_v40 = vadd.f32 %v1964_v8, %v1620_v30  ;;  %1297 = vmatmul.f32.gmra.mxu0 %v1296_v55  ;;  %v1310_v30 = vand.u32 4294901760, %v1309_v52  ;;  %v804_v55 = vld [vmem:[%s10401_s1 + $0x80] sm:$0xff] }
 0x252   : > { %2048 = vmatmul.f32.gmra.mxu2 %v1301_v43  ;;  %v7611_v57 = vadd.f32 %v2357_v62, %v1965_v40  ;;  %v5673_v43 = vsel %vm10562_vm14, 1.0, %v10558_v56  ;;  %v7628_v40 = vand.u32 4294901760, %v804_v55  ;;  %v1311_v59 = vsub.f32 %v1309_v52, %v1310_v30 }
 0x254   : > { %v1627_v25 = vpop.f32.mrf.mxu1  ;;  %10928 = vst [vmem:[#allocation94_spill] sm:$0xff] %v7611_v57  ;;  %2458 = vmatmul.f32.gmra.mxu3 %v1302_v60  ;;  %v7626_v60 = vpop.permute.xlu2 %390  ;;  %3145 = vmatpush.msrb.mxu2 %v7628_v40 }
 0x255   : > { %v1969_v27 = vpop.f32.mrf.mxu2  ;;  %v1178_v21 = vpop.f32.mrf.mxu0  ;;  %4412 = vmatpush.msra.mxu1 %v7628_v40 }
 0x256   : > { %v1624_v19 = vadd.f32 %v1623_v44, %v1178_v21  ;;  %v1317_v21 = vsub.f32 %v5673_v43, %v5673_v43  ;;  %v1312_v43 = vand.u32 4294901760, %v1311_v59 }
 0x257   : > { %5742 = vmatmul.msk.f32.gmra.mxu1 %vm10553_vm13, %v10862_v6  ;;  %v2363_v8 = vpop.f32.mrf.mxu3  ;;  %vm10563_vm13 = vcmp.eq.s32.totalorder %v7626_v60, %v6590_v50 }
 0x258   : > { %v1970_v62 = vadd.f32 %v1969_v27, %v1624_v19  ;;  %1305 = vmatmul.f32.gmra.mxu0 %v1304_v10  ;;  %v7634_v27 = vsub.f32 %v804_v55, %v7628_v40  ;;  %v10931_v55 = vand.u32 4294901760, %v6655_v53 }
 0x25a   : > { %2053 = vmatmul.f32.gmra.mxu2 %v1309_v52  ;;  %v7630_v44 = vadd.f32 %v2363_v8, %v1970_v62  ;;  %v10930_v8 = vand.u32 4294901760, %v6558_v28  ;;  %v3751_v10 = vand.u32 4294901760, %v7634_v27  ;;  %4059 = vmatpush.msra.mxu0 %v7634_v27  ;;  %v1318_v62 = vand.u32 4294901760, %v1317_v21 }
 0x25c   : > { %v1631_v47 = vpop.f32.mrf.mxu1  ;;  %10929 = vst [vmem:[#allocation95_spill] sm:$0xff] %v7630_v44  ;;  %2464 = vmatmul.f32.gmra.mxu3 %v1310_v30  ;;  %4801 = vmatpush.msra.mxu2 %v10930_v8  ;;  %v5675_v44 = vsel %vm10563_vm13, 1.0, %v10558_v56  ;;  %v3752_v28 = vsub.f32 %v7634_v27, %v3751_v10 }
 0x25d   : > { %v1974_v57 = vpop.f32.mrf.mxu2  ;;  %v1186_v52 = vpop.f32.mrf.mxu0  ;;  %v1325_v12 = vsub.f32 %v5675_v44, %v5675_v44 }
 0x25e   : > { %v1628_v30 = vadd.f32 %v1627_v25, %v1186_v52  ;;  %4805 = vmatpush.msra.mxu2 %v10931_v55  ;;  %v3753_v59 = vand.u32 4294901760, %v3752_v28  ;;  %v10932_v52 = vand.u32 4294901760, %v6729_v2  ;;  %v1319_v55 = vsub.f32 %v1317_v21, %v1318_v62 }
 0x25f   : > { %5743 = vmatmul.msk.f32.gmra.mxu1 %vm10562_vm14, %v10862_v6  ;;  %v2369_v19 = vpop.f32.mrf.mxu3  ;;  %vm10564_vm14 = vcmp.eq.s32.totalorder %v7656_v31, %v6590_v50 }
 0x260   : > { %v1975_v8 = vadd.f32 %v1974_v57, %v1628_v30  ;;  %1313 = vmatmul.f32.gmra.mxu0 %v1312_v43  ;;  %4809 = vmatpush.msra.mxu2 %v10932_v52  ;;  %v1326_v30 = vand.u32 4294901760, %v1325_v12  ;;  %v10936_v43 = vand.u32 4294901760, %v6924_v35 }
 0x261   : > { %3754 = vmatpush.msrb.mxu3 %v3753_v59 }
 0x262   : > { %2058 = vmatmul.f32.gmra.mxu2 %v1317_v21  ;;  %v7660_v53 = vadd.f32 %v2369_v19, %v1975_v8  ;;  %v10934_v21 = vand.u32 4294901760, %v6866_v36  ;;  %v1320_v19 = vand.u32 4294901760, %v1319_v55  ;;  %v1327_v28 = vsub.f32 %v1325_v12, %v1326_v30 }
 0x263   : > { %4813 = vmatpush.msra.mxu2 %v10933_v20  ;;  %5120 = vmatpush.msra.mxu3 %v6552_v26  ;;  %v5677_v20 = vsel %vm10564_vm14, 1.0, %v10935_v63  ;;  %v7680_v26 = vpop.permute.xlu1 %396  ;;  %v10940_v55 = vand.u32 4294901760, %v7208_v1  ;;  %v10942_v1 = vand.u32 4294901760, %v7350_v48 }
 0x264   : > { %v1635_v25 = vpop.f32.mrf.mxu1  ;;  %2470 = vmatmul.f32.gmra.mxu3 %v1318_v62  ;;  %v1333_v8 = vsub.f32 %v5677_v20, %v5677_v20 }
 0x265   : > { %v1979_v56 = vpop.f32.mrf.mxu2  ;;  %v1194_v2 = vpop.f32.mrf.mxu0  ;;  %4817 = vmatpush.msra.mxu2 %v10934_v21  ;;  %5122 = vmatpush.msra.mxu3 %v6645_v38 }
 0x266   : > { %v1632_v44 = vadd.f32 %v1631_v47, %v1194_v2  ;;  %v10937_v47 = vand.u32 4294901760, %v6995_v39  ;;  %v10939_v39 = vand.u32 4294901760, %v7137_v24  ;;  %v1334_v52 = vand.u32 4294901760, %v1333_v8 }
 0x267   : > { %5744 = vmatmul.msk.f32.gmra.mxu1 %vm10563_vm13, %v10862_v6  ;;  %v2375_v57 = vpop.f32.mrf.mxu3  ;;  %4821 = vmatpush.msra.mxu2 %v10936_v43  ;;  %vm10565_vm13 = vcmp.eq.s32.totalorder %v7680_v26, %v6590_v50  ;;  %v10944_v43 = vand.u32 4294901760, %v7492_v41 }
 0x268   : > { %v1980_v62 = vadd.f32 %v1979_v56, %v1632_v44  ;;  %1321 = vmatmul.f32.gmra.mxu0 %v1320_v19  ;;  %5124 = vmatpush.msra.mxu3 %v6722_v61  ;;  %v10938_v56 = vand.u32 4294901760, %v7066_v49  ;;  %v5679_v49 = vsel %vm10565_vm13, 1.0, %v10935_v63  ;;  %v1335_v21 = vsub.f32 %v1333_v8, %v1334_v52 }
 0x269   : > { %4825 = vmatpush.msra.mxu2 %v10937_v47  ;;  %v1341_v44 = vsub.f32 %v5679_v49, %v5679_v49  ;;  %v10943_v19 = vand.u32 4294901760, %v7421_v18  ;;  %v7735_v18 = vpop.permute.xlu0 %402  ;;  %v10945_v47 = vand.u32 4294901760, %v7563_v37 }
 0x26a   : > { %2063 = vmatmul.f32.gmra.mxu2 %v1325_v12  ;;  %v7685_v38 = vadd.f32 %v2375_v57, %v1980_v62  ;;  %5126 = vmatpush.msra.mxu3 %v6786_v58  ;;  %v1328_v58 = vand.u32 4294901760, %v1327_v28  ;;  %v7733_v62 = vadd.s32 128, %v6590_v50  ;;  %vm10568_vm15 = vcmp.eq.s32.totalorder %v7735_v18, %v6590_v50 }
 0x26b   : > { %4829 = vmatpush.msra.mxu2 %v10938_v56  ;;  %v1342_v20 = vand.u32 4294901760, %v1341_v44 }
 0x26c   : > { %v1639_v36 = vpop.f32.mrf.mxu1  ;;  %2476 = vmatmul.f32.gmra.mxu3 %v1326_v30  ;;  %vm411_vm12 = vcmp.eq.s32.totalorder %v6657_v4, %v7733_v62 }
 0x26d   : > { %v1984_v59 = vpop.f32.mrf.mxu2  ;;  %v1202_v61 = vpop.f32.mrf.mxu0  ;;  %5128 = vmatpush.msra.mxu3 %v6853_v16  ;;  %4833 = vmatpush.msra.mxu2 %v10939_v39 }
 0x26e   : > { %v1636_v12 = vadd.f32 %v1635_v25, %v1202_v61  ;;  %v7706_v16 = vpop.permute.xlu2 %399  ;;  %v10941_v25 = vand.u32 4294901760, %v7279_v46 }
 0x26f   : > { %5745 = vmatmul.msk.f32.gmra.mxu1 %vm10564_vm14, %v10862_v6  ;;  %v2381_v35 = vpop.f32.mrf.mxu3  ;;  %5130 = vmatpush.msra.mxu3 %v6920_v7  ;;  %vm10567_vm14 = vcmp.eq.s32.totalorder %v7706_v16, %v6590_v50 }
 0x270   : > { %4837 = vmatpush.msra.mxu2 %v10940_v55  ;;  %v1985_v2 = vadd.f32 %v1984_v59, %v1636_v12  ;;  %1329 = vmatmul.f32.gmra.mxu0 %v1328_v58  ;;  %v5681_v48 = vsel %vm10567_vm14, 1.0, %v10935_v63 }
 0x271   : > { %5132 = vmatpush.msra.mxu3 %v6989_v22  ;;  %v1349_v41 = vsub.f32 %v5681_v48, %v5681_v48 }
 0x272   : > { %2068 = vmatmul.f32.gmra.mxu2 %v1333_v8  ;;  %v7711_v57 = vadd.f32 %v2381_v35, %v1985_v2 }
 0x273   : > { %4841 = vmatpush.msra.mxu2 %v10941_v25  ;;  %5134 = vmatpush.msra.mxu3 %v7060_v51  ;;  %v1336_v51 = vand.u32 4294901760, %v1335_v21  ;;  %v1350_v56 = vand.u32 4294901760, %v1349_v41 }
 0x274   : > { %v1643_v24 = vpop.f32.mrf.mxu1  ;;  %2482 = vmatmul.f32.gmra.mxu3 %v1334_v52 }
 0x275   : > { %v1989_v7 = vpop.f32.mrf.mxu2  ;;  %4845 = vmatpush.msra.mxu2 %v10942_v1  ;;  %v1210_v22 = vpop.f32.mrf.mxu0  ;;  %5136 = vmatpush.msra.mxu3 %v7131_v45  ;;  %v1351_v12 = vsub.f32 %v1349_v41, %v1350_v56 }
 0x276   : > { %v1640_v30 = vadd.f32 %v1639_v36, %v1210_v22 }
 0x277   : > { %5746 = vmatmul.msk.f32.gmra.mxu1 %vm10565_vm13, %v10862_v6  ;;  %v2387_v46 = vpop.f32.mrf.mxu3  ;;  %4849 = vmatpush.msra.mxu2 %v10943_v19  ;;  %vm10570_vm13 = vcmp.eq.s32.totalorder %v6593_v54, %v7733_v62  ;;  %v1352_v55 = vand.u32 4294901760, %v1351_v12 }
 0x278   : > { %5138 = vmatpush.msra.mxu3 %v7202_v33  ;;  %v1990_v45 = vadd.f32 %v1989_v7, %v1640_v30  ;;  %1337 = vmatmul.f32.gmra.mxu0 %v1336_v51  ;;  %v1343_v33 = vsub.f32 %v1341_v44, %v1342_v20  ;;  %v5558_v27 = vsel %vm10570_vm13, 1.0, %v10935_v63 }
 0x279   : > { %4853 = vmatpush.msra.mxu2 %v10944_v43 }
 0x27a   : > { %2073 = vmatmul.f32.gmra.mxu2 %v1341_v44  ;;  %5140 = vmatpush.msra.mxu3 %v7273_v17  ;;  %v7740_v28 = vadd.f32 %v2387_v46, %v1990_v45 }
 0x27b   : > { %4857 = vmatpush.msra.mxu2 %v10945_v47 }
 0x27c   : > { %v1647_v36 = vpop.f32.mrf.mxu1  ;;  %2488 = vmatmul.f32.gmra.mxu3 %v1342_v20 }
 0x27d   : > { %v1994_v8 = vpop.f32.mrf.mxu2  ;;  %5142 = vmatpush.msra.mxu3 %v7344_v29  ;;  %4861 = vmatpush.msra.mxu2 %v3751_v10  ;;  %v1218_v17 = vpop.f32.mrf.mxu0  ;;  %v1344_v29 = vand.u32 4294901760, %v1343_v33  ;;  %v5683_v10 = vsel %vm10568_vm15, 1.0, %v10935_v63 }
 0x27e   : > { %v1644_v59 = vadd.f32 %v1643_v24, %v1218_v17  ;;  %v1357_v58 = vsub.f32 %v5683_v10, %v5683_v10  ;;  %v5564_v10 = vsel %vm411_vm12, 1.0, %v10935_v63 }
 0x27f   : > { %5747 = vmatmul.msk.f32.gmra.mxu1 %vm10567_vm14, %v10862_v6  ;;  %v2393_v37 = vpop.f32.mrf.mxu3  ;;  %5144 = vmatpush.msra.mxu3 %v7415_v9  ;;  %v7764_v9 = vsub.f32 %v5558_v27, %v5558_v27  ;;  %vm407_vm14 = vcmp.eq.s32.totalorder %v6619_v13, %v7733_v62  ;;  %v7824_v12 = vsub.f32 %v5564_v10, %v5564_v10 }
 0x280   : > { %v1995_v61 = vadd.f32 %v1994_v8, %v1644_v59  ;;  %1345 = vmatmul.f32.gmra.mxu0 %v1344_v29  ;;  %v1358_v2 = vand.u32 4294901760, %v1357_v58 }
 0x281   : > { %5146 = vmatpush.msra.mxu3 %v7486_v14  ;;  %v10581_v24 = vand.u32 4294901760, %v7764_v9 }
 0x282   : > { %2078 = vmatmul.f32.gmra.mxu2 %v1349_v41  ;;  %v7766_v39 = vadd.f32 %v2393_v37, %v1995_v61  ;;  %v1359_v1 = vsub.f32 %v1357_v58, %v1358_v2 }
 0x283   : > { %5148 = vmatpush.msra.mxu3 %v7557_v32  ;;  %v3149_v22 = vsub.f32 %v7764_v9, %v10581_v24 }
 0x284   : > { %v1651_v35 = vpop.f32.mrf.mxu1  ;;  %2494 = vmatmul.f32.gmra.mxu3 %v1350_v56  ;;  %v1360_v20 = vand.u32 4294901760, %v1359_v1 }
 0x285   : > { %v1999_v52 = vpop.f32.mrf.mxu2  ;;  %5150 = vmatpush.msra.mxu3 %v7628_v40  ;;  %v1226_v14 = vpop.f32.mrf.mxu0  ;;  %v5560_v40 = vsel %vm407_vm14, 1.0, %v10935_v63  ;;  %v3150_v48 = vand.u32 4294901760, %v3149_v22 }
 0x286   : > { %v1648_v49 = vadd.f32 %v1647_v36, %v1226_v14  ;;  %v7780_v44 = vsub.f32 %v5560_v40, %v5560_v40  ;;  %v10577_v40 = vand.u32 4294901760, %v7824_v12 }
 0x287   : > { %5748 = vmatmul.msk.f32.gmra.mxu1 %vm10568_vm15, %v10862_v6  ;;  %v2399_v32 = vpop.f32.mrf.mxu3  ;;  %vm409_vm15 = vcmp.eq.s32.totalorder %v6616_v11, %v7733_v62 }
 0x288   : > { %v2000_v25 = vadd.f32 %v1999_v52, %v1648_v49  ;;  %1353 = vmatmul.f32.gmra.mxu0 %v1352_v55  ;;  %v10580_v43 = vand.u32 4294901760, %v7780_v44  ;;  %v5562_v45 = vsel %vm409_vm15, 1.0, %v10935_v63 }
 0x289   : > { %v7798_v33 = vsub.f32 %v5562_v45, %v5562_v45 }
 0x28a   : > { %2083 = vmatmul.f32.gmra.mxu2 %v1357_v58  ;;  %v7782_v7 = vadd.f32 %v2399_v32, %v2000_v25  ;;  %v3157_v8 = vsub.f32 %v7780_v44, %v10580_v43 }
 0x28b   : > { %v10579_v27 = vand.u32 4294901760, %v7798_v33 }
 0x28c   : > { %v1655_v21 = vpop.f32.mrf.mxu1  ;;  %2500 = vmatmul.f32.gmra.mxu3 %v1358_v2  ;;  %v3158_v56 = vand.u32 4294901760, %v3157_v8 }
 0x28d   : > { %v2004_v46 = vpop.f32.mrf.mxu2  ;;  %v1234_v19 = vpop.f32.mrf.mxu0  ;;  %v3165_v52 = vsub.f32 %v7798_v33, %v10579_v27 }
 0x28e   : > { %v1652_v51 = vadd.f32 %v1651_v35, %v1234_v19  ;;  %v3173_v19 = vsub.f32 %v7824_v12, %v10577_v40 }
 0x28f   : > { %5813 = vmatmul.msk.f32.vlgmr.msrb.gmra.mxu1 %vm404_vm0, %v10862_v6  ;;  %v2405_v30 = vpop.f32.mrf.mxu3  ;;  %v3166_v2 = vand.u32 4294901760, %v3165_v52 }
 0x290   : > { %v2005_v36 = vadd.f32 %v2004_v46, %v1652_v51  ;;  %1361 = vmatmul.f32.gmra.mxu0 %v1360_v20  ;;  %v3174_v45 = vand.u32 4294901760, %v3173_v19 }
 0x292   : > { %3151 = vmatmul.f32.vlgmr.msrb.gmra.mxu2 %v3150_v48  ;;  %v7800_v41 = vadd.f32 %v2405_v30, %v2005_v36 }
 0x294   : > { %v1659_v47 = vpop.f32.mrf.mxu1  ;;  %5877 = vmatmul.msk.f32.vlgmr.msrb.gmra.mxu3 %vm10570_vm13, %v10862_v6  ;;  %vm413_vm13 = vcmp.eq.s32.totalorder %v6678_v23, %v7733_v62 }
 0x295   : > { %v2009_v17 = vpop.f32.mrf.mxu2  ;;  %v1242_v37 = vpop.f32.mrf.mxu0  ;;  %v5566_v25 = vsel %vm413_vm13, 1.0, %v10935_v63 }
 0x296   : > { %v1656_v29 = vadd.f32 %v1655_v21, %v1242_v37  ;;  %v7850_v22 = vsub.f32 %v5566_v25, %v5566_v25 }
 0x297   : > { %5814 = vmatmul.msk.f32.gmra.mxu1 %vm406_vm1, %v10862_v6  ;;  %v2411_v59 = vpop.f32.mrf.mxu3 }
 0x298   : > { %v2010_v61 = vadd.f32 %v2009_v17, %v1656_v29  ;;  %5749 = vmatmul.msk.f32.vlgmr.msrb.gmra.mxu0 %vm404_vm0, %v10862_v6  ;;  %vm415_vm0 = vcmp.eq.s32.totalorder %v6693_v0, %v7733_v62  ;;  %v10576_v36 = vand.u32 4294901760, %v7850_v22 }
 0x29a   : > { %3159 = vmatmul.f32.gmra.mxu2 %v3158_v56  ;;  %v7826_v58 = vadd.f32 %v2411_v59, %v2010_v61  ;;  %v3181_v29 = vsub.f32 %v7850_v22, %v10576_v36 }
 0x29c   : > { %v1663_v35 = vpop.f32.mrf.mxu1  ;;  %5878 = vmatmul.msk.f32.gmra.mxu3 %vm407_vm14, %v10862_v6  ;;  %v3182_v52 = vand.u32 4294901760, %v3181_v29 }
 0x29d   : > { %v2014_v14 = vpop.f32.mrf.mxu2  ;;  %v1250_v32 = vpop.f32.mrf.mxu0 }
 0x29e   : > { %v1660_v55 = vadd.f32 %v1659_v47, %v1250_v32  ;;  %v5568_v47 = vsel %vm415_vm0, 1.0, %v10935_v63 }
 0x29f   : > { %5815 = vmatmul.msk.f32.gmra.mxu1 %vm408_vm2, %v10862_v6  ;;  %v2417_v49 = vpop.f32.mrf.mxu3  ;;  %v7876_v37 = vsub.f32 %v5568_v47, %v5568_v47 }
 0x2a0   : > { %v2015_v21 = vadd.f32 %v2014_v14, %v1660_v55  ;;  %5750 = vmatmul.msk.f32.gmra.mxu0 %vm406_vm1, %v10862_v6  ;;  %vm417_vm1 = vcmp.eq.s32.totalorder %v6708_v34, %v7733_v62 }
 0x2a1   : > { %v10575_v14 = vand.u32 4294901760, %v7876_v37  ;;  %v5570_v32 = vsel %vm417_vm1, 1.0, %v10935_v63 }
 0x2a2   : > { %3167 = vmatmul.f32.gmra.mxu2 %v3166_v2  ;;  %v7852_v46 = vadd.f32 %v2417_v49, %v2015_v21  ;;  %v7902_v2 = vsub.f32 %v5570_v32, %v5570_v32 }
 0x2a3   : > { %v3189_v21 = vsub.f32 %v7876_v37, %v10575_v14 }
 0x2a4   : > { %v1667_v1 = vpop.f32.mrf.mxu1  ;;  %5879 = vmatmul.msk.f32.gmra.mxu3 %vm409_vm15, %v10862_v6 }
 0x2a5   : > { %v2019_v30 = vpop.f32.mrf.mxu2  ;;  %v1258_v51 = vpop.f32.mrf.mxu0 }
 0x2a6   : > { %v1664_v48 = vadd.f32 %v1663_v35, %v1258_v51 }
 0x2a7   : > { %5816 = vmatmul.msk.f32.gmra.mxu1 %vm410_vm3, %v10862_v6  ;;  %v2423_v20 = vpop.f32.mrf.mxu3 }
 0x2a8   : > { %v2020_v8 = vadd.f32 %v2019_v30, %v1664_v48  ;;  %5751 = vmatmul.msk.f32.gmra.mxu0 %vm408_vm2, %v10862_v6  ;;  %vm419_vm2 = vcmp.eq.s32.totalorder %v6731_v3, %v7733_v62  ;;  %v10573_v48 = vand.u32 4294901760, %v7902_v2 }
 0x2aa   : > { %3175 = vmatmul.f32.gmra.mxu2 %v3174_v45  ;;  %v7878_v59 = vadd.f32 %v2423_v20, %v2020_v8  ;;  %v3190_v20 = vand.u32 4294901760, %v3189_v21  ;;  %v5572_v45 = vsel %vm419_vm2, 1.0, %v10935_v63 }
 0x2ab   : > { %v7928_v29 = vsub.f32 %v5572_v45, %v5572_v45 }
 0x2ac   : > { %v1671_v17 = vpop.f32.mrf.mxu1  ;;  %5880 = vmatmul.msk.f32.gmra.mxu3 %vm411_vm12, %v10862_v6 }
 0x2ad   : > { %v2024_v56 = vpop.f32.mrf.mxu2  ;;  %v1266_v10 = vpop.f32.mrf.mxu0 }
 0x2ae   : > { %v1668_v35 = vadd.f32 %v1667_v1, %v1266_v10 }
 0x2af   : > { %5817 = vmatmul.msk.f32.gmra.mxu1 %vm412_vm4, %v10862_v6  ;;  %v2429_v61 = vpop.f32.mrf.mxu3 }
 0x2b0   : > { %v2025_v49 = vadd.f32 %v2024_v56, %v1668_v35  ;;  %5752 = vmatmul.msk.f32.gmra.mxu0 %vm410_vm3, %v10862_v6  ;;  %vm421_vm3 = vcmp.eq.s32.totalorder %v6751_v5, %v7733_v62 }
 0x2b1   : > { %v5574_v21 = vsel %vm421_vm3, 1.0, %v10935_v63 }
 0x2b2   : > { %3183 = vmatmul.f32.gmra.mxu2 %v3182_v52  ;;  %v7904_v25 = vadd.f32 %v2429_v61, %v2025_v49  ;;  %v10572_v49 = vand.u32 4294901760, %v7928_v29 }
 0x2b4   : > { %v1675_v55 = vpop.f32.mrf.mxu1  ;;  %5881 = vmatmul.msk.f32.gmra.mxu3 %vm413_vm13, %v10862_v6 }
 0x2b5   : > { %v2029_v1 = vpop.f32.mrf.mxu2  ;;  %v1274_v19 = vpop.f32.mrf.mxu0 }
 0x2b6   : > { %v1672_v51 = vadd.f32 %v1671_v17, %v1274_v19  ;;  %v3197_v17 = vsub.f32 %v7902_v2, %v10573_v48 }
 0x2b7   : > { %5818 = vmatmul.msk.f32.gmra.mxu1 %vm414_vm5, %v10862_v6  ;;  %v2435_v30 = vpop.f32.mrf.mxu3 }
 0x2b8   : > { %v2030_v47 = vadd.f32 %v2029_v1, %v1672_v51  ;;  %5753 = vmatmul.msk.f32.gmra.mxu0 %vm412_vm4, %v10862_v6  ;;  %v3198_v32 = vand.u32 4294901760, %v3197_v17  ;;  %vm423_vm4 = vcmp.eq.s32.totalorder %v6763_v15, %v7733_v62 }
 0x2ba   : > { %3191 = vmatmul.f32.gmra.mxu2 %v3190_v20  ;;  %v7930_v56 = vadd.f32 %v2435_v30, %v2030_v47  ;;  %v7954_v30 = vsub.f32 %v5574_v21, %v5574_v21 }
 0x2bc   : > { %v1679_v8 = vpop.f32.mrf.mxu1  ;;  %5882 = vmatmul.msk.f32.gmra.mxu3 %vm415_vm0, %v10862_v6 }
 0x2bd   : > { %v2034_v10 = vpop.f32.mrf.mxu2  ;;  %v1282_v61 = vpop.f32.mrf.mxu0 }
 0x2be   : > { %v1676_v52 = vadd.f32 %v1675_v55, %v1282_v61  ;;  %v3205_v55 = vsub.f32 %v7928_v29, %v10572_v49  ;;  %v10571_v61 = vand.u32 4294901760, %v7954_v30 }
 0x2bf   : > { %5819 = vmatmul.msk.f32.gmra.mxu1 %vm416_vm6, %v10862_v6  ;;  %v2441_v35 = vpop.f32.mrf.mxu3 }
 0x2c0   : > { %v2035_v1 = vadd.f32 %v2034_v10, %v1676_v52  ;;  %5754 = vmatmul.msk.f32.gmra.mxu0 %vm414_vm5, %v10862_v6  ;;  %v3206_v10 = vand.u32 4294901760, %v3205_v55  ;;  %vm425_vm5 = vcmp.eq.s32.totalorder %v6775_v42, %v7733_v62 }
 0x2c2   : > { %3199 = vmatmul.f32.gmra.mxu2 %v3198_v32  ;;  %v7956_v51 = vadd.f32 %v2441_v35, %v2035_v1  ;;  %v5576_v35 = vsel %vm423_vm4, 1.0, %v10935_v63 }
 0x2c3   : > { %v7980_v21 = vsub.f32 %v5576_v35, %v5576_v35  ;;  %v5578_v35 = vsel %vm425_vm5, 1.0, %v10935_v63 }
 0x2c4   : > { %v1683_v19 = vpop.f32.mrf.mxu1  ;;  %5883 = vmatmul.msk.f32.gmra.mxu3 %vm417_vm1, %v10862_v6  ;;  %v8006_v49 = vsub.f32 %v5578_v35, %v5578_v35 }
 0x2c5   : > { %v2039_v20 = vpop.f32.mrf.mxu2  ;;  %v1290_v45 = vpop.f32.mrf.mxu0 }
 0x2c6   : > { %v1680_v17 = vadd.f32 %v1679_v8, %v1290_v45  ;;  %v3213_v8 = vsub.f32 %v7954_v30, %v10571_v61  ;;  %10946 = vst [vmem:[#allocation96_spill] sm:$0xff] %v8006_v49  ;;  %v10578_v35 = vand.u32 4294901760, %v8006_v49 }
 0x2c7   : > { %5820 = vmatmul.msk.f32.gmra.mxu1 %vm418_vm7, %v10862_v6  ;;  %v2447_v47 = vpop.f32.mrf.mxu3 }
 0x2c8   : > { %v2040_v52 = vadd.f32 %v2039_v20, %v1680_v17  ;;  %5755 = vmatmul.msk.f32.gmra.mxu0 %vm416_vm6, %v10862_v6  ;;  %v3214_v17 = vand.u32 4294901760, %v3213_v8 }
 0x2ca   : > { %3207 = vmatmul.f32.gmra.mxu2 %v3206_v10  ;;  %v7982_v1 = vadd.f32 %v2447_v47, %v2040_v52  ;;  %v10574_v10 = vand.u32 4294901760, %v7980_v21 }
 0x2cc   : > { %v1687_v32 = vpop.f32.mrf.mxu1  ;;  %5884 = vmatmul.msk.f32.gmra.mxu3 %vm419_vm2, %v10862_v6 }
 0x2cd   : > { %v2044_v55 = vpop.f32.mrf.mxu2  ;;  %v1298_v20 = vpop.f32.mrf.mxu0 }
 0x2ce   : > { %v1684_v47 = vadd.f32 %v1683_v19, %v1298_v20  ;;  %v3221_v19 = vsub.f32 %v7980_v21, %v10574_v10 }
 0x2cf   : > { %5821 = vmatmul.msk.f32.gmra.mxu1 %vm420_vm8, %v10862_v6  ;;  %v2453_v45 = vpop.f32.mrf.mxu3 }
 0x2d0   : > { %v2045_v52 = vadd.f32 %v2044_v55, %v1684_v47  ;;  %5756 = vmatmul.msk.f32.gmra.mxu0 %vm418_vm7, %v10862_v6  ;;  %v10947_v55 = vld [vmem:[#allocation7_spill] sm:$0xff] }
 0x2d1   : > { %vm427_vm6 = vcmp.eq.s32.totalorder %v10947_v55, %v7733_v62 }
 0x2d2   : > { %3215 = vmatmul.f32.gmra.mxu2 %v3214_v17  ;;  %v8008_v48 = vadd.f32 %v2453_v45, %v2045_v52  ;;  %v3222_v17 = vand.u32 4294901760, %v3221_v19  ;;  %v5580_v52 = vsel %vm427_vm6, 1.0, %v10935_v63 }
 0x2d3   : > { %v8032_v36 = vsub.f32 %v5580_v52, %v5580_v52 }
 0x2d4   : > { %v1691_v61 = vpop.f32.mrf.mxu1  ;;  %5885 = vmatmul.msk.f32.gmra.mxu3 %vm421_vm3, %v10862_v6 }
 0x2d5   : > { %v2049_v8 = vpop.f32.mrf.mxu2  ;;  %v1306_v20 = vpop.f32.mrf.mxu0  ;;  %10948 = vst [vmem:[#allocation97_spill] sm:$0xff] %v8032_v36 }
 0x2d6   : > { %v1688_v47 = vadd.f32 %v1687_v32, %v1306_v20  ;;  %v3229_v32 = vsub.f32 %v8006_v49, %v10578_v35 }
 0x2d7   : > { %5822 = vmatmul.msk.f32.gmra.mxu1 %vm422_vm9, %v10862_v6  ;;  %v2459_v45 = vpop.f32.mrf.mxu3 }
 0x2d8   : > { %v2050_v10 = vadd.f32 %v2049_v8, %v1688_v47  ;;  %5757 = vmatmul.msk.f32.gmra.mxu0 %vm420_vm8, %v10862_v6  ;;  %v10949_v8 = vld [vmem:[#allocation8_spill] sm:$0xff]  ;;  %v3230_v47 = vand.u32 4294901760, %v3229_v32 }
 0x2d9   : > { %vm10593_vm7 = vcmp.eq.s32.totalorder %v10949_v8, %v7733_v62 }
 0x2da   : > { %3223 = vmatmul.f32.gmra.mxu2 %v3222_v17  ;;  %v8034_v40 = vadd.f32 %v2459_v45, %v2050_v10  ;;  %v10582_v17 = vand.u32 4294901760, %v8032_v36  ;;  %v5582_v52 = vsel %vm10593_vm7, 1.0, %v10935_v63 }
 0x2db   : > { %v8058_v43 = vsub.f32 %v5582_v52, %v5582_v52 }
 0x2dc   : > { %v1695_v14 = vpop.f32.mrf.mxu1  ;;  %5886 = vmatmul.msk.f32.gmra.mxu3 %vm423_vm4, %v10862_v6 }
 0x2dd   : > { %v2054_v19 = vpop.f32.mrf.mxu2  ;;  %v1314_v10 = vpop.f32.mrf.mxu0  ;;  %10950 = vst [vmem:[#allocation98_spill] sm:$0xff] %v8058_v43 }
 0x2de   : > { %v1692_v45 = vadd.f32 %v1691_v61, %v1314_v10  ;;  %v3237_v61 = vsub.f32 %v8032_v36, %v10582_v17 }
 0x2df   : > { %5823 = vmatmul.msk.f32.gmra.mxu1 %vm424_vm10, %v10862_v6  ;;  %v2465_v20 = vpop.f32.mrf.mxu3 }
 0x2e0   : > { %v2055_v35 = vadd.f32 %v2054_v19, %v1692_v45  ;;  %5758 = vmatmul.msk.f32.gmra.mxu0 %vm422_vm9, %v10862_v6  ;;  %v10952_v19 = vld [vmem:[#allocation9_spill] sm:$0xff]  ;;  %v3238_v45 = vand.u32 4294901760, %v3237_v61 }
 0x2e1   : > { %vm10598_vm8 = vcmp.eq.s32.totalorder %v10952_v19, %v7733_v62 }
 0x2e2   : > { %3231 = vmatmul.f32.gmra.mxu2 %v3230_v47  ;;  %v8060_v24 = vadd.f32 %v2465_v20, %v2055_v35  ;;  %v10587_v47 = vand.u32 4294901760, %v8058_v43  ;;  %v5584_v52 = vsel %vm10598_vm8, 1.0, %v10935_v63 }
 0x2e4   : > { %v1699_v27 = vpop.f32.mrf.mxu1  ;;  %10951 = vst [vmem:[#allocation99_spill] sm:$0xff] %v8060_v24  ;;  %5887 = vmatmul.msk.f32.gmra.mxu3 %vm425_vm5, %v10862_v6  ;;  %v8084_v24 = vsub.f32 %v5584_v52, %v5584_v52 }
 0x2e5   : > { %v2059_v32 = vpop.f32.mrf.mxu2  ;;  %v1322_v35 = vpop.f32.mrf.mxu0 }
 0x2e6   : > { %v1696_v20 = vadd.f32 %v1695_v14, %v1322_v35  ;;  %10953 = vst [vmem:[#allocation100_spill] sm:$0xff] %v8084_v24  ;;  %v3245_v14 = vsub.f32 %v8058_v43, %v10587_v47 }
 0x2e7   : > { %5824 = vmatmul.msk.f32.gmra.mxu1 %vm426_vm11, %v10862_v6  ;;  %v2471_v10 = vpop.f32.mrf.mxu3 }
 0x2e8   : > { %v2060_v17 = vadd.f32 %v2059_v32, %v1696_v20  ;;  %5759 = vmatmul.msk.f32.gmra.mxu0 %vm424_vm10, %v10862_v6  ;;  %v10955_v32 = vld [vmem:[#allocation10_spill] sm:$0xff]  ;;  %vm10956_vm10 = vcmp.eq.s32.totalorder %v10949_v8, %v6590_v50  ;;  %v3246_v20 = vand.u32 4294901760, %v3245_v14 }
 0x2e9   : > { %vm10603_vm9 = vcmp.eq.s32.totalorder %v10955_v32, %v7733_v62 }
 0x2ea   : > { %3239 = vmatmul.f32.gmra.mxu2 %v3238_v45  ;;  %v8086_v49 = vadd.f32 %v2471_v10, %v2060_v17  ;;  %v10592_v45 = vand.u32 4294901760, %v8084_v24  ;;  %v5586_v52 = vsel %vm10603_vm9, 1.0, %v10935_v63 }
 0x2ec   : > { %v1703_v36 = vpop.f32.mrf.mxu1  ;;  %10954 = vst [vmem:[#allocation101_spill] sm:$0xff] %v8086_v49  ;;  %5888 = vmatmul.msk.f32.gmra.mxu3 %vm427_vm6, %v10862_v6  ;;  %v8110_v49 = vsub.f32 %v5586_v52, %v5586_v52 }
 0x2ed   : > { %v2064_v61 = vpop.f32.mrf.mxu2  ;;  %v1330_v17 = vpop.f32.mrf.mxu0 }
 0x2ee   : > { %v1700_v10 = vadd.f32 %v1699_v27, %v1330_v17  ;;  %10957 = vst [vmem:[#allocation102_spill] sm:$0xff] %v8110_v49  ;;  %v3253_v27 = vsub.f32 %v8084_v24, %v10592_v45 }
 0x2ef   : > { %5825 = vmatmul.msk.f32.gmra.mxu1 %vm10956_vm10, %v10862_v6  ;;  %v2477_v35 = vpop.f32.mrf.mxu3 }
 0x2f0   : > { %v2065_v47 = vadd.f32 %v2064_v61, %v1700_v10  ;;  %5760 = vmatmul.msk.f32.gmra.mxu0 %vm426_vm11, %v10862_v6  ;;  %v10959_v61 = vld [vmem:[#allocation11_spill] sm:$0xff]  ;;  %vm10960_vm11 = vcmp.eq.s32.totalorder %v10952_v19, %v6590_v50  ;;  %v3254_v10 = vand.u32 4294901760, %v3253_v27 }
 0x2f1   : > { %vm10608_vm10 = vcmp.eq.s32.totalorder %v10959_v61, %v7733_v62 }
 0x2f2   : > { %3247 = vmatmul.f32.gmra.mxu2 %v3246_v20  ;;  %v8112_v42 = vadd.f32 %v2477_v35, %v2065_v47  ;;  %v10597_v20 = vand.u32 4294901760, %v8110_v49  ;;  %v5588_v52 = vsel %vm10608_vm10, 1.0, %v10935_v63 }
 0x2f4   : > { %v1707_v43 = vpop.f32.mrf.mxu1  ;;  %10958 = vst [vmem:[#allocation103_spill] sm:$0xff] %v8112_v42  ;;  %5889 = vmatmul.msk.f32.gmra.mxu3 %vm10593_vm7, %v10862_v6  ;;  %vm10961_vm7 = vcmp.eq.s32.totalorder %v10949_v8, %v6590_v50  ;;  %v8136_v42 = vsub.f32 %v5588_v52, %v5588_v52 }
 0x2f5   : > { %v2069_v14 = vpop.f32.mrf.mxu2  ;;  %v1338_v47 = vpop.f32.mrf.mxu0 }
 0x2f6   : > { %v1704_v35 = vadd.f32 %v1703_v36, %v1338_v47  ;;  %10962 = vst [vmem:[#allocation104_spill] sm:$0xff] %v8136_v42  ;;  %v3261_v36 = vsub.f32 %v8110_v49, %v10597_v20 }
 0x2f7   : > { %5826 = vmatmul.msk.f32.gmra.mxu1 %vm10960_vm11, %v10862_v6  ;;  %v2483_v17 = vpop.f32.mrf.mxu3 }
 0x2f8   : > { %v2070_v45 = vadd.f32 %v2069_v14, %v1704_v35  ;;  %5761 = vmatmul.msk.f32.gmra.mxu0 %vm10961_vm7, %v10862_v6  ;;  %v10964_v14 = vld [vmem:[#allocation12_spill] sm:$0xff]  ;;  %vm10965_vm7 = vcmp.eq.s32.totalorder %v10955_v32, %v6590_v50  ;;  %v3262_v35 = vand.u32 4294901760, %v3261_v36 }
 0x2f9   : > { %vm10615_vm11 = vcmp.eq.s32.totalorder %v10964_v14, %v7733_v62 }
 0x2fa   : > { %3255 = vmatmul.f32.gmra.mxu2 %v3254_v10  ;;  %v8138_v55 = vadd.f32 %v2483_v17, %v2070_v45  ;;  %v10602_v10 = vand.u32 4294901760, %v8136_v42  ;;  %v5590_v52 = vsel %vm10615_vm11, 1.0, %v10935_v63 }
 0x2fc   : > { %v1711_v24 = vpop.f32.mrf.mxu1  ;;  %10963 = vst [vmem:[#allocation105_spill] sm:$0xff] %v8138_v55  ;;  %5890 = vmatmul.msk.f32.gmra.mxu3 %vm10598_vm8, %v10862_v6  ;;  %vm10966_vm8 = vcmp.eq.s32.totalorder %v10952_v19, %v6590_v50  ;;  %v8162_v55 = vsub.f32 %v5590_v52, %v5590_v52 }
 0x2fd   : > { %v2074_v27 = vpop.f32.mrf.mxu2  ;;  %v1346_v45 = vpop.f32.mrf.mxu0 }
 0x2fe   : > { %v1708_v17 = vadd.f32 %v1707_v43, %v1346_v45  ;;  %10967 = vst [vmem:[#allocation106_spill] sm:$0xff] %v8162_v55  ;;  %v3269_v43 = vsub.f32 %v8136_v42, %v10602_v10 }
 0x2ff   : > { %5827 = vmatmul.msk.f32.gmra.mxu1 %vm10965_vm7, %v10862_v6  ;;  %v2489_v47 = vpop.f32.mrf.mxu3 }
 0x300   : > { %v2075_v20 = vadd.f32 %v2074_v27, %v1708_v17  ;;  %5762 = vmatmul.msk.f32.gmra.mxu0 %vm10966_vm8, %v10862_v6  ;;  %v10969_v27 = vld [vmem:[#allocation13_spill] sm:$0xff]  ;;  %vm10970_vm8 = vcmp.eq.s32.totalorder %v10959_v61, %v6590_v50  ;;  %v3270_v17 = vand.u32 4294901760, %v3269_v43 }
 0x301   : > { %vm10623_vm7 = vcmp.eq.s32.totalorder %v10969_v27, %v7733_v62 }
 0x302   : > { %3263 = vmatmul.f32.gmra.mxu2 %v3262_v35  ;;  %v8164_v8 = vadd.f32 %v2489_v47, %v2075_v20  ;;  %v10607_v35 = vand.u32 4294901760, %v8162_v55  ;;  %v5592_v52 = vsel %vm10623_vm7, 1.0, %v10935_v63 }
 0x304   : > { %v1715_v49 = vpop.f32.mrf.mxu1  ;;  %10968 = vst [vmem:[#allocation107_spill] sm:$0xff] %v8164_v8  ;;  %5891 = vmatmul.msk.f32.gmra.mxu3 %vm10603_vm9, %v10862_v6  ;;  %vm10971_vm9 = vcmp.eq.s32.totalorder %v10955_v32, %v6590_v50  ;;  %v8188_v8 = vsub.f32 %v5592_v52, %v5592_v52 }
 0x305   : > { %v2079_v36 = vpop.f32.mrf.mxu2  ;;  %v1354_v20 = vpop.f32.mrf.mxu0 }
 0x306   : > { %v1712_v47 = vadd.f32 %v1711_v24, %v1354_v20  ;;  %10972 = vst [vmem:[#allocation108_spill] sm:$0xff] %v8188_v8  ;;  %v3277_v24 = vsub.f32 %v8162_v55, %v10607_v35 }
 0x307   : > { %5828 = vmatmul.msk.f32.gmra.mxu1 %vm10970_vm8, %v10862_v6  ;;  %v2495_v45 = vpop.f32.mrf.mxu3 }
 0x308   : > { %v2080_v10 = vadd.f32 %v2079_v36, %v1712_v47  ;;  %5763 = vmatmul.msk.f32.gmra.mxu0 %vm10971_vm9, %v10862_v6  ;;  %v10974_v36 = vld [vmem:[#allocation14_spill] sm:$0xff]  ;;  %vm10975_vm9 = vcmp.eq.s32.totalorder %v10964_v14, %v6590_v50  ;;  %v3278_v47 = vand.u32 4294901760, %v3277_v24 }
 0x309   : > { %vm10628_vm8 = vcmp.eq.s32.totalorder %v10974_v36, %v7733_v62 }
 0x30a   : > { %3271 = vmatmul.f32.gmra.mxu2 %v3270_v17  ;;  %v8190_v19 = vadd.f32 %v2495_v45, %v2080_v10  ;;  %v10612_v17 = vand.u32 4294901760, %v8188_v8  ;;  %v5594_v52 = vsel %vm10628_vm8, 1.0, %v10935_v63 }
 0x30c   : > { %v2859_v42 = vpop.f32.mrf.mxu1  ;;  %10973 = vst [vmem:[#allocation109_spill] sm:$0xff] %v8190_v19  ;;  %5892 = vmatmul.msk.f32.gmra.mxu3 %vm10608_vm10, %v10862_v6  ;;  %vm10976_vm10 = vcmp.eq.s32.totalorder %v10959_v61, %v6590_v50  ;;  %v8214_v19 = vsub.f32 %v5594_v52, %v5594_v52 }
 0x30d   : > { %v2084_v43 = vpop.f32.mrf.mxu2  ;;  %v1362_v10 = vpop.f32.mrf.mxu0 }
 0x30e   : > { %v1716_v45 = vadd.f32 %v1715_v49, %v1362_v10  ;;  %10977 = vst [vmem:[#allocation110_spill] sm:$0xff] %v8214_v19  ;;  %v3285_v49 = vsub.f32 %v8188_v8, %v10612_v17  ;;  %v10620_v52 = vand.u32 4294901760, %v8214_v19 }
 0x30f   : > { %5829 = vmatmul.msk.f32.gmra.mxu1 %vm10975_vm9, %v10862_v6  ;;  %v2501_v20 = vpop.f32.mrf.mxu3 }
 0x310   : > { %v2085_v35 = vadd.f32 %v2084_v43, %v1716_v45  ;;  %5764 = vmatmul.msk.f32.gmra.mxu0 %vm10976_vm10, %v10862_v6  ;;  %v10979_v43 = vld [vmem:[#allocation16_spill] sm:$0xff]  ;;  %vm10980_vm10 = vcmp.eq.s32.totalorder %v10969_v27, %v6590_v50 }
 0x311   : > { %vm10633_vm9 = vcmp.eq.s32.totalorder %v10979_v43, %v7733_v62 }
 0x312   : > { %3279 = vmatmul.f32.gmra.mxu2 %v3278_v47  ;;  %v8216_v32 = vadd.f32 %v2501_v20, %v2085_v35  ;;  %v10981_v20 = vld [vmem:[#allocation15_spill] sm:$0xff]  ;;  %v3286_v47 = vand.u32 4294901760, %v3285_v49  ;;  %v5596_v17 = vsel %vm10633_vm9, 1.0, %v10935_v63  ;;  %v3293_v49 = vsub.f32 %v8214_v19, %v10620_v52 }
 0x313   : > { %v8241_v61 = vsub.f32 %v5596_v17, %v5596_v17 }
 0x314   : > { %v2863_v55 = vpop.f32.mrf.mxu1  ;;  %10978 = vst [vmem:[#allocation111_spill] sm:$0xff] %v8216_v32  ;;  %5893 = vmatmul.msk.f32.gmra.mxu3 %vm10615_vm11, %v10862_v6  ;;  %vm10982_vm11 = vcmp.eq.s32.totalorder %v10964_v14, %v6590_v50 }
 0x315   : > { %v3152_v24 = vpop.f32.mrf.mxu2  ;;  %v2570_v35 = vpop.f32.mrf.mxu0  ;;  %10983 = vst [vmem:[#allocation15_spill] sm:$0xff] %v8241_v61  ;;  %v10625_v14 = vand.u32 4294901760, %v8241_v61 }
 0x316   : > { %v2571_v45 = vadd.f32 %v2570_v35, %v10981_v20  ;;  %v10984_v35 = vld [vmem:[#allocation18_spill] sm:$0xff] }
 0x317   : > { %5830 = vmatmul.msk.f32.gmra.mxu1 %vm10980_vm10, %v10862_v6  ;;  %v3757_v10 = vpop.f32.mrf.mxu3  ;;  %vm10638_vm10 = vcmp.eq.s32.totalorder %v10984_v35, %v7733_v62 }
 0x318   : > { %v2860_v8 = vadd.f32 %v2859_v42, %v2571_v45  ;;  %5765 = vmatmul.msk.f32.gmra.mxu0 %vm10982_vm11, %v10862_v6  ;;  %vm10986_vm11 = vcmp.eq.s32.totalorder %v10974_v36, %v6590_v50  ;;  %v5598_v52 = vsel %vm10638_vm10, 1.0, %v10935_v63 }
 0x31a   : > { %3287 = vmatmul.f32.gmra.mxu2 %v3286_v47  ;;  %v3153_v15 = vadd.f32 %v3152_v24, %v2860_v8  ;;  %v10987_v24 = vld [vmem:[#allocation17_spill] sm:$0xff]  ;;  %v3294_v47 = vand.u32 4294901760, %v3293_v49  ;;  %v3301_v49 = vsub.f32 %v8241_v61, %v10625_v14 }
 0x31c   : > { %v2867_v32 = vpop.f32.mrf.mxu1  ;;  %5894 = vmatmul.msk.f32.gmra.mxu3 %vm10623_vm7, %v10862_v6  ;;  %v8252_v20 = vadd.f32 %v3757_v10, %v3153_v15  ;;  %vm10988_vm7 = vcmp.eq.s32.totalorder %v10969_v27, %v6590_v50  ;;  %v8268_v10 = vsub.f32 %v5598_v52, %v5598_v52 }
 0x31d   : > { %v3160_v42 = vpop.f32.mrf.mxu2  ;;  %v2574_v8 = vpop.f32.mrf.mxu0 }
 0x31e   : > { %10985 = vst [vmem:[#allocation112_spill] sm:$0xff] %v8252_v20  ;;  %v2575_v45 = vadd.f32 %v2574_v8, %v10987_v24  ;;  %v10990_v8 = vld [vmem:[#allocation19_spill] sm:$0xff]  ;;  %v10630_v27 = vand.u32 4294901760, %v8268_v10 }
 0x31f   : > { %5831 = vmatmul.msk.f32.gmra.mxu1 %vm10986_vm11, %v10862_v6  ;;  %v3761_v17 = vpop.f32.mrf.mxu3  ;;  %10989 = vst [vmem:[#allocation17_spill] sm:$0xff] %v8268_v10  ;;  %vm10643_vm11 = vcmp.eq.s32.totalorder %v10990_v8, %v7733_v62 }
 0x320   : > { %v2864_v19 = vadd.f32 %v2863_v55, %v2575_v45  ;;  %5766 = vmatmul.msk.f32.gmra.mxu0 %vm10988_vm7, %v10862_v6  ;;  %vm10992_vm7 = vcmp.eq.s32.totalorder %v10979_v43, %v6590_v50  ;;  %v5600_v14 = vsel %vm10643_vm11, 1.0, %v10935_v63 }
 0x322   : > { %3295 = vmatmul.f32.gmra.mxu2 %v3294_v47  ;;  %v3161_v20 = vadd.f32 %v3160_v42, %v2864_v19  ;;  %v10993_v42 = vld [vmem:[#allocation20_spill] sm:$0xff]  ;;  %v3302_v47 = vand.u32 4294901760, %v3301_v49  ;;  %v3309_v49 = vsub.f32 %v8268_v10, %v10630_v27 }
 0x324   : > { %v2871_v15 = vpop.f32.mrf.mxu1  ;;  %5895 = vmatmul.msk.f32.gmra.mxu3 %vm10628_vm8, %v10862_v6  ;;  %v8279_v24 = vadd.f32 %v3761_v17, %v3161_v20  ;;  %vm10994_vm8 = vcmp.eq.s32.totalorder %v10974_v36, %v6590_v50  ;;  %v8295_v17 = vsub.f32 %v5600_v14, %v5600_v14 }
 0x325   : > { %v3168_v55 = vpop.f32.mrf.mxu2  ;;  %v2578_v19 = vpop.f32.mrf.mxu0 }
 0x326   : > { %10991 = vst [vmem:[#allocation113_spill] sm:$0xff] %v8279_v24  ;;  %v2579_v45 = vadd.f32 %v2578_v19, %v10993_v42  ;;  %v10996_v19 = vld [vmem:[#allocation21_spill] sm:$0xff]  ;;  %v10635_v36 = vand.u32 4294901760, %v8295_v17 }
 0x327   : > { %5832 = vmatmul.msk.f32.gmra.mxu1 %vm10992_vm7, %v10862_v6  ;;  %v3765_v52 = vpop.f32.mrf.mxu3  ;;  %10995 = vst [vmem:[#allocation20_spill] sm:$0xff] %v8295_v17  ;;  %vm10648_vm7 = vcmp.eq.s32.totalorder %v10996_v19, %v7733_v62 }
 0x328   : > { %v2868_v61 = vadd.f32 %v2867_v32, %v2579_v45  ;;  %5767 = vmatmul.msk.f32.gmra.mxu0 %vm10994_vm8, %v10862_v6  ;;  %vm10998_vm8 = vcmp.eq.s32.totalorder %v10984_v35, %v6590_v50  ;;  %v5602_v27 = vsel %vm10648_vm7, 1.0, %v10935_v63 }
 0x32a   : > { %3303 = vmatmul.f32.gmra.mxu2 %v3302_v47  ;;  %v3169_v24 = vadd.f32 %v3168_v55, %v2868_v61  ;;  %v10999_v55 = vld [vmem:[#allocation22_spill] sm:$0xff]  ;;  %v3310_v47 = vand.u32 4294901760, %v3309_v49  ;;  %v3317_v49 = vsub.f32 %v8295_v17, %v10635_v36 }
 0x32c   : > { %v2875_v20 = vpop.f32.mrf.mxu1  ;;  %5896 = vmatmul.msk.f32.gmra.mxu3 %vm10633_vm9, %v10862_v6  ;;  %v8306_v42 = vadd.f32 %v3765_v52, %v3169_v24  ;;  %vm11000_vm9 = vcmp.eq.s32.totalorder %v10979_v43, %v6590_v50  ;;  %v8322_v52 = vsub.f32 %v5602_v27, %v5602_v27 }
 0x32d   : > { %v3176_v32 = vpop.f32.mrf.mxu2  ;;  %v2582_v61 = vpop.f32.mrf.mxu0 }
 0x32e   : > { %10997 = vst [vmem:[#allocation114_spill] sm:$0xff] %v8306_v42  ;;  %v2583_v45 = vadd.f32 %v2582_v61, %v10999_v55  ;;  %v11002_v61 = vld [vmem:[#allocation23_spill] sm:$0xff]  ;;  %v10640_v43 = vand.u32 4294901760, %v8322_v52 }
 0x32f   : > { %5833 = vmatmul.msk.f32.gmra.mxu1 %vm10998_vm8, %v10862_v6  ;;  %v3769_v14 = vpop.f32.mrf.mxu3  ;;  %11001 = vst [vmem:[#allocation22_spill] sm:$0xff] %v8322_v52  ;;  %vm10653_vm8 = vcmp.eq.s32.totalorder %v11002_v61, %v7733_v62 }
 0x330   : > { %v2872_v10 = vadd.f32 %v2871_v15, %v2583_v45  ;;  %5768 = vmatmul.msk.f32.gmra.mxu0 %vm11000_vm9, %v10862_v6  ;;  %vm11004_vm9 = vcmp.eq.s32.totalorder %v10990_v8, %v6590_v50  ;;  %v5604_v36 = vsel %vm10653_vm8, 1.0, %v10935_v63 }
 0x332   : > { %3311 = vmatmul.f32.gmra.mxu2 %v3310_v47  ;;  %v3177_v42 = vadd.f32 %v3176_v32, %v2872_v10  ;;  %v11005_v32 = vld [vmem:[#allocation24_spill] sm:$0xff]  ;;  %v3318_v47 = vand.u32 4294901760, %v3317_v49  ;;  %v3325_v49 = vsub.f32 %v8322_v52, %v10640_v43 }
 0x334   : > { %v2879_v24 = vpop.f32.mrf.mxu1  ;;  %5897 = vmatmul.msk.f32.gmra.mxu3 %vm10638_vm10, %v10862_v6  ;;  %v8333_v55 = vadd.f32 %v3769_v14, %v3177_v42  ;;  %vm11006_vm10 = vcmp.eq.s32.totalorder %v10984_v35, %v6590_v50  ;;  %v8349_v14 = vsub.f32 %v5604_v36, %v5604_v36 }
 0x335   : > { %v3184_v15 = vpop.f32.mrf.mxu2  ;;  %v2586_v27 = vpop.f32.mrf.mxu0 }
 0x336   : > { %11003 = vst [vmem:[#allocation115_spill] sm:$0xff] %v8333_v55  ;;  %v2587_v45 = vadd.f32 %v2586_v27, %v11005_v32  ;;  %v11008_v27 = vld [vmem:[#allocation25_spill] sm:$0xff]  ;;  %v10645_v35 = vand.u32 4294901760, %v8349_v14 }
 0x337   : > { %5834 = vmatmul.msk.f32.gmra.mxu1 %vm11004_vm9, %v10862_v6  ;;  %v3773_v10 = vpop.f32.mrf.mxu3  ;;  %11007 = vst [vmem:[#allocation24_spill] sm:$0xff] %v8349_v14  ;;  %vm10658_vm9 = vcmp.eq.s32.totalorder %v11008_v27, %v7733_v62 }
 0x338   : > { %v2876_v17 = vadd.f32 %v2875_v20, %v2587_v45  ;;  %5769 = vmatmul.msk.f32.gmra.mxu0 %vm11006_vm10, %v10862_v6  ;;  %vm11010_vm10 = vcmp.eq.s32.totalorder %v10996_v19, %v6590_v50  ;;  %v5606_v43 = vsel %vm10658_vm9, 1.0, %v10935_v63 }
 0x33a   : > { %3319 = vmatmul.f32.gmra.mxu2 %v3318_v47  ;;  %v3185_v55 = vadd.f32 %v3184_v15, %v2876_v17  ;;  %v11011_v15 = vld [vmem:[#allocation26_spill] sm:$0xff]  ;;  %v3326_v47 = vand.u32 4294901760, %v3325_v49  ;;  %v3333_v49 = vsub.f32 %v8349_v14, %v10645_v35 }
 0x33c   : > { %v2883_v42 = vpop.f32.mrf.mxu1  ;;  %5898 = vmatmul.msk.f32.gmra.mxu3 %vm10643_vm11, %v10862_v6  ;;  %v8360_v32 = vadd.f32 %v3773_v10, %v3185_v55  ;;  %vm11012_vm11 = vcmp.eq.s32.totalorder %v10990_v8, %v6590_v50  ;;  %v8376_v10 = vsub.f32 %v5606_v43, %v5606_v43 }
 0x33d   : > { %v3192_v20 = vpop.f32.mrf.mxu2  ;;  %v2590_v36 = vpop.f32.mrf.mxu0 }
 0x33e   : > { %11009 = vst [vmem:[#allocation116_spill] sm:$0xff] %v8360_v32  ;;  %v2591_v45 = vadd.f32 %v2590_v36, %v11011_v15  ;;  %v11014_v36 = vld [vmem:[#allocation27_spill] sm:$0xff]  ;;  %v10650_v8 = vand.u32 4294901760, %v8376_v10 }
 0x33f   : > { %5835 = vmatmul.msk.f32.gmra.mxu1 %vm11010_vm10, %v10862_v6  ;;  %v3777_v17 = vpop.f32.mrf.mxu3  ;;  %11013 = vst [vmem:[#allocation26_spill] sm:$0xff] %v8376_v10  ;;  %vm10663_vm10 = vcmp.eq.s32.totalorder %v11014_v36, %v7733_v62 }
 0x340   : > { %v2880_v52 = vadd.f32 %v2879_v24, %v2591_v45  ;;  %5770 = vmatmul.msk.f32.gmra.mxu0 %vm11012_vm11, %v10862_v6  ;;  %vm11016_vm11 = vcmp.eq.s32.totalorder %v11002_v61, %v6590_v50  ;;  %v5608_v35 = vsel %vm10663_vm10, 1.0, %v10935_v63 }
 0x342   : > { %3327 = vmatmul.f32.gmra.mxu2 %v3326_v47  ;;  %v3193_v32 = vadd.f32 %v3192_v20, %v2880_v52  ;;  %v11017_v20 = vld [vmem:[#allocation28_spill] sm:$0xff]  ;;  %v3334_v47 = vand.u32 4294901760, %v3333_v49  ;;  %v3341_v49 = vsub.f32 %v8376_v10, %v10650_v8 }
 0x344   : > { %v2887_v55 = vpop.f32.mrf.mxu1  ;;  %5899 = vmatmul.msk.f32.gmra.mxu3 %vm10648_vm7, %v10862_v6  ;;  %v8387_v15 = vadd.f32 %v3777_v17, %v3193_v32  ;;  %vm11018_vm7 = vcmp.eq.s32.totalorder %v10996_v19, %v6590_v50  ;;  %v8403_v17 = vsub.f32 %v5608_v35, %v5608_v35 }
 0x345   : > { %v3200_v24 = vpop.f32.mrf.mxu2  ;;  %v2594_v43 = vpop.f32.mrf.mxu0 }
 0x346   : > { %11015 = vst [vmem:[#allocation117_spill] sm:$0xff] %v8387_v15  ;;  %v2595_v45 = vadd.f32 %v2594_v43, %v11017_v20  ;;  %v11020_v43 = vld [vmem:[#allocation29_spill] sm:$0xff]  ;;  %v10655_v19 = vand.u32 4294901760, %v8403_v17 }
 0x347   : > { %5836 = vmatmul.msk.f32.gmra.mxu1 %vm11016_vm11, %v10862_v6  ;;  %v3781_v52 = vpop.f32.mrf.mxu3  ;;  %11019 = vst [vmem:[#allocation28_spill] sm:$0xff] %v8403_v17  ;;  %vm10668_vm11 = vcmp.eq.s32.totalorder %v11020_v43, %v7733_v62 }
 0x348   : > { %v2884_v14 = vadd.f32 %v2883_v42, %v2595_v45  ;;  %5771 = vmatmul.msk.f32.gmra.mxu0 %vm11018_vm7, %v10862_v6  ;;  %vm11022_vm7 = vcmp.eq.s32.totalorder %v11008_v27, %v6590_v50  ;;  %v5610_v8 = vsel %vm10668_vm11, 1.0, %v10935_v63 }
 0x34a   : > { %3335 = vmatmul.f32.gmra.mxu2 %v3334_v47  ;;  %v3201_v15 = vadd.f32 %v3200_v24, %v2884_v14  ;;  %v11023_v24 = vld [vmem:[#allocation30_spill] sm:$0xff]  ;;  %v3342_v47 = vand.u32 4294901760, %v3341_v49  ;;  %v3349_v49 = vsub.f32 %v8403_v17, %v10655_v19 }
 0x34c   : > { %v2891_v32 = vpop.f32.mrf.mxu1  ;;  %5900 = vmatmul.msk.f32.gmra.mxu3 %vm10653_vm8, %v10862_v6  ;;  %v8414_v20 = vadd.f32 %v3781_v52, %v3201_v15  ;;  %vm11024_vm8 = vcmp.eq.s32.totalorder %v11002_v61, %v6590_v50  ;;  %v8430_v52 = vsub.f32 %v5610_v8, %v5610_v8 }
 0x34d   : > { %v3208_v42 = vpop.f32.mrf.mxu2  ;;  %v2598_v35 = vpop.f32.mrf.mxu0 }
 0x34e   : > { %11021 = vst [vmem:[#allocation118_spill] sm:$0xff] %v8414_v20  ;;  %v2599_v45 = vadd.f32 %v2598_v35, %v11023_v24  ;;  %v11026_v35 = vld [vmem:[#allocation31_spill] sm:$0xff]  ;;  %v10660_v61 = vand.u32 4294901760, %v8430_v52 }
 0x34f   : > { %5837 = vmatmul.msk.f32.gmra.mxu1 %vm11022_vm7, %v10862_v6  ;;  %v3785_v14 = vpop.f32.mrf.mxu3  ;;  %11025 = vst [vmem:[#allocation30_spill] sm:$0xff] %v8430_v52  ;;  %vm10673_vm7 = vcmp.eq.s32.totalorder %v11026_v35, %v7733_v62 }
 0x350   : > { %v2888_v10 = vadd.f32 %v2887_v55, %v2599_v45  ;;  %5772 = vmatmul.msk.f32.gmra.mxu0 %vm11024_vm8, %v10862_v6  ;;  %vm11028_vm8 = vcmp.eq.s32.totalorder %v11014_v36, %v6590_v50  ;;  %v5612_v19 = vsel %vm10673_vm7, 1.0, %v10935_v63 }
 0x352   : > { %3343 = vmatmul.f32.gmra.mxu2 %v3342_v47  ;;  %v3209_v20 = vadd.f32 %v3208_v42, %v2888_v10  ;;  %v11029_v42 = vld [vmem:[#allocation32_spill] sm:$0xff]  ;;  %v3350_v47 = vand.u32 4294901760, %v3349_v49  ;;  %v3357_v49 = vsub.f32 %v8430_v52, %v10660_v61 }
 0x354   : > { %v2895_v15 = vpop.f32.mrf.mxu1  ;;  %5901 = vmatmul.msk.f32.gmra.mxu3 %vm10658_vm9, %v10862_v6  ;;  %v8441_v24 = vadd.f32 %v3785_v14, %v3209_v20  ;;  %vm11030_vm9 = vcmp.eq.s32.totalorder %v11008_v27, %v6590_v50  ;;  %v8457_v14 = vsub.f32 %v5612_v19, %v5612_v19 }
 0x355   : > { %v3216_v55 = vpop.f32.mrf.mxu2  ;;  %v2602_v8 = vpop.f32.mrf.mxu0 }
 0x356   : > { %11027 = vst [vmem:[#allocation119_spill] sm:$0xff] %v8441_v24  ;;  %v2603_v45 = vadd.f32 %v2602_v8, %v11029_v42  ;;  %v11032_v8 = vld [vmem:[#allocation33_spill] sm:$0xff]  ;;  %v10665_v27 = vand.u32 4294901760, %v8457_v14 }
 0x357   : > { %5838 = vmatmul.msk.f32.gmra.mxu1 %vm11028_vm8, %v10862_v6  ;;  %v3789_v10 = vpop.f32.mrf.mxu3  ;;  %11031 = vst [vmem:[#allocation32_spill] sm:$0xff] %v8457_v14  ;;  %vm10678_vm8 = vcmp.eq.s32.totalorder %v11032_v8, %v7733_v62 }
 0x358   : > { %v2892_v17 = vadd.f32 %v2891_v32, %v2603_v45  ;;  %5773 = vmatmul.msk.f32.gmra.mxu0 %vm11030_vm9, %v10862_v6  ;;  %vm11034_vm9 = vcmp.eq.s32.totalorder %v11020_v43, %v6590_v50  ;;  %v5614_v61 = vsel %vm10678_vm8, 1.0, %v10935_v63 }
 0x35a   : > { %3351 = vmatmul.f32.gmra.mxu2 %v3350_v47  ;;  %v3217_v24 = vadd.f32 %v3216_v55, %v2892_v17  ;;  %v11035_v55 = vld [vmem:[#allocation34_spill] sm:$0xff]  ;;  %v3358_v47 = vand.u32 4294901760, %v3357_v49  ;;  %v3365_v49 = vsub.f32 %v8457_v14, %v10665_v27 }
 0x35c   : > { %v2899_v20 = vpop.f32.mrf.mxu1  ;;  %5902 = vmatmul.msk.f32.gmra.mxu3 %vm10663_vm10, %v10862_v6  ;;  %v8468_v42 = vadd.f32 %v3789_v10, %v3217_v24  ;;  %vm11036_vm10 = vcmp.eq.s32.totalorder %v11014_v36, %v6590_v50  ;;  %v8484_v10 = vsub.f32 %v5614_v61, %v5614_v61 }
 0x35d   : > { %v3224_v32 = vpop.f32.mrf.mxu2  ;;  %v2606_v19 = vpop.f32.mrf.mxu0 }
 0x35e   : > { %11033 = vst [vmem:[#allocation120_spill] sm:$0xff] %v8468_v42  ;;  %v2607_v45 = vadd.f32 %v2606_v19, %v11035_v55  ;;  %v11038_v19 = vld [vmem:[#allocation35_spill] sm:$0xff]  ;;  %v10670_v36 = vand.u32 4294901760, %v8484_v10 }
 0x35f   : > { %5839 = vmatmul.msk.f32.gmra.mxu1 %vm11034_vm9, %v10862_v6  ;;  %v3793_v17 = vpop.f32.mrf.mxu3  ;;  %11037 = vst [vmem:[#allocation34_spill] sm:$0xff] %v8484_v10  ;;  %vm10683_vm9 = vcmp.eq.s32.totalorder %v11038_v19, %v7733_v62 }
 0x360   : > { %v2896_v52 = vadd.f32 %v2895_v15, %v2607_v45  ;;  %5774 = vmatmul.msk.f32.gmra.mxu0 %vm11036_vm10, %v10862_v6  ;;  %vm11040_vm10 = vcmp.eq.s32.totalorder %v11026_v35, %v6590_v50  ;;  %v5616_v27 = vsel %vm10683_vm9, 1.0, %v10935_v63 }
 0x362   : > { %3359 = vmatmul.f32.gmra.mxu2 %v3358_v47  ;;  %v3225_v42 = vadd.f32 %v3224_v32, %v2896_v52  ;;  %v11041_v32 = vld [vmem:[#allocation36_spill] sm:$0xff]  ;;  %v3366_v47 = vand.u32 4294901760, %v3365_v49  ;;  %v3373_v49 = vsub.f32 %v8484_v10, %v10670_v36 }
 0x364   : > { %v2903_v24 = vpop.f32.mrf.mxu1  ;;  %5903 = vmatmul.msk.f32.gmra.mxu3 %vm10668_vm11, %v10862_v6  ;;  %v8495_v55 = vadd.f32 %v3793_v17, %v3225_v42  ;;  %vm11042_vm11 = vcmp.eq.s32.totalorder %v11020_v43, %v6590_v50  ;;  %v8511_v17 = vsub.f32 %v5616_v27, %v5616_v27 }
 0x365   : > { %v3232_v15 = vpop.f32.mrf.mxu2  ;;  %v2610_v61 = vpop.f32.mrf.mxu0 }
 0x366   : > { %11039 = vst [vmem:[#allocation121_spill] sm:$0xff] %v8495_v55  ;;  %v2611_v45 = vadd.f32 %v2610_v61, %v11041_v32  ;;  %v11044_v61 = vld [vmem:[#allocation37_spill] sm:$0xff]  ;;  %v10675_v43 = vand.u32 4294901760, %v8511_v17 }
 0x367   : > { %5840 = vmatmul.msk.f32.gmra.mxu1 %vm11040_vm10, %v10862_v6  ;;  %v3797_v52 = vpop.f32.mrf.mxu3  ;;  %11043 = vst [vmem:[#allocation36_spill] sm:$0xff] %v8511_v17  ;;  %vm10688_vm10 = vcmp.eq.s32.totalorder %v11044_v61, %v7733_v62 }
 0x368   : > { %v2900_v14 = vadd.f32 %v2899_v20, %v2611_v45  ;;  %5775 = vmatmul.msk.f32.gmra.mxu0 %vm11042_vm11, %v10862_v6  ;;  %vm11046_vm11 = vcmp.eq.s32.totalorder %v11032_v8, %v6590_v50  ;;  %v5618_v36 = vsel %vm10688_vm10, 1.0, %v10935_v63 }
 0x36a   : > { %3367 = vmatmul.f32.gmra.mxu2 %v3366_v47  ;;  %v3233_v55 = vadd.f32 %v3232_v15, %v2900_v14  ;;  %v11047_v15 = vld [vmem:[#allocation38_spill] sm:$0xff]  ;;  %v3374_v47 = vand.u32 4294901760, %v3373_v49  ;;  %v3381_v49 = vsub.f32 %v8511_v17, %v10675_v43 }
 0x36c   : > { %v2907_v42 = vpop.f32.mrf.mxu1  ;;  %5904 = vmatmul.msk.f32.gmra.mxu3 %vm10673_vm7, %v10862_v6  ;;  %v8522_v32 = vadd.f32 %v3797_v52, %v3233_v55  ;;  %vm11048_vm7 = vcmp.eq.s32.totalorder %v11026_v35, %v6590_v50  ;;  %v8538_v52 = vsub.f32 %v5618_v36, %v5618_v36 }
 0x36d   : > { %v3240_v20 = vpop.f32.mrf.mxu2  ;;  %v2614_v27 = vpop.f32.mrf.mxu0 }
 0x36e   : > { %11045 = vst [vmem:[#allocation122_spill] sm:$0xff] %v8522_v32  ;;  %v2615_v45 = vadd.f32 %v2614_v27, %v11047_v15  ;;  %v11050_v27 = vld [vmem:[#allocation39_spill] sm:$0xff]  ;;  %v10680_v35 = vand.u32 4294901760, %v8538_v52 }
 0x36f   : > { %5841 = vmatmul.msk.f32.gmra.mxu1 %vm11046_vm11, %v10862_v6  ;;  %v3801_v14 = vpop.f32.mrf.mxu3  ;;  %11049 = vst [vmem:[#allocation38_spill] sm:$0xff] %v8538_v52  ;;  %vm10693_vm11 = vcmp.eq.s32.totalorder %v11050_v27, %v7733_v62 }
 0x370   : > { %v2904_v10 = vadd.f32 %v2903_v24, %v2615_v45  ;;  %5776 = vmatmul.msk.f32.gmra.mxu0 %vm11048_vm7, %v10862_v6  ;;  %vm11052_vm7 = vcmp.eq.s32.totalorder %v11038_v19, %v6590_v50  ;;  %v5620_v43 = vsel %vm10693_vm11, 1.0, %v10935_v63 }
 0x372   : > { %3375 = vmatmul.f32.gmra.mxu2 %v3374_v47  ;;  %v3241_v32 = vadd.f32 %v3240_v20, %v2904_v10  ;;  %v11053_v20 = vld [vmem:[#allocation40_spill] sm:$0xff]  ;;  %v3382_v47 = vand.u32 4294901760, %v3381_v49  ;;  %v3389_v49 = vsub.f32 %v8538_v52, %v10680_v35 }
 0x374   : > { %v2911_v55 = vpop.f32.mrf.mxu1  ;;  %5905 = vmatmul.msk.f32.gmra.mxu3 %vm10678_vm8, %v10862_v6  ;;  %v8549_v15 = vadd.f32 %v3801_v14, %v3241_v32  ;;  %vm11054_vm8 = vcmp.eq.s32.totalorder %v11032_v8, %v6590_v50  ;;  %v8565_v14 = vsub.f32 %v5620_v43, %v5620_v43 }
 0x375   : > { %v3248_v24 = vpop.f32.mrf.mxu2  ;;  %v2618_v36 = vpop.f32.mrf.mxu0 }
 0x376   : > { %11051 = vst [vmem:[#allocation123_spill] sm:$0xff] %v8549_v15  ;;  %v2619_v45 = vadd.f32 %v2618_v36, %v11053_v20  ;;  %v11056_v36 = vld [vmem:[#allocation41_spill] sm:$0xff]  ;;  %v10685_v8 = vand.u32 4294901760, %v8565_v14 }
 0x377   : > { %5842 = vmatmul.msk.f32.gmra.mxu1 %vm11052_vm7, %v10862_v6  ;;  %v3805_v10 = vpop.f32.mrf.mxu3  ;;  %11055 = vst [vmem:[#allocation40_spill] sm:$0xff] %v8565_v14  ;;  %vm10698_vm7 = vcmp.eq.s32.totalorder %v11056_v36, %v7733_v62 }
 0x378   : > { %v2908_v17 = vadd.f32 %v2907_v42, %v2619_v45  ;;  %5777 = vmatmul.msk.f32.gmra.mxu0 %vm11054_vm8, %v10862_v6  ;;  %vm11058_vm8 = vcmp.eq.s32.totalorder %v11044_v61, %v6590_v50  ;;  %v5622_v35 = vsel %vm10698_vm7, 1.0, %v10935_v63 }
 0x37a   : > { %3383 = vmatmul.f32.gmra.mxu2 %v3382_v47  ;;  %v3249_v15 = vadd.f32 %v3248_v24, %v2908_v17  ;;  %v11059_v24 = vld [vmem:[#allocation42_spill] sm:$0xff]  ;;  %v3390_v47 = vand.u32 4294901760, %v3389_v49  ;;  %v3397_v49 = vsub.f32 %v8565_v14, %v10685_v8 }
 0x37c   : > { %v2915_v32 = vpop.f32.mrf.mxu1  ;;  %5906 = vmatmul.msk.f32.gmra.mxu3 %vm10683_vm9, %v10862_v6  ;;  %v8576_v20 = vadd.f32 %v3805_v10, %v3249_v15  ;;  %vm11060_vm9 = vcmp.eq.s32.totalorder %v11038_v19, %v6590_v50  ;;  %v8592_v10 = vsub.f32 %v5622_v35, %v5622_v35 }
 0x37d   : > { %v3256_v42 = vpop.f32.mrf.mxu2  ;;  %v2622_v43 = vpop.f32.mrf.mxu0 }
 0x37e   : > { %11057 = vst [vmem:[#allocation124_spill] sm:$0xff] %v8576_v20  ;;  %v2623_v45 = vadd.f32 %v2622_v43, %v11059_v24  ;;  %v11062_v43 = vld [vmem:[#allocation43_spill] sm:$0xff]  ;;  %v10690_v19 = vand.u32 4294901760, %v8592_v10 }
 0x37f   : > { %5843 = vmatmul.msk.f32.gmra.mxu1 %vm11058_vm8, %v10862_v6  ;;  %v3809_v17 = vpop.f32.mrf.mxu3  ;;  %11061 = vst [vmem:[#allocation42_spill] sm:$0xff] %v8592_v10  ;;  %vm10703_vm8 = vcmp.eq.s32.totalorder %v11062_v43, %v7733_v62 }
 0x380   : > { %v2912_v52 = vadd.f32 %v2911_v55, %v2623_v45  ;;  %5778 = vmatmul.msk.f32.gmra.mxu0 %vm11060_vm9, %v10862_v6  ;;  %vm11064_vm9 = vcmp.eq.s32.totalorder %v11050_v27, %v6590_v50  ;;  %v5624_v8 = vsel %vm10703_vm8, 1.0, %v10935_v63 }
 0x382   : > { %3391 = vmatmul.f32.gmra.mxu2 %v3390_v47  ;;  %v3257_v20 = vadd.f32 %v3256_v42, %v2912_v52  ;;  %v11065_v42 = vld [vmem:[#allocation44_spill] sm:$0xff]  ;;  %v3398_v47 = vand.u32 4294901760, %v3397_v49  ;;  %v3405_v49 = vsub.f32 %v8592_v10, %v10690_v19 }
 0x384   : > { %v2919_v15 = vpop.f32.mrf.mxu1  ;;  %5907 = vmatmul.msk.f32.gmra.mxu3 %vm10688_vm10, %v10862_v6  ;;  %v8603_v24 = vadd.f32 %v3809_v17, %v3257_v20  ;;  %vm11066_vm10 = vcmp.eq.s32.totalorder %v11044_v61, %v6590_v50  ;;  %v8619_v17 = vsub.f32 %v5624_v8, %v5624_v8 }
 0x385   : > { %v3264_v55 = vpop.f32.mrf.mxu2  ;;  %v2626_v35 = vpop.f32.mrf.mxu0 }
 0x386   : > { %11063 = vst [vmem:[#allocation125_spill] sm:$0xff] %v8603_v24  ;;  %v2627_v45 = vadd.f32 %v2626_v35, %v11065_v42  ;;  %v11068_v35 = vld [vmem:[#allocation45_spill] sm:$0xff]  ;;  %v10695_v61 = vand.u32 4294901760, %v8619_v17 }
 0x387   : > { %5844 = vmatmul.msk.f32.gmra.mxu1 %vm11064_vm9, %v10862_v6  ;;  %v3813_v52 = vpop.f32.mrf.mxu3  ;;  %11067 = vst [vmem:[#allocation44_spill] sm:$0xff] %v8619_v17  ;;  %vm10708_vm9 = vcmp.eq.s32.totalorder %v11068_v35, %v7733_v62 }
 0x388   : > { %v2916_v14 = vadd.f32 %v2915_v32, %v2627_v45  ;;  %5779 = vmatmul.msk.f32.gmra.mxu0 %vm11066_vm10, %v10862_v6  ;;  %vm11070_vm10 = vcmp.eq.s32.totalorder %v11056_v36, %v6590_v50  ;;  %v5626_v19 = vsel %vm10708_vm9, 1.0, %v10935_v63 }
 0x38a   : > { %3399 = vmatmul.f32.gmra.mxu2 %v3398_v47  ;;  %v3265_v24 = vadd.f32 %v3264_v55, %v2916_v14  ;;  %v11071_v55 = vld [vmem:[#allocation46_spill] sm:$0xff]  ;;  %v3406_v47 = vand.u32 4294901760, %v3405_v49  ;;  %v3413_v49 = vsub.f32 %v8619_v17, %v10695_v61 }
 0x38c   : > { %v2923_v20 = vpop.f32.mrf.mxu1  ;;  %5908 = vmatmul.msk.f32.gmra.mxu3 %vm10693_vm11, %v10862_v6  ;;  %v8630_v42 = vadd.f32 %v3813_v52, %v3265_v24  ;;  %vm11072_vm11 = vcmp.eq.s32.totalorder %v11050_v27, %v6590_v50  ;;  %v8646_v52 = vsub.f32 %v5626_v19, %v5626_v19 }
 0x38d   : > { %v3272_v32 = vpop.f32.mrf.mxu2  ;;  %v2630_v8 = vpop.f32.mrf.mxu0 }
 0x38e   : > { %11069 = vst [vmem:[#allocation126_spill] sm:$0xff] %v8630_v42  ;;  %v2631_v45 = vadd.f32 %v2630_v8, %v11071_v55  ;;  %v11074_v8 = vld [vmem:[#allocation47_spill] sm:$0xff]  ;;  %v10700_v27 = vand.u32 4294901760, %v8646_v52 }
 0x38f   : > { %5845 = vmatmul.msk.f32.gmra.mxu1 %vm11070_vm10, %v10862_v6  ;;  %v3817_v14 = vpop.f32.mrf.mxu3  ;;  %11073 = vst [vmem:[#allocation46_spill] sm:$0xff] %v8646_v52  ;;  %vm10713_vm10 = vcmp.eq.s32.totalorder %v11074_v8, %v7733_v62 }
 0x390   : > { %v2920_v10 = vadd.f32 %v2919_v15, %v2631_v45  ;;  %5780 = vmatmul.msk.f32.gmra.mxu0 %vm11072_vm11, %v10862_v6  ;;  %vm11076_vm11 = vcmp.eq.s32.totalorder %v11062_v43, %v6590_v50  ;;  %v5628_v61 = vsel %vm10713_vm10, 1.0, %v10935_v63 }
 0x392   : > { %3407 = vmatmul.f32.gmra.mxu2 %v3406_v47  ;;  %v3273_v42 = vadd.f32 %v3272_v32, %v2920_v10  ;;  %v11077_v32 = vld [vmem:[#allocation48_spill] sm:$0xff]  ;;  %v3414_v47 = vand.u32 4294901760, %v3413_v49  ;;  %v3421_v49 = vsub.f32 %v8646_v52, %v10700_v27 }
 0x394   : > { %v2927_v24 = vpop.f32.mrf.mxu1  ;;  %5909 = vmatmul.msk.f32.gmra.mxu3 %vm10698_vm7, %v10862_v6  ;;  %v8657_v55 = vadd.f32 %v3817_v14, %v3273_v42  ;;  %vm11078_vm7 = vcmp.eq.s32.totalorder %v11056_v36, %v6590_v50  ;;  %v8673_v14 = vsub.f32 %v5628_v61, %v5628_v61 }
 0x395   : > { %v3280_v15 = vpop.f32.mrf.mxu2  ;;  %v2634_v19 = vpop.f32.mrf.mxu0 }
 0x396   : > { %11075 = vst [vmem:[#allocation127_spill] sm:$0xff] %v8657_v55  ;;  %v2635_v45 = vadd.f32 %v2634_v19, %v11077_v32  ;;  %v11080_v19 = vld [vmem:[#allocation49_spill] sm:$0xff]  ;;  %v10705_v36 = vand.u32 4294901760, %v8673_v14 }
 0x397   : > { %5846 = vmatmul.msk.f32.gmra.mxu1 %vm11076_vm11, %v10862_v6  ;;  %v3821_v10 = vpop.f32.mrf.mxu3  ;;  %11079 = vst [vmem:[#allocation48_spill] sm:$0xff] %v8673_v14  ;;  %vm10718_vm11 = vcmp.eq.s32.totalorder %v11080_v19, %v7733_v62 }
 0x398   : > { %v2924_v17 = vadd.f32 %v2923_v20, %v2635_v45  ;;  %5781 = vmatmul.msk.f32.gmra.mxu0 %vm11078_vm7, %v10862_v6  ;;  %vm11082_vm7 = vcmp.eq.s32.totalorder %v11068_v35, %v6590_v50  ;;  %v5630_v27 = vsel %vm10718_vm11, 1.0, %v10935_v63 }
 0x39a   : > { %3415 = vmatmul.f32.gmra.mxu2 %v3414_v47  ;;  %v3281_v55 = vadd.f32 %v3280_v15, %v2924_v17  ;;  %v11083_v15 = vld [vmem:[#allocation50_spill] sm:$0xff]  ;;  %v3422_v47 = vand.u32 4294901760, %v3421_v49  ;;  %v3429_v49 = vsub.f32 %v8673_v14, %v10705_v36 }
 0x39c   : > { %v2931_v42 = vpop.f32.mrf.mxu1  ;;  %5910 = vmatmul.msk.f32.gmra.mxu3 %vm10703_vm8, %v10862_v6  ;;  %v8684_v32 = vadd.f32 %v3821_v10, %v3281_v55  ;;  %vm11084_vm8 = vcmp.eq.s32.totalorder %v11062_v43, %v6590_v50  ;;  %v8700_v10 = vsub.f32 %v5630_v27, %v5630_v27 }
 0x39d   : > { %v3288_v20 = vpop.f32.mrf.mxu2  ;;  %v2638_v61 = vpop.f32.mrf.mxu0 }
 0x39e   : > { %11081 = vst [vmem:[#allocation128_spill] sm:$0xff] %v8684_v32  ;;  %v2639_v45 = vadd.f32 %v2638_v61, %v11083_v15  ;;  %v11086_v61 = vld [vmem:[#allocation51_spill] sm:$0xff]  ;;  %v10710_v43 = vand.u32 4294901760, %v8700_v10 }
 0x39f   : > { %5847 = vmatmul.msk.f32.gmra.mxu1 %vm11082_vm7, %v10862_v6  ;;  %v3825_v17 = vpop.f32.mrf.mxu3  ;;  %11085 = vst [vmem:[#allocation50_spill] sm:$0xff] %v8700_v10  ;;  %vm10723_vm7 = vcmp.eq.s32.totalorder %v11086_v61, %v7733_v62 }
 0x3a0   : > { %v2928_v52 = vadd.f32 %v2927_v24, %v2639_v45  ;;  %5782 = vmatmul.msk.f32.gmra.mxu0 %vm11084_vm8, %v10862_v6  ;;  %vm11088_vm8 = vcmp.eq.s32.totalorder %v11074_v8, %v6590_v50  ;;  %v5632_v36 = vsel %vm10723_vm7, 1.0, %v10935_v63 }
 0x3a2   : > { %3423 = vmatmul.f32.gmra.mxu2 %v3422_v47  ;;  %v3289_v32 = vadd.f32 %v3288_v20, %v2928_v52  ;;  %v11089_v20 = vld [vmem:[#allocation52_spill] sm:$0xff]  ;;  %v3430_v47 = vand.u32 4294901760, %v3429_v49  ;;  %v3437_v49 = vsub.f32 %v8700_v10, %v10710_v43 }
 0x3a4   : > { %v2935_v55 = vpop.f32.mrf.mxu1  ;;  %5911 = vmatmul.msk.f32.gmra.mxu3 %vm10708_vm9, %v10862_v6  ;;  %v8711_v15 = vadd.f32 %v3825_v17, %v3289_v32  ;;  %vm11090_vm9 = vcmp.eq.s32.totalorder %v11068_v35, %v6590_v50  ;;  %v8727_v17 = vsub.f32 %v5632_v36, %v5632_v36 }
 0x3a5   : > { %v3296_v24 = vpop.f32.mrf.mxu2  ;;  %v2642_v27 = vpop.f32.mrf.mxu0 }
 0x3a6   : > { %11087 = vst [vmem:[#allocation129_spill] sm:$0xff] %v8711_v15  ;;  %v2643_v45 = vadd.f32 %v2642_v27, %v11089_v20  ;;  %v11092_v27 = vld [vmem:[#allocation53_spill] sm:$0xff]  ;;  %v10715_v35 = vand.u32 4294901760, %v8727_v17 }
 0x3a7   : > { %5848 = vmatmul.msk.f32.gmra.mxu1 %vm11088_vm8, %v10862_v6  ;;  %v3829_v52 = vpop.f32.mrf.mxu3  ;;  %11091 = vst [vmem:[#allocation52_spill] sm:$0xff] %v8727_v17  ;;  %vm10728_vm8 = vcmp.eq.s32.totalorder %v11092_v27, %v7733_v62 }
 0x3a8   : > { %v2932_v14 = vadd.f32 %v2931_v42, %v2643_v45  ;;  %5783 = vmatmul.msk.f32.gmra.mxu0 %vm11090_vm9, %v10862_v6  ;;  %vm11094_vm9 = vcmp.eq.s32.totalorder %v11080_v19, %v6590_v50  ;;  %v5634_v43 = vsel %vm10728_vm8, 1.0, %v10935_v63 }
 0x3aa   : > { %3431 = vmatmul.f32.gmra.mxu2 %v3430_v47  ;;  %v3297_v15 = vadd.f32 %v3296_v24, %v2932_v14  ;;  %v11095_v24 = vld [vmem:[#allocation54_spill] sm:$0xff]  ;;  %v3438_v47 = vand.u32 4294901760, %v3437_v49  ;;  %v3445_v49 = vsub.f32 %v8727_v17, %v10715_v35 }
 0x3ac   : > { %v2939_v32 = vpop.f32.mrf.mxu1  ;;  %5912 = vmatmul.msk.f32.gmra.mxu3 %vm10713_vm10, %v10862_v6  ;;  %v8738_v20 = vadd.f32 %v3829_v52, %v3297_v15  ;;  %vm11096_vm10 = vcmp.eq.s32.totalorder %v11074_v8, %v6590_v50  ;;  %v8754_v52 = vsub.f32 %v5634_v43, %v5634_v43 }
 0x3ad   : > { %v3304_v42 = vpop.f32.mrf.mxu2  ;;  %v2646_v36 = vpop.f32.mrf.mxu0 }
 0x3ae   : > { %11093 = vst [vmem:[#allocation130_spill] sm:$0xff] %v8738_v20  ;;  %v2647_v45 = vadd.f32 %v2646_v36, %v11095_v24  ;;  %v11098_v36 = vld [vmem:[#allocation55_spill] sm:$0xff]  ;;  %v10720_v8 = vand.u32 4294901760, %v8754_v52 }
 0x3af   : > { %5849 = vmatmul.msk.f32.gmra.mxu1 %vm11094_vm9, %v10862_v6  ;;  %v3833_v14 = vpop.f32.mrf.mxu3  ;;  %11097 = vst [vmem:[#allocation54_spill] sm:$0xff] %v8754_v52  ;;  %vm10733_vm9 = vcmp.eq.s32.totalorder %v11098_v36, %v7733_v62 }
 0x3b0   : > { %v2936_v10 = vadd.f32 %v2935_v55, %v2647_v45  ;;  %5784 = vmatmul.msk.f32.gmra.mxu0 %vm11096_vm10, %v10862_v6  ;;  %vm11100_vm10 = vcmp.eq.s32.totalorder %v11086_v61, %v6590_v50  ;;  %v5636_v35 = vsel %vm10733_vm9, 1.0, %v10935_v63 }
 0x3b2   : > { %3439 = vmatmul.f32.gmra.mxu2 %v3438_v47  ;;  %v3305_v20 = vadd.f32 %v3304_v42, %v2936_v10  ;;  %v11101_v42 = vld [vmem:[#allocation56_spill] sm:$0xff]  ;;  %v3446_v47 = vand.u32 4294901760, %v3445_v49  ;;  %v3453_v49 = vsub.f32 %v8754_v52, %v10720_v8 }
 0x3b4   : > { %v2943_v15 = vpop.f32.mrf.mxu1  ;;  %5913 = vmatmul.msk.f32.gmra.mxu3 %vm10718_vm11, %v10862_v6  ;;  %v8765_v24 = vadd.f32 %v3833_v14, %v3305_v20  ;;  %vm11102_vm11 = vcmp.eq.s32.totalorder %v11080_v19, %v6590_v50  ;;  %v8781_v14 = vsub.f32 %v5636_v35, %v5636_v35 }
 0x3b5   : > { %v3312_v55 = vpop.f32.mrf.mxu2  ;;  %v2650_v43 = vpop.f32.mrf.mxu0 }
 0x3b6   : > { %11099 = vst [vmem:[#allocation131_spill] sm:$0xff] %v8765_v24  ;;  %v2651_v45 = vadd.f32 %v2650_v43, %v11101_v42  ;;  %v11104_v43 = vld [vmem:[#allocation57_spill] sm:$0xff]  ;;  %v10725_v19 = vand.u32 4294901760, %v8781_v14 }
 0x3b7   : > { %5850 = vmatmul.msk.f32.gmra.mxu1 %vm11100_vm10, %v10862_v6  ;;  %v3837_v10 = vpop.f32.mrf.mxu3  ;;  %11103 = vst [vmem:[#allocation56_spill] sm:$0xff] %v8781_v14  ;;  %vm10738_vm10 = vcmp.eq.s32.totalorder %v11104_v43, %v7733_v62 }
 0x3b8   : > { %v2940_v17 = vadd.f32 %v2939_v32, %v2651_v45  ;;  %5785 = vmatmul.msk.f32.gmra.mxu0 %vm11102_vm11, %v10862_v6  ;;  %vm11106_vm11 = vcmp.eq.s32.totalorder %v11092_v27, %v6590_v50  ;;  %v5638_v8 = vsel %vm10738_vm10, 1.0, %v10935_v63 }
 0x3ba   : > { %3447 = vmatmul.f32.gmra.mxu2 %v3446_v47  ;;  %v3313_v24 = vadd.f32 %v3312_v55, %v2940_v17  ;;  %v11107_v55 = vld [vmem:[#allocation58_spill] sm:$0xff]  ;;  %v3454_v47 = vand.u32 4294901760, %v3453_v49  ;;  %v3461_v49 = vsub.f32 %v8781_v14, %v10725_v19 }
 0x3bc   : > { %v2947_v20 = vpop.f32.mrf.mxu1  ;;  %5914 = vmatmul.msk.f32.gmra.mxu3 %vm10723_vm7, %v10862_v6  ;;  %v8792_v42 = vadd.f32 %v3837_v10, %v3313_v24  ;;  %vm11108_vm7 = vcmp.eq.s32.totalorder %v11086_v61, %v6590_v50  ;;  %v8808_v10 = vsub.f32 %v5638_v8, %v5638_v8 }
 0x3bd   : > { %v3320_v32 = vpop.f32.mrf.mxu2  ;;  %v2654_v35 = vpop.f32.mrf.mxu0 }
 0x3be   : > { %11105 = vst [vmem:[#allocation132_spill] sm:$0xff] %v8792_v42  ;;  %v2655_v45 = vadd.f32 %v2654_v35, %v11107_v55  ;;  %v11110_v35 = vld [vmem:[#allocation59_spill] sm:$0xff]  ;;  %v10730_v61 = vand.u32 4294901760, %v8808_v10 }
 0x3bf   : > { %5851 = vmatmul.msk.f32.gmra.mxu1 %vm11106_vm11, %v10862_v6  ;;  %v3841_v17 = vpop.f32.mrf.mxu3  ;;  %11109 = vst [vmem:[#allocation58_spill] sm:$0xff] %v8808_v10  ;;  %vm10743_vm11 = vcmp.eq.s32.totalorder %v11110_v35, %v7733_v62 }
 0x3c0   : > { %v2944_v52 = vadd.f32 %v2943_v15, %v2655_v45  ;;  %5786 = vmatmul.msk.f32.gmra.mxu0 %vm11108_vm7, %v10862_v6  ;;  %vm11112_vm7 = vcmp.eq.s32.totalorder %v11098_v36, %v6590_v50  ;;  %v5640_v19 = vsel %vm10743_vm11, 1.0, %v10935_v63 }
 0x3c2   : > { %3455 = vmatmul.f32.gmra.mxu2 %v3454_v47  ;;  %v3321_v42 = vadd.f32 %v3320_v32, %v2944_v52  ;;  %v11113_v32 = vld [vmem:[#allocation60_spill] sm:$0xff]  ;;  %v3462_v47 = vand.u32 4294901760, %v3461_v49  ;;  %v3469_v49 = vsub.f32 %v8808_v10, %v10730_v61 }
 0x3c4   : > { %v2951_v24 = vpop.f32.mrf.mxu1  ;;  %5915 = vmatmul.msk.f32.gmra.mxu3 %vm10728_vm8, %v10862_v6  ;;  %v8819_v55 = vadd.f32 %v3841_v17, %v3321_v42  ;;  %vm11114_vm8 = vcmp.eq.s32.totalorder %v11092_v27, %v6590_v50  ;;  %v8835_v17 = vsub.f32 %v5640_v19, %v5640_v19 }
 0x3c5   : > { %v3328_v15 = vpop.f32.mrf.mxu2  ;;  %v2658_v8 = vpop.f32.mrf.mxu0 }
 0x3c6   : > { %11111 = vst [vmem:[#allocation133_spill] sm:$0xff] %v8819_v55  ;;  %v2659_v45 = vadd.f32 %v2658_v8, %v11113_v32  ;;  %v11116_v8 = vld [vmem:[#allocation61_spill] sm:$0xff]  ;;  %v10735_v27 = vand.u32 4294901760, %v8835_v17 }
 0x3c7   : > { %5852 = vmatmul.msk.f32.gmra.mxu1 %vm11112_vm7, %v10862_v6  ;;  %v3845_v52 = vpop.f32.mrf.mxu3  ;;  %11115 = vst [vmem:[#allocation60_spill] sm:$0xff] %v8835_v17  ;;  %vm10748_vm7 = vcmp.eq.s32.totalorder %v11116_v8, %v7733_v62 }
 0x3c8   : > { %v2948_v14 = vadd.f32 %v2947_v20, %v2659_v45  ;;  %5787 = vmatmul.msk.f32.gmra.mxu0 %vm11114_vm8, %v10862_v6  ;;  %vm11118_vm8 = vcmp.eq.s32.totalorder %v11104_v43, %v6590_v50  ;;  %v5642_v61 = vsel %vm10748_vm7, 1.0, %v10935_v63 }
 0x3ca   : > { %3463 = vmatmul.f32.gmra.mxu2 %v3462_v47  ;;  %v3329_v55 = vadd.f32 %v3328_v15, %v2948_v14  ;;  %v11119_v15 = vld [vmem:[#allocation62_spill] sm:$0xff]  ;;  %v3470_v47 = vand.u32 4294901760, %v3469_v49  ;;  %v3477_v49 = vsub.f32 %v8835_v17, %v10735_v27 }
 0x3cc   : > { %v2955_v42 = vpop.f32.mrf.mxu1  ;;  %5916 = vmatmul.msk.f32.gmra.mxu3 %vm10733_vm9, %v10862_v6  ;;  %v8846_v32 = vadd.f32 %v3845_v52, %v3329_v55  ;;  %vm11120_vm9 = vcmp.eq.s32.totalorder %v11098_v36, %v6590_v50  ;;  %v8862_v52 = vsub.f32 %v5642_v61, %v5642_v61 }
 0x3cd   : > { %v3336_v20 = vpop.f32.mrf.mxu2  ;;  %v2662_v19 = vpop.f32.mrf.mxu0 }
 0x3ce   : > { %11117 = vst [vmem:[#allocation134_spill] sm:$0xff] %v8846_v32  ;;  %v2663_v45 = vadd.f32 %v2662_v19, %v11119_v15  ;;  %v11122_v19 = vld [vmem:[#allocation63_spill] sm:$0xff]  ;;  %v10740_v36 = vand.u32 4294901760, %v8862_v52 }
 0x3cf   : > { %5853 = vmatmul.msk.f32.gmra.mxu1 %vm11118_vm8, %v10862_v6  ;;  %v3849_v14 = vpop.f32.mrf.mxu3  ;;  %11121 = vst [vmem:[#allocation62_spill] sm:$0xff] %v8862_v52  ;;  %vm10753_vm8 = vcmp.eq.s32.totalorder %v11122_v19, %v7733_v62 }
 0x3d0   : > { %v2952_v10 = vadd.f32 %v2951_v24, %v2663_v45  ;;  %5788 = vmatmul.msk.f32.gmra.mxu0 %vm11120_vm9, %v10862_v6  ;;  %vm11124_vm9 = vcmp.eq.s32.totalorder %v11110_v35, %v6590_v50  ;;  %v5644_v27 = vsel %vm10753_vm8, 1.0, %v10935_v63 }
 0x3d2   : > { %3471 = vmatmul.f32.gmra.mxu2 %v3470_v47  ;;  %v3337_v32 = vadd.f32 %v3336_v20, %v2952_v10  ;;  %v11125_v20 = vld [vmem:[#allocation64_spill] sm:$0xff]  ;;  %v3478_v47 = vand.u32 4294901760, %v3477_v49  ;;  %v3485_v49 = vsub.f32 %v8862_v52, %v10740_v36 }
 0x3d4   : > { %v2959_v55 = vpop.f32.mrf.mxu1  ;;  %5917 = vmatmul.msk.f32.gmra.mxu3 %vm10738_vm10, %v10862_v6  ;;  %v8873_v15 = vadd.f32 %v3849_v14, %v3337_v32  ;;  %vm11126_vm10 = vcmp.eq.s32.totalorder %v11104_v43, %v6590_v50  ;;  %v8889_v14 = vsub.f32 %v5644_v27, %v5644_v27 }
 0x3d5   : > { %v3344_v24 = vpop.f32.mrf.mxu2  ;;  %v2666_v61 = vpop.f32.mrf.mxu0 }
 0x3d6   : > { %11123 = vst [vmem:[#allocation135_spill] sm:$0xff] %v8873_v15  ;;  %v2667_v45 = vadd.f32 %v2666_v61, %v11125_v20  ;;  %v11128_v61 = vld [vmem:[#allocation65_spill] sm:$0xff]  ;;  %v10745_v43 = vand.u32 4294901760, %v8889_v14 }
 0x3d7   : > { %5854 = vmatmul.msk.f32.gmra.mxu1 %vm11124_vm9, %v10862_v6  ;;  %v3853_v10 = vpop.f32.mrf.mxu3  ;;  %11127 = vst [vmem:[#allocation64_spill] sm:$0xff] %v8889_v14  ;;  %vm10758_vm9 = vcmp.eq.s32.totalorder %v11128_v61, %v7733_v62 }
 0x3d8   : > { %v2956_v17 = vadd.f32 %v2955_v42, %v2667_v45  ;;  %5789 = vmatmul.msk.f32.gmra.mxu0 %vm11126_vm10, %v10862_v6  ;;  %vm11130_vm10 = vcmp.eq.s32.totalorder %v11116_v8, %v6590_v50  ;;  %v5646_v36 = vsel %vm10758_vm9, 1.0, %v10935_v63 }
 0x3da   : > { %3479 = vmatmul.f32.gmra.mxu2 %v3478_v47  ;;  %v3345_v15 = vadd.f32 %v3344_v24, %v2956_v17  ;;  %v11131_v24 = vld [vmem:[#allocation66_spill] sm:$0xff]  ;;  %v3486_v47 = vand.u32 4294901760, %v3485_v49  ;;  %v3493_v49 = vsub.f32 %v8889_v14, %v10745_v43 }
 0x3dc   : > { %v2963_v32 = vpop.f32.mrf.mxu1  ;;  %5918 = vmatmul.msk.f32.gmra.mxu3 %vm10743_vm11, %v10862_v6  ;;  %v8900_v20 = vadd.f32 %v3853_v10, %v3345_v15  ;;  %vm11132_vm11 = vcmp.eq.s32.totalorder %v11110_v35, %v6590_v50  ;;  %v8916_v10 = vsub.f32 %v5646_v36, %v5646_v36 }
 0x3dd   : > { %v3352_v42 = vpop.f32.mrf.mxu2  ;;  %v2670_v27 = vpop.f32.mrf.mxu0 }
 0x3de   : > { %11129 = vst [vmem:[#allocation136_spill] sm:$0xff] %v8900_v20  ;;  %v2671_v45 = vadd.f32 %v2670_v27, %v11131_v24  ;;  %v11134_v27 = vld [vmem:[#allocation67_spill] sm:$0xff]  ;;  %v10750_v35 = vand.u32 4294901760, %v8916_v10 }
 0x3df   : > { %5855 = vmatmul.msk.f32.gmra.mxu1 %vm11130_vm10, %v10862_v6  ;;  %v3857_v17 = vpop.f32.mrf.mxu3  ;;  %11133 = vst [vmem:[#allocation66_spill] sm:$0xff] %v8916_v10  ;;  %vm10763_vm10 = vcmp.eq.s32.totalorder %v11134_v27, %v7733_v62 }
 0x3e0   : > { %v2960_v52 = vadd.f32 %v2959_v55, %v2671_v45  ;;  %5790 = vmatmul.msk.f32.gmra.mxu0 %vm11132_vm11, %v10862_v6  ;;  %vm11136_vm11 = vcmp.eq.s32.totalorder %v11122_v19, %v6590_v50  ;;  %v5648_v43 = vsel %vm10763_vm10, 1.0, %v10935_v63 }
 0x3e2   : > { %3487 = vmatmul.f32.gmra.mxu2 %v3486_v47  ;;  %v3353_v20 = vadd.f32 %v3352_v42, %v2960_v52  ;;  %v11137_v42 = vld [vmem:[#allocation68_spill] sm:$0xff]  ;;  %v3494_v47 = vand.u32 4294901760, %v3493_v49  ;;  %v3501_v49 = vsub.f32 %v8916_v10, %v10750_v35 }
 0x3e4   : > { %v2967_v15 = vpop.f32.mrf.mxu1  ;;  %5919 = vmatmul.msk.f32.gmra.mxu3 %vm10748_vm7, %v10862_v6  ;;  %v8927_v24 = vadd.f32 %v3857_v17, %v3353_v20  ;;  %vm11138_vm7 = vcmp.eq.s32.totalorder %v11116_v8, %v6590_v50  ;;  %v8943_v17 = vsub.f32 %v5648_v43, %v5648_v43 }
 0x3e5   : > { %v3360_v55 = vpop.f32.mrf.mxu2  ;;  %v2674_v36 = vpop.f32.mrf.mxu0 }
 0x3e6   : > { %11135 = vst [vmem:[#allocation137_spill] sm:$0xff] %v8927_v24  ;;  %v2675_v45 = vadd.f32 %v2674_v36, %v11137_v42  ;;  %v11140_v36 = vld [vmem:[#allocation69_spill] sm:$0xff]  ;;  %v10755_v8 = vand.u32 4294901760, %v8943_v17 }
 0x3e7   : > { %5856 = vmatmul.msk.f32.gmra.mxu1 %vm11136_vm11, %v10862_v6  ;;  %v3861_v52 = vpop.f32.mrf.mxu3  ;;  %11139 = vst [vmem:[#allocation68_spill] sm:$0xff] %v8943_v17  ;;  %vm10768_vm11 = vcmp.eq.s32.totalorder %v11140_v36, %v7733_v62 }
 0x3e8   : > { %v2964_v14 = vadd.f32 %v2963_v32, %v2675_v45  ;;  %5791 = vmatmul.msk.f32.gmra.mxu0 %vm11138_vm7, %v10862_v6  ;;  %vm11142_vm7 = vcmp.eq.s32.totalorder %v11128_v61, %v6590_v50  ;;  %v5650_v35 = vsel %vm10768_vm11, 1.0, %v10935_v63 }
 0x3ea   : > { %3495 = vmatmul.f32.gmra.mxu2 %v3494_v47  ;;  %v3361_v24 = vadd.f32 %v3360_v55, %v2964_v14  ;;  %v11143_v55 = vld [vmem:[#allocation70_spill] sm:$0xff]  ;;  %v3502_v47 = vand.u32 4294901760, %v3501_v49  ;;  %v3509_v49 = vsub.f32 %v8943_v17, %v10755_v8 }
 0x3ec   : > { %v2971_v20 = vpop.f32.mrf.mxu1  ;;  %5920 = vmatmul.msk.f32.gmra.mxu3 %vm10753_vm8, %v10862_v6  ;;  %v8954_v42 = vadd.f32 %v3861_v52, %v3361_v24  ;;  %vm11144_vm8 = vcmp.eq.s32.totalorder %v11122_v19, %v6590_v50  ;;  %v8970_v52 = vsub.f32 %v5650_v35, %v5650_v35 }
 0x3ed   : > { %v3368_v32 = vpop.f32.mrf.mxu2  ;;  %v2678_v43 = vpop.f32.mrf.mxu0 }
 0x3ee   : > { %11141 = vst [vmem:[#allocation138_spill] sm:$0xff] %v8954_v42  ;;  %v2679_v45 = vadd.f32 %v2678_v43, %v11143_v55  ;;  %v11146_v43 = vld [vmem:[#allocation71_spill] sm:$0xff]  ;;  %v10760_v19 = vand.u32 4294901760, %v8970_v52 }
 0x3ef   : > { %5857 = vmatmul.msk.f32.gmra.mxu1 %vm11142_vm7, %v10862_v6  ;;  %v3865_v14 = vpop.f32.mrf.mxu3  ;;  %11145 = vst [vmem:[#allocation70_spill] sm:$0xff] %v8970_v52  ;;  %vm10773_vm7 = vcmp.eq.s32.totalorder %v11146_v43, %v7733_v62 }
 0x3f0   : > { %v2968_v10 = vadd.f32 %v2967_v15, %v2679_v45  ;;  %5792 = vmatmul.msk.f32.gmra.mxu0 %vm11144_vm8, %v10862_v6  ;;  %vm11148_vm8 = vcmp.eq.s32.totalorder %v11134_v27, %v6590_v50  ;;  %v5652_v8 = vsel %vm10773_vm7, 1.0, %v10935_v63 }
 0x3f2   : > { %3503 = vmatmul.f32.gmra.mxu2 %v3502_v47  ;;  %v3369_v42 = vadd.f32 %v3368_v32, %v2968_v10  ;;  %v11149_v32 = vld [vmem:[#allocation72_spill] sm:$0xff]  ;;  %v3510_v47 = vand.u32 4294901760, %v3509_v49  ;;  %v3517_v49 = vsub.f32 %v8970_v52, %v10760_v19 }
 0x3f4   : > { %v2975_v24 = vpop.f32.mrf.mxu1  ;;  %5921 = vmatmul.msk.f32.gmra.mxu3 %vm10758_vm9, %v10862_v6  ;;  %v8981_v55 = vadd.f32 %v3865_v14, %v3369_v42  ;;  %vm11150_vm9 = vcmp.eq.s32.totalorder %v11128_v61, %v6590_v50  ;;  %v8997_v14 = vsub.f32 %v5652_v8, %v5652_v8 }
 0x3f5   : > { %v3376_v15 = vpop.f32.mrf.mxu2  ;;  %v2682_v35 = vpop.f32.mrf.mxu0 }
 0x3f6   : > { %11147 = vst [vmem:[#allocation139_spill] sm:$0xff] %v8981_v55  ;;  %v2683_v45 = vadd.f32 %v2682_v35, %v11149_v32  ;;  %v11152_v35 = vld [vmem:[#allocation73_spill] sm:$0xff]  ;;  %v10765_v61 = vand.u32 4294901760, %v8997_v14 }
 0x3f7   : > { %5858 = vmatmul.msk.f32.gmra.mxu1 %vm11148_vm8, %v10862_v6  ;;  %v3869_v10 = vpop.f32.mrf.mxu3  ;;  %11151 = vst [vmem:[#allocation72_spill] sm:$0xff] %v8997_v14  ;;  %vm10778_vm8 = vcmp.eq.s32.totalorder %v11152_v35, %v7733_v62 }
 0x3f8   : > { %v2972_v17 = vadd.f32 %v2971_v20, %v2683_v45  ;;  %5793 = vmatmul.msk.f32.gmra.mxu0 %vm11150_vm9, %v10862_v6  ;;  %vm11154_vm9 = vcmp.eq.s32.totalorder %v11140_v36, %v6590_v50  ;;  %v5654_v19 = vsel %vm10778_vm8, 1.0, %v10935_v63 }
 0x3fa   : > { %3511 = vmatmul.f32.gmra.mxu2 %v3510_v47  ;;  %v3377_v55 = vadd.f32 %v3376_v15, %v2972_v17  ;;  %v11155_v15 = vld [vmem:[#allocation74_spill] sm:$0xff]  ;;  %v3518_v47 = vand.u32 4294901760, %v3517_v49  ;;  %v3525_v49 = vsub.f32 %v8997_v14, %v10765_v61 }
 0x3fc   : > { %v2979_v42 = vpop.f32.mrf.mxu1  ;;  %5922 = vmatmul.msk.f32.gmra.mxu3 %vm10763_vm10, %v10862_v6  ;;  %v9008_v32 = vadd.f32 %v3869_v10, %v3377_v55  ;;  %vm11156_vm10 = vcmp.eq.s32.totalorder %v11134_v27, %v6590_v50  ;;  %v9024_v10 = vsub.f32 %v5654_v19, %v5654_v19 }
 0x3fd   : > { %v3384_v20 = vpop.f32.mrf.mxu2  ;;  %v2686_v8 = vpop.f32.mrf.mxu0 }
 0x3fe   : > { %11153 = vst [vmem:[#allocation140_spill] sm:$0xff] %v9008_v32  ;;  %v2687_v45 = vadd.f32 %v2686_v8, %v11155_v15  ;;  %v11158_v8 = vld [vmem:[#allocation75_spill] sm:$0xff]  ;;  %v10770_v27 = vand.u32 4294901760, %v9024_v10 }
 0x3ff   : > { %5859 = vmatmul.msk.f32.gmra.mxu1 %vm11154_vm9, %v10862_v6  ;;  %v3873_v17 = vpop.f32.mrf.mxu3  ;;  %11157 = vst [vmem:[#allocation74_spill] sm:$0xff] %v9024_v10  ;;  %vm10783_vm9 = vcmp.eq.s32.totalorder %v11158_v8, %v7733_v62 }
 0x400   : > { %v2976_v52 = vadd.f32 %v2975_v24, %v2687_v45  ;;  %5794 = vmatmul.msk.f32.gmra.mxu0 %vm11156_vm10, %v10862_v6  ;;  %vm11160_vm10 = vcmp.eq.s32.totalorder %v11146_v43, %v6590_v50  ;;  %v5656_v61 = vsel %vm10783_vm9, 1.0, %v10935_v63 }
 0x402   : > { %3519 = vmatmul.f32.gmra.mxu2 %v3518_v47  ;;  %v3385_v32 = vadd.f32 %v3384_v20, %v2976_v52  ;;  %v11161_v20 = vld [vmem:[#allocation76_spill] sm:$0xff]  ;;  %v3526_v47 = vand.u32 4294901760, %v3525_v49  ;;  %v3533_v49 = vsub.f32 %v9024_v10, %v10770_v27 }
 0x404   : > { %v2983_v55 = vpop.f32.mrf.mxu1  ;;  %5923 = vmatmul.msk.f32.gmra.mxu3 %vm10768_vm11, %v10862_v6  ;;  %v9035_v15 = vadd.f32 %v3873_v17, %v3385_v32  ;;  %vm11162_vm11 = vcmp.eq.s32.totalorder %v11140_v36, %v6590_v50  ;;  %v9051_v17 = vsub.f32 %v5656_v61, %v5656_v61 }
 0x405   : > { %v3392_v24 = vpop.f32.mrf.mxu2  ;;  %v2690_v19 = vpop.f32.mrf.mxu0 }
 0x406   : > { %11159 = vst [vmem:[#allocation141_spill] sm:$0xff] %v9035_v15  ;;  %v2691_v45 = vadd.f32 %v2690_v19, %v11161_v20  ;;  %v11164_v19 = vld [vmem:[#allocation77_spill] sm:$0xff]  ;;  %v10775_v36 = vand.u32 4294901760, %v9051_v17 }
 0x407   : > { %5860 = vmatmul.msk.f32.gmra.mxu1 %vm11160_vm10, %v10862_v6  ;;  %v3877_v52 = vpop.f32.mrf.mxu3  ;;  %11163 = vst [vmem:[#allocation76_spill] sm:$0xff] %v9051_v17  ;;  %vm10788_vm10 = vcmp.eq.s32.totalorder %v11164_v19, %v7733_v62 }
 0x408   : > { %v2980_v14 = vadd.f32 %v2979_v42, %v2691_v45  ;;  %5795 = vmatmul.msk.f32.gmra.mxu0 %vm11162_vm11, %v10862_v6  ;;  %vm11166_vm11 = vcmp.eq.s32.totalorder %v11152_v35, %v6590_v50  ;;  %v5658_v27 = vsel %vm10788_vm10, 1.0, %v10935_v63 }
 0x40a   : > { %3527 = vmatmul.f32.gmra.mxu2 %v3526_v47  ;;  %v3393_v15 = vadd.f32 %v3392_v24, %v2980_v14  ;;  %v11167_v24 = vld [vmem:[#allocation78_spill] sm:$0xff]  ;;  %v3534_v47 = vand.u32 4294901760, %v3533_v49  ;;  %v3541_v49 = vsub.f32 %v9051_v17, %v10775_v36 }
 0x40c   : > { %v2987_v32 = vpop.f32.mrf.mxu1  ;;  %5924 = vmatmul.msk.f32.gmra.mxu3 %vm10773_vm7, %v10862_v6  ;;  %v9062_v20 = vadd.f32 %v3877_v52, %v3393_v15  ;;  %vm11168_vm7 = vcmp.eq.s32.totalorder %v11146_v43, %v6590_v50  ;;  %v9078_v52 = vsub.f32 %v5658_v27, %v5658_v27 }
 0x40d   : > { %v3400_v42 = vpop.f32.mrf.mxu2  ;;  %v2694_v61 = vpop.f32.mrf.mxu0 }
 0x40e   : > { %11165 = vst [vmem:[#allocation142_spill] sm:$0xff] %v9062_v20  ;;  %v2695_v45 = vadd.f32 %v2694_v61, %v11167_v24  ;;  %v11170_v61 = vld [vmem:[#allocation79_spill] sm:$0xff]  ;;  %v10780_v43 = vand.u32 4294901760, %v9078_v52 }
 0x40f   : > { %5861 = vmatmul.msk.f32.gmra.mxu1 %vm11166_vm11, %v10862_v6  ;;  %v3881_v14 = vpop.f32.mrf.mxu3  ;;  %11169 = vst [vmem:[#allocation78_spill] sm:$0xff] %v9078_v52  ;;  %vm10793_vm11 = vcmp.eq.s32.totalorder %v11170_v61, %v7733_v62 }
 0x410   : > { %v2984_v10 = vadd.f32 %v2983_v55, %v2695_v45  ;;  %5796 = vmatmul.msk.f32.gmra.mxu0 %vm11168_vm7, %v10862_v6  ;;  %vm11172_vm7 = vcmp.eq.s32.totalorder %v11158_v8, %v6590_v50  ;;  %v5660_v36 = vsel %vm10793_vm11, 1.0, %v10935_v63 }
 0x412   : > { %3535 = vmatmul.f32.gmra.mxu2 %v3534_v47  ;;  %v3401_v20 = vadd.f32 %v3400_v42, %v2984_v10  ;;  %v11173_v42 = vld [vmem:[#allocation80_spill] sm:$0xff]  ;;  %v3542_v47 = vand.u32 4294901760, %v3541_v49  ;;  %v3549_v49 = vsub.f32 %v9078_v52, %v10780_v43 }
 0x414   : > { %v2991_v15 = vpop.f32.mrf.mxu1  ;;  %5925 = vmatmul.msk.f32.gmra.mxu3 %vm10778_vm8, %v10862_v6  ;;  %v9089_v24 = vadd.f32 %v3881_v14, %v3401_v20  ;;  %vm11174_vm8 = vcmp.eq.s32.totalorder %v11152_v35, %v6590_v50  ;;  %v9105_v14 = vsub.f32 %v5660_v36, %v5660_v36 }
 0x415   : > { %v3408_v55 = vpop.f32.mrf.mxu2  ;;  %v2698_v27 = vpop.f32.mrf.mxu0 }
 0x416   : > { %11171 = vst [vmem:[#allocation143_spill] sm:$0xff] %v9089_v24  ;;  %v2699_v45 = vadd.f32 %v2698_v27, %v11173_v42  ;;  %v11176_v27 = vld [vmem:[#allocation81_spill] sm:$0xff]  ;;  %v10785_v35 = vand.u32 4294901760, %v9105_v14 }
 0x417   : > { %5862 = vmatmul.msk.f32.gmra.mxu1 %vm11172_vm7, %v10862_v6  ;;  %v3885_v10 = vpop.f32.mrf.mxu3  ;;  %11175 = vst [vmem:[#allocation80_spill] sm:$0xff] %v9105_v14  ;;  %vm10798_vm7 = vcmp.eq.s32.totalorder %v11176_v27, %v7733_v62 }
 0x418   : > { %v2988_v17 = vadd.f32 %v2987_v32, %v2699_v45  ;;  %5797 = vmatmul.msk.f32.gmra.mxu0 %vm11174_vm8, %v10862_v6  ;;  %vm11178_vm8 = vcmp.eq.s32.totalorder %v11164_v19, %v6590_v50  ;;  %v5662_v43 = vsel %vm10798_vm7, 1.0, %v10935_v63 }
 0x41a   : > { %3543 = vmatmul.f32.gmra.mxu2 %v3542_v47  ;;  %v3409_v24 = vadd.f32 %v3408_v55, %v2988_v17  ;;  %v11179_v55 = vld [vmem:[#allocation82_spill] sm:$0xff]  ;;  %v3550_v47 = vand.u32 4294901760, %v3549_v49  ;;  %v3557_v49 = vsub.f32 %v9105_v14, %v10785_v35 }
 0x41c   : > { %v2995_v20 = vpop.f32.mrf.mxu1  ;;  %5926 = vmatmul.msk.f32.gmra.mxu3 %vm10783_vm9, %v10862_v6  ;;  %v9116_v42 = vadd.f32 %v3885_v10, %v3409_v24  ;;  %vm11180_vm9 = vcmp.eq.s32.totalorder %v11158_v8, %v6590_v50  ;;  %v9132_v10 = vsub.f32 %v5662_v43, %v5662_v43 }
 0x41d   : > { %v3416_v32 = vpop.f32.mrf.mxu2  ;;  %v2702_v36 = vpop.f32.mrf.mxu0 }
 0x41e   : > { %11177 = vst [vmem:[#allocation144_spill] sm:$0xff] %v9116_v42  ;;  %v2703_v45 = vadd.f32 %v2702_v36, %v11179_v55  ;;  %v11182_v36 = vld [vmem:[#allocation83_spill] sm:$0xff]  ;;  %v10790_v8 = vand.u32 4294901760, %v9132_v10 }
 0x41f   : > { %5863 = vmatmul.msk.f32.gmra.mxu1 %vm11178_vm8, %v10862_v6  ;;  %v3889_v17 = vpop.f32.mrf.mxu3  ;;  %11181 = vst [vmem:[#allocation82_spill] sm:$0xff] %v9132_v10  ;;  %vm10803_vm8 = vcmp.eq.s32.totalorder %v11182_v36, %v7733_v62 }
 0x420   : > { %v2992_v52 = vadd.f32 %v2991_v15, %v2703_v45  ;;  %5798 = vmatmul.msk.f32.gmra.mxu0 %vm11180_vm9, %v10862_v6  ;;  %vm11184_vm9 = vcmp.eq.s32.totalorder %v11170_v61, %v6590_v50  ;;  %v5664_v35 = vsel %vm10803_vm8, 1.0, %v10935_v63 }
 0x422   : > { %3551 = vmatmul.f32.gmra.mxu2 %v3550_v47  ;;  %v3417_v42 = vadd.f32 %v3416_v32, %v2992_v52  ;;  %v11185_v32 = vld [vmem:[#allocation84_spill] sm:$0xff]  ;;  %v3558_v47 = vand.u32 4294901760, %v3557_v49  ;;  %v3565_v49 = vsub.f32 %v9132_v10, %v10790_v8 }
 0x424   : > { %v2999_v24 = vpop.f32.mrf.mxu1  ;;  %5927 = vmatmul.msk.f32.gmra.mxu3 %vm10788_vm10, %v10862_v6  ;;  %v9143_v55 = vadd.f32 %v3889_v17, %v3417_v42  ;;  %vm11186_vm10 = vcmp.eq.s32.totalorder %v11164_v19, %v6590_v50  ;;  %v9159_v17 = vsub.f32 %v5664_v35, %v5664_v35 }
 0x425   : > { %v3424_v15 = vpop.f32.mrf.mxu2  ;;  %v2706_v43 = vpop.f32.mrf.mxu0 }
 0x426   : > { %11183 = vst [vmem:[#allocation145_spill] sm:$0xff] %v9143_v55  ;;  %v2707_v45 = vadd.f32 %v2706_v43, %v11185_v32  ;;  %v11188_v43 = vld [vmem:[#allocation85_spill] sm:$0xff]  ;;  %v10795_v19 = vand.u32 4294901760, %v9159_v17 }
 0x427   : > { %5864 = vmatmul.msk.f32.gmra.mxu1 %vm11184_vm9, %v10862_v6  ;;  %v3893_v52 = vpop.f32.mrf.mxu3  ;;  %11187 = vst [vmem:[#allocation84_spill] sm:$0xff] %v9159_v17  ;;  %vm10808_vm9 = vcmp.eq.s32.totalorder %v11188_v43, %v7733_v62 }
 0x428   : > { %v2996_v14 = vadd.f32 %v2995_v20, %v2707_v45  ;;  %5799 = vmatmul.msk.f32.gmra.mxu0 %vm11186_vm10, %v10862_v6  ;;  %vm11190_vm10 = vcmp.eq.s32.totalorder %v11176_v27, %v6590_v50  ;;  %v5666_v8 = vsel %vm10808_vm9, 1.0, %v10935_v63 }
 0x42a   : > { %3559 = vmatmul.f32.gmra.mxu2 %v3558_v47  ;;  %v3425_v55 = vadd.f32 %v3424_v15, %v2996_v14  ;;  %v11191_v15 = vld [vmem:[#allocation86_spill] sm:$0xff]  ;;  %v3566_v47 = vand.u32 4294901760, %v3565_v49  ;;  %v3573_v49 = vsub.f32 %v9159_v17, %v10795_v19 }
 0x42c   : > { %v3003_v42 = vpop.f32.mrf.mxu1  ;;  %5928 = vmatmul.msk.f32.gmra.mxu3 %vm10793_vm11, %v10862_v6  ;;  %v9170_v32 = vadd.f32 %v3893_v52, %v3425_v55  ;;  %vm11192_vm11 = vcmp.eq.s32.totalorder %v11170_v61, %v6590_v50  ;;  %v9186_v52 = vsub.f32 %v5666_v8, %v5666_v8 }
 0x42d   : > { %v3432_v20 = vpop.f32.mrf.mxu2  ;;  %v2710_v35 = vpop.f32.mrf.mxu0 }
 0x42e   : > { %11189 = vst [vmem:[#allocation146_spill] sm:$0xff] %v9170_v32  ;;  %v2711_v45 = vadd.f32 %v2710_v35, %v11191_v15  ;;  %v11194_v35 = vld [vmem:[#allocation87_spill] sm:$0xff]  ;;  %v10800_v61 = vand.u32 4294901760, %v9186_v52 }
 0x42f   : > { %5865 = vmatmul.msk.f32.gmra.mxu1 %vm11190_vm10, %v10862_v6  ;;  %v3897_v14 = vpop.f32.mrf.mxu3  ;;  %11193 = vst [vmem:[#allocation86_spill] sm:$0xff] %v9186_v52  ;;  %vm10813_vm10 = vcmp.eq.s32.totalorder %v11194_v35, %v7733_v62 }
 0x430   : > { %v3000_v10 = vadd.f32 %v2999_v24, %v2711_v45  ;;  %5800 = vmatmul.msk.f32.gmra.mxu0 %vm11192_vm11, %v10862_v6  ;;  %vm11196_vm11 = vcmp.eq.s32.totalorder %v11182_v36, %v6590_v50  ;;  %v5668_v19 = vsel %vm10813_vm10, 1.0, %v10935_v63 }
 0x432   : > { %3567 = vmatmul.f32.gmra.mxu2 %v3566_v47  ;;  %v3433_v32 = vadd.f32 %v3432_v20, %v3000_v10  ;;  %v11197_v20 = vld [vmem:[#allocation88_spill] sm:$0xff]  ;;  %v3574_v47 = vand.u32 4294901760, %v3573_v49  ;;  %v3581_v49 = vsub.f32 %v9186_v52, %v10800_v61 }
 0x434   : > { %v3007_v55 = vpop.f32.mrf.mxu1  ;;  %5929 = vmatmul.msk.f32.gmra.mxu3 %vm10798_vm7, %v10862_v6  ;;  %v9197_v15 = vadd.f32 %v3897_v14, %v3433_v32  ;;  %vm11198_vm7 = vcmp.eq.s32.totalorder %v11176_v27, %v6590_v50  ;;  %v9213_v14 = vsub.f32 %v5668_v19, %v5668_v19 }
 0x435   : > { %v3440_v24 = vpop.f32.mrf.mxu2  ;;  %v2714_v8 = vpop.f32.mrf.mxu0 }
 0x436   : > { %11195 = vst [vmem:[#allocation87_spill] sm:$0xff] %v9197_v15  ;;  %v2715_v45 = vadd.f32 %v2714_v8, %v11197_v20  ;;  %v11200_v8 = vld [vmem:[#allocation89_spill] sm:$0xff]  ;;  %v10805_v27 = vand.u32 4294901760, %v9213_v14 }
 0x437   : > { %5866 = vmatmul.msk.f32.gmra.mxu1 %vm11196_vm11, %v10862_v6  ;;  %v3901_v10 = vpop.f32.mrf.mxu3  ;;  %11199 = vst [vmem:[#allocation88_spill] sm:$0xff] %v9213_v14  ;;  %vm10817_vm11 = vcmp.eq.s32.totalorder %v11200_v8, %v7733_v62 }
 0x438   : > { %v3004_v17 = vadd.f32 %v3003_v42, %v2715_v45  ;;  %5801 = vmatmul.msk.f32.gmra.mxu0 %vm11198_vm7, %v10862_v6  ;;  %vm11202_vm7 = vcmp.eq.s32.totalorder %v11188_v43, %v6590_v50  ;;  %v5670_v61 = vsel %vm10817_vm11, 1.0, %v10935_v63 }
 0x43a   : > { %3575 = vmatmul.f32.gmra.mxu2 %v3574_v47  ;;  %v3441_v15 = vadd.f32 %v3440_v24, %v3004_v17  ;;  %v11203_v24 = vld [vmem:[#allocation90_spill] sm:$0xff]  ;;  %v3582_v47 = vand.u32 4294901760, %v3581_v49  ;;  %v3589_v49 = vsub.f32 %v9213_v14, %v10805_v27 }
 0x43c   : > { %v3011_v32 = vpop.f32.mrf.mxu1  ;;  %5930 = vmatmul.msk.f32.gmra.mxu3 %vm10803_vm8, %v10862_v6  ;;  %v9224_v20 = vadd.f32 %v3901_v10, %v3441_v15  ;;  %vm11204_vm8 = vcmp.eq.s32.totalorder %v11182_v36, %v6590_v50  ;;  %v9240_v10 = vsub.f32 %v5670_v61, %v5670_v61 }
 0x43d   : > { %v3448_v42 = vpop.f32.mrf.mxu2  ;;  %v2718_v19 = vpop.f32.mrf.mxu0 }
 0x43e   : > { %11201 = vst [vmem:[#allocation89_spill] sm:$0xff] %v9224_v20  ;;  %v2719_v45 = vadd.f32 %v2718_v19, %v11203_v24  ;;  %v11206_v19 = vld [vmem:[#allocation91_spill] sm:$0xff]  ;;  %v10810_v36 = vand.u32 4294901760, %v9240_v10 }
 0x43f   : > { %5867 = vmatmul.msk.f32.gmra.mxu1 %vm11202_vm7, %v10862_v6  ;;  %v3905_v17 = vpop.f32.mrf.mxu3  ;;  %11205 = vst [vmem:[#allocation90_spill] sm:$0xff] %v9240_v10  ;;  %vm10819_vm7 = vcmp.eq.s32.totalorder %v11206_v19, %v7733_v62 }
 0x440   : > { %v3008_v52 = vadd.f32 %v3007_v55, %v2719_v45  ;;  %5802 = vmatmul.msk.f32.gmra.mxu0 %vm11204_vm8, %v10862_v6  ;;  %vm11208_vm8 = vcmp.eq.s32.totalorder %v11194_v35, %v6590_v50  ;;  %v5672_v27 = vsel %vm10819_vm7, 1.0, %v10935_v63 }
 0x442   : > { %3583 = vmatmul.f32.gmra.mxu2 %v3582_v47  ;;  %v3449_v20 = vadd.f32 %v3448_v42, %v3008_v52  ;;  %v11209_v42 = vld [vmem:[#allocation92_spill] sm:$0xff]  ;;  %v3590_v47 = vand.u32 4294901760, %v3589_v49  ;;  %v3597_v49 = vsub.f32 %v9240_v10, %v10810_v36 }
 0x444   : > { %v3015_v15 = vpop.f32.mrf.mxu1  ;;  %5931 = vmatmul.msk.f32.gmra.mxu3 %vm10808_vm9, %v10862_v6  ;;  %v9251_v24 = vadd.f32 %v3905_v17, %v3449_v20  ;;  %vm11210_vm9 = vcmp.eq.s32.totalorder %v11188_v43, %v6590_v50  ;;  %v9267_v17 = vsub.f32 %v5672_v27, %v5672_v27 }
 0x445   : > { %v3456_v55 = vpop.f32.mrf.mxu2  ;;  %v2722_v61 = vpop.f32.mrf.mxu0 }
 0x446   : > { %11207 = vst [vmem:[#allocation91_spill] sm:$0xff] %v9251_v24  ;;  %v2723_v45 = vadd.f32 %v2722_v61, %v11209_v42  ;;  %v11212_v61 = vld [vmem:[#allocation93_spill] sm:$0xff]  ;;  %v10814_v43 = vand.u32 4294901760, %v9267_v17 }
 0x447   : > { %5868 = vmatmul.msk.f32.gmra.mxu1 %vm11208_vm8, %v10862_v6  ;;  %v3909_v52 = vpop.f32.mrf.mxu3  ;;  %11211 = vst [vmem:[#allocation92_spill] sm:$0xff] %v9267_v17  ;;  %vm10823_vm8 = vcmp.eq.s32.totalorder %v11212_v61, %v7733_v62 }
 0x448   : > { %v3012_v14 = vadd.f32 %v3011_v32, %v2723_v45  ;;  %5803 = vmatmul.msk.f32.gmra.mxu0 %vm11210_vm9, %v10862_v6  ;;  %vm11214_vm9 = vcmp.eq.s32.totalorder %v11200_v8, %v6590_v50  ;;  %v5674_v36 = vsel %vm10823_vm8, 1.0, %v10935_v63 }
 0x44a   : > { %3591 = vmatmul.f32.gmra.mxu2 %v3590_v47  ;;  %v3457_v24 = vadd.f32 %v3456_v55, %v3012_v14  ;;  %v11215_v55 = vld [vmem:[#allocation94_spill] sm:$0xff]  ;;  %v3598_v47 = vand.u32 4294901760, %v3597_v49  ;;  %v3605_v49 = vsub.f32 %v9267_v17, %v10814_v43 }
 0x44c   : > { %v3019_v20 = vpop.f32.mrf.mxu1  ;;  %5932 = vmatmul.msk.f32.gmra.mxu3 %vm10813_vm10, %v10862_v6  ;;  %v9278_v42 = vadd.f32 %v3909_v52, %v3457_v24  ;;  %vm11216_vm10 = vcmp.eq.s32.totalorder %v11194_v35, %v6590_v50  ;;  %v9294_v52 = vsub.f32 %v5674_v36, %v5674_v36 }
 0x44d   : > { %v3464_v32 = vpop.f32.mrf.mxu2  ;;  %v2726_v27 = vpop.f32.mrf.mxu0 }
 0x44e   : > { %11213 = vst [vmem:[#allocation93_spill] sm:$0xff] %v9278_v42  ;;  %v2727_v45 = vadd.f32 %v2726_v27, %v11215_v55 }
 0x44f   : > { %5869 = vmatmul.msk.f32.gmra.mxu1 %vm11214_vm9, %v10862_v6  ;;  %v3913_v14 = vpop.f32.mrf.mxu3  ;;  %11217 = vst [vmem:[#allocation94_spill] sm:$0xff] %v9294_v52  ;;  %vm10827_vm9 = vcmp.eq.s32.totalorder %v7626_v60, %v7733_v62 }
 0x450   : > { %v3016_v10 = vadd.f32 %v3015_v15, %v2727_v45  ;;  %5804 = vmatmul.msk.f32.gmra.mxu0 %vm11216_vm10, %v10862_v6  ;;  %vm11219_vm10 = vcmp.eq.s32.totalorder %v11206_v19, %v6590_v50  ;;  %v3606_v45 = vand.u32 4294901760, %v3605_v49  ;;  %v5676_v43 = vsel %vm10827_vm9, 1.0, %v10935_v63 }
 0x452   : > { %3599 = vmatmul.f32.gmra.mxu2 %v3598_v47  ;;  %v3465_v42 = vadd.f32 %v3464_v32, %v3016_v10  ;;  %v11220_v32 = vld [vmem:[#allocation95_spill] sm:$0xff]  ;;  %v10818_v47 = vand.u32 4294901760, %v9294_v52 }
 0x454   : > { %v3023_v24 = vpop.f32.mrf.mxu1  ;;  %5933 = vmatmul.msk.f32.gmra.mxu3 %vm10817_vm11, %v10862_v6  ;;  %v9305_v27 = vadd.f32 %v3913_v14, %v3465_v42  ;;  %vm11221_vm11 = vcmp.eq.s32.totalorder %v11200_v8, %v6590_v50  ;;  %v9321_v14 = vsub.f32 %v5676_v43, %v5676_v43  ;;  %v3613_v49 = vsub.f32 %v9294_v52, %v10818_v47 }
 0x455   : > { %v3472_v15 = vpop.f32.mrf.mxu2  ;;  %v2730_v36 = vpop.f32.mrf.mxu0 }
 0x456   : > { %11218 = vst [vmem:[#allocation147_spill] sm:$0xff] %v9305_v27  ;;  %v2731_v55 = vadd.f32 %v2730_v36, %v11220_v32  ;;  %v3614_v32 = vand.u32 4294901760, %v3613_v49 }
 0x457   : > { %5870 = vmatmul.msk.f32.gmra.mxu1 %vm11219_vm10, %v10862_v6  ;;  %v3917_v10 = vpop.f32.mrf.mxu3  ;;  %11222 = vst [vmem:[#allocation95_spill] sm:$0xff] %v9321_v14  ;;  %vm10831_vm10 = vcmp.eq.s32.totalorder %v7656_v31, %v7733_v62 }
 0x458   : > { %v3020_v17 = vadd.f32 %v3019_v20, %v2731_v55  ;;  %5805 = vmatmul.msk.f32.gmra.mxu0 %vm11221_vm11, %v10862_v6  ;;  %vm11223_vm11 = vcmp.eq.s32.totalorder %v11212_v61, %v6590_v50  ;;  %v10822_v55 = vand.u32 4294901760, %v9321_v14 }
 0x45a   : > { %3607 = vmatmul.f32.gmra.mxu2 %v3606_v45  ;;  %v3473_v27 = vadd.f32 %v3472_v15, %v3020_v17  ;;  %v5678_v45 = vsel %vm10831_vm10, 1.0, %v10935_v63 }
 0x45c   : > { %v3027_v42 = vpop.f32.mrf.mxu1  ;;  %5934 = vmatmul.msk.f32.gmra.mxu3 %vm10819_vm7, %v10862_v6  ;;  %v9332_v36 = vadd.f32 %v3917_v10, %v3473_v27  ;;  %vm11224_vm7 = vcmp.eq.s32.totalorder %v11206_v19, %v6590_v50  ;;  %v9348_v10 = vsub.f32 %v5678_v45, %v5678_v45 }
 0x45d   : > { %v3480_v20 = vpop.f32.mrf.mxu2  ;;  %v2734_v43 = vpop.f32.mrf.mxu0 }
 0x45e   : > { %v2735_v15 = vadd.f32 %v2734_v43, %v7660_v53  ;;  %11225 = vst [vmem:[#allocation148_spill] sm:$0xff] %v9348_v10  ;;  %v3621_v53 = vsub.f32 %v9321_v14, %v10822_v55 }
 0x45f   : > { %5871 = vmatmul.msk.f32.gmra.mxu1 %vm11223_vm11, %v10862_v6  ;;  %v3921_v17 = vpop.f32.mrf.mxu3  ;;  %vm527_vm11 = vcmp.eq.s32.totalorder %v7680_v26, %v7733_v62 }
 0x460   : > { %v3024_v47 = vadd.f32 %v3023_v24, %v2735_v15  ;;  %5806 = vmatmul.msk.f32.gmra.mxu0 %vm11224_vm7, %v10862_v6  ;;  %vm11226_vm7 = vcmp.eq.s32.totalorder %v7626_v60, %v6590_v50  ;;  %v3622_v15 = vand.u32 4294901760, %v3621_v53  ;;  %v5680_v45 = vsel %vm527_vm11, 1.0, %v10935_v63 }
 0x462   : > { %3615 = vmatmul.f32.gmra.mxu2 %v3614_v32  ;;  %v3481_v52 = vadd.f32 %v3480_v20, %v3024_v47  ;;  %v10826_v32 = vand.u32 4294901760, %v9348_v10 }
 0x464   : > { %v3031_v27 = vpop.f32.mrf.mxu1  ;;  %5935 = vmatmul.msk.f32.gmra.mxu3 %vm10823_vm8, %v10862_v6  ;;  %v9359_v49 = vadd.f32 %v3921_v17, %v3481_v52  ;;  %vm11227_vm8 = vcmp.eq.s32.totalorder %v11212_v61, %v6590_v50  ;;  %v9375_v17 = vsub.f32 %v5680_v45, %v5680_v45 }
 0x465   : > { %v3488_v24 = vpop.f32.mrf.mxu2  ;;  %v2738_v47 = vpop.f32.mrf.mxu0 }
 0x466   : > { %v2739_v43 = vadd.f32 %v2738_v47, %v7685_v38  ;;  %11228 = vst [vmem:[#allocation149_spill] sm:$0xff] %v9375_v17  ;;  %v3629_v38 = vsub.f32 %v9348_v10, %v10826_v32 }
 0x467   : > { %5872 = vmatmul.msk.f32.gmra.mxu1 %vm11226_vm7, %v10862_v6  ;;  %v3925_v20 = vpop.f32.mrf.mxu3  ;;  %vm529_vm7 = vcmp.eq.s32.totalorder %v7706_v16, %v7733_v62 }
 0x468   : > { %v3028_v55 = vadd.f32 %v3027_v42, %v2739_v43  ;;  %5807 = vmatmul.msk.f32.gmra.mxu0 %vm11227_vm8, %v10862_v6  ;;  %vm11229_vm8 = vcmp.eq.s32.totalorder %v7656_v31, %v6590_v50  ;;  %v3630_v43 = vand.u32 4294901760, %v3629_v38  ;;  %v5682_v45 = vsel %vm529_vm7, 1.0, %v10935_v63 }
 0x46a   : > { %3623 = vmatmul.f32.gmra.mxu2 %v3622_v15  ;;  %v3489_v14 = vadd.f32 %v3488_v24, %v3028_v55  ;;  %v10830_v15 = vand.u32 4294901760, %v9375_v17 }
 0x46c   : > { %v3035_v52 = vpop.f32.mrf.mxu1  ;;  %5936 = vmatmul.msk.f32.gmra.mxu3 %vm10827_vm9, %v10862_v6  ;;  %v9386_v53 = vadd.f32 %v3925_v20, %v3489_v14  ;;  %vm11230_vm9 = vcmp.eq.s32.totalorder %v7626_v60, %v6590_v50  ;;  %v9402_v20 = vsub.f32 %v5682_v45, %v5682_v45 }
 0x46d   : > { %v3496_v42 = vpop.f32.mrf.mxu2  ;;  %v2742_v55 = vpop.f32.mrf.mxu0 }
 0x46e   : > { %v2743_v47 = vadd.f32 %v2742_v55, %v7711_v57  ;;  %v3637_v57 = vsub.f32 %v9375_v17, %v10830_v15 }
 0x46f   : > { %5873 = vmatmul.msk.f32.gmra.mxu1 %vm11229_vm8, %v10862_v6  ;;  %v3929_v24 = vpop.f32.mrf.mxu3  ;;  %vm10835_vm8 = vcmp.eq.s32.totalorder %v7735_v18, %v7733_v62 }
 0x470   : > { %v3032_v32 = vadd.f32 %v3031_v27, %v2743_v47  ;;  %5808 = vmatmul.msk.f32.gmra.mxu0 %vm11230_vm9, %v10862_v6  ;;  %vm11231_vm9 = vcmp.eq.s32.totalorder %v7680_v26, %v6590_v50  ;;  %v3638_v47 = vand.u32 4294901760, %v3637_v57  ;;  %v5684_v45 = vsel %vm10835_vm8, 1.0, %v10935_v63 }
 0x472   : > { %3631 = vmatmul.f32.gmra.mxu2 %v3630_v43  ;;  %v3497_v10 = vadd.f32 %v3496_v42, %v3032_v32  ;;  %v3644_v43 = vand.u32 4294901760, %v9402_v20 }
 0x474   : > { %v3039_v14 = vpop.f32.mrf.mxu1  ;;  %5937 = vmatmul.msk.f32.gmra.mxu3 %vm10831_vm10, %v10862_v6  ;;  %v9413_v38 = vadd.f32 %v3929_v24, %v3497_v10  ;;  %vm11232_vm10 = vcmp.eq.s32.totalorder %v7656_v31, %v6590_v50  ;;  %v9429_v24 = vsub.f32 %v5684_v45, %v5684_v45  ;;  %v3645_v63 = vsub.f32 %v9402_v20, %v3644_v43 }
 0x475   : > { %v3504_v27 = vpop.f32.mrf.mxu2  ;;  %v2746_v32 = vpop.f32.mrf.mxu0 }
 0x476   : > { %v2747_v55 = vadd.f32 %v2746_v32, %v7740_v28 }
 0x477   : > { %5874 = vmatmul.msk.f32.gmra.mxu1 %vm11231_vm9, %v10862_v6  ;;  %v3933_v42 = vpop.f32.mrf.mxu3 }
 0x478   : > { %v3036_v15 = vadd.f32 %v3035_v52, %v2747_v55  ;;  %5809 = vmatmul.msk.f32.gmra.mxu0 %vm11232_vm10, %v10862_v6  ;;  %vm11233_vm10 = vcmp.eq.s32.totalorder %v7706_v16, %v6590_v50  ;;  %v10834_v55 = vand.u32 4294901760, %v9429_v24 }
 0x47a   : > { %3639 = vmatmul.f32.gmra.mxu2 %v3638_v47  ;;  %v3505_v17 = vadd.f32 %v3504_v27, %v3036_v15  ;;  %v3646_v27 = vand.u32 4294901760, %v3645_v63 }
 0x47c   : > { %v3043_v10 = vpop.f32.mrf.mxu1  ;;  %5938 = vmatmul.msk.f32.gmra.mxu3 %vm527_vm11, %v10862_v6  ;;  %v9438_v52 = vadd.f32 %v3933_v42, %v3505_v17 }
 0x47d   : > { %v3512_v28 = vpop.f32.mrf.mxu2  ;;  %v2750_v57 = vpop.f32.mrf.mxu0 }
 0x47e   : > { %v2751_v15 = vadd.f32 %v2750_v57, %v7766_v39  ;;  %v3653_v39 = vsub.f32 %v9429_v24, %v10834_v55 }
 0x47f   : > { %5875 = vmatmul.msk.f32.gmra.mxu1 %vm11233_vm10, %v10862_v6  ;;  %v3937_v32 = vpop.f32.mrf.mxu3  ;;  %vm11234_vm10 = vcmp.eq.s32.totalorder %v7735_v18, %v6590_v50 }
 0x480   : > { %v3040_v47 = vadd.f32 %v3039_v14, %v2751_v15  ;;  %5810 = vmatmul.msk.f32.gmra.mxu0 %vm11231_vm9, %v10862_v6  ;;  %v3654_v15 = vand.u32 4294901760, %v3653_v39  ;;  %vm11235_vm9 = vcmp.eq.s32.totalorder %v7706_v16, %v6590_v50 }
 0x482   : > { %3647 = vmatmul.f32.gmra.mxu2 %v3646_v27  ;;  %v3513_v42 = vadd.f32 %v3512_v28, %v3040_v47 }
 0x484   : > { %v3047_v17 = vpop.f32.mrf.mxu1  ;;  %5939 = vmatmul.msk.f32.gmra.mxu3 %vm529_vm7, %v10862_v6  ;;  %v9457_v63 = vadd.f32 %v3937_v32, %v3513_v42 }
 0x485   : > { %v3520_v45 = vpop.f32.mrf.mxu2  ;;  %v2754_v14 = vpop.f32.mrf.mxu0 }
 0x486   : > { %v2755_v28 = vadd.f32 %v2754_v14, %v7782_v7  ;;  %v11236_v7 = vand.u32 4294901760, %v7764_v9 }
 0x487   : > { %5876 = vmatmul.msk.f32.gmra.mxu1 %vm11234_vm10, %v10862_v6  ;;  %v3941_v57 = vpop.f32.mrf.mxu3 }
 0x488   : > { %v3044_v27 = vadd.f32 %v3043_v10, %v2755_v28  ;;  %5811 = vmatmul.msk.f32.gmra.mxu0 %vm11235_vm9, %v10862_v6  ;;  %vm11237_vm9 = vcmp.eq.s32.totalorder %v6593_v54, %v7733_v62 }
 0x48a   : > { %3655 = vmatmul.f32.gmra.mxu2 %v3654_v15  ;;  %v3521_v32 = vadd.f32 %v3520_v45, %v3044_v27 }
 0x48c   : > { %v3051_v47 = vpop.f32.mrf.mxu1  ;;  %5940 = vmatmul.msk.f32.gmra.mxu3 %vm10835_vm8, %v10862_v6  ;;  %v9472_v55 = vadd.f32 %v3941_v57, %v3521_v32  ;;  %vm11238_vm8 = vmmov %vm11237_vm9 }
 0x48d   : > { %v3528_v42 = vpop.f32.mrf.mxu2  ;;  %v2758_v10 = vpop.f32.mrf.mxu0 }
 0x48e   : > { %v2759_v14 = vadd.f32 %v2758_v10, %v7800_v41 }
 0x48f   : > { %4416 = vmatmul.f32.vlgmr.msra.gmra.mxu1 %v11236_v7  ;;  %v3945_v39 = vpop.f32.mrf.mxu3 }
 0x490   : > { %v3048_v28 = vadd.f32 %v3047_v17, %v2759_v14  ;;  %5812 = vmatmul.msk.f32.gmra.mxu0 %vm11234_vm10, %v10862_v6  ;;  %v11239_v17 = vand.u32 4294901760, %v7780_v44 }
 0x492   : > { %5941 = vmatmul.msk.f32.vlgmr.msra.gmra.mxu2 %vm11237_vm9, %v10862_v6  ;;  %v3529_v57 = vadd.f32 %v3528_v42, %v3048_v28 }
 0x494   : > { %v3055_v45 = vpop.f32.mrf.mxu1  ;;  %6005 = vmatmul.msk.f32.vlgmr.msra.gmra.mxu3 %vm11238_vm8, %v10862_v6  ;;  %v9489_v41 = vadd.f32 %v3945_v39, %v3529_v57 }
 0x495   : > { %v3536_v15 = vpop.f32.mrf.mxu2  ;;  %v2762_v50 = vpop.f32.mrf.mxu0 }
 0x496   : > { %v2763_v32 = vadd.f32 %v2762_v50, %v7826_v58  ;;  %v11240_v58 = vand.u32 4294901760, %v7798_v33 }
 0x497   : > { %4422 = vmatmul.f32.gmra.mxu1 %v11239_v17  ;;  %v3949_v27 = vpop.f32.mrf.mxu3 }
 0x498   : > { %v3052_v7 = vadd.f32 %v3051_v47, %v2763_v32  ;;  %4062 = vmatmul.f32.vlgmr.msra.gmra.mxu0 %v7764_v9 }
 0x49a   : > { %5942 = vmatmul.msk.f32.gmra.mxu2 %vm407_vm14, %v10862_v6  ;;  %v3537_v42 = vadd.f32 %v3536_v15, %v3052_v7 }
 0x49c   : > { %v3059_v54 = vpop.f32.mrf.mxu1  ;;  %6006 = vmatmul.msk.f32.gmra.mxu3 %vm407_vm14, %v10862_v6  ;;  %v9503_v39 = vadd.f32 %v3949_v27, %v3537_v42 }
 0x49d   : > { %v3544_v10 = vpop.f32.mrf.mxu2  ;;  %v2766_v47 = vpop.f32.mrf.mxu0 }
 0x49e   : > { %v2767_v14 = vadd.f32 %v2766_v47, %v7852_v46  ;;  %v11241_v46 = vand.u32 4294901760, %v7824_v12 }
 0x49f   : > { %4428 = vmatmul.f32.gmra.mxu1 %v11240_v58  ;;  %v3953_v9 = vpop.f32.mrf.mxu3 }
 0x4a0   : > { %v3056_v28 = vadd.f32 %v3055_v45, %v2767_v14  ;;  %4067 = vmatmul.f32.gmra.mxu0 %v7780_v44 }
 0x4a2   : > { %5943 = vmatmul.msk.f32.gmra.mxu2 %vm409_vm15, %v10862_v6  ;;  %v3545_v57 = vadd.f32 %v3544_v10, %v3056_v28 }
 0x4a4   : > { %v3063_v13 = vpop.f32.mrf.mxu1  ;;  %6007 = vmatmul.msk.f32.gmra.mxu3 %vm409_vm15, %v10862_v6  ;;  %v9517_v17 = vadd.f32 %v3953_v9, %v3545_v57 }
 0x4a5   : > { %v3552_v15 = vpop.f32.mrf.mxu2  ;;  %v2770_v45 = vpop.f32.mrf.mxu0 }
 0x4a6   : > { %v2771_v50 = vadd.f32 %v2770_v45, %v7878_v59  ;;  %v11242_v59 = vand.u32 4294901760, %v7850_v22 }
 0x4a7   : > { %4434 = vmatmul.f32.gmra.mxu1 %v11241_v46  ;;  %v3957_v44 = vpop.f32.mrf.mxu3 }
 0x4a8   : > { %v3060_v27 = vadd.f32 %v3059_v54, %v2771_v50  ;;  %4072 = vmatmul.f32.gmra.mxu0 %v7798_v33 }
 0x4aa   : > { %5944 = vmatmul.msk.f32.gmra.mxu2 %vm411_vm12, %v10862_v6  ;;  %v3553_v32 = vadd.f32 %v3552_v15, %v3060_v27 }
 0x4ac   : > { %v3067_v11 = vpop.f32.mrf.mxu1  ;;  %6008 = vmatmul.msk.f32.gmra.mxu3 %vm411_vm12, %v10862_v6  ;;  %v9531_v42 = vadd.f32 %v3957_v44, %v3553_v32 }
 0x4ad   : > { %v3560_v7 = vpop.f32.mrf.mxu2  ;;  %v2774_v54 = vpop.f32.mrf.mxu0 }
 0x4ae   : > { %v2775_v10 = vadd.f32 %v2774_v54, %v7904_v25  ;;  %v11243_v25 = vand.u32 4294901760, %v7876_v37 }
 0x4af   : > { %4440 = vmatmul.f32.gmra.mxu1 %v11242_v59  ;;  %v3961_v33 = vpop.f32.mrf.mxu3 }
 0x4b0   : > { %v3064_v58 = vadd.f32 %v3063_v13, %v2775_v10  ;;  %4077 = vmatmul.f32.gmra.mxu0 %v7824_v12 }
 0x4b2   : > { %5945 = vmatmul.msk.f32.gmra.mxu2 %vm413_vm13, %v10862_v6  ;;  %v3561_v47 = vadd.f32 %v3560_v7, %v3064_v58 }
 0x4b4   : > { %v3071_v4 = vpop.f32.mrf.mxu1  ;;  %6009 = vmatmul.msk.f32.gmra.mxu3 %vm413_vm13, %v10862_v6  ;;  %v9545_v14 = vadd.f32 %v3961_v33, %v3561_v47 }
 0x4b5   : > { %v3568_v9 = vpop.f32.mrf.mxu2  ;;  %v2778_v28 = vpop.f32.mrf.mxu0 }
 0x4b6   : > { %v2779_v13 = vadd.f32 %v2778_v28, %v7930_v56  ;;  %v11244_v56 = vand.u32 4294901760, %v7902_v2 }
 0x4b7   : > { %4446 = vmatmul.f32.gmra.mxu1 %v11243_v25  ;;  %v3965_v12 = vpop.f32.mrf.mxu3 }
 0x4b8   : > { %v3068_v57 = vadd.f32 %v3067_v11, %v2779_v13  ;;  %4082 = vmatmul.f32.gmra.mxu0 %v7850_v22 }
 0x4ba   : > { %5946 = vmatmul.msk.f32.gmra.mxu2 %vm415_vm0, %v10862_v6  ;;  %v3569_v15 = vadd.f32 %v3568_v9, %v3068_v57 }
 0x4bc   : > { %v3075_v23 = vpop.f32.mrf.mxu1  ;;  %6010 = vmatmul.msk.f32.gmra.mxu3 %vm415_vm0, %v10862_v6  ;;  %v9559_v45 = vadd.f32 %v3965_v12, %v3569_v15 }
 0x4bd   : > { %v3576_v46 = vpop.f32.mrf.mxu2  ;;  %v2782_v44 = vpop.f32.mrf.mxu0 }
 0x4be   : > { %v2783_v50 = vadd.f32 %v2782_v44, %v7956_v51  ;;  %v11245_v51 = vand.u32 4294901760, %v7928_v29 }
 0x4bf   : > { %4452 = vmatmul.f32.gmra.mxu1 %v11244_v56  ;;  %v3969_v22 = vpop.f32.mrf.mxu3 }
 0x4c0   : > { %v3072_v27 = vadd.f32 %v3071_v4, %v2783_v50  ;;  %4087 = vmatmul.f32.gmra.mxu0 %v7876_v37  ;;  %v11249_v50 = vld [vmem:[#allocation96_spill] sm:$0xff] }
 0x4c2   : > { %5947 = vmatmul.msk.f32.gmra.mxu2 %vm417_vm1, %v10862_v6  ;;  %v3577_v11 = vadd.f32 %v3576_v46, %v3072_v27 }
 0x4c4   : > { %v3079_v0 = vpop.f32.mrf.mxu1  ;;  %6011 = vmatmul.msk.f32.gmra.mxu3 %vm417_vm1, %v10862_v6  ;;  %v9573_v7 = vadd.f32 %v3969_v22, %v3577_v11 }
 0x4c5   : > { %v3584_v32 = vpop.f32.mrf.mxu2  ;;  %v2786_v59 = vpop.f32.mrf.mxu0 }
 0x4c6   : > { %v2787_v54 = vadd.f32 %v2786_v59, %v7982_v1  ;;  %v11246_v1 = vand.u32 4294901760, %v7954_v30 }
 0x4c7   : > { %4458 = vmatmul.f32.gmra.mxu1 %v11245_v51  ;;  %v3973_v37 = vpop.f32.mrf.mxu3  ;;  %v11265_v51 = vld [vmem:[#allocation105_spill] sm:$0xff] }
 0x4c8   : > { %v3076_v33 = vadd.f32 %v3075_v23, %v2787_v54  ;;  %4092 = vmatmul.f32.gmra.mxu0 %v7902_v2 }
 0x4ca   : > { %5948 = vmatmul.msk.f32.gmra.mxu2 %vm419_vm2, %v10862_v6  ;;  %v3585_v10 = vadd.f32 %v3584_v32, %v3076_v33 }
 0x4cc   : > { %v3083_v34 = vpop.f32.mrf.mxu1  ;;  %6012 = vmatmul.msk.f32.gmra.mxu3 %vm419_vm2, %v10862_v6  ;;  %v9587_v4 = vadd.f32 %v3973_v37, %v3585_v10 }
 0x4cd   : > { %v3592_v58 = vpop.f32.mrf.mxu2  ;;  %v2790_v47 = vpop.f32.mrf.mxu0 }
 0x4ce   : > { %v2791_v9 = vadd.f32 %v2790_v47, %v8008_v48  ;;  %v11247_v48 = vand.u32 4294901760, %v7980_v21 }
 0x4cf   : > { %4464 = vmatmul.f32.gmra.mxu1 %v11246_v1  ;;  %v3977_v2 = vpop.f32.mrf.mxu3  ;;  %v11255_v1 = vld [vmem:[#allocation101_spill] sm:$0xff] }
 0x4d0   : > { %v3080_v25 = vadd.f32 %v3079_v0, %v2791_v9  ;;  %4097 = vmatmul.f32.gmra.mxu0 %v7928_v29  ;;  %v11251_v0 = vld [vmem:[#allocation99_spill] sm:$0xff] }
 0x4d2   : > { %5949 = vmatmul.msk.f32.gmra.mxu2 %vm421_vm3, %v10862_v6  ;;  %v3593_v28 = vadd.f32 %v3592_v58, %v3080_v25 }
 0x4d4   : > { %v3087_v3 = vpop.f32.mrf.mxu1  ;;  %6013 = vmatmul.msk.f32.gmra.mxu3 %vm421_vm3, %v10862_v6  ;;  %v9601_v13 = vadd.f32 %v3977_v2, %v3593_v28 }
 0x4d5   : > { %v3600_v12 = vpop.f32.mrf.mxu2  ;;  %v2794_v57 = vpop.f32.mrf.mxu0 }
 0x4d6   : > { %v2795_v23 = vadd.f32 %v2794_v57, %v8034_v40  ;;  %v11250_v40 = vand.u32 4294901760, %v11249_v50 }
 0x4d7   : > { %4470 = vmatmul.f32.gmra.mxu1 %v11247_v48  ;;  %v3981_v29 = vpop.f32.mrf.mxu3  ;;  %v11257_v48 = vld [vmem:[#allocation98_spill] sm:$0xff] }
 0x4d8   : > { %v3084_v15 = vadd.f32 %v3083_v34, %v2795_v23  ;;  %4102 = vmatmul.f32.gmra.mxu0 %v7954_v30  ;;  %v11253_v34 = vld [vmem:[#allocation97_spill] sm:$0xff]  ;;  %v11258_v57 = vand.u32 4294901760, %v11257_v48 }
 0x4d9   : > { %v11254_v10 = vand.u32 4294901760, %v11253_v34 }
 0x4da   : > { %5950 = vmatmul.msk.f32.gmra.mxu2 %vm423_vm4, %v10862_v6  ;;  %v3601_v56 = vadd.f32 %v3600_v12, %v3084_v15  ;;  %v11259_v15 = vld [vmem:[#allocation103_spill] sm:$0xff] }
 0x4dc   : > { %v3091_v5 = vpop.f32.mrf.mxu1  ;;  %6014 = vmatmul.msk.f32.gmra.mxu3 %vm423_vm4, %v10862_v6  ;;  %v9615_v22 = vadd.f32 %v3981_v29, %v3601_v56  ;;  %v11260_v56 = vld [vmem:[#allocation8_spill] sm:$0xff] }
 0x4dd   : > { %v3608_v44 = vpop.f32.mrf.mxu2  ;;  %v2798_v27 = vpop.f32.mrf.mxu0  ;;  %vm11261_vm12 = vcmp.eq.s32.totalorder %v11260_v56, %v7733_v62 }
 0x4de   : > { %v2799_v11 = vadd.f32 %v2798_v27, %v11251_v0  ;;  %vm11262_vm13 = vmmov %vm11261_vm12 }
 0x4df   : > { %4476 = vmatmul.f32.gmra.mxu1 %v11250_v40  ;;  %v3985_v30 = vpop.f32.mrf.mxu3 }
 0x4e0   : > { %v3088_v32 = vadd.f32 %v3087_v3, %v2799_v11  ;;  %4107 = vmatmul.f32.gmra.mxu0 %v7980_v21 }
 0x4e2   : > { %5951 = vmatmul.msk.f32.gmra.mxu2 %vm425_vm5, %v10862_v6  ;;  %v3609_v37 = vadd.f32 %v3608_v44, %v3088_v32 }
 0x4e4   : > { %v3095_v59 = vpop.f32.mrf.mxu1  ;;  %6015 = vmatmul.msk.f32.gmra.mxu3 %vm425_vm5, %v10862_v6  ;;  %v9629_v33 = vadd.f32 %v3985_v30, %v3609_v37  ;;  %v11263_v30 = vld [vmem:[#allocation100_spill] sm:$0xff] }
 0x4e5   : > { %v3616_v54 = vpop.f32.mrf.mxu2  ;;  %v2802_v58 = vpop.f32.mrf.mxu0  ;;  %v11264_v0 = vand.u32 4294901760, %v11263_v30 }
 0x4e6   : > { %v2803_v47 = vadd.f32 %v2802_v58, %v11255_v1  ;;  %v11269_v1 = vld [vmem:[#allocation102_spill] sm:$0xff] }
 0x4e7   : > { %4482 = vmatmul.f32.gmra.mxu1 %v11254_v10  ;;  %v3989_v21 = vpop.f32.mrf.mxu3 }
 0x4e8   : > { %v3092_v2 = vadd.f32 %v3091_v5, %v2803_v47  ;;  %4112 = vmatmul.f32.gmra.mxu0 %v11249_v50  ;;  %v11270_v47 = vand.u32 4294901760, %v11269_v1 }
 0x4ea   : > { %5952 = vmatmul.msk.f32.gmra.mxu2 %vm427_vm6, %v10862_v6  ;;  %v3617_v3 = vadd.f32 %v3616_v54, %v3092_v2  ;;  %v11266_v54 = vld [vmem:[#allocation9_spill] sm:$0xff] }
 0x4eb   : > { %vm11267_vm14 = vcmp.eq.s32.totalorder %v11266_v54, %v7733_v62 }
 0x4ec   : > { %v3099_v25 = vpop.f32.mrf.mxu1  ;;  %6016 = vmatmul.msk.f32.gmra.mxu3 %vm427_vm6, %v10862_v6  ;;  %v9643_v12 = vadd.f32 %v3989_v21, %v3617_v3  ;;  %vm11268_vm15 = vmmov %vm11267_vm14 }
 0x4ed   : > { %v3624_v28 = vpop.f32.mrf.mxu2  ;;  %v2806_v29 = vpop.f32.mrf.mxu0 }
 0x4ee   : > { %v2807_v46 = vadd.f32 %v2806_v29, %v11259_v15 }
 0x4ef   : > { %4488 = vmatmul.f32.gmra.mxu1 %v11258_v57  ;;  %v3993_v23 = vpop.f32.mrf.mxu3 }
 0x4f0   : > { %v3096_v5 = vadd.f32 %v3095_v59, %v2807_v46  ;;  %4117 = vmatmul.f32.gmra.mxu0 %v11253_v34  ;;  %v11275_v46 = vld [vmem:[#allocation104_spill] sm:$0xff] }
 0x4f2   : > { %5953 = vmatmul.msk.f32.gmra.mxu2 %vm11261_vm12, %v10862_v6  ;;  %v3625_v50 = vadd.f32 %v3624_v28, %v3096_v5  ;;  %v11276_v5 = vand.u32 4294901760, %v11275_v46 }
 0x4f4   : > { %v3103_v44 = vpop.f32.mrf.mxu1  ;;  %6017 = vmatmul.msk.f32.gmra.mxu3 %vm11262_vm13, %v10862_v6  ;;  %v9657_v27 = vadd.f32 %v3993_v23, %v3625_v50  ;;  %v11277_v50 = vld [vmem:[#allocation109_spill] sm:$0xff] }
 0x4f5   : > { %v3632_v40 = vpop.f32.mrf.mxu2  ;;  %v2810_v11 = vpop.f32.mrf.mxu0 }
 0x4f6   : > { %v2811_v59 = vadd.f32 %v2810_v11, %v11265_v51 }
 0x4f7   : > { %4494 = vmatmul.f32.gmra.mxu1 %v11264_v0  ;;  %v3997_v32 = vpop.f32.mrf.mxu3  ;;  %v11278_v0 = vld [vmem:[#allocation11_spill] sm:$0xff] }
 0x4f8   : > { %v3100_v37 = vadd.f32 %v3099_v25, %v2811_v59  ;;  %4122 = vmatmul.f32.gmra.mxu0 %v11257_v48  ;;  %v11271_v25 = vld [vmem:[#allocation107_spill] sm:$0xff]  ;;  %v11272_v48 = vld [vmem:[#allocation10_spill] sm:$0xff]  ;;  %vm11279_vm2 = vcmp.eq.s32.totalorder %v11278_v0, %v7733_v62 }
 0x4f9   : > { %vm11273_vm0 = vcmp.eq.s32.totalorder %v11272_v48, %v7733_v62  ;;  %vm11280_vm3 = vmmov %vm11279_vm2  ;;  %v11287_v48 = vld [vmem:[#allocation108_spill] sm:$0xff] }
 0x4fa   : > { %5954 = vmatmul.msk.f32.gmra.mxu2 %vm11267_vm14, %v10862_v6  ;;  %v3633_v10 = vadd.f32 %v3632_v40, %v3100_v37  ;;  %vm11274_vm1 = vmmov %vm11273_vm0  ;;  %v11281_v37 = vld [vmem:[#allocation106_spill] sm:$0xff] }
 0x4fb   : > { %v11282_v54 = vand.u32 4294901760, %v11281_v37 }
 0x4fc   : > { %v3107_v34 = vpop.f32.mrf.mxu1  ;;  %6018 = vmatmul.msk.f32.gmra.mxu3 %vm11268_vm15, %v10862_v6  ;;  %v9671_v21 = vadd.f32 %v3997_v32, %v3633_v10 }
 0x4fd   : > { %v3640_v58 = vpop.f32.mrf.mxu2  ;;  %v2814_v2 = vpop.f32.mrf.mxu0 }
 0x4fe   : > { %v2815_v3 = vadd.f32 %v2814_v2, %v11271_v25  ;;  %v11284_v2 = vld [vmem:[#allocation12_spill] sm:$0xff] }
 0x4ff   : > { %4500 = vmatmul.f32.gmra.mxu1 %v11270_v47  ;;  %v4001_v9 = vpop.f32.mrf.mxu3  ;;  %vm11285_vm4 = vcmp.eq.s32.totalorder %v11284_v2, %v7733_v62 }
 0x500   : > { %v3104_v28 = vadd.f32 %v3103_v44, %v2815_v3  ;;  %4127 = vmatmul.f32.gmra.mxu0 %v11263_v30  ;;  %vm11286_vm5 = vmmov %vm11285_vm4 }
 0x502   : > { %5955 = vmatmul.msk.f32.gmra.mxu2 %vm11273_vm0, %v10862_v6  ;;  %v3641_v29 = vadd.f32 %v3640_v58, %v3104_v28  ;;  %v11283_v58 = vld [vmem:[#allocation111_spill] sm:$0xff] }
 0x504   : > { %v3111_v57 = vpop.f32.mrf.mxu1  ;;  %6019 = vmatmul.msk.f32.gmra.mxu3 %vm11274_vm1, %v10862_v6  ;;  %v9685_v15 = vadd.f32 %v4001_v9, %v3641_v29  ;;  %v11288_v29 = vand.u32 4294901760, %v11287_v48 }
 0x505   : > { %v3648_v23 = vpop.f32.mrf.mxu2  ;;  %v2818_v56 = vpop.f32.mrf.mxu0 }
 0x506   : > { %v2819_v40 = vadd.f32 %v2818_v56, %v11277_v50 }
 0x507   : > { %4506 = vmatmul.f32.gmra.mxu1 %v11276_v5  ;;  %v4005_v44 = vpop.f32.mrf.mxu3 }
 0x508   : > { %v3108_v30 = vadd.f32 %v3107_v34, %v2819_v40  ;;  %4132 = vmatmul.f32.gmra.mxu0 %v11269_v1 }
 0x50a   : > { %5956 = vmatmul.msk.f32.gmra.mxu2 %vm11279_vm2, %v10862_v6  ;;  %v3649_v32 = vadd.f32 %v3648_v23, %v3108_v30 }
 0x50c   : > { %v4417_v11 = vpop.f32.mrf.mxu1  ;;  %6020 = vmatmul.msk.f32.gmra.mxu3 %vm11280_vm3, %v10862_v6  ;;  %v9699_v59 = vadd.f32 %v4005_v44, %v3649_v32  ;;  %v11290_v44 = vld [vmem:[#allocation13_spill] sm:$0xff]  ;;  %v11293_v32 = vld [vmem:[#allocation110_spill] sm:$0xff] }
 0x50d   : > { %v3656_v51 = vpop.f32.mrf.mxu2  ;;  %v2822_v34 = vpop.f32.mrf.mxu0  ;;  %vm11291_vm6 = vcmp.eq.s32.totalorder %v11290_v44, %v7733_v62 }
 0x50e   : > { %v2823_v1 = vadd.f32 %v2822_v34, %v11283_v58  ;;  %vm11292_vm8 = vmmov %vm11291_vm6  ;;  %v11296_v58 = vld [vmem:[#allocation14_spill] sm:$0xff] }
 0x50f   : > { %4512 = vmatmul.f32.gmra.mxu1 %v11282_v54  ;;  %v4009_v10 = vpop.f32.mrf.mxu3  ;;  %vm11297_vm10 = vcmp.eq.s32.totalorder %v11296_v58, %v7733_v62 }
 0x510   : > { %v3112_v47 = vadd.f32 %v3111_v57, %v2823_v1  ;;  %4137 = vmatmul.f32.gmra.mxu0 %v11275_v46  ;;  %v11289_v46 = vld [vmem:[#allocation112_spill] sm:$0xff]  ;;  %vm11298_vm9 = vmmov %vm11297_vm10 }
 0x512   : > { %5957 = vmatmul.msk.f32.gmra.mxu2 %vm11285_vm4, %v10862_v6  ;;  %v3657_v25 = vadd.f32 %v3656_v51, %v3112_v47 }
 0x514   : > { %v4423_v9 = vpop.f32.mrf.mxu1  ;;  %6021 = vmatmul.msk.f32.gmra.mxu3 %vm11286_vm5, %v10862_v6  ;;  %v9713_v28 = vadd.f32 %v4009_v10, %v3657_v25 }
 0x515   : > { %v4864_v3 = vpop.f32.mrf.mxu2  ;;  %v4063_v57 = vpop.f32.mrf.mxu0 }
 0x516   : > { %v4064_v5 = vadd.f32 %v4063_v57, %v11289_v46  ;;  %v11301_v57 = vld [vmem:[#allocation114_spill] sm:$0xff] }
 0x517   : > { %4518 = vmatmul.f32.gmra.mxu1 %v11288_v29  ;;  %v5153_v23 = vpop.f32.mrf.mxu3 }
 0x518   : > { %v4418_v56 = vadd.f32 %v4417_v11, %v4064_v5  ;;  %4142 = vmatmul.f32.gmra.mxu0 %v11281_v37  ;;  %v11294_v11 = vand.u32 4294901760, %v11293_v32  ;;  %v11295_v37 = vld [vmem:[#allocation113_spill] sm:$0xff]  ;;  %v11302_v5 = vld [vmem:[#allocation16_spill] sm:$0xff] }
 0x519   : > { %vm11303_vm12 = vcmp.eq.s32.totalorder %v11302_v5, %v7733_v62 }
 0x51a   : > { %5958 = vmatmul.msk.f32.gmra.mxu2 %vm11291_vm6, %v10862_v6  ;;  %v4865_v40 = vadd.f32 %v4864_v3, %v4418_v56  ;;  %v11299_v3 = vld [vmem:[#allocation15_spill] sm:$0xff]  ;;  %vm11304_vm13 = vmmov %vm11303_vm12 }
 0x51b   : > { %v11300_v29 = vand.u32 4294901760, %v11299_v3 }
 0x51c   : > { %v4429_v50 = vpop.f32.mrf.mxu1  ;;  %6022 = vmatmul.msk.f32.gmra.mxu3 %vm11292_vm8, %v10862_v6  ;;  %v5154_v0 = vadd.f32 %v5153_v23, %v4865_v40 }
 0x51d   : > { %v4868_v30 = vpop.f32.mrf.mxu2  ;;  %v4068_v51 = vpop.f32.mrf.mxu0 }
 0x51e   : > { %5408 = vst [vmem:[%s9732_s8] sm:$0xff] %v5154_v0  ;;  %v4069_v34 = vadd.f32 %v4068_v51, %v11295_v37  ;;  %v11305_v0 = vld [vmem:[#allocation17_spill] sm:$0xff]  ;;  %v11307_v51 = vld [vmem:[#allocation115_spill] sm:$0xff] }
 0x51f   : > { %4524 = vmatmul.f32.gmra.mxu1 %v11294_v11  ;;  %v5157_v54 = vpop.f32.mrf.mxu3  ;;  %v11306_v11 = vand.u32 4294901760, %v11305_v0 }
 0x520   : > { %v4424_v10 = vadd.f32 %v4423_v9, %v4069_v34  ;;  %4147 = vmatmul.f32.gmra.mxu0 %v11287_v48  ;;  %v11308_v34 = vld [vmem:[#allocation18_spill] sm:$0xff] }
 0x521   : > { %vm11309_vm14 = vcmp.eq.s32.totalorder %v11308_v34, %v7733_v62 }
 0x522   : > { %5959 = vmatmul.msk.f32.gmra.mxu2 %vm11297_vm10, %v10862_v6  ;;  %v4869_v47 = vadd.f32 %v4868_v30, %v4424_v10  ;;  %vm11310_vm15 = vmmov %vm11309_vm14 }
 0x524   : > { %v4435_v1 = vpop.f32.mrf.mxu1  ;;  %6023 = vmatmul.msk.f32.gmra.mxu3 %vm11298_vm9, %v10862_v6  ;;  %v5158_v25 = vadd.f32 %v5157_v54, %v4869_v47 }
 0x525   : > { %v4872_v2 = vpop.f32.mrf.mxu2  ;;  %v4073_v9 = vpop.f32.mrf.mxu0 }
 0x526   : > { %5409 = vst [vmem:[%s9732_s8 + $0x8] sm:$0xff] %v5158_v25  ;;  %v4074_v23 = vadd.f32 %v4073_v9, %v11301_v57  ;;  %v11311_v25 = vld [vmem:[#allocation20_spill] sm:$0xff] }
 0x527   : > { %4530 = vmatmul.f32.gmra.mxu1 %v11300_v29  ;;  %v5161_v48 = vpop.f32.mrf.mxu3  ;;  %v11312_v29 = vand.u32 4294901760, %v11311_v25  ;;  %v11313_v9 = vld [vmem:[#allocation116_spill] sm:$0xff] }
 0x528   : > { %v4430_v46 = vadd.f32 %v4429_v50, %v4074_v23  ;;  %4152 = vmatmul.f32.gmra.mxu0 %v11293_v32  ;;  %v11314_v23 = vld [vmem:[#allocation19_spill] sm:$0xff] }
 0x529   : > { %vm11315_vm0 = vcmp.eq.s32.totalorder %v11314_v23, %v7733_v62 }
 0x52a   : > { %5960 = vmatmul.msk.f32.gmra.mxu2 %vm11303_vm12, %v10862_v6  ;;  %v4873_v44 = vadd.f32 %v4872_v2, %v4430_v46  ;;  %vm11316_vm1 = vmmov %vm11315_vm0 }
 0x52c   : > { %v4441_v56 = vpop.f32.mrf.mxu1  ;;  %6024 = vmatmul.msk.f32.gmra.mxu3 %vm11304_vm13, %v10862_v6  ;;  %v5162_v30 = vadd.f32 %v5161_v48, %v4873_v44 }
 0x52d   : > { %v4876_v40 = vpop.f32.mrf.mxu2  ;;  %v4078_v50 = vpop.f32.mrf.mxu0 }
 0x52e   : > { %5410 = vst [vmem:[%s9732_s8 + $0x10] sm:$0xff] %v5162_v30  ;;  %v4079_v54 = vadd.f32 %v4078_v50, %v11307_v51  ;;  %v11317_v30 = vld [vmem:[#allocation22_spill] sm:$0xff]  ;;  %v11319_v50 = vld [vmem:[#allocation117_spill] sm:$0xff] }
 0x52f   : > { %4536 = vmatmul.f32.gmra.mxu1 %v11306_v11  ;;  %v5165_v32 = vpop.f32.mrf.mxu3  ;;  %v11318_v11 = vand.u32 4294901760, %v11317_v30 }
 0x530   : > { %v4436_v37 = vadd.f32 %v4435_v1, %v4079_v54  ;;  %4157 = vmatmul.f32.gmra.mxu0 %v11299_v3  ;;  %v11320_v54 = vld [vmem:[#allocation21_spill] sm:$0xff] }
 0x531   : > { %vm11321_vm2 = vcmp.eq.s32.totalorder %v11320_v54, %v7733_v62 }
 0x532   : > { %5961 = vmatmul.msk.f32.gmra.mxu2 %vm11309_vm14, %v10862_v6  ;;  %v4877_v58 = vadd.f32 %v4876_v40, %v4436_v37  ;;  %vm11322_vm3 = vmmov %vm11321_vm2 }
 0x534   : > { %v4447_v10 = vpop.f32.mrf.mxu1  ;;  %6025 = vmatmul.msk.f32.gmra.mxu3 %vm11310_vm15, %v10862_v6  ;;  %v5166_v2 = vadd.f32 %v5165_v32, %v4877_v58 }
 0x535   : > { %v4880_v47 = vpop.f32.mrf.mxu2  ;;  %v4083_v1 = vpop.f32.mrf.mxu0 }
 0x536   : > { %5411 = vst [vmem:[%s9732_s8 + $0x18] sm:$0xff] %v5166_v2  ;;  %v4084_v48 = vadd.f32 %v4083_v1, %v11313_v9  ;;  %v11323_v2 = vld [vmem:[#allocation24_spill] sm:$0xff]  ;;  %v11325_v1 = vld [vmem:[#allocation118_spill] sm:$0xff] }
 0x537   : > { %4542 = vmatmul.f32.gmra.mxu1 %v11312_v29  ;;  %v5169_v3 = vpop.f32.mrf.mxu3  ;;  %v11324_v29 = vand.u32 4294901760, %v11323_v2 }
 0x538   : > { %v4442_v57 = vadd.f32 %v4441_v56, %v4084_v48  ;;  %4162 = vmatmul.f32.gmra.mxu0 %v11305_v0  ;;  %v11326_v48 = vld [vmem:[#allocation23_spill] sm:$0xff] }
 0x539   : > { %vm11327_vm4 = vcmp.eq.s32.totalorder %v11326_v48, %v7733_v62 }
 0x53a   : > { %5962 = vmatmul.msk.f32.gmra.mxu2 %vm11315_vm0, %v10862_v6  ;;  %v4881_v5 = vadd.f32 %v4880_v47, %v4442_v57  ;;  %vm11328_vm5 = vmmov %vm11327_vm4 }
 0x53c   : > { %v4453_v46 = vpop.f32.mrf.mxu1  ;;  %6026 = vmatmul.msk.f32.gmra.mxu3 %vm11316_vm1, %v10862_v6  ;;  %v5170_v40 = vadd.f32 %v5169_v3, %v4881_v5 }
 0x53d   : > { %v4884_v44 = vpop.f32.mrf.mxu2  ;;  %v4088_v56 = vpop.f32.mrf.mxu0 }
 0x53e   : > { %5412 = vst [vmem:[%s9732_s8 + $0x20] sm:$0xff] %v5170_v40  ;;  %v4089_v32 = vadd.f32 %v4088_v56, %v11319_v50  ;;  %v11329_v40 = vld [vmem:[#allocation26_spill] sm:$0xff]  ;;  %v11331_v56 = vld [vmem:[#allocation119_spill] sm:$0xff] }
 0x53f   : > { %4548 = vmatmul.f32.gmra.mxu1 %v11318_v11  ;;  %v5173_v0 = vpop.f32.mrf.mxu3  ;;  %v11330_v11 = vand.u32 4294901760, %v11329_v40 }
 0x540   : > { %v4448_v51 = vadd.f32 %v4447_v10, %v4089_v32  ;;  %4167 = vmatmul.f32.gmra.mxu0 %v11311_v25  ;;  %v11332_v32 = vld [vmem:[#allocation25_spill] sm:$0xff] }
 0x541   : > { %vm11333_vm6 = vcmp.eq.s32.totalorder %v11332_v32, %v7733_v62 }
 0x542   : > { %5963 = vmatmul.msk.f32.gmra.mxu2 %vm11321_vm2, %v10862_v6  ;;  %v4885_v34 = vadd.f32 %v4884_v44, %v4448_v51  ;;  %vm11334_vm8 = vmmov %vm11333_vm6 }
 0x544   : > { %v4459_v37 = vpop.f32.mrf.mxu1  ;;  %6027 = vmatmul.msk.f32.gmra.mxu3 %vm11322_vm3, %v10862_v6  ;;  %v5174_v47 = vadd.f32 %v5173_v0, %v4885_v34 }
 0x545   : > { %v4888_v58 = vpop.f32.mrf.mxu2  ;;  %v4093_v10 = vpop.f32.mrf.mxu0 }
 0x546   : > { %5413 = vst [vmem:[%s9732_s8 + $0x28] sm:$0xff] %v5174_v47  ;;  %v4094_v3 = vadd.f32 %v4093_v10, %v11325_v1  ;;  %v11335_v47 = vld [vmem:[#allocation28_spill] sm:$0xff] }
 0x547   : > { %4554 = vmatmul.f32.gmra.mxu1 %v11324_v29  ;;  %v5177_v25 = vpop.f32.mrf.mxu3  ;;  %v11336_v29 = vand.u32 4294901760, %v11335_v47  ;;  %v11337_v10 = vld [vmem:[#allocation120_spill] sm:$0xff] }
 0x548   : > { %v4454_v9 = vadd.f32 %v4453_v46, %v4094_v3  ;;  %4172 = vmatmul.f32.gmra.mxu0 %v11317_v30  ;;  %v11338_v3 = vld [vmem:[#allocation27_spill] sm:$0xff] }
 0x549   : > { %vm11339_vm10 = vcmp.eq.s32.totalorder %v11338_v3, %v7733_v62 }
 0x54a   : > { %5964 = vmatmul.msk.f32.gmra.mxu2 %vm11327_vm4, %v10862_v6  ;;  %v4889_v23 = vadd.f32 %v4888_v58, %v4454_v9  ;;  %vm11340_vm9 = vmmov %vm11339_vm10 }
 0x54c   : > { %v4465_v57 = vpop.f32.mrf.mxu1  ;;  %6028 = vmatmul.msk.f32.gmra.mxu3 %vm11328_vm5, %v10862_v6  ;;  %v5178_v44 = vadd.f32 %v5177_v25, %v4889_v23 }
 0x54d   : > { %v4892_v5 = vpop.f32.mrf.mxu2  ;;  %v4098_v46 = vpop.f32.mrf.mxu0 }
 0x54e   : > { %5414 = vst [vmem:[%s9732_s8 + $0x30] sm:$0xff] %v5178_v44  ;;  %v4099_v0 = vadd.f32 %v4098_v46, %v11331_v56  ;;  %v11341_v44 = vld [vmem:[#allocation30_spill] sm:$0xff]  ;;  %v11343_v46 = vld [vmem:[#allocation121_spill] sm:$0xff] }
 0x54f   : > { %4560 = vmatmul.f32.gmra.mxu1 %v11330_v11  ;;  %v5181_v30 = vpop.f32.mrf.mxu3  ;;  %v11342_v11 = vand.u32 4294901760, %v11341_v44 }
 0x550   : > { %v4460_v50 = vadd.f32 %v4459_v37, %v4099_v0  ;;  %4177 = vmatmul.f32.gmra.mxu0 %v11323_v2  ;;  %v11344_v0 = vld [vmem:[#allocation29_spill] sm:$0xff] }
 0x551   : > { %vm11345_vm12 = vcmp.eq.s32.totalorder %v11344_v0, %v7733_v62 }
 0x552   : > { %5965 = vmatmul.msk.f32.gmra.mxu2 %vm11333_vm6, %v10862_v6  ;;  %v4893_v54 = vadd.f32 %v4892_v5, %v4460_v50  ;;  %vm11346_vm13 = vmmov %vm11345_vm12 }
 0x554   : > { %v4471_v51 = vpop.f32.mrf.mxu1  ;;  %6029 = vmatmul.msk.f32.gmra.mxu3 %vm11334_vm8, %v10862_v6  ;;  %v5182_v58 = vadd.f32 %v5181_v30, %v4893_v54 }
 0x555   : > { %v4896_v34 = vpop.f32.mrf.mxu2  ;;  %v4103_v37 = vpop.f32.mrf.mxu0 }
 0x556   : > { %5415 = vst [vmem:[%s9732_s8 + $0x38] sm:$0xff] %v5182_v58  ;;  %v4104_v25 = vadd.f32 %v4103_v37, %v11337_v10  ;;  %v11347_v58 = vld [vmem:[#allocation32_spill] sm:$0xff]  ;;  %v11349_v37 = vld [vmem:[#allocation122_spill] sm:$0xff] }
 0x557   : > { %4566 = vmatmul.f32.gmra.mxu1 %v11336_v29  ;;  %v5185_v2 = vpop.f32.mrf.mxu3  ;;  %v11348_v29 = vand.u32 4294901760, %v11347_v58 }
 0x558   : > { %v4466_v1 = vadd.f32 %v4465_v57, %v4104_v25  ;;  %4182 = vmatmul.f32.gmra.mxu0 %v11329_v40  ;;  %v11350_v25 = vld [vmem:[#allocation31_spill] sm:$0xff] }
 0x559   : > { %vm11351_vm14 = vcmp.eq.s32.totalorder %v11350_v25, %v7733_v62 }
 0x55a   : > { %5966 = vmatmul.msk.f32.gmra.mxu2 %vm11339_vm10, %v10862_v6  ;;  %v4897_v48 = vadd.f32 %v4896_v34, %v4466_v1  ;;  %vm11352_vm15 = vmmov %vm11351_vm14 }
 0x55c   : > { %v4477_v9 = vpop.f32.mrf.mxu1  ;;  %6030 = vmatmul.msk.f32.gmra.mxu3 %vm11340_vm9, %v10862_v6  ;;  %v5186_v5 = vadd.f32 %v5185_v2, %v4897_v48 }
 0x55d   : > { %v4900_v23 = vpop.f32.mrf.mxu2  ;;  %v4108_v57 = vpop.f32.mrf.mxu0 }
 0x55e   : > { %5416 = vst [vmem:[%s9732_s8 + $0x40] sm:$0xff] %v5186_v5  ;;  %v4109_v30 = vadd.f32 %v4108_v57, %v11343_v46  ;;  %v11353_v5 = vld [vmem:[#allocation34_spill] sm:$0xff]  ;;  %v11355_v57 = vld [vmem:[#allocation123_spill] sm:$0xff] }
 0x55f   : > { %4572 = vmatmul.f32.gmra.mxu1 %v11342_v11  ;;  %v5189_v40 = vpop.f32.mrf.mxu3  ;;  %v11354_v11 = vand.u32 4294901760, %v11353_v5 }
 0x560   : > { %v4472_v56 = vadd.f32 %v4471_v51, %v4109_v30  ;;  %4187 = vmatmul.f32.gmra.mxu0 %v11335_v47  ;;  %v11356_v30 = vld [vmem:[#allocation33_spill] sm:$0xff] }
 0x561   : > { %vm11357_vm0 = vcmp.eq.s32.totalorder %v11356_v30, %v7733_v62 }
 0x562   : > { %5967 = vmatmul.msk.f32.gmra.mxu2 %vm11345_vm12, %v10862_v6  ;;  %v4901_v32 = vadd.f32 %v4900_v23, %v4472_v56  ;;  %vm11358_vm1 = vmmov %vm11357_vm0 }
 0x564   : > { %v4483_v50 = vpop.f32.mrf.mxu1  ;;  %6031 = vmatmul.msk.f32.gmra.mxu3 %vm11346_vm13, %v10862_v6  ;;  %v5190_v34 = vadd.f32 %v5189_v40, %v4901_v32 }
 0x565   : > { %v4904_v54 = vpop.f32.mrf.mxu2  ;;  %v4113_v51 = vpop.f32.mrf.mxu0 }
 0x566   : > { %5417 = vst [vmem:[%s9732_s8 + $0x48] sm:$0xff] %v5190_v34  ;;  %v4114_v2 = vadd.f32 %v4113_v51, %v11349_v37  ;;  %v11359_v34 = vld [vmem:[#allocation36_spill] sm:$0xff] }
 0x567   : > { %4578 = vmatmul.f32.gmra.mxu1 %v11348_v29  ;;  %v5193_v47 = vpop.f32.mrf.mxu3  ;;  %v11360_v29 = vand.u32 4294901760, %v11359_v34  ;;  %v11361_v51 = vld [vmem:[#allocation124_spill] sm:$0xff] }
 0x568   : > { %v4478_v10 = vadd.f32 %v4477_v9, %v4114_v2  ;;  %4192 = vmatmul.f32.gmra.mxu0 %v11341_v44  ;;  %v11362_v2 = vld [vmem:[#allocation35_spill] sm:$0xff] }
 0x569   : > { %vm11363_vm2 = vcmp.eq.s32.totalorder %v11362_v2, %v7733_v62 }
 0x56a   : > { %5968 = vmatmul.msk.f32.gmra.mxu2 %vm11351_vm14, %v10862_v6  ;;  %v4905_v3 = vadd.f32 %v4904_v54, %v4478_v10  ;;  %vm11364_vm3 = vmmov %vm11363_vm2 }
 0x56c   : > { %v4489_v1 = vpop.f32.mrf.mxu1  ;;  %6032 = vmatmul.msk.f32.gmra.mxu3 %vm11352_vm15, %v10862_v6  ;;  %v5194_v23 = vadd.f32 %v5193_v47, %v4905_v3 }
 0x56d   : > { %v4908_v48 = vpop.f32.mrf.mxu2  ;;  %v4118_v9 = vpop.f32.mrf.mxu0 }
 0x56e   : > { %5418 = vst [vmem:[%s9732_s8 + $0x50] sm:$0xff] %v5194_v23  ;;  %v4119_v40 = vadd.f32 %v4118_v9, %v11355_v57  ;;  %v11365_v23 = vld [vmem:[#allocation38_spill] sm:$0xff]  ;;  %v11367_v9 = vld [vmem:[#allocation125_spill] sm:$0xff] }
 0x56f   : > { %4584 = vmatmul.f32.gmra.mxu1 %v11354_v11  ;;  %v5197_v44 = vpop.f32.mrf.mxu3  ;;  %v11366_v11 = vand.u32 4294901760, %v11365_v23 }
 0x570   : > { %v4484_v46 = vadd.f32 %v4483_v50, %v4119_v40  ;;  %4197 = vmatmul.f32.gmra.mxu0 %v11347_v58  ;;  %v11368_v40 = vld [vmem:[#allocation37_spill] sm:$0xff] }
 0x571   : > { %vm11369_vm4 = vcmp.eq.s32.totalorder %v11368_v40, %v7733_v62 }
 0x572   : > { %5969 = vmatmul.msk.f32.gmra.mxu2 %vm11357_vm0, %v10862_v6  ;;  %v4909_v0 = vadd.f32 %v4908_v48, %v4484_v46  ;;  %vm11370_vm5 = vmmov %vm11369_vm4 }
 0x574   : > { %v4495_v56 = vpop.f32.mrf.mxu1  ;;  %6033 = vmatmul.msk.f32.gmra.mxu3 %vm11358_vm1, %v10862_v6  ;;  %v5198_v54 = vadd.f32 %v5197_v44, %v4909_v0 }
 0x575   : > { %v4912_v32 = vpop.f32.mrf.mxu2  ;;  %v4123_v50 = vpop.f32.mrf.mxu0 }
 0x576   : > { %5419 = vst [vmem:[%s9732_s8 + $0x58] sm:$0xff] %v5198_v54  ;;  %v4124_v47 = vadd.f32 %v4123_v50, %v11361_v51  ;;  %v11371_v54 = vld [vmem:[#allocation40_spill] sm:$0xff]  ;;  %v11373_v50 = vld [vmem:[#allocation126_spill] sm:$0xff] }
 0x577   : > { %4590 = vmatmul.f32.gmra.mxu1 %v11360_v29  ;;  %v5201_v58 = vpop.f32.mrf.mxu3  ;;  %v11372_v29 = vand.u32 4294901760, %v11371_v54 }
 0x578   : > { %v4490_v37 = vadd.f32 %v4489_v1, %v4124_v47  ;;  %4202 = vmatmul.f32.gmra.mxu0 %v11353_v5  ;;  %v11374_v47 = vld [vmem:[#allocation39_spill] sm:$0xff] }
 0x579   : > { %vm11375_vm6 = vcmp.eq.s32.totalorder %v11374_v47, %v7733_v62 }
 0x57a   : > { %5970 = vmatmul.msk.f32.gmra.mxu2 %vm11363_vm2, %v10862_v6  ;;  %v4913_v25 = vadd.f32 %v4912_v32, %v4490_v37  ;;  %vm11376_vm8 = vmmov %vm11375_vm6 }
 0x57c   : > { %v4501_v10 = vpop.f32.mrf.mxu1  ;;  %6034 = vmatmul.msk.f32.gmra.mxu3 %vm11364_vm3, %v10862_v6  ;;  %v5202_v48 = vadd.f32 %v5201_v58, %v4913_v25 }
 0x57d   : > { %v4916_v3 = vpop.f32.mrf.mxu2  ;;  %v4128_v1 = vpop.f32.mrf.mxu0 }
 0x57e   : > { %5420 = vst [vmem:[%s9732_s8 + $0x60] sm:$0xff] %v5202_v48  ;;  %v4129_v44 = vadd.f32 %v4128_v1, %v11367_v9  ;;  %v11377_v48 = vld [vmem:[#allocation42_spill] sm:$0xff]  ;;  %v11379_v1 = vld [vmem:[#allocation127_spill] sm:$0xff] }
 0x57f   : > { %4596 = vmatmul.f32.gmra.mxu1 %v11366_v11  ;;  %v5205_v5 = vpop.f32.mrf.mxu3  ;;  %v11378_v11 = vand.u32 4294901760, %v11377_v48 }
 0x580   : > { %v4496_v57 = vadd.f32 %v4495_v56, %v4129_v44  ;;  %4207 = vmatmul.f32.gmra.mxu0 %v11359_v34  ;;  %v11380_v44 = vld [vmem:[#allocation41_spill] sm:$0xff] }
 0x581   : > { %vm11381_vm10 = vcmp.eq.s32.totalorder %v11380_v44, %v7733_v62 }
 0x582   : > { %5971 = vmatmul.msk.f32.gmra.mxu2 %vm11369_vm4, %v10862_v6  ;;  %v4917_v30 = vadd.f32 %v4916_v3, %v4496_v57  ;;  %vm11382_vm9 = vmmov %vm11381_vm10 }
 0x584   : > { %v4507_v46 = vpop.f32.mrf.mxu1  ;;  %6035 = vmatmul.msk.f32.gmra.mxu3 %vm11370_vm5, %v10862_v6  ;;  %v5206_v32 = vadd.f32 %v5205_v5, %v4917_v30 }
 0x585   : > { %v4920_v0 = vpop.f32.mrf.mxu2  ;;  %v4133_v56 = vpop.f32.mrf.mxu0 }
 0x586   : > { %5421 = vst [vmem:[%s9732_s8 + $0x68] sm:$0xff] %v5206_v32  ;;  %v4134_v58 = vadd.f32 %v4133_v56, %v11373_v50  ;;  %v11383_v32 = vld [vmem:[#allocation44_spill] sm:$0xff] }
 0x587   : > { %4602 = vmatmul.f32.gmra.mxu1 %v11372_v29  ;;  %v5209_v34 = vpop.f32.mrf.mxu3  ;;  %v11384_v29 = vand.u32 4294901760, %v11383_v32  ;;  %v11385_v56 = vld [vmem:[#allocation128_spill] sm:$0xff] }
 0x588   : > { %v4502_v51 = vadd.f32 %v4501_v10, %v4134_v58  ;;  %4212 = vmatmul.f32.gmra.mxu0 %v11365_v23  ;;  %v11386_v58 = vld [vmem:[#allocation43_spill] sm:$0xff] }
 0x589   : > { %vm11387_vm12 = vcmp.eq.s32.totalorder %v11386_v58, %v7733_v62 }
 0x58a   : > { %5972 = vmatmul.msk.f32.gmra.mxu2 %vm11375_vm6, %v10862_v6  ;;  %v4921_v2 = vadd.f32 %v4920_v0, %v4502_v51  ;;  %vm11388_vm13 = vmmov %vm11387_vm12 }
 0x58c   : > { %v4513_v37 = vpop.f32.mrf.mxu1  ;;  %6036 = vmatmul.msk.f32.gmra.mxu3 %vm11376_vm8, %v10862_v6  ;;  %v5210_v3 = vadd.f32 %v5209_v34, %v4921_v2 }
 0x58d   : > { %v4924_v25 = vpop.f32.mrf.mxu2  ;;  %v4138_v10 = vpop.f32.mrf.mxu0 }
 0x58e   : > { %5422 = vst [vmem:[%s9732_s8 + $0x70] sm:$0xff] %v5210_v3  ;;  %v4139_v5 = vadd.f32 %v4138_v10, %v11379_v1  ;;  %v11389_v3 = vld [vmem:[#allocation46_spill] sm:$0xff]  ;;  %v11391_v10 = vld [vmem:[#allocation129_spill] sm:$0xff] }
 0x58f   : > { %4608 = vmatmul.f32.gmra.mxu1 %v11378_v11  ;;  %v5213_v23 = vpop.f32.mrf.mxu3  ;;  %v11390_v11 = vand.u32 4294901760, %v11389_v3 }
 0x590   : > { %v4508_v9 = vadd.f32 %v4507_v46, %v4139_v5  ;;  %4217 = vmatmul.f32.gmra.mxu0 %v11371_v54  ;;  %v11392_v5 = vld [vmem:[#allocation45_spill] sm:$0xff] }
 0x591   : > { %vm11393_vm14 = vcmp.eq.s32.totalorder %v11392_v5, %v7733_v62 }
 0x592   : > { %5973 = vmatmul.msk.f32.gmra.mxu2 %vm11381_vm10, %v10862_v6  ;;  %v4925_v40 = vadd.f32 %v4924_v25, %v4508_v9  ;;  %vm11394_vm15 = vmmov %vm11393_vm14 }
 0x594   : > { %v4519_v57 = vpop.f32.mrf.mxu1  ;;  %6037 = vmatmul.msk.f32.gmra.mxu3 %vm11382_vm9, %v10862_v6  ;;  %v5214_v0 = vadd.f32 %v5213_v23, %v4925_v40 }
 0x595   : > { %v4928_v30 = vpop.f32.mrf.mxu2  ;;  %v4143_v46 = vpop.f32.mrf.mxu0 }
 0x596   : > { %5423 = vst [vmem:[%s9732_s8 + $0x78] sm:$0xff] %v5214_v0  ;;  %v4144_v34 = vadd.f32 %v4143_v46, %v11385_v56  ;;  %v11395_v0 = vld [vmem:[#allocation48_spill] sm:$0xff]  ;;  %v11397_v46 = vld [vmem:[#allocation130_spill] sm:$0xff] }
 0x597   : > { %4614 = vmatmul.f32.gmra.mxu1 %v11384_v29  ;;  %v5217_v54 = vpop.f32.mrf.mxu3  ;;  %v11396_v29 = vand.u32 4294901760, %v11395_v0 }
 0x598   : > { %v4514_v50 = vadd.f32 %v4513_v37, %v4144_v34  ;;  %4222 = vmatmul.f32.gmra.mxu0 %v11377_v48  ;;  %v11398_v34 = vld [vmem:[#allocation47_spill] sm:$0xff] }
 0x599   : > { %vm11399_vm0 = vcmp.eq.s32.totalorder %v11398_v34, %v7733_v62 }
 0x59a   : > { %5974 = vmatmul.msk.f32.gmra.mxu2 %vm11387_vm12, %v10862_v6  ;;  %v4929_v47 = vadd.f32 %v4928_v30, %v4514_v50  ;;  %vm11400_vm1 = vmmov %vm11399_vm0 }
 0x59c   : > { %v4525_v51 = vpop.f32.mrf.mxu1  ;;  %6038 = vmatmul.msk.f32.gmra.mxu3 %vm11388_vm13, %v10862_v6  ;;  %v5218_v25 = vadd.f32 %v5217_v54, %v4929_v47 }
 0x59d   : > { %v4932_v2 = vpop.f32.mrf.mxu2  ;;  %v4148_v37 = vpop.f32.mrf.mxu0 }
 0x59e   : > { %5424 = vst [vmem:[%s9732_s8 + $0x80] sm:$0xff] %v5218_v25  ;;  %v4149_v23 = vadd.f32 %v4148_v37, %v11391_v10  ;;  %v11401_v25 = vld [vmem:[#allocation50_spill] sm:$0xff]  ;;  %v11403_v37 = vld [vmem:[#allocation131_spill] sm:$0xff] }
 0x59f   : > { %4620 = vmatmul.f32.gmra.mxu1 %v11390_v11  ;;  %v5221_v48 = vpop.f32.mrf.mxu3  ;;  %v11402_v11 = vand.u32 4294901760, %v11401_v25 }
 0x5a0   : > { %v4520_v1 = vadd.f32 %v4519_v57, %v4149_v23  ;;  %4227 = vmatmul.f32.gmra.mxu0 %v11383_v32  ;;  %v11404_v23 = vld [vmem:[#allocation49_spill] sm:$0xff] }
 0x5a1   : > { %vm11405_vm2 = vcmp.eq.s32.totalorder %v11404_v23, %v7733_v62 }
 0x5a2   : > { %5975 = vmatmul.msk.f32.gmra.mxu2 %vm11393_vm14, %v10862_v6  ;;  %v4933_v44 = vadd.f32 %v4932_v2, %v4520_v1  ;;  %vm11406_vm3 = vmmov %vm11405_vm2 }
 0x5a4   : > { %v4531_v9 = vpop.f32.mrf.mxu1  ;;  %6039 = vmatmul.msk.f32.gmra.mxu3 %vm11394_vm15, %v10862_v6  ;;  %v5222_v30 = vadd.f32 %v5221_v48, %v4933_v44 }
 0x5a5   : > { %v4936_v40 = vpop.f32.mrf.mxu2  ;;  %v4153_v57 = vpop.f32.mrf.mxu0 }
 0x5a6   : > { %5425 = vst [vmem:[%s9732_s8 + $0x88] sm:$0xff] %v5222_v30  ;;  %v4154_v54 = vadd.f32 %v4153_v57, %v11397_v46  ;;  %v11407_v30 = vld [vmem:[#allocation52_spill] sm:$0xff] }
 0x5a7   : > { %4626 = vmatmul.f32.gmra.mxu1 %v11396_v29  ;;  %v5225_v32 = vpop.f32.mrf.mxu3  ;;  %v11408_v29 = vand.u32 4294901760, %v11407_v30  ;;  %v11409_v57 = vld [vmem:[#allocation132_spill] sm:$0xff] }
 0x5a8   : > { %v4526_v56 = vadd.f32 %v4525_v51, %v4154_v54  ;;  %4232 = vmatmul.f32.gmra.mxu0 %v11389_v3  ;;  %v11410_v54 = vld [vmem:[#allocation51_spill] sm:$0xff] }
 0x5a9   : > { %vm11411_vm4 = vcmp.eq.s32.totalorder %v11410_v54, %v7733_v62 }
 0x5aa   : > { %5976 = vmatmul.msk.f32.gmra.mxu2 %vm11399_vm0, %v10862_v6  ;;  %v4937_v58 = vadd.f32 %v4936_v40, %v4526_v56  ;;  %vm11412_vm5 = vmmov %vm11411_vm4 }
 0x5ac   : > { %v4537_v50 = vpop.f32.mrf.mxu1  ;;  %6040 = vmatmul.msk.f32.gmra.mxu3 %vm11400_vm1, %v10862_v6  ;;  %v5226_v2 = vadd.f32 %v5225_v32, %v4937_v58 }
 0x5ad   : > { %v4940_v47 = vpop.f32.mrf.mxu2  ;;  %v4158_v51 = vpop.f32.mrf.mxu0 }
 0x5ae   : > { %5426 = vst [vmem:[%s9732_s8 + $0x90] sm:$0xff] %v5226_v2  ;;  %v4159_v48 = vadd.f32 %v4158_v51, %v11403_v37  ;;  %v11413_v2 = vld [vmem:[#allocation54_spill] sm:$0xff]  ;;  %v11415_v51 = vld [vmem:[#allocation133_spill] sm:$0xff] }
 0x5af   : > { %4632 = vmatmul.f32.gmra.mxu1 %v11402_v11  ;;  %v5229_v3 = vpop.f32.mrf.mxu3  ;;  %v11414_v11 = vand.u32 4294901760, %v11413_v2 }
 0x5b0   : > { %v4532_v10 = vadd.f32 %v4531_v9, %v4159_v48  ;;  %4237 = vmatmul.f32.gmra.mxu0 %v11395_v0  ;;  %v11416_v48 = vld [vmem:[#allocation53_spill] sm:$0xff] }
 0x5b1   : > { %vm11417_vm6 = vcmp.eq.s32.totalorder %v11416_v48, %v7733_v62 }
 0x5b2   : > { %5977 = vmatmul.msk.f32.gmra.mxu2 %vm11405_vm2, %v10862_v6  ;;  %v4941_v5 = vadd.f32 %v4940_v47, %v4532_v10  ;;  %vm11418_vm8 = vmmov %vm11417_vm6 }
 0x5b4   : > { %v4543_v1 = vpop.f32.mrf.mxu1  ;;  %6041 = vmatmul.msk.f32.gmra.mxu3 %vm11406_vm3, %v10862_v6  ;;  %v5230_v40 = vadd.f32 %v5229_v3, %v4941_v5 }
 0x5b5   : > { %v4944_v44 = vpop.f32.mrf.mxu2  ;;  %v4163_v9 = vpop.f32.mrf.mxu0 }
 0x5b6   : > { %5427 = vst [vmem:[%s9732_s8 + $0x98] sm:$0xff] %v5230_v40  ;;  %v4164_v32 = vadd.f32 %v4163_v9, %v11409_v57  ;;  %v11419_v40 = vld [vmem:[#allocation56_spill] sm:$0xff]  ;;  %v11421_v9 = vld [vmem:[#allocation134_spill] sm:$0xff] }
 0x5b7   : > { %4638 = vmatmul.f32.gmra.mxu1 %v11408_v29  ;;  %v5233_v0 = vpop.f32.mrf.mxu3  ;;  %v11420_v29 = vand.u32 4294901760, %v11419_v40 }
 0x5b8   : > { %v4538_v46 = vadd.f32 %v4537_v50, %v4164_v32  ;;  %4242 = vmatmul.f32.gmra.mxu0 %v11401_v25  ;;  %v11422_v32 = vld [vmem:[#allocation55_spill] sm:$0xff] }
 0x5b9   : > { %vm11423_vm10 = vcmp.eq.s32.totalorder %v11422_v32, %v7733_v62 }
 0x5ba   : > { %5978 = vmatmul.msk.f32.gmra.mxu2 %vm11411_vm4, %v10862_v6  ;;  %v4945_v34 = vadd.f32 %v4944_v44, %v4538_v46  ;;  %vm11424_vm9 = vmmov %vm11423_vm10 }
 0x5bc   : > { %v4549_v56 = vpop.f32.mrf.mxu1  ;;  %6042 = vmatmul.msk.f32.gmra.mxu3 %vm11412_vm5, %v10862_v6  ;;  %v5234_v47 = vadd.f32 %v5233_v0, %v4945_v34 }
 0x5bd   : > { %v4948_v58 = vpop.f32.mrf.mxu2  ;;  %v4168_v50 = vpop.f32.mrf.mxu0 }
 0x5be   : > { %5428 = vst [vmem:[%s9732_s8 + $0xa0] sm:$0xff] %v5234_v47  ;;  %v4169_v3 = vadd.f32 %v4168_v50, %v11415_v51  ;;  %v11425_v47 = vld [vmem:[#allocation58_spill] sm:$0xff]  ;;  %v11427_v50 = vld [vmem:[#allocation135_spill] sm:$0xff] }
 0x5bf   : > { %4644 = vmatmul.f32.gmra.mxu1 %v11414_v11  ;;  %v5237_v25 = vpop.f32.mrf.mxu3  ;;  %v11426_v11 = vand.u32 4294901760, %v11425_v47 }
 0x5c0   : > { %v4544_v37 = vadd.f32 %v4543_v1, %v4169_v3  ;;  %4247 = vmatmul.f32.gmra.mxu0 %v11407_v30  ;;  %v11428_v3 = vld [vmem:[#allocation57_spill] sm:$0xff] }
 0x5c1   : > { %vm11429_vm12 = vcmp.eq.s32.totalorder %v11428_v3, %v7733_v62 }
 0x5c2   : > { %5979 = vmatmul.msk.f32.gmra.mxu2 %vm11417_vm6, %v10862_v6  ;;  %v4949_v23 = vadd.f32 %v4948_v58, %v4544_v37  ;;  %vm11430_vm13 = vmmov %vm11429_vm12 }
 0x5c4   : > { %v4555_v10 = vpop.f32.mrf.mxu1  ;;  %6043 = vmatmul.msk.f32.gmra.mxu3 %vm11418_vm8, %v10862_v6  ;;  %v5238_v44 = vadd.f32 %v5237_v25, %v4949_v23 }
 0x5c5   : > { %v4952_v5 = vpop.f32.mrf.mxu2  ;;  %v4173_v1 = vpop.f32.mrf.mxu0 }
 0x5c6   : > { %5429 = vst [vmem:[%s9732_s8 + $0xa8] sm:$0xff] %v5238_v44  ;;  %v4174_v0 = vadd.f32 %v4173_v1, %v11421_v9  ;;  %v11431_v44 = vld [vmem:[#allocation60_spill] sm:$0xff] }
 0x5c7   : > { %4650 = vmatmul.f32.gmra.mxu1 %v11420_v29  ;;  %v5241_v30 = vpop.f32.mrf.mxu3  ;;  %v11432_v29 = vand.u32 4294901760, %v11431_v44  ;;  %v11433_v1 = vld [vmem:[#allocation136_spill] sm:$0xff] }
 0x5c8   : > { %v4550_v57 = vadd.f32 %v4549_v56, %v4174_v0  ;;  %4252 = vmatmul.f32.gmra.mxu0 %v11413_v2  ;;  %v11434_v0 = vld [vmem:[#allocation59_spill] sm:$0xff] }
 0x5c9   : > { %vm11435_vm14 = vcmp.eq.s32.totalorder %v11434_v0, %v7733_v62 }
 0x5ca   : > { %5980 = vmatmul.msk.f32.gmra.mxu2 %vm11423_vm10, %v10862_v6  ;;  %v4953_v54 = vadd.f32 %v4952_v5, %v4550_v57  ;;  %vm11436_vm15 = vmmov %vm11435_vm14 }
 0x5cc   : > { %v4561_v46 = vpop.f32.mrf.mxu1  ;;  %6044 = vmatmul.msk.f32.gmra.mxu3 %vm11424_vm9, %v10862_v6  ;;  %v5242_v58 = vadd.f32 %v5241_v30, %v4953_v54 }
 0x5cd   : > { %v4956_v34 = vpop.f32.mrf.mxu2  ;;  %v4178_v56 = vpop.f32.mrf.mxu0 }
 0x5ce   : > { %5430 = vst [vmem:[%s9732_s8 + $0xb0] sm:$0xff] %v5242_v58  ;;  %v4179_v25 = vadd.f32 %v4178_v56, %v11427_v50  ;;  %v11437_v58 = vld [vmem:[#allocation62_spill] sm:$0xff]  ;;  %v11439_v56 = vld [vmem:[#allocation137_spill] sm:$0xff] }
 0x5cf   : > { %4656 = vmatmul.f32.gmra.mxu1 %v11426_v11  ;;  %v5245_v2 = vpop.f32.mrf.mxu3  ;;  %v11438_v11 = vand.u32 4294901760, %v11437_v58 }
 0x5d0   : > { %v4556_v51 = vadd.f32 %v4555_v10, %v4179_v25  ;;  %4257 = vmatmul.f32.gmra.mxu0 %v11419_v40  ;;  %v11440_v25 = vld [vmem:[#allocation61_spill] sm:$0xff] }
 0x5d1   : > { %vm11441_vm0 = vcmp.eq.s32.totalorder %v11440_v25, %v7733_v62 }
 0x5d2   : > { %5981 = vmatmul.msk.f32.gmra.mxu2 %vm11429_vm12, %v10862_v6  ;;  %v4957_v48 = vadd.f32 %v4956_v34, %v4556_v51  ;;  %vm11442_vm1 = vmmov %vm11441_vm0 }
 0x5d4   : > { %v4567_v37 = vpop.f32.mrf.mxu1  ;;  %6045 = vmatmul.msk.f32.gmra.mxu3 %vm11430_vm13, %v10862_v6  ;;  %v5246_v5 = vadd.f32 %v5245_v2, %v4957_v48 }
 0x5d5   : > { %v4960_v23 = vpop.f32.mrf.mxu2  ;;  %v4183_v10 = vpop.f32.mrf.mxu0 }
 0x5d6   : > { %5431 = vst [vmem:[%s9732_s8 + $0xb8] sm:$0xff] %v5246_v5  ;;  %v4184_v30 = vadd.f32 %v4183_v10, %v11433_v1  ;;  %v11443_v5 = vld [vmem:[#allocation64_spill] sm:$0xff]  ;;  %v11445_v10 = vld [vmem:[#allocation138_spill] sm:$0xff] }
 0x5d7   : > { %4662 = vmatmul.f32.gmra.mxu1 %v11432_v29  ;;  %v5249_v40 = vpop.f32.mrf.mxu3  ;;  %v11444_v29 = vand.u32 4294901760, %v11443_v5 }
 0x5d8   : > { %v4562_v9 = vadd.f32 %v4561_v46, %v4184_v30  ;;  %4262 = vmatmul.f32.gmra.mxu0 %v11425_v47  ;;  %v11446_v30 = vld [vmem:[#allocation63_spill] sm:$0xff] }
 0x5d9   : > { %vm11447_vm2 = vcmp.eq.s32.totalorder %v11446_v30, %v7733_v62 }
 0x5da   : > { %5982 = vmatmul.msk.f32.gmra.mxu2 %vm11435_vm14, %v10862_v6  ;;  %v4961_v32 = vadd.f32 %v4960_v23, %v4562_v9  ;;  %vm11448_vm3 = vmmov %vm11447_vm2 }
 0x5dc   : > { %v4573_v57 = vpop.f32.mrf.mxu1  ;;  %6046 = vmatmul.msk.f32.gmra.mxu3 %vm11436_vm15, %v10862_v6  ;;  %v5250_v34 = vadd.f32 %v5249_v40, %v4961_v32 }
 0x5dd   : > { %v4964_v54 = vpop.f32.mrf.mxu2  ;;  %v4188_v46 = vpop.f32.mrf.mxu0 }
 0x5de   : > { %5432 = vst [vmem:[%s9732_s8 + $0xc0] sm:$0xff] %v5250_v34  ;;  %v4189_v2 = vadd.f32 %v4188_v46, %v11439_v56  ;;  %v11449_v34 = vld [vmem:[#allocation66_spill] sm:$0xff]  ;;  %v11451_v46 = vld [vmem:[#allocation139_spill] sm:$0xff] }
 0x5df   : > { %4668 = vmatmul.f32.gmra.mxu1 %v11438_v11  ;;  %v5253_v47 = vpop.f32.mrf.mxu3  ;;  %v11450_v11 = vand.u32 4294901760, %v11449_v34 }
 0x5e0   : > { %v4568_v50 = vadd.f32 %v4567_v37, %v4189_v2  ;;  %4267 = vmatmul.f32.gmra.mxu0 %v11431_v44  ;;  %v11452_v2 = vld [vmem:[#allocation65_spill] sm:$0xff] }
 0x5e1   : > { %vm11453_vm4 = vcmp.eq.s32.totalorder %v11452_v2, %v7733_v62 }
 0x5e2   : > { %5983 = vmatmul.msk.f32.gmra.mxu2 %vm11441_vm0, %v10862_v6  ;;  %v4965_v3 = vadd.f32 %v4964_v54, %v4568_v50  ;;  %vm11454_vm5 = vmmov %vm11453_vm4 }
 0x5e4   : > { %v4579_v51 = vpop.f32.mrf.mxu1  ;;  %6047 = vmatmul.msk.f32.gmra.mxu3 %vm11442_vm1, %v10862_v6  ;;  %v5254_v23 = vadd.f32 %v5253_v47, %v4965_v3 }
 0x5e5   : > { %v4968_v48 = vpop.f32.mrf.mxu2  ;;  %v4193_v37 = vpop.f32.mrf.mxu0 }
 0x5e6   : > { %5433 = vst [vmem:[%s9732_s8 + $0xc8] sm:$0xff] %v5254_v23  ;;  %v4194_v40 = vadd.f32 %v4193_v37, %v11445_v10  ;;  %v11455_v23 = vld [vmem:[#allocation68_spill] sm:$0xff] }
 0x5e7   : > { %4674 = vmatmul.f32.gmra.mxu1 %v11444_v29  ;;  %v5257_v44 = vpop.f32.mrf.mxu3  ;;  %v11456_v29 = vand.u32 4294901760, %v11455_v23  ;;  %v11457_v37 = vld [vmem:[#allocation140_spill] sm:$0xff] }
 0x5e8   : > { %v4574_v1 = vadd.f32 %v4573_v57, %v4194_v40  ;;  %4272 = vmatmul.f32.gmra.mxu0 %v11437_v58  ;;  %v11458_v40 = vld [vmem:[#allocation67_spill] sm:$0xff] }
 0x5e9   : > { %vm11459_vm6 = vcmp.eq.s32.totalorder %v11458_v40, %v7733_v62 }
 0x5ea   : > { %5984 = vmatmul.msk.f32.gmra.mxu2 %vm11447_vm2, %v10862_v6  ;;  %v4969_v0 = vadd.f32 %v4968_v48, %v4574_v1  ;;  %vm11460_vm8 = vmmov %vm11459_vm6 }
 0x5ec   : > { %v4585_v9 = vpop.f32.mrf.mxu1  ;;  %6048 = vmatmul.msk.f32.gmra.mxu3 %vm11448_vm3, %v10862_v6  ;;  %v5258_v54 = vadd.f32 %v5257_v44, %v4969_v0 }
 0x5ed   : > { %v4972_v32 = vpop.f32.mrf.mxu2  ;;  %v4198_v57 = vpop.f32.mrf.mxu0 }
 0x5ee   : > { %5434 = vst [vmem:[%s9732_s8 + $0xd0] sm:$0xff] %v5258_v54  ;;  %v4199_v47 = vadd.f32 %v4198_v57, %v11451_v46  ;;  %v11461_v54 = vld [vmem:[#allocation70_spill] sm:$0xff]  ;;  %v11463_v57 = vld [vmem:[#allocation141_spill] sm:$0xff] }
 0x5ef   : > { %4680 = vmatmul.f32.gmra.mxu1 %v11450_v11  ;;  %v5261_v58 = vpop.f32.mrf.mxu3  ;;  %v11462_v11 = vand.u32 4294901760, %v11461_v54 }
 0x5f0   : > { %v4580_v56 = vadd.f32 %v4579_v51, %v4199_v47  ;;  %4277 = vmatmul.f32.gmra.mxu0 %v11443_v5  ;;  %v11464_v47 = vld [vmem:[#allocation69_spill] sm:$0xff] }
 0x5f1   : > { %vm11465_vm10 = vcmp.eq.s32.totalorder %v11464_v47, %v7733_v62 }
 0x5f2   : > { %5985 = vmatmul.msk.f32.gmra.mxu2 %vm11453_vm4, %v10862_v6  ;;  %v4973_v25 = vadd.f32 %v4972_v32, %v4580_v56  ;;  %vm11466_vm9 = vmmov %vm11465_vm10 }
 0x5f4   : > { %v4591_v50 = vpop.f32.mrf.mxu1  ;;  %6049 = vmatmul.msk.f32.gmra.mxu3 %vm11454_vm5, %v10862_v6  ;;  %v5262_v48 = vadd.f32 %v5261_v58, %v4973_v25 }
 0x5f5   : > { %v4976_v3 = vpop.f32.mrf.mxu2  ;;  %v4203_v51 = vpop.f32.mrf.mxu0 }
 0x5f6   : > { %5435 = vst [vmem:[%s9732_s8 + $0xd8] sm:$0xff] %v5262_v48  ;;  %v4204_v44 = vadd.f32 %v4203_v51, %v11457_v37  ;;  %v11467_v48 = vld [vmem:[#allocation72_spill] sm:$0xff]  ;;  %v11469_v51 = vld [vmem:[#allocation142_spill] sm:$0xff] }
 0x5f7   : > { %4686 = vmatmul.f32.gmra.mxu1 %v11456_v29  ;;  %v5265_v5 = vpop.f32.mrf.mxu3  ;;  %v11468_v29 = vand.u32 4294901760, %v11467_v48 }
 0x5f8   : > { %v4586_v10 = vadd.f32 %v4585_v9, %v4204_v44  ;;  %4282 = vmatmul.f32.gmra.mxu0 %v11449_v34  ;;  %v11470_v44 = vld [vmem:[#allocation71_spill] sm:$0xff] }
 0x5f9   : > { %vm11471_vm12 = vcmp.eq.s32.totalorder %v11470_v44, %v7733_v62 }
 0x5fa   : > { %5986 = vmatmul.msk.f32.gmra.mxu2 %vm11459_vm6, %v10862_v6  ;;  %v4977_v30 = vadd.f32 %v4976_v3, %v4586_v10  ;;  %vm11472_vm13 = vmmov %vm11471_vm12 }
 0x5fc   : > { %v4597_v1 = vpop.f32.mrf.mxu1  ;;  %6050 = vmatmul.msk.f32.gmra.mxu3 %vm11460_vm8, %v10862_v6  ;;  %v5266_v32 = vadd.f32 %v5265_v5, %v4977_v30 }
 0x5fd   : > { %v4980_v0 = vpop.f32.mrf.mxu2  ;;  %v4208_v9 = vpop.f32.mrf.mxu0 }
 0x5fe   : > { %5436 = vst [vmem:[%s9732_s8 + $0xe0] sm:$0xff] %v5266_v32  ;;  %v4209_v58 = vadd.f32 %v4208_v9, %v11463_v57  ;;  %v11473_v32 = vld [vmem:[#allocation74_spill] sm:$0xff]  ;;  %v11475_v9 = vld [vmem:[#allocation143_spill] sm:$0xff] }
 0x5ff   : > { %4692 = vmatmul.f32.gmra.mxu1 %v11462_v11  ;;  %v5269_v34 = vpop.f32.mrf.mxu3  ;;  %v11474_v11 = vand.u32 4294901760, %v11473_v32 }
 0x600   : > { %v4592_v46 = vadd.f32 %v4591_v50, %v4209_v58  ;;  %4287 = vmatmul.f32.gmra.mxu0 %v11455_v23  ;;  %v11476_v58 = vld [vmem:[#allocation73_spill] sm:$0xff] }
 0x601   : > { %vm11477_vm14 = vcmp.eq.s32.totalorder %v11476_v58, %v7733_v62 }
 0x602   : > { %5987 = vmatmul.msk.f32.gmra.mxu2 %vm11465_vm10, %v10862_v6  ;;  %v4981_v2 = vadd.f32 %v4980_v0, %v4592_v46  ;;  %vm11478_vm15 = vmmov %vm11477_vm14 }
 0x604   : > { %v4603_v56 = vpop.f32.mrf.mxu1  ;;  %6051 = vmatmul.msk.f32.gmra.mxu3 %vm11466_vm9, %v10862_v6  ;;  %v5270_v3 = vadd.f32 %v5269_v34, %v4981_v2 }
 0x605   : > { %v4984_v25 = vpop.f32.mrf.mxu2  ;;  %v4213_v50 = vpop.f32.mrf.mxu0 }
 0x606   : > { %5437 = vst [vmem:[%s9732_s8 + $0xe8] sm:$0xff] %v5270_v3  ;;  %v4214_v5 = vadd.f32 %v4213_v50, %v11469_v51  ;;  %v11479_v3 = vld [vmem:[#allocation76_spill] sm:$0xff] }
 0x607   : > { %4698 = vmatmul.f32.gmra.mxu1 %v11468_v29  ;;  %v5273_v23 = vpop.f32.mrf.mxu3  ;;  %v11480_v29 = vand.u32 4294901760, %v11479_v3  ;;  %v11481_v50 = vld [vmem:[#allocation144_spill] sm:$0xff] }
 0x608   : > { %v4598_v37 = vadd.f32 %v4597_v1, %v4214_v5  ;;  %4292 = vmatmul.f32.gmra.mxu0 %v11461_v54  ;;  %v11482_v5 = vld [vmem:[#allocation75_spill] sm:$0xff] }
 0x609   : > { %vm11483_vm0 = vcmp.eq.s32.totalorder %v11482_v5, %v7733_v62 }
 0x60a   : > { %5988 = vmatmul.msk.f32.gmra.mxu2 %vm11471_vm12, %v10862_v6  ;;  %v4985_v40 = vadd.f32 %v4984_v25, %v4598_v37  ;;  %vm11484_vm1 = vmmov %vm11483_vm0 }
 0x60c   : > { %v4609_v10 = vpop.f32.mrf.mxu1  ;;  %6052 = vmatmul.msk.f32.gmra.mxu3 %vm11472_vm13, %v10862_v6  ;;  %v5274_v0 = vadd.f32 %v5273_v23, %v4985_v40 }
 0x60d   : > { %v4988_v30 = vpop.f32.mrf.mxu2  ;;  %v4218_v1 = vpop.f32.mrf.mxu0 }
 0x60e   : > { %5438 = vst [vmem:[%s9732_s8 + $0xf0] sm:$0xff] %v5274_v0  ;;  %v4219_v34 = vadd.f32 %v4218_v1, %v11475_v9  ;;  %v11485_v0 = vld [vmem:[#allocation78_spill] sm:$0xff]  ;;  %v11487_v1 = vld [vmem:[#allocation145_spill] sm:$0xff] }
 0x60f   : > { %4704 = vmatmul.f32.gmra.mxu1 %v11474_v11  ;;  %v5277_v54 = vpop.f32.mrf.mxu3  ;;  %v11486_v11 = vand.u32 4294901760, %v11485_v0 }
 0x610   : > { %v4604_v57 = vadd.f32 %v4603_v56, %v4219_v34  ;;  %4297 = vmatmul.f32.gmra.mxu0 %v11467_v48  ;;  %v11488_v34 = vld [vmem:[#allocation77_spill] sm:$0xff] }
 0x611   : > { %vm11489_vm2 = vcmp.eq.s32.totalorder %v11488_v34, %v7733_v62 }
 0x612   : > { %5989 = vmatmul.msk.f32.gmra.mxu2 %vm11477_vm14, %v10862_v6  ;;  %v4989_v47 = vadd.f32 %v4988_v30, %v4604_v57  ;;  %vm11490_vm3 = vmmov %vm11489_vm2  ;;  %vm11518_vm14 = vcmp.eq.s32.totalorder %v11194_v35, %v7733_v62 }
 0x614   : > { %v4615_v46 = vpop.f32.mrf.mxu1  ;;  %6053 = vmatmul.msk.f32.gmra.mxu3 %vm11478_vm15, %v10862_v6  ;;  %v5278_v25 = vadd.f32 %v5277_v54, %v4989_v47  ;;  %vm11519_vm15 = vmmov %vm11518_vm14 }
 0x615   : > { %v4992_v2 = vpop.f32.mrf.mxu2  ;;  %v4223_v56 = vpop.f32.mrf.mxu0 }
 0x616   : > { %5439 = vst [vmem:[%s9732_s8 + $0xf8] sm:$0xff] %v5278_v25  ;;  %v4224_v23 = vadd.f32 %v4223_v56, %v11481_v50  ;;  %v11491_v25 = vld [vmem:[#allocation80_spill] sm:$0xff]  ;;  %v11493_v56 = vld [vmem:[#allocation146_spill] sm:$0xff] }
 0x617   : > { %4710 = vmatmul.f32.gmra.mxu1 %v11480_v29  ;;  %v5281_v48 = vpop.f32.mrf.mxu3  ;;  %v11492_v29 = vand.u32 4294901760, %v11491_v25 }
 0x618   : > { %v4610_v51 = vadd.f32 %v4609_v10, %v4224_v23  ;;  %4302 = vmatmul.f32.gmra.mxu0 %v11473_v32  ;;  %v11494_v23 = vld [vmem:[#allocation79_spill] sm:$0xff] }
 0x619   : > { %vm11495_vm4 = vcmp.eq.s32.totalorder %v11494_v23, %v7733_v62 }
 0x61a   : > { %5990 = vmatmul.msk.f32.gmra.mxu2 %vm11483_vm0, %v10862_v6  ;;  %v4993_v44 = vadd.f32 %v4992_v2, %v4610_v51  ;;  %vm11496_vm5 = vmmov %vm11495_vm4  ;;  %vm11523_vm0 = vcmp.eq.s32.totalorder %v11200_v8, %v7733_v62 }
 0x61c   : > { %v4621_v37 = vpop.f32.mrf.mxu1  ;;  %6054 = vmatmul.msk.f32.gmra.mxu3 %vm11484_vm1, %v10862_v6  ;;  %v5282_v30 = vadd.f32 %v5281_v48, %v4993_v44  ;;  %vm11524_vm1 = vmmov %vm11523_vm0 }
 0x61d   : > { %v4996_v40 = vpop.f32.mrf.mxu2  ;;  %v4228_v10 = vpop.f32.mrf.mxu0 }
 0x61e   : > { %5440 = vst [vmem:[%s9732_s8 + $0x100] sm:$0xff] %v5282_v30  ;;  %v4229_v54 = vadd.f32 %v4228_v10, %v11487_v1  ;;  %v11497_v30 = vld [vmem:[#allocation82_spill] sm:$0xff]  ;;  %v11499_v10 = vld [vmem:[#allocation87_spill] sm:$0xff] }
 0x61f   : > { %4716 = vmatmul.f32.gmra.mxu1 %v11486_v11  ;;  %v5285_v32 = vpop.f32.mrf.mxu3  ;;  %v11498_v11 = vand.u32 4294901760, %v11497_v30 }
 0x620   : > { %v4616_v9 = vadd.f32 %v4615_v46, %v4229_v54  ;;  %4307 = vmatmul.f32.gmra.mxu0 %v11479_v3  ;;  %v11500_v54 = vld [vmem:[#allocation81_spill] sm:$0xff] }
 0x621   : > { %vm11501_vm6 = vcmp.eq.s32.totalorder %v11500_v54, %v7733_v62 }
 0x622   : > { %5991 = vmatmul.msk.f32.gmra.mxu2 %vm11489_vm2, %v10862_v6  ;;  %v4997_v58 = vadd.f32 %v4996_v40, %v4616_v9  ;;  %vm11502_vm8 = vmmov %vm11501_vm6  ;;  %vm11527_vm2 = vcmp.eq.s32.totalorder %v11206_v19, %v7733_v62 }
 0x624   : > { %v4627_v57 = vpop.f32.mrf.mxu1  ;;  %6055 = vmatmul.msk.f32.gmra.mxu3 %vm11490_vm3, %v10862_v6  ;;  %v5286_v2 = vadd.f32 %v5285_v32, %v4997_v58  ;;  %vm11528_vm3 = vmmov %vm11527_vm2 }
 0x625   : > { %v5000_v47 = vpop.f32.mrf.mxu2  ;;  %v4233_v46 = vpop.f32.mrf.mxu0 }
 0x626   : > { %5441 = vst [vmem:[%s9732_s8 + $0x108] sm:$0xff] %v5286_v2  ;;  %v4234_v48 = vadd.f32 %v4233_v46, %v11493_v56  ;;  %v11503_v2 = vld [vmem:[#allocation84_spill] sm:$0xff]  ;;  %v11505_v46 = vld [vmem:[#allocation89_spill] sm:$0xff] }
 0x627   : > { %4722 = vmatmul.f32.gmra.mxu1 %v11492_v29  ;;  %v5289_v3 = vpop.f32.mrf.mxu3  ;;  %v11504_v29 = vand.u32 4294901760, %v11503_v2 }
 0x628   : > { %v4622_v50 = vadd.f32 %v4621_v37, %v4234_v48  ;;  %4312 = vmatmul.f32.gmra.mxu0 %v11485_v0  ;;  %v11506_v48 = vld [vmem:[#allocation83_spill] sm:$0xff] }
 0x629   : > { %vm11507_vm10 = vcmp.eq.s32.totalorder %v11506_v48, %v7733_v62 }
 0x62a   : > { %5992 = vmatmul.msk.f32.gmra.mxu2 %vm11495_vm4, %v10862_v6  ;;  %v5001_v5 = vadd.f32 %v5000_v47, %v4622_v50  ;;  %vm11508_vm9 = vmmov %vm11507_vm10  ;;  %vm11531_vm4 = vcmp.eq.s32.totalorder %v11212_v61, %v7733_v62 }
 0x62c   : > { %v4633_v51 = vpop.f32.mrf.mxu1  ;;  %6056 = vmatmul.msk.f32.gmra.mxu3 %vm11496_vm5, %v10862_v6  ;;  %v5290_v40 = vadd.f32 %v5289_v3, %v5001_v5  ;;  %vm11532_vm5 = vmmov %vm11531_vm4 }
 0x62d   : > { %v5004_v44 = vpop.f32.mrf.mxu2  ;;  %v4238_v37 = vpop.f32.mrf.mxu0 }
 0x62e   : > { %5442 = vst [vmem:[%s9732_s8 + $0x110] sm:$0xff] %v5290_v40  ;;  %v4239_v32 = vadd.f32 %v4238_v37, %v11499_v10  ;;  %v11509_v40 = vld [vmem:[#allocation86_spill] sm:$0xff]  ;;  %v11511_v37 = vld [vmem:[#allocation91_spill] sm:$0xff] }
 0x62f   : > { %4728 = vmatmul.f32.gmra.mxu1 %v11498_v11  ;;  %v5293_v0 = vpop.f32.mrf.mxu3  ;;  %v11510_v11 = vand.u32 4294901760, %v11509_v40 }
 0x630   : > { %v4628_v1 = vadd.f32 %v4627_v57, %v4239_v32  ;;  %4317 = vmatmul.f32.gmra.mxu0 %v11491_v25  ;;  %v11512_v32 = vld [vmem:[#allocation85_spill] sm:$0xff] }
 0x631   : > { %vm11513_vm12 = vcmp.eq.s32.totalorder %v11512_v32, %v7733_v62  ;;  %v11525_v32 = vld [vmem:[#allocation92_spill] sm:$0xff] }
 0x632   : > { %5993 = vmatmul.msk.f32.gmra.mxu2 %vm11501_vm6, %v10862_v6  ;;  %v5005_v34 = vadd.f32 %v5004_v44, %v4628_v1  ;;  %vm11514_vm13 = vmmov %vm11513_vm12  ;;  %vm11535_vm6 = vcmp.eq.s32.totalorder %v7626_v60, %v7733_v62 }
 0x634   : > { %v4639_v9 = vpop.f32.mrf.mxu1  ;;  %6057 = vmatmul.msk.f32.gmra.mxu3 %vm11502_vm8, %v10862_v6  ;;  %v5294_v47 = vadd.f32 %v5293_v0, %v5005_v34  ;;  %vm11536_vm8 = vmmov %vm11535_vm6 }
 0x635   : > { %v5008_v58 = vpop.f32.mrf.mxu2  ;;  %v4243_v57 = vpop.f32.mrf.mxu0 }
 0x636   : > { %5443 = vst [vmem:[%s9732_s8 + $0x118] sm:$0xff] %v5294_v47  ;;  %v4244_v3 = vadd.f32 %v4243_v57, %v11505_v46  ;;  %v11515_v47 = vld [vmem:[#allocation88_spill] sm:$0xff]  ;;  %v11517_v57 = vld [vmem:[#allocation93_spill] sm:$0xff] }
 0x637   : > { %4734 = vmatmul.f32.gmra.mxu1 %v11504_v29  ;;  %v5297_v25 = vpop.f32.mrf.mxu3  ;;  %v11516_v29 = vand.u32 4294901760, %v11515_v47 }
 0x638   : > { %v4634_v56 = vadd.f32 %v4633_v51, %v4244_v3  ;;  %4322 = vmatmul.f32.gmra.mxu0 %v11497_v30 }
 0x63a   : > { %5994 = vmatmul.msk.f32.gmra.mxu2 %vm11507_vm10, %v10862_v6  ;;  %v5009_v23 = vadd.f32 %v5008_v58, %v4634_v56  ;;  %vm11539_vm10 = vcmp.eq.s32.totalorder %v7656_v31, %v7733_v62 }
 0x63c   : > { %v4645_v50 = vpop.f32.mrf.mxu1  ;;  %6058 = vmatmul.msk.f32.gmra.mxu3 %vm11508_vm9, %v10862_v6  ;;  %v5298_v44 = vadd.f32 %v5297_v25, %v5009_v23  ;;  %vm11540_vm9 = vmmov %vm11539_vm10 }
 0x63d   : > { %v5012_v5 = vpop.f32.mrf.mxu2  ;;  %v4248_v51 = vpop.f32.mrf.mxu0 }
 0x63e   : > { %5444 = vst [vmem:[%s9732_s8 + $0x120] sm:$0xff] %v5298_v44  ;;  %v4249_v0 = vadd.f32 %v4248_v51, %v11511_v37 }
 0x63f   : > { %4740 = vmatmul.f32.gmra.mxu1 %v11510_v11  ;;  %v5301_v30 = vpop.f32.mrf.mxu3  ;;  %v11522_v11 = vld [vmem:[#allocation147_spill] sm:$0xff] }
 0x640   : > { %v4640_v10 = vadd.f32 %v4639_v9, %v4249_v0  ;;  %4327 = vmatmul.f32.gmra.mxu0 %v11503_v2 }
 0x642   : > { %5995 = vmatmul.msk.f32.gmra.mxu2 %vm11513_vm12, %v10862_v6  ;;  %v5013_v54 = vadd.f32 %v5012_v5, %v4640_v10  ;;  %v11520_v5 = vld [vmem:[#allocation90_spill] sm:$0xff] }
 0x643   : > { %v11521_v44 = vand.u32 4294901760, %v11520_v5 }
 0x644   : > { %v4651_v1 = vpop.f32.mrf.mxu1  ;;  %6059 = vmatmul.msk.f32.gmra.mxu3 %vm11514_vm13, %v10862_v6  ;;  %v5302_v58 = vadd.f32 %v5301_v30, %v5013_v54  ;;  %v11526_v54 = vand.u32 4294901760, %v11525_v32 }
 0x645   : > { %v5016_v34 = vpop.f32.mrf.mxu2  ;;  %v4253_v9 = vpop.f32.mrf.mxu0 }
 0x646   : > { %5445 = vst [vmem:[%s9732_s8 + $0x128] sm:$0xff] %v5302_v58  ;;  %v4254_v25 = vadd.f32 %v4253_v9, %v11517_v57  ;;  %v11529_v57 = vld [vmem:[#allocation94_spill] sm:$0xff] }
 0x647   : > { %4746 = vmatmul.f32.gmra.mxu1 %v11516_v29  ;;  %v5305_v2 = vpop.f32.mrf.mxu3 }
 0x648   : > { %v4646_v46 = vadd.f32 %v4645_v50, %v4254_v25  ;;  %4332 = vmatmul.f32.gmra.mxu0 %v11509_v40  ;;  %v11530_v25 = vand.u32 4294901760, %v11529_v57 }
 0x64a   : > { %5996 = vmatmul.msk.f32.gmra.mxu2 %vm11518_vm14, %v10862_v6  ;;  %v5017_v56 = vadd.f32 %v5016_v34, %v4646_v46 }
 0x64c   : > { %v4657_v3 = vpop.f32.mrf.mxu1  ;;  %6060 = vmatmul.msk.f32.gmra.mxu3 %vm11519_vm15, %v10862_v6  ;;  %v5306_v23 = vadd.f32 %v5305_v2, %v5017_v56 }
 0x64d   : > { %v5020_v48 = vpop.f32.mrf.mxu2  ;;  %v4258_v50 = vpop.f32.mrf.mxu0 }
 0x64e   : > { %5446 = vst [vmem:[%s9732_s8 + $0x130] sm:$0xff] %v5306_v23  ;;  %v4259_v51 = vadd.f32 %v4258_v50, %v11522_v11 }
 0x64f   : > { %4752 = vmatmul.f32.gmra.mxu1 %v11521_v44  ;;  %v5309_v40 = vpop.f32.mrf.mxu3  ;;  %v11533_v44 = vld [vmem:[#allocation95_spill] sm:$0xff] }
 0x650   : > { %v4652_v30 = vadd.f32 %v4651_v1, %v4259_v51  ;;  %4337 = vmatmul.f32.gmra.mxu0 %v11515_v47  ;;  %v11534_v50 = vand.u32 4294901760, %v11533_v44 }
 0x652   : > { %5997 = vmatmul.msk.f32.gmra.mxu2 %vm11523_vm0, %v10862_v6  ;;  %v5021_v37 = vadd.f32 %v5020_v48, %v4652_v30 }
 0x654   : > { %v4663_v35 = vpop.f32.mrf.mxu1  ;;  %6061 = vmatmul.msk.f32.gmra.mxu3 %vm11524_vm1, %v10862_v6  ;;  %v5310_v10 = vadd.f32 %v5309_v40, %v5021_v37 }
 0x655   : > { %v5024_v0 = vpop.f32.mrf.mxu2  ;;  %v4263_v1 = vpop.f32.mrf.mxu0 }
 0x656   : > { %5447 = vst [vmem:[%s9732_s8 + $0x138] sm:$0xff] %v5310_v10  ;;  %v4264_v58 = vadd.f32 %v4263_v1, %v9332_v36 }
 0x657   : > { %4758 = vmatmul.f32.gmra.mxu1 %v11526_v54  ;;  %v5313_v34 = vpop.f32.mrf.mxu3 }
 0x658   : > { %v4658_v47 = vadd.f32 %v4657_v3, %v4264_v58  ;;  %4342 = vmatmul.f32.gmra.mxu0 %v11520_v5 }
 0x65a   : > { %5998 = vmatmul.msk.f32.gmra.mxu2 %vm11527_vm2, %v10862_v6  ;;  %v5025_v29 = vadd.f32 %v5024_v0, %v4658_v47  ;;  %v11537_v0 = vld [vmem:[#allocation148_spill] sm:$0xff] }
 0x65b   : > { %v11538_v10 = vand.u32 4294901760, %v11537_v0 }
 0x65c   : > { %v4669_v8 = vpop.f32.mrf.mxu1  ;;  %6062 = vmatmul.msk.f32.gmra.mxu3 %vm11528_vm3, %v10862_v6  ;;  %v5314_v2 = vadd.f32 %v5313_v34, %v5025_v29 }
 0x65d   : > { %v5028_v9 = vpop.f32.mrf.mxu2  ;;  %v4268_v36 = vpop.f32.mrf.mxu0 }
 0x65e   : > { %5448 = vst [vmem:[%s9732_s8 + $0x140] sm:$0xff] %v5314_v2  ;;  %v4269_v3 = vadd.f32 %v4268_v36, %v9359_v49 }
 0x65f   : > { %4764 = vmatmul.f32.gmra.mxu1 %v11530_v25  ;;  %v5317_v46 = vpop.f32.mrf.mxu3 }
 0x660   : > { %v4664_v56 = vadd.f32 %v4663_v35, %v4269_v3  ;;  %4347 = vmatmul.f32.gmra.mxu0 %v11525_v32 }
 0x662   : > { %5999 = vmatmul.msk.f32.gmra.mxu2 %vm11531_vm4, %v10862_v6  ;;  %v5029_v48 = vadd.f32 %v5028_v9, %v4664_v56 }
 0x664   : > { %v4675_v19 = vpop.f32.mrf.mxu1  ;;  %6063 = vmatmul.msk.f32.gmra.mxu3 %vm11532_vm5, %v10862_v6  ;;  %v5318_v5 = vadd.f32 %v5317_v46, %v5029_v48 }
 0x665   : > { %v5032_v23 = vpop.f32.mrf.mxu2  ;;  %v4273_v49 = vpop.f32.mrf.mxu0 }
 0x666   : > { %5449 = vst [vmem:[%s9732_s8 + $0x148] sm:$0xff] %v5318_v5  ;;  %v4274_v11 = vadd.f32 %v4273_v49, %v9386_v53  ;;  %v11543_v5 = vand.u32 4294901760, %v9429_v24 }
 0x667   : > { %4770 = vmatmul.f32.gmra.mxu1 %v11534_v50  ;;  %v5321_v40 = vpop.f32.mrf.mxu3 }
 0x668   : > { %v4670_v51 = vadd.f32 %v4669_v8, %v4274_v11  ;;  %4352 = vmatmul.f32.gmra.mxu0 %v11529_v57  ;;  %v11541_v8 = vld [vmem:[#allocation149_spill] sm:$0xff] }
 0x669   : > { %v11542_v29 = vand.u32 4294901760, %v11541_v8 }
 0x66a   : > { %6000 = vmatmul.msk.f32.gmra.mxu2 %vm11535_vm6, %v10862_v6  ;;  %v5033_v30 = vadd.f32 %v5032_v23, %v4670_v51 }
 0x66c   : > { %v4681_v61 = vpop.f32.mrf.mxu1  ;;  %6064 = vmatmul.msk.f32.gmra.mxu3 %vm11536_vm8, %v10862_v6  ;;  %v5322_v37 = vadd.f32 %v5321_v40, %v5033_v30 }
 0x66d   : > { %v5036_v35 = vpop.f32.mrf.mxu2  ;;  %v4278_v53 = vpop.f32.mrf.mxu0 }
 0x66e   : > { %5450 = vst [vmem:[%s9732_s8 + $0x150] sm:$0xff] %v5322_v37  ;;  %v4279_v54 = vadd.f32 %v4278_v53, %v9413_v38 }
 0x66f   : > { %4776 = vmatmul.f32.gmra.mxu1 %v11538_v10  ;;  %v5325_v32 = vpop.f32.mrf.mxu3 }
 0x670   : > { %v4676_v1 = vadd.f32 %v4675_v19, %v4279_v54  ;;  %4357 = vmatmul.f32.gmra.mxu0 %v11533_v44 }
 0x672   : > { %6001 = vmatmul.msk.f32.gmra.mxu2 %vm11539_vm10, %v10862_v6  ;;  %v5037_v34 = vadd.f32 %v5036_v35, %v4676_v1 }
 0x674   : > { %v4687_v60 = vpop.f32.mrf.mxu1  ;;  %6065 = vmatmul.msk.f32.gmra.mxu3 %vm11540_vm9, %v10862_v6  ;;  %v5326_v47 = vadd.f32 %v5325_v32, %v5037_v34 }
 0x675   : > { %v5040_v58 = vpop.f32.mrf.mxu2  ;;  %v4283_v38 = vpop.f32.mrf.mxu0 }
 0x676   : > { %5451 = vst [vmem:[%s9732_s8 + $0x158] sm:$0xff] %v5326_v47  ;;  %v4284_v2 = vadd.f32 %v4283_v38, %v9438_v52 }
 0x677   : > { %4782 = vmatmul.f32.gmra.mxu1 %v11542_v29  ;;  %v5329_v9 = vpop.f32.mrf.mxu3 }
 0x678   : > { %v4682_v57 = vadd.f32 %v4681_v61, %v4284_v2  ;;  %4362 = vmatmul.f32.gmra.mxu0 %v11537_v0 }
 0x67a   : > { %6002 = vmatmul.msk.f32.gmra.mxu2 %vm527_vm11, %v10862_v6  ;;  %v5041_v25 = vadd.f32 %v5040_v58, %v4682_v57 }
 0x67c   : > { %v4693_v31 = vpop.f32.mrf.mxu1  ;;  %6066 = vmatmul.msk.f32.gmra.mxu3 %vm527_vm11, %v10862_v6  ;;  %v5330_v46 = vadd.f32 %v5329_v9, %v5041_v25  ;;  %vm11544_vm11 = vcmp.eq.s32.totalorder %v7735_v18, %v7733_v62 }
 0x67d   : > { %v5044_v36 = vpop.f32.mrf.mxu2  ;;  %v4288_v52 = vpop.f32.mrf.mxu0 }
 0x67e   : > { %5452 = vst [vmem:[%s9732_s8 + $0x160] sm:$0xff] %v5330_v46  ;;  %v4289_v56 = vadd.f32 %v4288_v52, %v9457_v63 }
 0x67f   : > { %4788 = vmatmul.f32.gmra.mxu1 %v3644_v43  ;;  %v5333_v3 = vpop.f32.mrf.mxu3 }
 0x680   : > { %v4688_v19 = vadd.f32 %v4687_v60, %v4289_v56  ;;  %4367 = vmatmul.f32.gmra.mxu0 %v11541_v8 }
 0x682   : > { %6003 = vmatmul.msk.f32.gmra.mxu2 %vm529_vm7, %v10862_v6  ;;  %v5045_v48 = vadd.f32 %v5044_v36, %v4688_v19 }
 0x684   : > { %v4699_v26 = vpop.f32.mrf.mxu1  ;;  %6067 = vmatmul.msk.f32.gmra.mxu3 %vm529_vm7, %v10862_v6  ;;  %v5334_v23 = vadd.f32 %v5333_v3, %v5045_v48  ;;  %vm11545_vm7 = vmmov %vm11544_vm11 }
 0x685   : > { %v5048_v43 = vpop.f32.mrf.mxu2  ;;  %v4293_v63 = vpop.f32.mrf.mxu0 }
 0x686   : > { %5453 = vst [vmem:[%s9732_s8 + $0x168] sm:$0xff] %v5334_v23  ;;  %v4294_v50 = vadd.f32 %v4293_v63, %v9472_v55 }
 0x687   : > { %4794 = vmatmul.f32.gmra.mxu1 %v11543_v5  ;;  %v5337_v44 = vpop.f32.mrf.mxu3 }
 0x688   : > { %v4694_v49 = vadd.f32 %v4693_v31, %v4294_v50  ;;  %4372 = vmatmul.f32.gmra.mxu0 %v9402_v20 }
 0x68a   : > { %6004 = vmatmul.msk.f32.gmra.mxu2 %vm11544_vm11, %v10862_v6  ;;  %v5049_v40 = vadd.f32 %v5048_v43, %v4694_v49 }
 0x68c   : > { %v4705_v16 = vpop.f32.mrf.mxu1  ;;  %6068 = vmatmul.msk.f32.gmra.mxu3 %vm11545_vm7, %v10862_v6  ;;  %v5338_v51 = vadd.f32 %v5337_v44, %v5049_v40 }
 0x68d   : > { %v5052_v11 = vpop.f32.mrf.mxu2  ;;  %v4298_v61 = vpop.f32.mrf.mxu0 }
 0x68e   : > { %5454 = vst [vmem:[%s9732_s8 + $0x170] sm:$0xff] %v5338_v51  ;;  %v4299_v20 = vadd.f32 %v4298_v61, %v9489_v41 }
 0x68f   : > { %v5341_v55 = vpop.f32.mrf.mxu3 }
 0x690   : > { %v4700_v30 = vadd.f32 %v4699_v26, %v4299_v20  ;;  %4377 = vmatmul.f32.gmra.mxu0 %v9429_v24 }
 0x692   : > { %v5053_v37 = vadd.f32 %v5052_v11, %v4700_v30 }
 0x694   : > { %v4711_v35 = vpop.f32.mrf.mxu1  ;;  %v5342_v10 = vadd.f32 %v5341_v55, %v5053_v37 }
 0x695   : > { %v5056_v0 = vpop.f32.mrf.mxu2  ;;  %v4303_v53 = vpop.f32.mrf.mxu0 }
 0x696   : > { %5455 = vst [vmem:[%s9732_s8 + $0x178] sm:$0xff] %v5342_v10  ;;  %v4304_v6 = vadd.f32 %v4303_v53, %v9503_v39 }
 0x697   : > { %v5345_v32 = vpop.f32.mrf.mxu3 }
 0x698   : > { %v4706_v62 = vadd.f32 %v4705_v16, %v4304_v6 }
 0x69a   : > { %v5057_v54 = vadd.f32 %v5056_v0, %v4706_v62 }
 0x69c   : > { %v4717_v18 = vpop.f32.mrf.mxu1  ;;  %v5346_v60 = vadd.f32 %v5345_v32, %v5057_v54 }
 0x69d   : > { %v5060_v1 = vpop.f32.mrf.mxu2  ;;  %v4308_v41 = vpop.f32.mrf.mxu0 }
 0x69e   : > { %5456 = vst [vmem:[%s9732_s8 + $0x180] sm:$0xff] %v5346_v60  ;;  %v4309_v24 = vadd.f32 %v4308_v41, %v9517_v17 }
 0x69f   : > { %v5349_v34 = vpop.f32.mrf.mxu3 }
 0x6a0   : > { %v4712_v58 = vadd.f32 %v4711_v35, %v4309_v24 }
 0x6a2   : > { %v5061_v8 = vadd.f32 %v5060_v1, %v4712_v58 }
 0x6a4   : > { %v4723_v47 = vpop.f32.mrf.mxu1  ;;  %v5350_v38 = vadd.f32 %v5349_v34, %v5061_v8 }
 0x6a5   : > { %v5064_v29 = vpop.f32.mrf.mxu2  ;;  %v4313_v9 = vpop.f32.mrf.mxu0 }
 0x6a6   : > { %5457 = vst [vmem:[%s9732_s8 + $0x188] sm:$0xff] %v5350_v38  ;;  %v4314_v39 = vadd.f32 %v4313_v9, %v9531_v42 }
 0x6a7   : > { %v5353_v2 = vpop.f32.mrf.mxu3 }
 0x6a8   : > { %v4718_v57 = vadd.f32 %v4717_v18, %v4314_v39 }
 0x6aa   : > { %v5065_v25 = vadd.f32 %v5064_v29, %v4718_v57 }
 0x6ac   : > { %v4729_v31 = vpop.f32.mrf.mxu1  ;;  %v5354_v46 = vadd.f32 %v5353_v2, %v5065_v25 }
 0x6ad   : > { %v5068_v36 = vpop.f32.mrf.mxu2  ;;  %v4318_v52 = vpop.f32.mrf.mxu0 }
 0x6ae   : > { %5458 = vst [vmem:[%s9732_s8 + $0x190] sm:$0xff] %v5354_v46  ;;  %v4319_v17 = vadd.f32 %v4318_v52, %v9545_v14 }
 0x6af   : > { %v5357_v3 = vpop.f32.mrf.mxu3 }
 0x6b0   : > { %v4724_v56 = vadd.f32 %v4723_v47, %v4319_v17 }
 0x6b2   : > { %v5069_v26 = vadd.f32 %v5068_v36, %v4724_v56 }
 0x6b4   : > { %v4735_v19 = vpop.f32.mrf.mxu1  ;;  %v5358_v43 = vadd.f32 %v5357_v3, %v5069_v26 }
 0x6b5   : > { %v5072_v48 = vpop.f32.mrf.mxu2  ;;  %v4323_v23 = vpop.f32.mrf.mxu0 }
 0x6b6   : > { %5459 = vst [vmem:[%s9732_s8 + $0x198] sm:$0xff] %v5358_v43  ;;  %v4324_v42 = vadd.f32 %v4323_v23, %v9559_v45 }
 0x6b7   : > { %v5361_v5 = vpop.f32.mrf.mxu3 }
 0x6b8   : > { %v4730_v63 = vadd.f32 %v4729_v31, %v4324_v42 }
 0x6ba   : > { %v5073_v50 = vadd.f32 %v5072_v48, %v4730_v63 }
 0x6bc   : > { %v4741_v44 = vpop.f32.mrf.mxu1  ;;  %v5362_v16 = vadd.f32 %v5361_v5, %v5073_v50 }
 0x6bd   : > { %v5076_v49 = vpop.f32.mrf.mxu2  ;;  %v4328_v40 = vpop.f32.mrf.mxu0 }
 0x6be   : > { %5460 = vst [vmem:[%s9732_s8 + $0x1a0] sm:$0xff] %v5362_v16  ;;  %v4329_v14 = vadd.f32 %v4328_v40, %v9573_v7 }
 0x6bf   : > { %v5365_v11 = vpop.f32.mrf.mxu3 }
 0x6c0   : > { %v4736_v51 = vadd.f32 %v4735_v19, %v4329_v14 }
 0x6c2   : > { %v5077_v55 = vadd.f32 %v5076_v49, %v4736_v51 }
 0x6c4   : > { %v4747_v61 = vpop.f32.mrf.mxu1  ;;  %v5366_v30 = vadd.f32 %v5365_v11, %v5077_v55 }
 0x6c5   : > { %v5080_v20 = vpop.f32.mrf.mxu2  ;;  %v4333_v35 = vpop.f32.mrf.mxu0 }
 0x6c6   : > { %5461 = vst [vmem:[%s9732_s8 + $0x1a8] sm:$0xff] %v5366_v30  ;;  %v4334_v45 = vadd.f32 %v4333_v35, %v9587_v4 }
 0x6c7   : > { %v5369_v37 = vpop.f32.mrf.mxu3 }
 0x6c8   : > { %v4742_v0 = vadd.f32 %v4741_v44, %v4334_v45 }
 0x6ca   : > { %v5081_v53 = vadd.f32 %v5080_v20, %v4742_v0 }
 0x6cc   : > { %v4753_v10 = vpop.f32.mrf.mxu1  ;;  %v5370_v6 = vadd.f32 %v5369_v37, %v5081_v53 }
 0x6cd   : > { %v5084_v32 = vpop.f32.mrf.mxu2  ;;  %v4338_v62 = vpop.f32.mrf.mxu0 }
 0x6ce   : > { %5462 = vst [vmem:[%s9732_s8 + $0x1b0] sm:$0xff] %v5370_v6  ;;  %v4339_v7 = vadd.f32 %v4338_v62, %v9601_v13 }
 0x6cf   : > { %v5373_v18 = vpop.f32.mrf.mxu3 }
 0x6d0   : > { %v4748_v54 = vadd.f32 %v4747_v61, %v4339_v7 }
 0x6d2   : > { %v5085_v1 = vadd.f32 %v5084_v32, %v4748_v54 }
 0x6d4   : > { %v4759_v60 = vpop.f32.mrf.mxu1  ;;  %v5374_v34 = vadd.f32 %v5373_v18, %v5085_v1 }
 0x6d5   : > { %v5088_v41 = vpop.f32.mrf.mxu2  ;;  %v4343_v24 = vpop.f32.mrf.mxu0 }
 0x6d6   : > { %5463 = vst [vmem:[%s9732_s8 + $0x1b8] sm:$0xff] %v5374_v34  ;;  %v4344_v4 = vadd.f32 %v4343_v24, %v9615_v22 }
 0x6d7   : > { %v5377_v58 = vpop.f32.mrf.mxu3 }
 0x6d8   : > { %v4754_v47 = vadd.f32 %v4753_v10, %v4344_v4 }
 0x6da   : > { %v5089_v8 = vadd.f32 %v5088_v41, %v4754_v47 }
 0x6dc   : > { %v5378_v38 = vadd.f32 %v5377_v58, %v5089_v8  ;;  %v4765_v9 = vpop.f32.mrf.mxu1 }
 0x6dd   : > { %v5092_v29 = vpop.f32.mrf.mxu2  ;;  %v4348_v2 = vpop.f32.mrf.mxu0 }
 0x6de   : > { %5464 = vst [vmem:[%s9732_s8 + $0x1c0] sm:$0xff] %v5378_v38  ;;  %v4349_v13 = vadd.f32 %v4348_v2, %v9629_v33 }
 0x6df   : > { %v5381_v39 = vpop.f32.mrf.mxu3 }
 0x6e0   : > { %v4760_v57 = vadd.f32 %v4759_v60, %v4349_v13 }
 0x6e2   : > { %v5093_v31 = vadd.f32 %v5092_v29, %v4760_v57 }
 0x6e4   : > { %v5382_v36 = vadd.f32 %v5381_v39, %v5093_v31  ;;  %v4771_v3 = vpop.f32.mrf.mxu1 }
 0x6e5   : > { %v5096_v25 = vpop.f32.mrf.mxu2  ;;  %v4353_v46 = vpop.f32.mrf.mxu0 }
 0x6e6   : > { %5465 = vst [vmem:[%s9732_s8 + $0x1c8] sm:$0xff] %v5382_v36  ;;  %v4354_v22 = vadd.f32 %v4353_v46, %v9643_v12 }
 0x6e7   : > { %v5385_v52 = vpop.f32.mrf.mxu3 }
 0x6e8   : > { %v4766_v17 = vadd.f32 %v4765_v9, %v4354_v22 }
 0x6ea   : > { %v5097_v56 = vadd.f32 %v5096_v25, %v4766_v17 }
 0x6ec   : > { %v5386_v26 = vadd.f32 %v5385_v52, %v5097_v56  ;;  %v4777_v5 = vpop.f32.mrf.mxu1 }
 0x6ed   : > { %v5100_v19 = vpop.f32.mrf.mxu2  ;;  %v4358_v48 = vpop.f32.mrf.mxu0 }
 0x6ee   : > { %5466 = vst [vmem:[%s9732_s8 + $0x1d0] sm:$0xff] %v5386_v26  ;;  %v4359_v33 = vadd.f32 %v4358_v48, %v9657_v27 }
 0x6ef   : > { %v5389_v43 = vpop.f32.mrf.mxu3 }
 0x6f0   : > { %v4772_v23 = vadd.f32 %v4771_v3, %v4359_v33 }
 0x6f2   : > { %v5101_v42 = vadd.f32 %v5100_v19, %v4772_v23 }
 0x6f4   : > { %v5390_v44 = vadd.f32 %v5389_v43, %v5101_v42  ;;  %v4783_v11 = vpop.f32.mrf.mxu1 }
 0x6f5   : > { %v5104_v63 = vpop.f32.mrf.mxu2  ;;  %v4363_v50 = vpop.f32.mrf.mxu0 }
 0x6f6   : > { %5467 = vst [vmem:[%s9732_s8 + $0x1d8] sm:$0xff] %v5390_v44  ;;  %v4364_v12 = vadd.f32 %v4363_v50, %v9671_v21 }
 0x6f7   : > { %v5393_v49 = vpop.f32.mrf.mxu3 }
 0x6f8   : > { %v4778_v16 = vadd.f32 %v4777_v5, %v4364_v12 }
 0x6fa   : > { %v5105_v40 = vadd.f32 %v5104_v63, %v4778_v16 }
 0x6fc   : > { %v5394_v14 = vadd.f32 %v5393_v49, %v5105_v40  ;;  %v4789_v37 = vpop.f32.mrf.mxu1 }
 0x6fd   : > { %v4368_v51 = vpop.f32.mrf.mxu0  ;;  %v5108_v61 = vpop.f32.mrf.mxu2 }
 0x6fe   : > { %5468 = vst [vmem:[%s9732_s8 + $0x1e0] sm:$0xff] %v5394_v14  ;;  %v4369_v27 = vadd.f32 %v4368_v51, %v9685_v15 }
 0x6ff   : > { %v5397_v55 = vpop.f32.mrf.mxu3 }
 0x700   : > { %v4784_v20 = vadd.f32 %v4783_v11, %v4369_v27 }
 0x702   : > { %v5109_v30 = vadd.f32 %v5108_v61, %v4784_v20 }
 0x704   : > { %v5398_v35 = vadd.f32 %v5397_v55, %v5109_v30  ;;  %v4795_v18 = vpop.f32.mrf.mxu1 }
 0x705   : > { %v4373_v45 = vpop.f32.mrf.mxu0  ;;  %v5112_v0 = vpop.f32.mrf.mxu2 }
 0x706   : > { %5469 = vst [vmem:[%s9732_s8 + $0x1e8] sm:$0xff] %v5398_v35  ;;  %v4374_v21 = vadd.f32 %v4373_v45, %v9699_v59 }
 0x707   : > { %v5401_v53 = vpop.f32.mrf.mxu3 }
 0x708   : > { %v4790_v10 = vadd.f32 %v4789_v37, %v4374_v21 }
 0x70a   : > { %v5113_v32 = vadd.f32 %v5112_v0, %v4790_v10 }
 0x70c   : > { %v5402_v6 = vadd.f32 %v5401_v53, %v5113_v32 }
 0x70d   : > { %v4378_v15 = vpop.f32.mrf.mxu0  ;;  %v5116_v59 = vpop.f32.mrf.mxu2 }
 0x70e   : > { %5470 = vst [vmem:[%s9732_s8 + $0x1f0] sm:$0xff] %v5402_v6  ;;  %v4379_v62 = vadd.f32 %v4378_v15, %v9713_v28 }
 0x70f   : > { %v5405_v1 = vpop.f32.mrf.mxu3 }
 0x710   : > { %v4796_v7 = vadd.f32 %v4795_v18, %v4379_v62 }
 0x712   : > { %v5117_v54 = vadd.f32 %v5116_v59, %v4796_v7 }
 0x714   : > { %v5406_v60 = vadd.f32 %v5405_v1, %v5117_v54 }
 0x716   : > { %5471 = vst [vmem:[%s9732_s8 + $0x1f8] sm:$0xff] %v5406_v60 }
 0x717   : > { %6149 = shalt.err (!%p6146_p3)
}
 0x718   : > { %s6189_s3 = smov 128   ;;  %s6190_s4 = smov 8  }
 0x719   : > { %6075 = dma.vmem_to_hbm [thread:$0]  (%p6244_p5), %s5486_s22, 8192, %s5488_s23, %s5473_s13, %s6189_s3, %s6189_s3, %s6190_s4  }
 0x71a PF: > { %p6081_p4 = scmp.ge.s32.totalorder %s6184_s12, 2  ;;  %s5502_s5 = sand.u32 1, %s6172_s9  }
 0x71b   : > { %s5503_s6 = scalar_lea.sflag [#allocation3], %s5502_s5 }
 0x71c   : > { %p6078_p7 = pnand %p6081_p4, %p6248_p6 }
 0x71e   : > { %p6079_p8 = pneg %p6078_p7 }
 0x720   : > { %6167 = dma.done.wait (%p6079_p8), %s5503_s6, 8192  }
 0x721   : > { %6169 = vsyncadd (%p6079_p8), %s5503_s6, 4294959104  ;;  %p12_p9 = scmp.ge.s32.totalorder %s6231_s15, 4   ;;  %s11546_s9 = smov %s6176_s10 }
 0x722   : > { %s11547_s10 = smov %s6180_s11  ;;  %s11548_s11 = smov %s6242_s18 }
 0x723   : > { %s11549_s12 = smov %s6231_s15  ;;  %14 = sbr.rel (!%p12_p9) target bundleno = 3 (0x3), region = 63 }
 0x728   :  { %5509 = vsyncpa [#allocation3], 1 }
 0x729   :  { %5511 = vsyncpa [#allocation3 + $0x1], 1 }

</bundles_post_ra>
